<compile_context>
chip_gen: v6e
topology: v6e:2x2x1
jax: 0.10.0
libtpu: 0.0.40
codegen_flags: <defaults>
</compile_context>

<pallas_src>
import jax
import jax.numpy as jnp
from jax import lax
from jax.experimental import pallas as pl
from jax.experimental.pallas import tpu as pltpu


def downsample_kernel(x_ref, w1_ref, b1_ref, w2_ref, b2_ref, out_ref,
                      xpad_ref, h1pad_ref):
    """Fused DoubleConv + MaxPool for `block_n` images (one grid point)."""
    block_n, H, W, Cin = x_ref.shape
    Cout = out_ref.shape[-1]

    def zero_halo(pad_ref):
        # Zero only the 4 halo strips (padding=1); the interior is overwritten each image.
        Hp, Wp, C = pad_ref.shape
        pad_ref[0:1, :, :] = jnp.zeros((1, Wp, C), pad_ref.dtype)
        pad_ref[Hp - 1:Hp, :, :] = jnp.zeros((1, Wp, C), pad_ref.dtype)
        pad_ref[1:Hp - 1, 0:1, :] = jnp.zeros((Hp - 2, 1, C), pad_ref.dtype)
        pad_ref[1:Hp - 1, Wp - 1:Wp, :] = jnp.zeros((Hp - 2, 1, C), pad_ref.dtype)

    def conv3x3_bias_relu(pad_ref, w_ref, b_ref):
        # 9 shifted-window dots, f32 accumulation in registers (no im2col buffer).
        C = pad_ref.shape[-1]
        acc = None
        for ky in range(3):
            for kx in range(3):
                win = pad_ref[ky:ky + H, kx:kx + W, :].reshape(H * W, C)   # bf16
                part = jnp.dot(win, w_ref[ky, kx],
                               preferred_element_type=jnp.float32)          # (H*W, Cout) f32
                acc = part if acc is None else acc + part
        y = jnp.maximum(acc + b_ref[...], 0.0)                              # bias + ReLU, f32
        return y.reshape(H, W, Cout)

    # Halo strips never get data written into them below, so once per invocation suffices.
    zero_halo(xpad_ref)
    zero_halo(h1pad_ref)

    for n in range(block_n):                                # static unroll over the block
        # ---- conv1 + ReLU: zero-padded (padding=1) input lives in bf16 VMEM scratch ----
        xpad_ref[1:H + 1, 1:W + 1, :] = x_ref[n]            # bf16 -> bf16, no cast
        h1 = conv3x3_bias_relu(xpad_ref, w1_ref, b1_ref)    # (H, W, Cout) f32

        # ---- conv2 + ReLU: h1 never leaves VMEM, re-padded in bf16 scratch ----
        h1pad_ref[1:H + 1, 1:W + 1, :] = h1.astype(h1pad_ref.dtype)
        h2 = conv3x3_bias_relu(h1pad_ref, w2_ref, b2_ref)   # (H, W, Cout) f32

        # ---- 2x2 / stride-2 maxpool, f32 epilogue, channels stay on the lane axis ----
        rh = jnp.max(h2.reshape(H // 2, 2, W, Cout), axis=1)          # pool rows (leading split)
        p = jnp.max(rh.reshape(H // 2, W // 2, 2, Cout), axis=2)      # pool cols
        out_ref[n] = p.astype(out_ref.dtype)


def downsample_forward(x_nchw, params, block_n=1):
    """Pallas equivalent of DownSample.forward; returns the pooled output (NCHW, f32).

    block_n: images per grid step (raise to amortize per-step overhead for large N;
    keep grid length >= 2 so both v7x TensorCores get work).
    """
    x = jnp.transpose(x_nchw, (0, 2, 3, 1))                 # NCHW -> NHWC
    N, H, W, Cin = x.shape
    Cout = params["w1"].shape[-1]
    assert N % block_n == 0 and H % 2 == 0 and W % 2 == 0
    cdt = jnp.bfloat16                                      # MXU operand dtype

    x_bf = x.astype(cdt)                                    # halves HBM traffic for x
    w1 = params["w1"].astype(cdt)                           # (3, 3, Cin, Cout)
    w2 = params["w2"].astype(cdt)                           # (3, 3, Cout, Cout)
    b1 = params["b1"].reshape(1, Cout).astype(jnp.float32)
    b2 = params["b2"].reshape(1, Cout).astype(jnp.float32)

    out = pl.pallas_call(
        downsample_kernel,
        out_shape=jax.ShapeDtypeStruct((N, H // 2, W // 2, Cout), jnp.float32),
        grid=(N // block_n,),
        in_specs=[
            pl.BlockSpec((block_n, H, W, Cin), lambda n: (n, 0, 0, 0)),   # image block
            pl.BlockSpec((3, 3, Cin, Cout), lambda n: (0, 0, 0, 0)),      # conv1 weight
            pl.BlockSpec((1, Cout), lambda n: (0, 0)),                    # conv1 bias (f32)
            pl.BlockSpec((3, 3, Cout, Cout), lambda n: (0, 0, 0, 0)),     # conv2 weight
            pl.BlockSpec((1, Cout), lambda n: (0, 0)),                    # conv2 bias (f32)
        ],
        out_specs=pl.BlockSpec((block_n, H // 2, W // 2, Cout),
                               lambda n: (n, 0, 0, 0)),
        scratch_shapes=[
            pltpu.VMEM((H + 2, W + 2, Cin), cdt),            # zero-padded conv1 input (bf16)
            pltpu.VMEM((H + 2, W + 2, Cout), cdt),           # zero-padded conv2 input (bf16)
        ],
        compiler_params=pltpu.CompilerParams(
            dimension_semantics=("parallel",),
            # Demo shapes need almost nothing; for UNet-scale tiles raise toward ~100 MiB
            # on v6e, keep <= ~48 MiB on v7x (64 MiB physical).
            vmem_limit_bytes=32 * 1024 * 1024,
        ),
    )(x_bf, w1, b1, w2, b2)
    return jnp.transpose(out, (0, 3, 1, 2))                  # NHWC -> NCHW


def downsample_reference(x_nchw, params):
    """Pure-JAX reference (XLA conv) at matched operand precision: bf16 operands, f32 math."""
    cdt = jnp.bfloat16
    x = jnp.transpose(x_nchw, (0, 2, 3, 1)).astype(cdt).astype(jnp.float32)
    w1 = params["w1"].astype(cdt).astype(jnp.float32)
    w2 = params["w2"].astype(cdt).astype(jnp.float32)

    def conv(x, w, b):
        y = lax.conv_general_dilated(x, w, (1, 1), "SAME",
                                     dimension_numbers=("NHWC", "HWIO", "NHWC"))
        return jnp.maximum(y + b.reshape(1, 1, 1, -1).astype(jnp.float32), 0.0)

    h1 = conv(x, w1, params["b1"])
    h1 = h1.astype(cdt).astype(jnp.float32)          # kernel feeds conv2 operands in bf16
    h2 = conv(h1, w2, params["b2"])
    N, H, W, C = h2.shape
    p = jnp.max(h2.reshape(N, H // 2, 2, W // 2, 2, C), axis=(2, 4))
    return jnp.transpose(p, (0, 3, 1, 2))


if __name__ == "__main__":
    key = jax.random.PRNGKey(0)
    N, Cin, H, W = 2, 4, 16, 16            # DownSample(in_channels=4, out_channels=8)
    Cout = 8
    k = jax.random.split(key, 5)
    x = jax.random.normal(k[0], (N, Cin, H, W), jnp.float32)
    params = {
        "w1": jax.random.normal(k[1], (3, 3, Cin, Cout), jnp.float32) / (3 * 3 * Cin) ** 0.5,
        "b1": jax.random.normal(k[2], (Cout,), jnp.float32) * 0.1,
        "w2": jax.random.normal(k[3], (3, 3, Cout, Cout), jnp.float32) / (3 * 3 * Cout) ** 0.5,
        "b2": jax.random.normal(k[4], (Cout,), jnp.float32) * 0.1,
    }

    out = jax.block_until_ready(downsample_forward(x, params, block_n=1))
    ref = jax.block_until_ready(downsample_reference(x, params))

    assert out.shape == (N, Cout, H // 2, W // 2), out.shape
    err = float(jnp.max(jnp.abs(out - ref)))
    # bf16 operands through two stacked convs: ~1e-2 level error vs matched-precision ref.
    assert jnp.allclose(out, ref, rtol=2e-2, atol=2e-2), err
    print("KERNEL_OK")
</pallas_src>

<mosaic_0001>
module attributes {stable_mosaic.version = 11 : i64} {
  func.func @downsample_kernel(%arg0: i32, %arg1: memref<1x16x16x4xbf16, #tpu.memory_space<vmem>>, %arg2: memref<3x3x4x8xbf16, #tpu.memory_space<vmem>>, %arg3: memref<1x8xf32, #tpu.memory_space<vmem>>, %arg4: memref<3x3x8x8xbf16, #tpu.memory_space<vmem>>, %arg5: memref<1x8xf32, #tpu.memory_space<vmem>>, %arg6: memref<1x8x8x8xf32, #tpu.memory_space<vmem>>, %arg7: memref<18x18x4xbf16, #tpu.memory_space<vmem>>, %arg8: memref<18x18x8xbf16, #tpu.memory_space<vmem>>) attributes {dimension_semantics = [#tpu.dimension_semantics<parallel>], iteration_bounds = array<i64: 2>, scalar_prefetch = 0 : i64, scratch_operands = 2 : i64, tpu.core_type = #tpu.core_type<tc>, window_params = [{transform_indices = @transform_0, window_bounds = array<i64: 1, 16, 16, 4>}, {pipeline_mode = #tpu.pipeline_mode<synchronous>, transform_indices = @transform_1, window_bounds = array<i64: 3, 3, 4, 8>}, {pipeline_mode = #tpu.pipeline_mode<synchronous>, transform_indices = @transform_2, window_bounds = array<i64: 1, 8>}, {pipeline_mode = #tpu.pipeline_mode<synchronous>, transform_indices = @transform_3, window_bounds = array<i64: 3, 3, 8, 8>}, {pipeline_mode = #tpu.pipeline_mode<synchronous>, transform_indices = @transform_4, window_bounds = array<i64: 1, 8>}, {transform_indices = @transform_5, window_bounds = array<i64: 1, 8, 8, 8>}]} {
    %cst = arith.constant 0.000000e+00 : bf16
    %0 = vector.broadcast %cst : bf16 to vector<1x18x4xbf16>
    %c0 = arith.constant 0 : index
    %c0_0 = arith.constant 0 : index
    %c0_1 = arith.constant 0 : index
    %1 = vector.load %arg7[%c0, %c0_0, %c0_1] : memref<18x18x4xbf16, #tpu.memory_space<vmem>>, vector<1x18x4xbf16>
    tpu.vector_store %arg7[%c0, %c0_0, %c0_1], %0 {strides = array<i32>} : memref<18x18x4xbf16, #tpu.memory_space<vmem>>, vector<1x18x4xbf16>,
    %cst_2 = arith.constant 0.000000e+00 : bf16
    %2 = vector.broadcast %cst_2 : bf16 to vector<1x18x4xbf16>
    %c17 = arith.constant 17 : index
    %c0_3 = arith.constant 0 : index
    %c0_4 = arith.constant 0 : index
    %3 = vector.load %arg7[%c17, %c0_3, %c0_4] : memref<18x18x4xbf16, #tpu.memory_space<vmem>>, vector<1x18x4xbf16>
    tpu.vector_store %arg7[%c17, %c0_3, %c0_4], %2 {strides = array<i32>} : memref<18x18x4xbf16, #tpu.memory_space<vmem>>, vector<1x18x4xbf16>,
    %cst_5 = arith.constant 0.000000e+00 : bf16
    %4 = vector.broadcast %cst_5 : bf16 to vector<16x1x4xbf16>
    %c1 = arith.constant 1 : index
    %c0_6 = arith.constant 0 : index
    %c0_7 = arith.constant 0 : index
    %5 = vector.load %arg7[%c1, %c0_6, %c0_7] : memref<18x18x4xbf16, #tpu.memory_space<vmem>>, vector<16x1x4xbf16>
    tpu.vector_store %arg7[%c1, %c0_6, %c0_7], %4 {strides = array<i32>} : memref<18x18x4xbf16, #tpu.memory_space<vmem>>, vector<16x1x4xbf16>,
    %cst_8 = arith.constant 0.000000e+00 : bf16
    %6 = vector.broadcast %cst_8 : bf16 to vector<16x1x4xbf16>
    %c1_9 = arith.constant 1 : index
    %c17_10 = arith.constant 17 : index
    %c0_11 = arith.constant 0 : index
    %7 = vector.load %arg7[%c1_9, %c17_10, %c0_11] : memref<18x18x4xbf16, #tpu.memory_space<vmem>>, vector<16x1x4xbf16>
    tpu.vector_store %arg7[%c1_9, %c17_10, %c0_11], %6 {strides = array<i32>} : memref<18x18x4xbf16, #tpu.memory_space<vmem>>, vector<16x1x4xbf16>,
    %cst_12 = arith.constant 0.000000e+00 : bf16
    %8 = vector.broadcast %cst_12 : bf16 to vector<1x18x8xbf16>
    %c0_13 = arith.constant 0 : index
    %c0_14 = arith.constant 0 : index
    %c0_15 = arith.constant 0 : index
    %9 = vector.load %arg8[%c0_13, %c0_14, %c0_15] : memref<18x18x8xbf16, #tpu.memory_space<vmem>>, vector<1x18x8xbf16>
    tpu.vector_store %arg8[%c0_13, %c0_14, %c0_15], %8 {strides = array<i32>} : memref<18x18x8xbf16, #tpu.memory_space<vmem>>, vector<1x18x8xbf16>,
    %cst_16 = arith.constant 0.000000e+00 : bf16
    %10 = vector.broadcast %cst_16 : bf16 to vector<1x18x8xbf16>
    %c17_17 = arith.constant 17 : index
    %c0_18 = arith.constant 0 : index
    %c0_19 = arith.constant 0 : index
    %11 = vector.load %arg8[%c17_17, %c0_18, %c0_19] : memref<18x18x8xbf16, #tpu.memory_space<vmem>>, vector<1x18x8xbf16>
    tpu.vector_store %arg8[%c17_17, %c0_18, %c0_19], %10 {strides = array<i32>} : memref<18x18x8xbf16, #tpu.memory_space<vmem>>, vector<1x18x8xbf16>,
    %cst_20 = arith.constant 0.000000e+00 : bf16
    %12 = vector.broadcast %cst_20 : bf16 to vector<16x1x8xbf16>
    %c1_21 = arith.constant 1 : index
    %c0_22 = arith.constant 0 : index
    %c0_23 = arith.constant 0 : index
    %13 = vector.load %arg8[%c1_21, %c0_22, %c0_23] : memref<18x18x8xbf16, #tpu.memory_space<vmem>>, vector<16x1x8xbf16>
    tpu.vector_store %arg8[%c1_21, %c0_22, %c0_23], %12 {strides = array<i32>} : memref<18x18x8xbf16, #tpu.memory_space<vmem>>, vector<16x1x8xbf16>,
    %cst_24 = arith.constant 0.000000e+00 : bf16
    %14 = vector.broadcast %cst_24 : bf16 to vector<16x1x8xbf16>
    %c1_25 = arith.constant 1 : index
    %c17_26 = arith.constant 17 : index
    %c0_27 = arith.constant 0 : index
    %15 = vector.load %arg8[%c1_25, %c17_26, %c0_27] : memref<18x18x8xbf16, #tpu.memory_space<vmem>>, vector<16x1x8xbf16>
    tpu.vector_store %arg8[%c1_25, %c17_26, %c0_27], %14 {strides = array<i32>} : memref<18x18x8xbf16, #tpu.memory_space<vmem>>, vector<16x1x8xbf16>,
    %c0_28 = arith.constant 0 : index
    %c0_29 = arith.constant 0 : index
    %c0_30 = arith.constant 0 : index
    %c0_31 = arith.constant 0 : index
    %16 = vector.load %arg1[%c0_28, %c0_29, %c0_30, %c0_31] : memref<1x16x16x4xbf16, #tpu.memory_space<vmem>>, vector<1x16x16x4xbf16>
    %17 = vector.shape_cast %16 : vector<1x16x16x4xbf16> to vector<16x16x4xbf16>
    %c1_32 = arith.constant 1 : index
    %c1_33 = arith.constant 1 : index
    %c0_34 = arith.constant 0 : index
    %18 = vector.load %arg7[%c1_32, %c1_33, %c0_34] : memref<18x18x4xbf16, #tpu.memory_space<vmem>>, vector<16x16x4xbf16>
    tpu.vector_store %arg7[%c1_32, %c1_33, %c0_34], %17 {strides = array<i32>} : memref<18x18x4xbf16, #tpu.memory_space<vmem>>, vector<16x16x4xbf16>,
    %c0_35 = arith.constant 0 : index
    %c0_36 = arith.constant 0 : index
    %c0_37 = arith.constant 0 : index
    %19 = vector.load %arg7[%c0_35, %c0_36, %c0_37] : memref<18x18x4xbf16, #tpu.memory_space<vmem>>, vector<16x16x4xbf16>
    %20 = vector.shape_cast %19 : vector<16x16x4xbf16> to vector<256x4xbf16>
    %c0_38 = arith.constant 0 : index
    %c0_39 = arith.constant 0 : index
    %c0_40 = arith.constant 0 : index
    %c0_41 = arith.constant 0 : index
    %21 = vector.load %arg2[%c0_38, %c0_39, %c0_40, %c0_41] : memref<3x3x4x8xbf16, #tpu.memory_space<vmem>>, vector<1x1x4x8xbf16>
    %22 = vector.shape_cast %21 : vector<1x1x4x8xbf16> to vector<4x8xbf16>
    %cst_42 = arith.constant dense<0.000000e+00> : vector<256x8xf32>
    %23 = tpu.matmul %20, %22, %cst_42 {dimension_numbers = #tpu.dot_dimension_numbers<[1], [0], [0], [1], [0, 0, 1, 1], [], []>} : vector<256x4xbf16>, vector<4x8xbf16>, vector<256x8xf32> -> vector<256x8xf32>
    %c0_43 = arith.constant 0 : index
    %c1_44 = arith.constant 1 : index
    %c0_45 = arith.constant 0 : index
    %24 = vector.load %arg7[%c0_43, %c1_44, %c0_45] : memref<18x18x4xbf16, #tpu.memory_space<vmem>>, vector<16x16x4xbf16>
    %25 = vector.shape_cast %24 : vector<16x16x4xbf16> to vector<256x4xbf16>
    %c0_46 = arith.constant 0 : index
    %c1_47 = arith.constant 1 : index
    %c0_48 = arith.constant 0 : index
    %c0_49 = arith.constant 0 : index
    %26 = vector.load %arg2[%c0_46, %c1_47, %c0_48, %c0_49] : memref<3x3x4x8xbf16, #tpu.memory_space<vmem>>, vector<1x1x4x8xbf16>
    %27 = vector.shape_cast %26 : vector<1x1x4x8xbf16> to vector<4x8xbf16>
    %cst_50 = arith.constant dense<0.000000e+00> : vector<256x8xf32>
    %28 = tpu.matmul %25, %27, %cst_50 {dimension_numbers = #tpu.dot_dimension_numbers<[1], [0], [0], [1], [0, 0, 1, 1], [], []>} : vector<256x4xbf16>, vector<4x8xbf16>, vector<256x8xf32> -> vector<256x8xf32>
    %29 = arith.addf %23, %28 : vector<256x8xf32>
    %c0_51 = arith.constant 0 : index
    %c2 = arith.constant 2 : index
    %c0_52 = arith.constant 0 : index
    %30 = vector.load %arg7[%c0_51, %c2, %c0_52] : memref<18x18x4xbf16, #tpu.memory_space<vmem>>, vector<16x16x4xbf16>
    %31 = vector.shape_cast %30 : vector<16x16x4xbf16> to vector<256x4xbf16>
    %c0_53 = arith.constant 0 : index
    %c2_54 = arith.constant 2 : index
    %c0_55 = arith.constant 0 : index
    %c0_56 = arith.constant 0 : index
    %32 = vector.load %arg2[%c0_53, %c2_54, %c0_55, %c0_56] : memref<3x3x4x8xbf16, #tpu.memory_space<vmem>>, vector<1x1x4x8xbf16>
    %33 = vector.shape_cast %32 : vector<1x1x4x8xbf16> to vector<4x8xbf16>
    %cst_57 = arith.constant dense<0.000000e+00> : vector<256x8xf32>
    %34 = tpu.matmul %31, %33, %cst_57 {dimension_numbers = #tpu.dot_dimension_numbers<[1], [0], [0], [1], [0, 0, 1, 1], [], []>} : vector<256x4xbf16>, vector<4x8xbf16>, vector<256x8xf32> -> vector<256x8xf32>
    %35 = arith.addf %29, %34 : vector<256x8xf32>
    %c1_58 = arith.constant 1 : index
    %c0_59 = arith.constant 0 : index
    %c0_60 = arith.constant 0 : index
    %36 = vector.load %arg7[%c1_58, %c0_59, %c0_60] : memref<18x18x4xbf16, #tpu.memory_space<vmem>>, vector<16x16x4xbf16>
    %37 = vector.shape_cast %36 : vector<16x16x4xbf16> to vector<256x4xbf16>
    %c1_61 = arith.constant 1 : index
    %c0_62 = arith.constant 0 : index
    %c0_63 = arith.constant 0 : index
    %c0_64 = arith.constant 0 : index
    %38 = vector.load %arg2[%c1_61, %c0_62, %c0_63, %c0_64] : memref<3x3x4x8xbf16, #tpu.memory_space<vmem>>, vector<1x1x4x8xbf16>
    %39 = vector.shape_cast %38 : vector<1x1x4x8xbf16> to vector<4x8xbf16>
    %cst_65 = arith.constant dense<0.000000e+00> : vector<256x8xf32>
    %40 = tpu.matmul %37, %39, %cst_65 {dimension_numbers = #tpu.dot_dimension_numbers<[1], [0], [0], [1], [0, 0, 1, 1], [], []>} : vector<256x4xbf16>, vector<4x8xbf16>, vector<256x8xf32> -> vector<256x8xf32>
    %41 = arith.addf %35, %40 : vector<256x8xf32>
    %c1_66 = arith.constant 1 : index
    %c1_67 = arith.constant 1 : index
    %c0_68 = arith.constant 0 : index
    %42 = vector.load %arg7[%c1_66, %c1_67, %c0_68] : memref<18x18x4xbf16, #tpu.memory_space<vmem>>, vector<16x16x4xbf16>
    %43 = vector.shape_cast %42 : vector<16x16x4xbf16> to vector<256x4xbf16>
    %c1_69 = arith.constant 1 : index
    %c1_70 = arith.constant 1 : index
    %c0_71 = arith.constant 0 : index
    %c0_72 = arith.constant 0 : index
    %44 = vector.load %arg2[%c1_69, %c1_70, %c0_71, %c0_72] : memref<3x3x4x8xbf16, #tpu.memory_space<vmem>>, vector<1x1x4x8xbf16>
    %45 = vector.shape_cast %44 : vector<1x1x4x8xbf16> to vector<4x8xbf16>
    %cst_73 = arith.constant dense<0.000000e+00> : vector<256x8xf32>
    %46 = tpu.matmul %43, %45, %cst_73 {dimension_numbers = #tpu.dot_dimension_numbers<[1], [0], [0], [1], [0, 0, 1, 1], [], []>} : vector<256x4xbf16>, vector<4x8xbf16>, vector<256x8xf32> -> vector<256x8xf32>
    %47 = arith.addf %41, %46 : vector<256x8xf32>
    %c1_74 = arith.constant 1 : index
    %c2_75 = arith.constant 2 : index
    %c0_76 = arith.constant 0 : index
    %48 = vector.load %arg7[%c1_74, %c2_75, %c0_76] : memref<18x18x4xbf16, #tpu.memory_space<vmem>>, vector<16x16x4xbf16>
    %49 = vector.shape_cast %48 : vector<16x16x4xbf16> to vector<256x4xbf16>
    %c1_77 = arith.constant 1 : index
    %c2_78 = arith.constant 2 : index
    %c0_79 = arith.constant 0 : index
    %c0_80 = arith.constant 0 : index
    %50 = vector.load %arg2[%c1_77, %c2_78, %c0_79, %c0_80] : memref<3x3x4x8xbf16, #tpu.memory_space<vmem>>, vector<1x1x4x8xbf16>
    %51 = vector.shape_cast %50 : vector<1x1x4x8xbf16> to vector<4x8xbf16>
    %cst_81 = arith.constant dense<0.000000e+00> : vector<256x8xf32>
    %52 = tpu.matmul %49, %51, %cst_81 {dimension_numbers = #tpu.dot_dimension_numbers<[1], [0], [0], [1], [0, 0, 1, 1], [], []>} : vector<256x4xbf16>, vector<4x8xbf16>, vector<256x8xf32> -> vector<256x8xf32>
    %53 = arith.addf %47, %52 : vector<256x8xf32>
    %c2_82 = arith.constant 2 : index
    %c0_83 = arith.constant 0 : index
    %c0_84 = arith.constant 0 : index
    %54 = vector.load %arg7[%c2_82, %c0_83, %c0_84] : memref<18x18x4xbf16, #tpu.memory_space<vmem>>, vector<16x16x4xbf16>
    %55 = vector.shape_cast %54 : vector<16x16x4xbf16> to vector<256x4xbf16>
    %c2_85 = arith.constant 2 : index
    %c0_86 = arith.constant 0 : index
    %c0_87 = arith.constant 0 : index
    %c0_88 = arith.constant 0 : index
    %56 = vector.load %arg2[%c2_85, %c0_86, %c0_87, %c0_88] : memref<3x3x4x8xbf16, #tpu.memory_space<vmem>>, vector<1x1x4x8xbf16>
    %57 = vector.shape_cast %56 : vector<1x1x4x8xbf16> to vector<4x8xbf16>
    %cst_89 = arith.constant dense<0.000000e+00> : vector<256x8xf32>
    %58 = tpu.matmul %55, %57, %cst_89 {dimension_numbers = #tpu.dot_dimension_numbers<[1], [0], [0], [1], [0, 0, 1, 1], [], []>} : vector<256x4xbf16>, vector<4x8xbf16>, vector<256x8xf32> -> vector<256x8xf32>
    %59 = arith.addf %53, %58 : vector<256x8xf32>
    %c2_90 = arith.constant 2 : index
    %c1_91 = arith.constant 1 : index
    %c0_92 = arith.constant 0 : index
    %60 = vector.load %arg7[%c2_90, %c1_91, %c0_92] : memref<18x18x4xbf16, #tpu.memory_space<vmem>>, vector<16x16x4xbf16>
    %61 = vector.shape_cast %60 : vector<16x16x4xbf16> to vector<256x4xbf16>
    %c2_93 = arith.constant 2 : index
    %c1_94 = arith.constant 1 : index
    %c0_95 = arith.constant 0 : index
    %c0_96 = arith.constant 0 : index
    %62 = vector.load %arg2[%c2_93, %c1_94, %c0_95, %c0_96] : memref<3x3x4x8xbf16, #tpu.memory_space<vmem>>, vector<1x1x4x8xbf16>
    %63 = vector.shape_cast %62 : vector<1x1x4x8xbf16> to vector<4x8xbf16>
    %cst_97 = arith.constant dense<0.000000e+00> : vector<256x8xf32>
    %64 = tpu.matmul %61, %63, %cst_97 {dimension_numbers = #tpu.dot_dimension_numbers<[1], [0], [0], [1], [0, 0, 1, 1], [], []>} : vector<256x4xbf16>, vector<4x8xbf16>, vector<256x8xf32> -> vector<256x8xf32>
    %65 = arith.addf %59, %64 : vector<256x8xf32>
    %c2_98 = arith.constant 2 : index
    %c2_99 = arith.constant 2 : index
    %c0_100 = arith.constant 0 : index
    %66 = vector.load %arg7[%c2_98, %c2_99, %c0_100] : memref<18x18x4xbf16, #tpu.memory_space<vmem>>, vector<16x16x4xbf16>
    %67 = vector.shape_cast %66 : vector<16x16x4xbf16> to vector<256x4xbf16>
    %c2_101 = arith.constant 2 : index
    %c2_102 = arith.constant 2 : index
    %c0_103 = arith.constant 0 : index
    %c0_104 = arith.constant 0 : index
    %68 = vector.load %arg2[%c2_101, %c2_102, %c0_103, %c0_104] : memref<3x3x4x8xbf16, #tpu.memory_space<vmem>>, vector<1x1x4x8xbf16>
    %69 = vector.shape_cast %68 : vector<1x1x4x8xbf16> to vector<4x8xbf16>
    %cst_105 = arith.constant dense<0.000000e+00> : vector<256x8xf32>
    %70 = tpu.matmul %67, %69, %cst_105 {dimension_numbers = #tpu.dot_dimension_numbers<[1], [0], [0], [1], [0, 0, 1, 1], [], []>} : vector<256x4xbf16>, vector<4x8xbf16>, vector<256x8xf32> -> vector<256x8xf32>
    %71 = arith.addf %65, %70 : vector<256x8xf32>
    %c0_106 = arith.constant 0 : index
    %c0_107 = arith.constant 0 : index
    %72 = vector.load %arg3[%c0_106, %c0_107] : memref<1x8xf32, #tpu.memory_space<vmem>>, vector<1x8xf32>
    %73 = vector.broadcast %72 : vector<1x8xf32> to vector<256x8xf32>
    %74 = arith.addf %71, %73 : vector<256x8xf32>
    %cst_108 = arith.constant 0.000000e+00 : f32
    %75 = vector.broadcast %cst_108 : f32 to vector<256x8xf32>
    %76 = arith.maximumf %74, %75 : vector<256x8xf32>
    %77 = vector.shape_cast %76 : vector<256x8xf32> to vector<16x16x8xf32>
    %78 = arith.truncf %77 : vector<16x16x8xf32> to vector<16x16x8xbf16>
    %c1_109 = arith.constant 1 : index
    %c1_110 = arith.constant 1 : index
    %c0_111 = arith.constant 0 : index
    %79 = vector.load %arg8[%c1_109, %c1_110, %c0_111] : memref<18x18x8xbf16, #tpu.memory_space<vmem>>, vector<16x16x8xbf16>
    tpu.vector_store %arg8[%c1_109, %c1_110, %c0_111], %78 {strides = array<i32>} : memref<18x18x8xbf16, #tpu.memory_space<vmem>>, vector<16x16x8xbf16>,
    %c0_112 = arith.constant 0 : index
    %c0_113 = arith.constant 0 : index
    %c0_114 = arith.constant 0 : index
    %80 = vector.load %arg8[%c0_112, %c0_113, %c0_114] : memref<18x18x8xbf16, #tpu.memory_space<vmem>>, vector<16x16x8xbf16>
    %81 = vector.shape_cast %80 : vector<16x16x8xbf16> to vector<256x8xbf16>
    %c0_115 = arith.constant 0 : index
    %c0_116 = arith.constant 0 : index
    %c0_117 = arith.constant 0 : index
    %c0_118 = arith.constant 0 : index
    %82 = vector.load %arg4[%c0_115, %c0_116, %c0_117, %c0_118] : memref<3x3x8x8xbf16, #tpu.memory_space<vmem>>, vector<1x1x8x8xbf16>
    %83 = vector.shape_cast %82 : vector<1x1x8x8xbf16> to vector<8x8xbf16>
    %cst_119 = arith.constant dense<0.000000e+00> : vector<256x8xf32>
    %84 = tpu.matmul %81, %83, %cst_119 {dimension_numbers = #tpu.dot_dimension_numbers<[1], [0], [0], [1], [0, 0, 1, 1], [], []>} : vector<256x8xbf16>, vector<8x8xbf16>, vector<256x8xf32> -> vector<256x8xf32>
    %c0_120 = arith.constant 0 : index
    %c1_121 = arith.constant 1 : index
    %c0_122 = arith.constant 0 : index
    %85 = vector.load %arg8[%c0_120, %c1_121, %c0_122] : memref<18x18x8xbf16, #tpu.memory_space<vmem>>, vector<16x16x8xbf16>
    %86 = vector.shape_cast %85 : vector<16x16x8xbf16> to vector<256x8xbf16>
    %c0_123 = arith.constant 0 : index
    %c1_124 = arith.constant 1 : index
    %c0_125 = arith.constant 0 : index
    %c0_126 = arith.constant 0 : index
    %87 = vector.load %arg4[%c0_123, %c1_124, %c0_125, %c0_126] : memref<3x3x8x8xbf16, #tpu.memory_space<vmem>>, vector<1x1x8x8xbf16>
    %88 = vector.shape_cast %87 : vector<1x1x8x8xbf16> to vector<8x8xbf16>
    %cst_127 = arith.constant dense<0.000000e+00> : vector<256x8xf32>
    %89 = tpu.matmul %86, %88, %cst_127 {dimension_numbers = #tpu.dot_dimension_numbers<[1], [0], [0], [1], [0, 0, 1, 1], [], []>} : vector<256x8xbf16>, vector<8x8xbf16>, vector<256x8xf32> -> vector<256x8xf32>
    %90 = arith.addf %84, %89 : vector<256x8xf32>
    %c0_128 = arith.constant 0 : index
    %c2_129 = arith.constant 2 : index
    %c0_130 = arith.constant 0 : index
    %91 = vector.load %arg8[%c0_128, %c2_129, %c0_130] : memref<18x18x8xbf16, #tpu.memory_space<vmem>>, vector<16x16x8xbf16>
    %92 = vector.shape_cast %91 : vector<16x16x8xbf16> to vector<256x8xbf16>
    %c0_131 = arith.constant 0 : index
    %c2_132 = arith.constant 2 : index
    %c0_133 = arith.constant 0 : index
    %c0_134 = arith.constant 0 : index
    %93 = vector.load %arg4[%c0_131, %c2_132, %c0_133, %c0_134] : memref<3x3x8x8xbf16, #tpu.memory_space<vmem>>, vector<1x1x8x8xbf16>
    %94 = vector.shape_cast %93 : vector<1x1x8x8xbf16> to vector<8x8xbf16>
    %cst_135 = arith.constant dense<0.000000e+00> : vector<256x8xf32>
    %95 = tpu.matmul %92, %94, %cst_135 {dimension_numbers = #tpu.dot_dimension_numbers<[1], [0], [0], [1], [0, 0, 1, 1], [], []>} : vector<256x8xbf16>, vector<8x8xbf16>, vector<256x8xf32> -> vector<256x8xf32>
    %96 = arith.addf %90, %95 : vector<256x8xf32>
    %c1_136 = arith.constant 1 : index
    %c0_137 = arith.constant 0 : index
    %c0_138 = arith.constant 0 : index
    %97 = vector.load %arg8[%c1_136, %c0_137, %c0_138] : memref<18x18x8xbf16, #tpu.memory_space<vmem>>, vector<16x16x8xbf16>
    %98 = vector.shape_cast %97 : vector<16x16x8xbf16> to vector<256x8xbf16>
    %c1_139 = arith.constant 1 : index
    %c0_140 = arith.constant 0 : index
    %c0_141 = arith.constant 0 : index
    %c0_142 = arith.constant 0 : index
    %99 = vector.load %arg4[%c1_139, %c0_140, %c0_141, %c0_142] : memref<3x3x8x8xbf16, #tpu.memory_space<vmem>>, vector<1x1x8x8xbf16>
    %100 = vector.shape_cast %99 : vector<1x1x8x8xbf16> to vector<8x8xbf16>
    %cst_143 = arith.constant dense<0.000000e+00> : vector<256x8xf32>
    %101 = tpu.matmul %98, %100, %cst_143 {dimension_numbers = #tpu.dot_dimension_numbers<[1], [0], [0], [1], [0, 0, 1, 1], [], []>} : vector<256x8xbf16>, vector<8x8xbf16>, vector<256x8xf32> -> vector<256x8xf32>
    %102 = arith.addf %96, %101 : vector<256x8xf32>
    %c1_144 = arith.constant 1 : index
    %c1_145 = arith.constant 1 : index
    %c0_146 = arith.constant 0 : index
    %103 = vector.load %arg8[%c1_144, %c1_145, %c0_146] : memref<18x18x8xbf16, #tpu.memory_space<vmem>>, vector<16x16x8xbf16>
    %104 = vector.shape_cast %103 : vector<16x16x8xbf16> to vector<256x8xbf16>
    %c1_147 = arith.constant 1 : index
    %c1_148 = arith.constant 1 : index
    %c0_149 = arith.constant 0 : index
    %c0_150 = arith.constant 0 : index
    %105 = vector.load %arg4[%c1_147, %c1_148, %c0_149, %c0_150] : memref<3x3x8x8xbf16, #tpu.memory_space<vmem>>, vector<1x1x8x8xbf16>
    %106 = vector.shape_cast %105 : vector<1x1x8x8xbf16> to vector<8x8xbf16>
    %cst_151 = arith.constant dense<0.000000e+00> : vector<256x8xf32>
    %107 = tpu.matmul %104, %106, %cst_151 {dimension_numbers = #tpu.dot_dimension_numbers<[1], [0], [0], [1], [0, 0, 1, 1], [], []>} : vector<256x8xbf16>, vector<8x8xbf16>, vector<256x8xf32> -> vector<256x8xf32>
    %108 = arith.addf %102, %107 : vector<256x8xf32>
    %c1_152 = arith.constant 1 : index
    %c2_153 = arith.constant 2 : index
    %c0_154 = arith.constant 0 : index
    %109 = vector.load %arg8[%c1_152, %c2_153, %c0_154] : memref<18x18x8xbf16, #tpu.memory_space<vmem>>, vector<16x16x8xbf16>
    %110 = vector.shape_cast %109 : vector<16x16x8xbf16> to vector<256x8xbf16>
    %c1_155 = arith.constant 1 : index
    %c2_156 = arith.constant 2 : index
    %c0_157 = arith.constant 0 : index
    %c0_158 = arith.constant 0 : index
    %111 = vector.load %arg4[%c1_155, %c2_156, %c0_157, %c0_158] : memref<3x3x8x8xbf16, #tpu.memory_space<vmem>>, vector<1x1x8x8xbf16>
    %112 = vector.shape_cast %111 : vector<1x1x8x8xbf16> to vector<8x8xbf16>
    %cst_159 = arith.constant dense<0.000000e+00> : vector<256x8xf32>
    %113 = tpu.matmul %110, %112, %cst_159 {dimension_numbers = #tpu.dot_dimension_numbers<[1], [0], [0], [1], [0, 0, 1, 1], [], []>} : vector<256x8xbf16>, vector<8x8xbf16>, vector<256x8xf32> -> vector<256x8xf32>
    %114 = arith.addf %108, %113 : vector<256x8xf32>
    %c2_160 = arith.constant 2 : index
    %c0_161 = arith.constant 0 : index
    %c0_162 = arith.constant 0 : index
    %115 = vector.load %arg8[%c2_160, %c0_161, %c0_162] : memref<18x18x8xbf16, #tpu.memory_space<vmem>>, vector<16x16x8xbf16>
    %116 = vector.shape_cast %115 : vector<16x16x8xbf16> to vector<256x8xbf16>
    %c2_163 = arith.constant 2 : index
    %c0_164 = arith.constant 0 : index
    %c0_165 = arith.constant 0 : index
    %c0_166 = arith.constant 0 : index
    %117 = vector.load %arg4[%c2_163, %c0_164, %c0_165, %c0_166] : memref<3x3x8x8xbf16, #tpu.memory_space<vmem>>, vector<1x1x8x8xbf16>
    %118 = vector.shape_cast %117 : vector<1x1x8x8xbf16> to vector<8x8xbf16>
    %cst_167 = arith.constant dense<0.000000e+00> : vector<256x8xf32>
    %119 = tpu.matmul %116, %118, %cst_167 {dimension_numbers = #tpu.dot_dimension_numbers<[1], [0], [0], [1], [0, 0, 1, 1], [], []>} : vector<256x8xbf16>, vector<8x8xbf16>, vector<256x8xf32> -> vector<256x8xf32>
    %120 = arith.addf %114, %119 : vector<256x8xf32>
    %c2_168 = arith.constant 2 : index
    %c1_169 = arith.constant 1 : index
    %c0_170 = arith.constant 0 : index
    %121 = vector.load %arg8[%c2_168, %c1_169, %c0_170] : memref<18x18x8xbf16, #tpu.memory_space<vmem>>, vector<16x16x8xbf16>
    %122 = vector.shape_cast %121 : vector<16x16x8xbf16> to vector<256x8xbf16>
    %c2_171 = arith.constant 2 : index
    %c1_172 = arith.constant 1 : index
    %c0_173 = arith.constant 0 : index
    %c0_174 = arith.constant 0 : index
    %123 = vector.load %arg4[%c2_171, %c1_172, %c0_173, %c0_174] : memref<3x3x8x8xbf16, #tpu.memory_space<vmem>>, vector<1x1x8x8xbf16>
    %124 = vector.shape_cast %123 : vector<1x1x8x8xbf16> to vector<8x8xbf16>
    %cst_175 = arith.constant dense<0.000000e+00> : vector<256x8xf32>
    %125 = tpu.matmul %122, %124, %cst_175 {dimension_numbers = #tpu.dot_dimension_numbers<[1], [0], [0], [1], [0, 0, 1, 1], [], []>} : vector<256x8xbf16>, vector<8x8xbf16>, vector<256x8xf32> -> vector<256x8xf32>
    %126 = arith.addf %120, %125 : vector<256x8xf32>
    %c2_176 = arith.constant 2 : index
    %c2_177 = arith.constant 2 : index
    %c0_178 = arith.constant 0 : index
    %127 = vector.load %arg8[%c2_176, %c2_177, %c0_178] : memref<18x18x8xbf16, #tpu.memory_space<vmem>>, vector<16x16x8xbf16>
    %128 = vector.shape_cast %127 : vector<16x16x8xbf16> to vector<256x8xbf16>
    %c2_179 = arith.constant 2 : index
    %c2_180 = arith.constant 2 : index
    %c0_181 = arith.constant 0 : index
    %c0_182 = arith.constant 0 : index
    %129 = vector.load %arg4[%c2_179, %c2_180, %c0_181, %c0_182] : memref<3x3x8x8xbf16, #tpu.memory_space<vmem>>, vector<1x1x8x8xbf16>
    %130 = vector.shape_cast %129 : vector<1x1x8x8xbf16> to vector<8x8xbf16>
    %cst_183 = arith.constant dense<0.000000e+00> : vector<256x8xf32>
    %131 = tpu.matmul %128, %130, %cst_183 {dimension_numbers = #tpu.dot_dimension_numbers<[1], [0], [0], [1], [0, 0, 1, 1], [], []>} : vector<256x8xbf16>, vector<8x8xbf16>, vector<256x8xf32> -> vector<256x8xf32>
    %132 = arith.addf %126, %131 : vector<256x8xf32>
    %c0_184 = arith.constant 0 : index
    %c0_185 = arith.constant 0 : index
    %133 = vector.load %arg5[%c0_184, %c0_185] : memref<1x8xf32, #tpu.memory_space<vmem>>, vector<1x8xf32>
    %134 = vector.broadcast %133 : vector<1x8xf32> to vector<256x8xf32>
    %135 = arith.addf %132, %134 : vector<256x8xf32>
    %cst_186 = arith.constant 0.000000e+00 : f32
    %136 = vector.broadcast %cst_186 : f32 to vector<256x8xf32>
    %137 = arith.maximumf %135, %136 : vector<256x8xf32>
    %138 = vector.shape_cast %137 : vector<256x8xf32> to vector<16x16x8xf32>
    %139 = vector.shape_cast %138 : vector<16x16x8xf32> to vector<8x2x16x8xf32>
    %cst_187 = arith.constant dense<0xFF800000> : vector<8x16x8xf32>
    %140 = vector.multi_reduction <maximumf>, %139, %cst_187 [1] : vector<8x2x16x8xf32> to vector<8x16x8xf32>
    %141 = vector.shape_cast %140 : vector<8x16x8xf32> to vector<8x8x2x8xf32>
    %cst_188 = arith.constant dense<0xFF800000> : vector<8x8x8xf32>
    %142 = vector.multi_reduction <maximumf>, %141, %cst_188 [2] : vector<8x8x2x8xf32> to vector<8x8x8xf32>
    %c0_189 = arith.constant 0 : index
    %c0_190 = arith.constant 0 : index
    %c0_191 = arith.constant 0 : index
    %c0_192 = arith.constant 0 : index
    %143 = vector.load %arg6[%c0_189, %c0_190, %c0_191, %c0_192] : memref<1x8x8x8xf32, #tpu.memory_space<vmem>>, vector<1x8x8x8xf32>
    %144 = vector.shape_cast %143 : vector<1x8x8x8xf32> to vector<8x8x8xf32>
    %145 = vector.shape_cast %142 : vector<8x8x8xf32> to vector<1x8x8x8xf32>
    tpu.vector_store %arg6[%c0_189, %c0_190, %c0_191, %c0_192], %145 {strides = array<i32>} : memref<1x8x8x8xf32, #tpu.memory_space<vmem>>, vector<1x8x8x8xf32>,
    return
  }
  func.func @transform_0(%arg0: i32) -> (i32, i32, i32, i32) {
    %c0_i32 = arith.constant 0 : i32
    %c0_i32_0 = arith.constant 0 : i32
    %c0_i32_1 = arith.constant 0 : i32
    %c0_i32_2 = arith.constant 0 : i32
    return %arg0, %c0_i32, %c0_i32_0, %c0_i32_1 : i32, i32, i32, i32
  }
  func.func @transform_1(%arg0: i32) -> (i32, i32, i32, i32) {
    %c0_i32 = arith.constant 0 : i32
    %c0_i32_0 = arith.constant 0 : i32
    %c0_i32_1 = arith.constant 0 : i32
    %c0_i32_2 = arith.constant 0 : i32
    %c0_i32_3 = arith.constant 0 : i32
    return %c0_i32, %c0_i32_0, %c0_i32_1, %c0_i32_2 : i32, i32, i32, i32
  }
  func.func @transform_2(%arg0: i32) -> (i32, i32) {
    %c0_i32 = arith.constant 0 : i32
    %c0_i32_0 = arith.constant 0 : i32
    %c0_i32_1 = arith.constant 0 : i32
    return %c0_i32, %c0_i32_0 : i32, i32
  }
  func.func @transform_3(%arg0: i32) -> (i32, i32, i32, i32) {
    %c0_i32 = arith.constant 0 : i32
    %c0_i32_0 = arith.constant 0 : i32
    %c0_i32_1 = arith.constant 0 : i32
    %c0_i32_2 = arith.constant 0 : i32
    %c0_i32_3 = arith.constant 0 : i32
    return %c0_i32, %c0_i32_0, %c0_i32_1, %c0_i32_2 : i32, i32, i32, i32
  }
  func.func @transform_4(%arg0: i32) -> (i32, i32) {
    %c0_i32 = arith.constant 0 : i32
    %c0_i32_0 = arith.constant 0 : i32
    %c0_i32_1 = arith.constant 0 : i32
    return %c0_i32, %c0_i32_0 : i32, i32
  }
  func.func @transform_5(%arg0: i32) -> (i32, i32, i32, i32) {
    %c0_i32 = arith.constant 0 : i32
    %c0_i32_0 = arith.constant 0 : i32
    %c0_i32_1 = arith.constant 0 : i32
    %c0_i32_2 = arith.constant 0 : i32
    return %arg0, %c0_i32, %c0_i32_0, %c0_i32_1 : i32, i32, i32, i32
  }
}

</mosaic_0001>

<bundles_post_ra>
// kernel: tpu_custom_call.1
= control target key start
LH: loop header
LB: loop body
LE: loop exit
PB: predicated region body
PF: predicated region fallthrough
CT: control target
= control target key end

     0   :  { %10 = vsyncpa [#allocation5], 0  ;;  %s18854_s0 = inlined_call_operand.vmem [shape: bf16[2,16,16,4], index: 0, kind: input, shape index: {}]   ;;  %s18855_s1 = inlined_call_operand.vmem [shape: bf16[3,3,4,8], index: 1, kind: input, shape index: {}]   ;;  %s18856_s2 = inlined_call_operand.vmem [shape: f32[1,8], index: 2, kind: input, shape index: {}]   ;;  %s18857_s3 = inlined_call_operand.vmem [shape: bf16[3,3,8,8], index: 3, kind: input, shape index: {}]   ;;  %s18858_s4 = inlined_call_operand.vmem [shape: f32[1,8], index: 4, kind: input, shape index: {}]   ;;  %s18859_s5 = inlined_call_operand.hbm [shape: f32[2,8,8,8], index: 5, kind: output, shape index: {}]  }
   0x1   :  { %12 = vsyncpa [#allocation5 + $0x1], 0  ;;  %s13729_s18 = smov 0   ;;  %s13731_s19 = smov 0  }
   0x2   :  { %s13733_s20 = smov 0   ;;  %s13735_s21 = smov 0  }
   0x3 LB: > { %s13750_s22 = sadd.s32 4294967295, %s13692_s21   ;;  %s11762_s23 = sadd.s32 4294967294, %s13692_s21   ;;  %s13692_s21 = sphi %s13735_s21, %s19205_s21   ;;  %s13688_s20 = sphi %s13733_s20, %s19204_s20   ;;  %s13684_s19 = sphi %s13731_s19, %s19203_s19   ;;  %s13680_s18 = sphi %s13729_s18, %s19202_s18  }
   0x4   : > { %s13754_s24 = sadd.s32 1, %s13692_s21   ;;  %s135_s25 = sadd.s32 1, %s13688_s20 }
   0x5   : > { %s132_s26 = ssub.s32 %s13692_s21, %s13754_s24  ;;  %p145_p0 = scmp.ne.s32.totalorder %s13688_s20, %s13684_s19 }
   0x6   : > { %p133_p1 = scmp.eq.s32.totalorder %s132_s26, 0  ;;  %p146_p2 = scmp.eq.s32.totalorder %s13750_s22, 1 }
   0x7   : > { %p151_p3 = scmp.ne.s32.totalorder %s13684_s19, %s13680_s18  ;;  %p152_p4 = scmp.eq.s32.totalorder %s11762_s23, 1 }
   0x8   : > { %s13765_s27 = scalar_select %p133_p1, %s13688_s20, %s135_s25  }
   0x9   : > { %p13767_p5 = por %p146_p2, %p145_p0  ;;  %p13771_p6 = por %p152_p4, %p151_p3 }
   0xa   : > { %p11765_p7 = scmp.ge.s32.totalorder %s13692_s21, 1  ;;  %p190_p8 = scmp.lt.s32.totalorder %s13692_s21, 3 }
   0xc   : > { %p191_p9 = pnand %p11765_p7, %p190_p8 }
   0xe   : > { %194 = sbr.rel (%p191_p9) target bundleno = 1352 (0x548), region = 40 }
  0x13   : > { %v11769_v0 = vld [vmem:[%s18855_s1 + $0x2] sm:$0x3]  ;;  %vm1447_vm0 = vcmask 1041408   ;;  %v944_v1 = vld [vmem:[%s18855_s1] sm:$0x3]  ;;  %vm224_vm1 = vcmask 27648  }
  0x14   : > { %13448 = vmatprep.subr.msk.bf16.mxu0 %vm1447_vm0, %v11769_v0  ;;  %v1449_v2 = vsel %vm1447_vm0, %v11769_v0, 0  ;;  %13449 = vmatprep.subr.msk.bf16.mxu1 %vm1447_vm0, %v944_v1  ;;  %v1741_v3 = vsel %vm1447_vm0, %v944_v1, 0  ;;  %vm227_vm2 = vcmask 24576   ;;  %v13790_v4 = vld [vmem:[%s18855_s1 + $0x4] sm:$0x3]  ;;  %v13694_v5 = vmov 0  }
  0x15   : > { %12837 = vmatpush3.bf16.msra.mxu0 %v1449_v2  ;;  %12871 = vmatpush3.bf16.msra.mxu1 %v1741_v3  ;;  %225 = vst.msk [vmem:[#allocation2] sm:$0xf] %vm224_vm1, %v13694_v5  ;;  %226 = vst.msk [vmem:[#allocation2 + $0x4] sm:$0xf] %vm224_vm1, %v13694_v5  ;;  %vm235_vm3 = vsmask.f32 256 }
  0x16   : > { %228 = vst.msk [vmem:[#allocation2 + $0x8] sm:$0x1] %vm227_vm2, %v13694_v5  ;;  %232 = vst.msk [vmem:[#allocation2 + $0xd4] sm:$0x1] %vm227_vm2, %v13694_v5  ;;  %vm285_vm4 = vsmask.f32 7938  ;;  %13450 = vmatprep.subr.msk.bf16.mxu0 %vm1447_vm0, %v13790_v4 }
  0x17   : > { %vm335_vm5 = vcmask 60416   ;;  %vm338_vm6 = vcmask 57344   ;;  %230 = vst.msk [vmem:[#allocation2 + $0xcc] sm:$0xf] %vm224_vm1, %v13694_v5  ;;  %231 = vst.msk [vmem:[#allocation2 + $0xd0] sm:$0xf] %vm224_vm1, %v13694_v5 }
  0x18   : > { %vm13800_vm7 = vmand %vm227_vm2, %vm235_vm3  ;;  %336 = vst.msk [vmem:[#allocation3] sm:$0xf] %vm335_vm5, %v13694_v5  ;;  %p218_p10 = scmp.lt.s32.totalorder %s13750_s22, 1  ;;  %v237_v8 = vld [vmem:[#allocation2 + $0xc] sm:$0x1]  ;;  %vm1398_vm11 = vcmask 31744  }
  0x19   : > { %337 = vst.msk [vmem:[#allocation3 + $0x4] sm:$0xf] %vm335_vm5, %v13694_v5  ;;  %341 = vst.msk [vmem:[#allocation3 + $0xcc] sm:$0xf] %vm335_vm5, %v13694_v5  ;;  %v287_v9 = vld [vmem:[#allocation2 + $0x14] sm:$0x1] }
  0x1a   : > { %339 = vst.msk [vmem:[#allocation3 + $0x8] sm:$0x1] %vm338_vm6, %v13694_v5  ;;  %343 = vst.msk [vmem:[#allocation3 + $0xd4] sm:$0x1] %vm338_vm6, %v13694_v5  ;;  %s219_s11 = scalar_select %p218_p10, %s13750_s22, 1  ;;  %v238_v10 = vsel %vm13800_vm7, 0, %v237_v8 }
  0x1b   : > { %342 = vst.msk [vmem:[#allocation3 + $0xd0] sm:$0xf] %vm335_vm5, %v13694_v5  ;;  %vm13815_vm8 = vmand %vm227_vm2, %vm285_vm4  ;;  %v240_v12 = vld [vmem:[#allocation2 + $0x18] sm:$0x1]  ;;  %v290_v14 = vld [vmem:[#allocation2 + $0x20] sm:$0x1] }
  0x1c   : > { %v288_v11 = vsel %vm13815_vm8, 0, %v287_v9  ;;  %239 = vst [vmem:[#allocation2 + $0xc] sm:$0x1] %v238_v10  ;;  %v241_v13 = vsel %vm13800_vm7, 0, %v240_v12  ;;  %v243_v15 = vld [vmem:[#allocation2 + $0x24] sm:$0x1]  ;;  %vm13843_vm13 = vmand %vm224_vm1, %vm285_vm4 }
  0x1d   : > { %289 = vst [vmem:[#allocation2 + $0x14] sm:$0x1] %v288_v11  ;;  %s12496_s12 = sshll.u32 %s219_s11, 7  ;;  %242 = vst [vmem:[#allocation2 + $0x18] sm:$0x1] %v241_v13  ;;  %v291_v16 = vsel %vm13815_vm8, 0, %v290_v14 }
  0x1e   : > { %v244_v17 = vsel %vm13800_vm7, 0, %v243_v15  ;;  %v293_v18 = vld [vmem:[#allocation2 + $0x2c] sm:$0x1]  ;;  %vm961_vm9 = vsmask.f32 3328  ;;  %s13833_s15 = scalar_lea.vmem %s18854_s0, %s12496_s12  ;;  %v18895_v48 = vmov 0 }
  0x1f   : > { %vm962_vm10 = vsmask.f32 7440  ;;  %292 = vst [vmem:[#allocation2 + $0x20] sm:$0x1] %v291_v16  ;;  %245 = vst [vmem:[#allocation2 + $0x24] sm:$0x1] %v244_v17 }
  0x20   : > { %v294_v19 = vsel %vm13815_vm8, 0, %v293_v18  ;;  %v912_v20 = vld [vmem:[#allocation2] sm:$0xf]  ;;  %v913_v21 = vld [vmem:[#allocation2 + $0x4] sm:$0xf]  ;;  %vm13850_vm14 = vmor %vm961_vm9, %vm962_vm10  ;;  %v18898_v56 = vmov 0 }
  0x21   : > { %v945_v22 = vld [vmem:[#allocation2 + $0x8] sm:$0x1]  ;;  %295 = vst [vmem:[#allocation2 + $0x2c] sm:$0x1] %v294_v19  ;;  %v965_v23 = vshrl.u32 %v912_v20, 16  ;;  %v968_v24 = vshll.u32 %v912_v20, 16  ;;  %v11802_v29 = vcombine.low %v912_v20, %v913_v21 }
  0x22   : > { %v974_v25 = vshll.u32 %v913_v21, 16  ;;  %v978_v26 = vshrl.u32 %v913_v21, 16  ;;  %v444_v27 = vld [vmem:[%s13833_s15] sm:$0xf]  ;;  %v984_v28 = vshll.u32 %v945_v22, 16  ;;  %v18896_v48 = vsel %vm13850_vm14, 4294967295, %v18895_v48 }
  0x23   : > { %v445_v30 = vld [vmem:[%s13833_s15 + $0x4] sm:$0xf]  ;;  %vm476_vm12 = vsmask.f32 4368  ;;  %v479_v31 = vshrl.u32 %v444_v27, 16  ;;  %v967_v32 = vrot.slane %v965_v23, 4  ;;  %12872 = vmatprep.mubr.msk.bf16.mxu1 %vm1398_vm11, %v11802_v29 }
  0x24   : > { %v970_v33 = vrot.slane %v968_v24, 5  ;;  %v976_v34 = vrot.slane %v974_v25, 5  ;;  %v980_v35 = vrot.slane %v978_v26, 4  ;;  %v446_v36 = vld [vmem:[%s13833_s15 + $0x8] sm:$0xf]  ;;  %v986_v37 = vrot.slane %v984_v28, 5  ;;  %vm13856_vm15 = vmor %vm235_vm3, %vm476_vm12 }
  0x25   : > { %v481_v38 = vrot.slane %v479_v31, 7  ;;  %v482_v39 = vshll.u32 %v444_v27, 16  ;;  %v487_v40 = vshrl.u32 %v445_v30, 16  ;;  %v490_v44 = vshll.u32 %v445_v30, 16  ;;  %v800_v45 = vld [vmem:[#allocation2 + $0xc] sm:$0xf] }
  0x26   : > { %v971_v42 = vor.u32 %v970_v33, %v967_v32  ;;  %v981_v43 = vor.u32 %v980_v35, %v976_v34  ;;  %v447_v46 = vld [vmem:[%s13833_s15 + $0xc] sm:$0xf]  ;;  %v496_v47 = vshrl.u32 %v446_v36, 16  ;;  %18897 = vst [vmem:[#allocation7_spill] sm:$0xff] %v18896_v48  ;;  %v804_v52 = vld [vmem:[#allocation2 + $0x14] sm:$0x1] }
  0x27   : > { %v484_v49 = vor.u32 %v482_v39, %v481_v38  ;;  %v485_v50 = vrot.slane %v481_v38, 4  ;;  %v489_v51 = vrot.slane %v487_v40, 7  ;;  %v499_v53 = vshll.u32 %v446_v36, 16  ;;  %v807_v59 = vld [vmem:[#allocation2 + $0x18] sm:$0xf]  ;;  %s215_s10 = sand.u32 1, %s13684_s19  }
  0x28   : > { %v972_v54 = vrot.slane %v971_v42, 4  ;;  %v982_v55 = vrot.slane %v981_v43, 4  ;;  %v18899_v56 = vsel %vm13856_vm15, 4294967295, %v18898_v56  ;;  %v498_v57 = vrot.slane %v496_v47, 7  ;;  %v448_v0 = vld [vmem:[%s13833_s15 + $0x10] sm:$0xf] }
  0x29   : > { %18900 = vst [vmem:[#allocation8_spill] sm:$0xff] %v18899_v56  ;;  %v504_v58 = vshrl.u32 %v447_v46, 16  ;;  %v492_v60 = vor.u32 %v490_v44, %v489_v51  ;;  %v494_v61 = vrot.slane %v489_v51, 4  ;;  %v801_v62 = vsel %vm13843_vm13, %v484_v49, %v800_v45  ;;  %v449_v1 = vld [vmem:[%s13833_s15 + $0x14] sm:$0xf]  ;;  %s11766_s11 = sshll.u32 %s215_s10, 6 }
  0x2a   : > { %v507_v63 = vshll.u32 %v447_v46, 16  ;;  %v977_v2 = vsel %vm13850_vm14, %v972_v54, %v976_v34  ;;  %v987_v3 = vsel %vm13850_vm14, %v982_v55, %v986_v37  ;;  %802 = vst [vmem:[#allocation2 + $0xc] sm:$0xf] %v801_v62  ;;  %v501_v5 = vor.u32 %v499_v53, %v498_v57  ;;  %v246_v9 = vld [vmem:[#allocation2 + $0x30] sm:$0x1]  ;;  %s18553_s12 = scalar_lea.vmem [#allocation4], %s11766_s11 }
  0x2b   : > { %v502_v8 = vrot.slane %v498_v57, 4  ;;  %v296_v10 = vld [vmem:[#allocation2 + $0x38] sm:$0x1]  ;;  %v11770_v11 = vcombine.low %v977_v2, %v987_v3  ;;  %v493_v12 = vsel %vm13856_vm15, %v485_v50, %v492_v60  ;;  %v805_v13 = vsel %vm13800_vm7, %v494_v61, %v804_v52  ;;  %v811_v15 = vld [vmem:[#allocation2 + $0x20] sm:$0x1]  ;;  %s11700_s16 = sshll.u32 %s18553_s12, 4  ;;  %s18807_s16 = int_to_ptr.vmem [resolvable:$true] %s11700_s16 }
  0x2c   : > { %v506_v14 = vrot.slane %v504_v58, 7  ;;  %v450_v16 = vld [vmem:[%s13833_s15 + $0x18] sm:$0xf]  ;;  %803 = vst.msk [vmem:[#allocation2 + $0x10] sm:$0xf] %vm224_vm1, %v493_v12  ;;  %v808_v17 = vsel %vm13843_vm13, %v501_v5, %v807_v59  ;;  %v513_v18 = vshrl.u32 %v448_v0, 16 }
  0x2d   : > { %806 = vst [vmem:[#allocation2 + $0x14] sm:$0x1] %v805_v13  ;;  %v516_v19 = vshll.u32 %v448_v0, 16  ;;  %v521_v20 = vshrl.u32 %v449_v1, 16  ;;  %v451_v21 = vld [vmem:[%s13833_s15 + $0x1c] sm:$0xf]  ;;  %12838 = vmatprep.mubr.msk.bf16.mxu0 %vm1398_vm11, %v11770_v11 }
  0x2e   : > { %v509_v22 = vor.u32 %v507_v63, %v506_v14  ;;  %v511_v23 = vrot.slane %v506_v14, 4  ;;  %809 = vst [vmem:[#allocation2 + $0x18] sm:$0xf] %v808_v17  ;;  %v524_v24 = vshll.u32 %v449_v1, 16  ;;  %v247_v25 = vsel %vm13800_vm7, 0, %v246_v9  ;;  %s13632_s26 = scalar_lea.vmem %s18807_s16, 1024 }
  0x2f   : > { %v515_v26 = vrot.slane %v513_v18, 7  ;;  %v523_v27 = vrot.slane %v521_v20, 7  ;;  %248 = vst [vmem:[#allocation2 + $0x30] sm:$0x1] %v247_v25  ;;  %v297_v28 = vsel %vm13815_vm8, 0, %v296_v10  ;;  %v530_v29 = vshrl.u32 %v450_v16, 16  ;;  %p13633_p11 = scmp.ne.s32.totalorder %s18807_s16, %s13632_s26 }
  0x30   : > { %v249_v30 = vld [vmem:[#allocation2 + $0x3c] sm:$0x1]  ;;  %v510_v31 = vsel %vm13856_vm15, %v502_v8, %v509_v22  ;;  %v812_v32 = vsel %vm13800_vm7, %v511_v23, %v811_v15  ;;  %v814_v33 = vld [vmem:[#allocation2 + $0x24] sm:$0xf]  ;;  %298 = vst [vmem:[#allocation2 + $0x38] sm:$0x1] %v297_v28 }
  0x31   : > { %v533_v34 = vshll.u32 %v450_v16, 16  ;;  %v538_v35 = vshrl.u32 %v451_v21, 16  ;;  %810 = vst.msk [vmem:[#allocation2 + $0x1c] sm:$0xf] %vm224_vm1, %v510_v31  ;;  %813 = vst [vmem:[#allocation2 + $0x20] sm:$0x1] %v812_v32  ;;  %v518_v36 = vor.u32 %v516_v19, %v515_v26  ;;  %v526_v38 = vor.u32 %v524_v24, %v523_v27  ;;  %p13634_p12 = pnand %p13633_p11, %p13767_p5 }
  0x32   : > { %v519_v37 = vrot.slane %v515_v26, 4  ;;  %v528_v39 = vrot.slane %v523_v27, 4  ;;  %v818_v40 = vld [vmem:[#allocation2 + $0x2c] sm:$0x1]  ;;  %v532_v43 = vrot.slane %v530_v29, 7  ;;  %v541_v45 = vshll.u32 %v451_v21, 16 }
  0x33   : > { %v914_v42 = vld [vmem:[#allocation2 + $0xc] sm:$0xf]  ;;  %v13887_v44 = vrot.slane %v538_v35, 7  ;;  %v250_v46 = vsel %vm13800_vm7, 0, %v249_v30  ;;  %v815_v51 = vsel %vm13843_vm13, %v518_v36, %v814_v33  ;;  %v915_v52 = vld [vmem:[#allocation2 + $0x10] sm:$0xf]  ;;  %p13635_p13 = pneg %p13634_p12 }
  0x34   : > { %v989_v47 = vshrl.u32 %v914_v42, 16  ;;  %v992_v49 = vshll.u32 %v914_v42, 16  ;;  %v527_v50 = vsel %vm13856_vm15, %v519_v37, %v526_v38  ;;  %251 = vst [vmem:[#allocation2 + $0x3c] sm:$0x1] %v250_v46  ;;  %v946_v53 = vld [vmem:[#allocation2 + $0x14] sm:$0x1]  ;;  %v819_v54 = vsel %vm13800_vm7, %v528_v39, %v818_v40 }
  0x35   : > { %816 = vst [vmem:[#allocation2 + $0x24] sm:$0xf] %v815_v51  ;;  %817 = vst.msk [vmem:[#allocation2 + $0x28] sm:$0xf] %vm224_vm1, %v527_v50  ;;  %v535_v55 = vor.u32 %v533_v34, %v532_v43  ;;  %v536_v57 = vrot.slane %v532_v43, 4  ;;  %v543_v58 = vor.u32 %v541_v45, %v13887_v44  ;;  %v998_v61 = vshll.u32 %v915_v52, 16 }
  0x36   : > { %v991_v59 = vrot.slane %v989_v47, 4  ;;  %v994_v60 = vrot.slane %v992_v49, 5  ;;  %v1002_v62 = vshrl.u32 %v915_v52, 16  ;;  %v916_v63 = vld [vmem:[#allocation2 + $0x18] sm:$0xf]  ;;  %v1008_v0 = vshll.u32 %v946_v53, 16 }
  0x37   : > { %820 = vst [vmem:[#allocation2 + $0x2c] sm:$0x1] %v819_v54  ;;  %v11803_v1 = vcombine.low %v914_v42, %v915_v52  ;;  %v2166_v2 = vsel %vm1447_vm0, %v13790_v4, 0  ;;  %v821_v3 = vld [vmem:[#allocation2 + $0x30] sm:$0xf]  ;;  %v1000_v8 = vrot.slane %v998_v61, 5  ;;  %v544_v15 = vsel %vm13856_vm15, %v536_v57, %v543_v58 }
  0x38   : > { %v995_v5 = vor.u32 %v994_v60, %v991_v59  ;;  %v1004_v9 = vrot.slane %v1002_v62, 4  ;;  %v1013_v10 = vshrl.u32 %v916_v63, 16  ;;  %v1010_v11 = vrot.slane %v1008_v0, 5  ;;  %v917_v12 = vld [vmem:[#allocation2 + $0x1c] sm:$0xf]  ;;  %s13696_s30 = smov [#allocation4]  }
  0x39   : > { %12873 = vmatmul.mubr.msk.bf16.vlgmr.msra.gmra.mxu1 %vm1398_vm11, %v11803_v1  ;;  %v947_v13 = vld [vmem:[#allocation2 + $0x20] sm:$0x1]  ;;  %v1016_v14 = vshll.u32 %v916_v63, 16  ;;  %v822_v16 = vsel %vm13843_vm13, %v535_v55, %v821_v3  ;;  %v1022_v19 = vshll.u32 %v917_v12, 16  ;;  %824 = vst.msk [vmem:[#allocation2 + $0x34] sm:$0xf] %vm224_vm1, %v544_v15  ;;  %v11804_v23 = vcombine.low %v916_v63, %v917_v12 }
  0x3a   : > { %v996_v17 = vrot.slane %v995_v5, 4  ;;  %v1005_v18 = vor.u32 %v1004_v9, %v1000_v8  ;;  %v1015_v4 = vrot.slane %v1013_v10, 4  ;;  %823 = vst [vmem:[#allocation2 + $0x30] sm:$0xf] %v822_v16  ;;  %v1026_v21 = vshrl.u32 %v917_v12, 16  ;;  %s13636_s6 = sshll.u32 %s13696_s30, 4  ;;  %s13637_s6 = int_to_ptr.vmem [resolvable:$false] %s13636_s6 }
  0x3b   : > { %v1018_v20 = vrot.slane %v1016_v14, 5  ;;  %v1032_v22 = vshll.u32 %v947_v13, 16  ;;  %v1024_v26 = vrot.slane %v1022_v19, 5  ;;  %12876 = vmatprep.mubr.msk.bf16.mxu1 %vm1398_vm11, %v11804_v23  ;;  %v825_v49 = vld [vmem:[#allocation2 + $0x38] sm:$0x1]  ;;  %v545_v53 = vrot.slane %v13887_v44, 4  ;;  %p13639_p0 = scmp.lt.s32.totalorder %s18807_s16, %s13637_s6 }
  0x3c   : > { %v1001_v24 = vsel %vm13850_vm14, %v996_v17, %v1000_v8  ;;  %v1006_v25 = vrot.slane %v1005_v18, 4  ;;  %v918_v27 = vld [vmem:[#allocation2 + $0x24] sm:$0xf]  ;;  %v919_v28 = vld [vmem:[#allocation2 + $0x28] sm:$0xf]  ;;  %v1028_v30 = vrot.slane %v1026_v21, 4 }
  0x3d   : > { %v1019_v29 = vor.u32 %v1018_v20, %v1015_v4  ;;  %v1034_v31 = vrot.slane %v1032_v22, 5  ;;  %v1037_v33 = vshrl.u32 %v918_v27, 16  ;;  %v1040_v35 = vshll.u32 %v918_v27, 16  ;;  %v299_v1 = vld [vmem:[#allocation2 + $0x44] sm:$0x1]  ;;  %s13638_s7 = scalar_lea.vmem %s13637_s6, 2048 }
  0x3e   : > { %v948_v32 = vld [vmem:[#allocation2 + $0x2c] sm:$0x1]  ;;  %v1011_v34 = vsel %vm13850_vm14, %v1006_v25, %v1010_v11  ;;  %v1046_v36 = vshll.u32 %v919_v28, 16  ;;  %v1050_v37 = vshrl.u32 %v919_v28, 16  ;;  %v1029_v40 = vor.u32 %v1028_v30, %v1024_v26  ;;  %v452_v44 = vld [vmem:[%s13833_s15 + $0x20] sm:$0xf]  ;;  %p13640_p1 = scmp.lt.s32.totalorder %s13638_s7, %s13632_s26 }
  0x3f   : > { %v11771_v38 = vcombine.low %v1001_v24, %v1011_v34  ;;  %v1020_v39 = vrot.slane %v1019_v29, 4  ;;  %v1039_v42 = vrot.slane %v1037_v33, 4  ;;  %v1042_v43 = vrot.slane %v1040_v35, 5  ;;  %v453_v9 = vld [vmem:[%s13833_s15 + $0x24] sm:$0xf] }
  0x40   : > { %v1048_v45 = vrot.slane %v1046_v36, 5  ;;  %v1052_v46 = vrot.slane %v1050_v37, 4  ;;  %v1056_v47 = vshll.u32 %v948_v32, 16  ;;  %v1030_v51 = vrot.slane %v1029_v40, 4  ;;  %v921_v55 = vld [vmem:[#allocation2 + $0x34] sm:$0xf]  ;;  %p13641_p2 = por %p13640_p1, %p13639_p0 }
  0x41   : > { %12839 = vmatmul.mubr.msk.bf16.vlgmr.msra.gmra.mxu0 %vm1398_vm11, %v11771_v38  ;;  %v1025_v50 = vsel %vm13850_vm14, %v1020_v39, %v1024_v26  ;;  %v11805_v52 = vcombine.low %v918_v27, %v919_v28  ;;  %v920_v54 = vld [vmem:[#allocation2 + $0x30] sm:$0xf]  ;;  %v1043_v57 = vor.u32 %v1042_v43, %v1039_v42  ;;  %v826_v62 = vsel %vm13800_vm7, %v545_v53, %v825_v49  ;;  %v252_v14 = vld [vmem:[#allocation2 + $0x48] sm:$0x1]  ;;  %v455_v28 = vld [vmem:[%s13833_s15 + $0x2c] sm:$0xf] }
  0x42   : > { %12905 = vmatpush3.bf16.msra.mxu0 %v2166_v2  ;;  %v1053_v58 = vor.u32 %v1052_v46, %v1048_v45  ;;  %v1058_v59 = vrot.slane %v1056_v47, 5  ;;  %v1061_v60 = vshrl.u32 %v920_v54, 16  ;;  %v1035_v61 = vsel %vm13850_vm14, %v1030_v51, %v1034_v31  ;;  %827 = vst [vmem:[#allocation2 + $0x38] sm:$0x1] %v826_v62  ;;  %v302_v4 = vld [vmem:[#allocation2 + $0x50] sm:$0x1]  ;;  %p13642_p3 = pnand %p13641_p2, %p13635_p13 }
  0x43   : > { %12877 = vmatmul.mubr.msk.bf16.gmra.mxu1 %vm1398_vm11, %v11805_v52  ;;  %v1064_v63 = vshll.u32 %v920_v54, 16  ;;  %v1070_v0 = vshll.u32 %v921_v55, 16  ;;  %v11772_v3 = vcombine.low %v1025_v50, %v1035_v61  ;;  %v1044_v5 = vrot.slane %v1043_v57, 4  ;;  %v454_v19 = vld [vmem:[%s13833_s15 + $0x28] sm:$0xf] }
  0x44   : > { %v1054_v2 = vrot.slane %v1053_v58, 4  ;;  %v1063_v8 = vrot.slane %v1061_v60, 4  ;;  %v1074_v12 = vshrl.u32 %v921_v55, 16  ;;  %v11806_v13 = vcombine.low %v920_v54, %v921_v55  ;;  %v828_v31 = vld [vmem:[#allocation2 + $0x3c] sm:$0xf] }
  0x45   : > { %v1066_v10 = vrot.slane %v1064_v63, 5  ;;  %v13923_v11 = vrot.slane %v1070_v0, 5  ;;  %12842 = vmatprep.mubr.msk.bf16.mxu0 %vm1398_vm11, %v11772_v3  ;;  %v1049_v15 = vsel %vm13850_vm14, %v1044_v5, %v1048_v45  ;;  %v300_v17 = vsel %vm13815_vm8, 0, %v299_v1  ;;  %v255_v34 = vld [vmem:[#allocation2 + $0x54] sm:$0x1] }
  0x46   : > { %v1059_v16 = vsel %vm13850_vm14, %v1054_v2, %v1058_v59  ;;  %v547_v18 = vshrl.u32 %v452_v44, 16  ;;  %v1076_v22 = vrot.slane %v1074_v12, 4  ;;  %12880 = vmatprep.mubr.msk.bf16.mxu1 %vm1398_vm11, %v11806_v13  ;;  %301 = vst [vmem:[#allocation2 + $0x44] sm:$0x1] %v300_v17  ;;  %v550_v23 = vshll.u32 %v452_v44, 16 }
  0x47   : > { %v11773_v20 = vcombine.low %v1049_v15, %v1059_v16  ;;  %v1067_v21 = vor.u32 %v1066_v10, %v1063_v8  ;;  %v555_v25 = vshrl.u32 %v453_v9, 16  ;;  %v558_v26 = vshll.u32 %v453_v9, 16  ;;  %v305_v39 = vld [vmem:[#allocation2 + $0x5c] sm:$0x1]  ;;  %v456_v52 = vld [vmem:[%s13833_s15 + $0x30] sm:$0xf] }
  0x48   : > { %v549_v24 = vrot.slane %v547_v18, 7  ;;  %v253_v27 = vsel %vm13800_vm7, 0, %v252_v14  ;;  %v1077_v30 = vor.u32 %v1076_v22, %v13923_v11  ;;  %v303_v32 = vsel %vm13815_vm8, 0, %v302_v4  ;;  %v457_v53 = vld [vmem:[%s13833_s15 + $0x34] sm:$0xf] }
  0x49   : > { %12843 = vmatmul.mubr.msk.bf16.gmra.mxu0 %vm1398_vm11, %v11773_v20  ;;  %v1068_v29 = vrot.slane %v1067_v21, 4  ;;  %254 = vst [vmem:[#allocation2 + $0x48] sm:$0x1] %v253_v27  ;;  %v564_v33 = vshrl.u32 %v454_v19, 16  ;;  %v557_v37 = vrot.slane %v555_v25, 7  ;;  %v567_v38 = vshll.u32 %v454_v19, 16 }
  0x4a   : > { %v552_v35 = vor.u32 %v550_v23, %v549_v24  ;;  %v553_v36 = vrot.slane %v549_v24, 4  ;;  %304 = vst [vmem:[#allocation2 + $0x50] sm:$0x1] %v303_v32  ;;  %v949_v40 = vld [vmem:[#allocation2 + $0x38] sm:$0x1]  ;;  %v1078_v43 = vrot.slane %v1077_v30, 4 }
  0x4b   : > { %v1073_v42 = vsel %vm13850_vm14, %v1068_v29, %v13923_v11  ;;  %v566_v45 = vrot.slane %v564_v33, 7  ;;  %v572_v46 = vshrl.u32 %v455_v28, 16  ;;  %v1080_v47 = vshll.u32 %v949_v40, 16  ;;  %v258_v59 = vld [vmem:[#allocation2 + $0x60] sm:$0x1] }
  0x4c   : > { %v560_v49 = vor.u32 %v558_v26, %v557_v37  ;;  %v562_v50 = vrot.slane %v557_v37, 4  ;;  %v829_v51 = vsel %vm13843_vm13, %v552_v35, %v828_v31  ;;  %v575_v58 = vshll.u32 %v455_v28, 16  ;;  %v308_v2 = vld [vmem:[#allocation2 + $0x68] sm:$0x1]  ;;  %v458_v8 = vld [vmem:[%s13833_s15 + $0x38] sm:$0xf] }
  0x4d   : > { %830 = vst [vmem:[#allocation2 + $0x3c] sm:$0xf] %v829_v51  ;;  %v569_v54 = vor.u32 %v567_v38, %v566_v45  ;;  %v570_v55 = vrot.slane %v566_v45, 4  ;;  %v574_v57 = vrot.slane %v572_v46, 7  ;;  %v1082_v60 = vrot.slane %v1080_v47, 5 }
  0x4e   : > { %v561_v61 = vsel %vm13856_vm15, %v553_v36, %v560_v49  ;;  %v832_v62 = vld [vmem:[#allocation2 + $0x44] sm:$0x1]  ;;  %v256_v63 = vsel %vm13800_vm7, 0, %v255_v34  ;;  %v306_v0 = vsel %vm13815_vm8, 0, %v305_v39  ;;  %v581_v5 = vshrl.u32 %v456_v52, 16 }
  0x4f   : > { %831 = vst.msk [vmem:[#allocation2 + $0x40] sm:$0xf] %vm224_vm1, %v561_v61  ;;  %v833_v1 = vsel %vm13800_vm7, %v562_v50, %v832_v62  ;;  %v577_v44 = vor.u32 %v575_v58, %v574_v57  ;;  %v579_v3 = vrot.slane %v574_v57, 4  ;;  %257 = vst [vmem:[#allocation2 + $0x54] sm:$0x1] %v256_v63  ;;  %v1083_v9 = vsel %vm13850_vm14, %v1078_v43, %v1082_v60 }
  0x50   : > { %307 = vst [vmem:[#allocation2 + $0x5c] sm:$0x1] %v306_v0  ;;  %834 = vst [vmem:[#allocation2 + $0x44] sm:$0x1] %v833_v1  ;;  %v835_v10 = vld [vmem:[#allocation2 + $0x48] sm:$0xf]  ;;  %v11774_v14 = vcombine.low %v1073_v42, %v1083_v9 }
  0x51   : > { %v584_v11 = vshll.u32 %v456_v52, 16  ;;  %v589_v12 = vshrl.u32 %v457_v53, 16  ;;  %v592_v13 = vshll.u32 %v457_v53, 16  ;;  %v578_v15 = vsel %vm13856_vm15, %v570_v55, %v577_v44  ;;  %v839_v17 = vld [vmem:[#allocation2 + $0x50] sm:$0x1] }
  0x52   : > { %v836_v16 = vsel %vm13843_vm13, %v569_v54, %v835_v10  ;;  %v583_v18 = vrot.slane %v581_v5, 7  ;;  %v13965_v4 = vld [vmem:[%s13833_s15 + $0x3c] sm:$0xf]  ;;  %838 = vst.msk [vmem:[#allocation2 + $0x4c] sm:$0xf] %vm224_vm1, %v578_v15  ;;  %v840_v19 = vsel %vm13800_vm7, %v579_v3, %v839_v17  ;;  %v259_v21 = vsel %vm13800_vm7, 0, %v258_v59  ;;  %12846 = vmatprep.mubr.msk.bf16.mxu0 %vm1398_vm11, %v11774_v14 }
  0x53   : > { %837 = vst [vmem:[#allocation2 + $0x48] sm:$0xf] %v836_v16  ;;  %v591_v20 = vrot.slane %v589_v12, 7  ;;  %v309_v22 = vsel %vm13815_vm8, 0, %v308_v2  ;;  %v261_v23 = vld [vmem:[#allocation2 + $0x6c] sm:$0x1] }
  0x54   : > { %841 = vst [vmem:[#allocation2 + $0x50] sm:$0x1] %v840_v19  ;;  %v586_v24 = vor.u32 %v584_v11, %v583_v18  ;;  %v587_v25 = vrot.slane %v583_v18, 4  ;;  %260 = vst [vmem:[#allocation2 + $0x60] sm:$0x1] %v259_v21  ;;  %v598_v26 = vshrl.u32 %v458_v8, 16 }
  0x55   : > { %310 = vst [vmem:[#allocation2 + $0x68] sm:$0x1] %v309_v22  ;;  %v601_v27 = vshll.u32 %v458_v8, 16  ;;  %v922_v28 = vld [vmem:[#allocation2 + $0x3c] sm:$0xf]  ;;  %v594_v29 = vor.u32 %v592_v13, %v591_v20  ;;  %v596_v30 = vrot.slane %v591_v20, 4 }
  0x56   : > { %v606_v31 = vshrl.u32 %v13965_v4, 16  ;;  %v609_v32 = vshll.u32 %v13965_v4, 16  ;;  %v1085_v33 = vshrl.u32 %v922_v28, 16  ;;  %v1088_v34 = vshll.u32 %v922_v28, 16  ;;  %v923_v37 = vld [vmem:[#allocation2 + $0x40] sm:$0xf] }
  0x57   : > { %v13977_v35 = vrot.slane %v598_v26, 7  ;;  %v262_v36 = vsel %vm13800_vm7, 0, %v261_v23  ;;  %v595_v38 = vsel %vm13856_vm15, %v587_v25, %v594_v29  ;;  %v842_v39 = vld [vmem:[#allocation2 + $0x54] sm:$0xf]  ;;  %v846_v40 = vld [vmem:[#allocation2 + $0x5c] sm:$0x1]  ;;  %v11807_v50 = vcombine.low %v922_v28, %v923_v37 }
  0x58   : > { %263 = vst [vmem:[#allocation2 + $0x6c] sm:$0x1] %v262_v36  ;;  %v950_v42 = vld [vmem:[#allocation2 + $0x44] sm:$0x1]  ;;  %v1087_v43 = vrot.slane %v1085_v33, 4  ;;  %v1090_v45 = vrot.slane %v1088_v34, 5  ;;  %v843_v51 = vsel %vm13843_vm13, %v586_v24, %v842_v39  ;;  %v847_v52 = vsel %vm13800_vm7, %v596_v30, %v846_v40 }
  0x59   : > { %v1094_v46 = vshll.u32 %v923_v37, 16  ;;  %v1098_v47 = vshrl.u32 %v923_v37, 16  ;;  %845 = vst.msk [vmem:[#allocation2 + $0x58] sm:$0xf] %vm224_vm1, %v595_v38  ;;  %v1104_v49 = vshll.u32 %v950_v42, 16  ;;  %v603_v59 = vor.u32 %v601_v27, %v13977_v35  ;;  %12881 = vmatmul.mubr.msk.bf16.gmra.mxu1 %vm1398_vm11, %v11807_v50 }
  0x5a   : > { %v1091_v53 = vor.u32 %v1090_v45, %v1087_v43  ;;  %v924_v57 = vld [vmem:[#allocation2 + $0x48] sm:$0xf]  ;;  %v925_v58 = vld [vmem:[#allocation2 + $0x4c] sm:$0xf]  ;;  %844 = vst [vmem:[#allocation2 + $0x54] sm:$0xf] %v843_v51 }
  0x5b   : > { %v1096_v54 = vrot.slane %v1094_v46, 5  ;;  %v1100_v55 = vrot.slane %v1098_v47, 4  ;;  %848 = vst [vmem:[#allocation2 + $0x5c] sm:$0x1] %v847_v52  ;;  %v1106_v60 = vrot.slane %v1104_v49, 5  ;;  %v1109_v62 = vshrl.u32 %v924_v57, 16 }
  0x5c   : > { %v951_v61 = vld [vmem:[#allocation2 + $0x50] sm:$0x1]  ;;  %v1112_v63 = vshll.u32 %v924_v57, 16  ;;  %v1118_v0 = vshll.u32 %v925_v58, 16  ;;  %v1092_v1 = vrot.slane %v1091_v53, 4  ;;  %v1122_v3 = vshrl.u32 %v925_v58, 16 }
  0x5d   : > { %v1101_v44 = vor.u32 %v1100_v55, %v1096_v54  ;;  %v1128_v5 = vshll.u32 %v951_v61, 16  ;;  %v849_v2 = vld [vmem:[#allocation2 + $0x60] sm:$0xf]  ;;  %v1111_v8 = vrot.slane %v1109_v62, 4  ;;  %v11808_v11 = vcombine.low %v924_v57, %v925_v58  ;;  %v311_v30 = vld [vmem:[#allocation2 + $0x74] sm:$0x1] }
  0x5e   : > { %v1114_v9 = vrot.slane %v1112_v63, 5  ;;  %v1120_v10 = vrot.slane %v1118_v0, 5  ;;  %v1097_v12 = vsel %vm13850_vm14, %v1092_v1, %v1096_v54  ;;  %v1124_v14 = vrot.slane %v1122_v3, 4  ;;  %v853_v37 = vld [vmem:[#allocation2 + $0x68] sm:$0x1] }
  0x5f   : > { %v1102_v13 = vrot.slane %v1101_v44, 4  ;;  %v1130_v15 = vrot.slane %v1128_v5, 5  ;;  %12884 = vmatprep.mubr.msk.bf16.mxu1 %vm1398_vm11, %v11808_v11  ;;  %v604_v18 = vrot.slane %v13977_v35, 4  ;;  %v608_v4 = vrot.slane %v606_v31, 7  ;;  %v460_v31 = vld [vmem:[%s13833_s15 + $0x40] sm:$0xf] }
  0x60   : > { %v1115_v16 = vor.u32 %v1114_v9, %v1111_v8  ;;  %v13993_v17 = vld [vmem:[#allocation2 + $0x58] sm:$0xf]  ;;  %v850_v19 = vsel %vm13843_vm13, %v603_v59, %v849_v2  ;;  %v1125_v21 = vor.u32 %v1124_v14, %v1120_v10  ;;  %v314_v50 = vld [vmem:[#allocation2 + $0x80] sm:$0x1]  ;;  %v14018_v51 = vld [vmem:[%s18855_s1 + $0x6] sm:$0x3] }
  0x61   : > { %v1107_v20 = vsel %vm13850_vm14, %v1102_v13, %v1106_v60  ;;  %v1142_v22 = vshll.u32 %v13993_v17, 16  ;;  %v1146_v23 = vshrl.u32 %v13993_v17, 16  ;;  %851 = vst [vmem:[#allocation2 + $0x60] sm:$0xf] %v850_v19  ;;  %v926_v26 = vld [vmem:[#allocation2 + $0x54] sm:$0xf]  ;;  %v611_v28 = vor.u32 %v609_v32, %v608_v4  ;;  %13451 = vmatprep.subr.msk.bf16.mxu1 %vm1447_vm0, %v14018_v51 }
  0x62   : > { %v11775_v24 = vcombine.low %v1097_v12, %v1107_v20  ;;  %v1116_v25 = vrot.slane %v1115_v16, 4  ;;  %v14002_v27 = vld [vmem:[#allocation2 + $0x5c] sm:$0x1]  ;;  %v613_v29 = vrot.slane %v608_v4, 4  ;;  %v1126_v33 = vrot.slane %v1125_v21, 4 }
  0x63   : > { %v1133_v34 = vshrl.u32 %v926_v26, 16  ;;  %v1136_v35 = vshll.u32 %v926_v26, 16  ;;  %v1144_v36 = vrot.slane %v1142_v22, 5  ;;  %v1148_v39 = vrot.slane %v1146_v23, 4  ;;  %v461_v32 = vld [vmem:[%s13833_s15 + $0x44] sm:$0xf] }
  0x64   : > { %12847 = vmatmul.mubr.msk.bf16.gmra.mxu0 %vm1398_vm11, %v11775_v24  ;;  %v1121_v38 = vsel %vm13850_vm14, %v1116_v25, %v1120_v10  ;;  %v1152_v40 = vshll.u32 %v14002_v27, 16  ;;  %v11809_v42 = vcombine.low %v926_v26, %v13993_v17  ;;  %v264_v43 = vld [vmem:[#allocation2 + $0x78] sm:$0x1]  ;;  %v1131_v45 = vsel %vm13850_vm14, %v1126_v33, %v1130_v15  ;;  %v462_v57 = vld [vmem:[%s13833_s15 + $0x48] sm:$0xf] }
  0x65   : > { %v1135_v46 = vrot.slane %v1133_v34, 4  ;;  %v1138_v47 = vrot.slane %v1136_v35, 5  ;;  %v612_v49 = vsel %vm13856_vm15, %v604_v18, %v611_v28  ;;  %v11776_v52 = vcombine.low %v1121_v38, %v1131_v45  ;;  %v14030_v58 = vld [vmem:[%s18855_s1 + $0x8] sm:$0x3]  ;;  %v856_v3 = vld [vmem:[#allocation2 + $0x6c] sm:$0xf] }
  0x66   : > { %v1149_v53 = vor.u32 %v1148_v39, %v1144_v36  ;;  %v1154_v54 = vrot.slane %v1152_v40, 5  ;;  %12885 = vmatmul.mubr.msk.bf16.gmra.mxu1 %vm1398_vm11, %v11809_v42  ;;  %852 = vst.msk [vmem:[#allocation2 + $0x64] sm:$0xf] %vm224_vm1, %v612_v49  ;;  %v854_v55 = vsel %vm13800_vm7, %v613_v29, %v853_v37  ;;  %v312_v60 = vsel %vm13815_vm8, 0, %v311_v30  ;;  %13452 = vmatprep.subr.msk.bf16.mxu0 %vm1447_vm0, %v14030_v58  ;;  %v463_v19 = vld [vmem:[%s13833_s15 + $0x4c] sm:$0xf] }
  0x67   : > { %v1139_v59 = vor.u32 %v1138_v47, %v1135_v46  ;;  %855 = vst [vmem:[#allocation2 + $0x68] sm:$0x1] %v854_v55  ;;  %v615_v61 = vshrl.u32 %v460_v31, 16  ;;  %v618_v62 = vshll.u32 %v460_v31, 16  ;;  %12850 = vmatprep.mubr.msk.bf16.mxu0 %vm1398_vm11, %v11776_v52  ;;  %313 = vst [vmem:[#allocation2 + $0x74] sm:$0x1] %v312_v60 }
  0x68   : > { %v1150_v63 = vrot.slane %v1149_v53, 4  ;;  %v928_v0 = vld [vmem:[#allocation2 + $0x60] sm:$0xf]  ;;  %v623_v1 = vshrl.u32 %v461_v32, 16  ;;  %v626_v44 = vshll.u32 %v461_v32, 16  ;;  %v265_v5 = vsel %vm13800_vm7, 0, %v264_v43 }
  0x69   : > { %v1140_v2 = vrot.slane %v1139_v59, 4  ;;  %v1157_v8 = vshrl.u32 %v928_v0, 16  ;;  %v1160_v9 = vshll.u32 %v928_v0, 16  ;;  %v617_v10 = vrot.slane %v615_v61, 7  ;;  %266 = vst [vmem:[#allocation2 + $0x78] sm:$0x1] %v265_v5 }
  0x6a   : > { %v1155_v11 = vsel %vm13850_vm14, %v1150_v63, %v1154_v54  ;;  %v625_v12 = vrot.slane %v623_v1, 7  ;;  %v315_v13 = vsel %vm13815_vm8, 0, %v314_v50  ;;  %v632_v14 = vshrl.u32 %v462_v57, 16  ;;  %v267_v24 = vld [vmem:[#allocation2 + $0x84] sm:$0x1] }
  0x6b   : > { %v1145_v15 = vsel %vm13850_vm14, %v1140_v2, %v1144_v36  ;;  %v1159_v16 = vrot.slane %v1157_v8, 4  ;;  %v1162_v18 = vrot.slane %v1160_v9, 5  ;;  %v620_v4 = vor.u32 %v618_v62, %v617_v10  ;;  %316 = vst [vmem:[#allocation2 + $0x80] sm:$0x1] %v315_v13  ;;  %v317_v31 = vld [vmem:[#allocation2 + $0x8c] sm:$0x1] }
  0x6c   : > { %v11777_v20 = vcombine.low %v1145_v15, %v1155_v11  ;;  %v621_v21 = vrot.slane %v617_v10, 4  ;;  %v628_v22 = vor.u32 %v626_v44, %v625_v12  ;;  %v630_v23 = vrot.slane %v625_v12, 4  ;;  %v464_v38 = vld [vmem:[%s13833_s15 + $0x50] sm:$0xf]  ;;  %v14060_v39 = vld [vmem:[%s13833_s15 + $0x54] sm:$0xf] }
  0x6d   : > { %v14046_v25 = vld [vmem:[#allocation2 + $0x64] sm:$0xf]  ;;  %v1163_v26 = vor.u32 %v1162_v18, %v1159_v16  ;;  %v857_v28 = vsel %vm13843_vm13, %v620_v4, %v856_v3  ;;  %v634_v29 = vrot.slane %v632_v14, 7  ;;  %v635_v30 = vshll.u32 %v462_v57, 16  ;;  %v270_v46 = vld [vmem:[#allocation2 + $0x90] sm:$0x1] }
  0x6e   : > { %12851 = vmatmul.mubr.msk.bf16.gmra.mxu0 %vm1398_vm11, %v11777_v20  ;;  %v14051_v33 = vld [vmem:[#allocation2 + $0x68] sm:$0x1]  ;;  %v1166_v34 = vshll.u32 %v14046_v25, 16  ;;  %v1170_v35 = vshrl.u32 %v14046_v25, 16  ;;  %v11810_v36 = vcombine.low %v928_v0, %v14046_v25  ;;  %v629_v37 = vsel %vm13856_vm15, %v621_v21, %v628_v22  ;;  %858 = vst [vmem:[#allocation2 + $0x6c] sm:$0xf] %v857_v28 }
  0x6f   : > { %v1164_v40 = vrot.slane %v1163_v26, 4  ;;  %v1176_v42 = vshll.u32 %v14051_v33, 16  ;;  %859 = vst.msk [vmem:[#allocation2 + $0x70] sm:$0xf] %vm224_vm1, %v629_v37  ;;  %v860_v32 = vld [vmem:[#allocation2 + $0x74] sm:$0x1]  ;;  %v637_v43 = vor.u32 %v635_v30, %v634_v29 }
  0x70   : > { %v638_v45 = vrot.slane %v634_v29, 4  ;;  %v1168_v47 = vrot.slane %v1166_v34, 5  ;;  %v1172_v49 = vrot.slane %v1170_v35, 4  ;;  %12888 = vmatprep.mubr.msk.bf16.mxu1 %vm1398_vm11, %v11810_v36  ;;  %v861_v50 = vsel %vm13800_vm7, %v630_v23, %v860_v32  ;;  %v863_v53 = vld [vmem:[#allocation2 + $0x78] sm:$0xf] }
  0x71   : > { %v640_v52 = vshrl.u32 %v463_v19, 16  ;;  %v1178_v54 = vrot.slane %v1176_v42, 5  ;;  %862 = vst [vmem:[#allocation2 + $0x74] sm:$0x1] %v861_v50  ;;  %v643_v55 = vshll.u32 %v463_v19, 16  ;;  %v864_v57 = vsel %vm13843_vm13, %v637_v43, %v863_v53 }
  0x72   : > { %v268_v59 = vsel %vm13800_vm7, 0, %v267_v24  ;;  %v1169_v60 = vsel %vm13850_vm14, %v1164_v40, %v1168_v47  ;;  %v1173_v61 = vor.u32 %v1172_v49, %v1168_v47  ;;  %865 = vst [vmem:[#allocation2 + $0x78] sm:$0xf] %v864_v57  ;;  %v318_v63 = vsel %vm13815_vm8, 0, %v317_v31  ;;  %v320_v0 = vld [vmem:[#allocation2 + $0x98] sm:$0x1] }
  0x73   : > { %v642_v62 = vrot.slane %v640_v52, 7  ;;  %269 = vst [vmem:[#allocation2 + $0x84] sm:$0x1] %v268_v59  ;;  %v14076_v1 = vld [vmem:[%s13833_s15 + $0x58] sm:$0xf]  ;;  %v649_v3 = vshrl.u32 %v464_v38, 16 }
  0x74   : > { %v867_v44 = vld [vmem:[#allocation2 + $0x80] sm:$0x1]  ;;  %319 = vst [vmem:[#allocation2 + $0x8c] sm:$0x1] %v318_v63  ;;  %v652_v5 = vshll.u32 %v464_v38, 16  ;;  %v657_v2 = vshrl.u32 %v14060_v39, 16 }
  0x75   : > { %v660_v8 = vshll.u32 %v14060_v39, 16  ;;  %v1174_v9 = vrot.slane %v1173_v61, 4  ;;  %v645_v10 = vor.u32 %v643_v55, %v642_v62  ;;  %v647_v11 = vrot.slane %v642_v62, 4  ;;  %v930_v13 = vld [vmem:[#allocation2 + $0x6c] sm:$0xf] }
  0x76   : > { %v271_v12 = vsel %vm13800_vm7, 0, %v270_v46  ;;  %v651_v14 = vrot.slane %v649_v3, 7  ;;  %v659_v15 = vrot.slane %v657_v2, 7  ;;  %v321_v16 = vsel %vm13815_vm8, 0, %v320_v0  ;;  %v14087_v19 = vld [vmem:[#allocation2 + $0x70] sm:$0xf] }
  0x77   : > { %272 = vst [vmem:[#allocation2 + $0x90] sm:$0x1] %v271_v12  ;;  %v666_v18 = vshrl.u32 %v14076_v1, 16  ;;  %v1179_v4 = vsel %vm13850_vm14, %v1174_v9, %v1178_v54  ;;  %v1181_v20 = vshrl.u32 %v930_v13, 16  ;;  %v1184_v21 = vshll.u32 %v930_v13, 16 }
  0x78   : > { %v646_v22 = vsel %vm13856_vm15, %v638_v45, %v645_v10  ;;  %322 = vst [vmem:[#allocation2 + $0x98] sm:$0x1] %v321_v16  ;;  %v11778_v23 = vcombine.low %v1169_v60, %v1179_v4  ;;  %v1190_v24 = vshll.u32 %v14087_v19, 16  ;;  %v1194_v26 = vshrl.u32 %v14087_v19, 16  ;;  %v14095_v29 = vld [vmem:[#allocation2 + $0x74] sm:$0x1] }
  0x79   : > { %v11811_v28 = vcombine.low %v930_v13, %v14087_v19  ;;  %866 = vst.msk [vmem:[#allocation2 + $0x7c] sm:$0xf] %vm224_vm1, %v646_v22  ;;  %v1183_v30 = vrot.slane %v1181_v20, 4  ;;  %v1186_v31 = vrot.slane %v1184_v21, 5  ;;  %v868_v34 = vsel %vm13800_vm7, %v647_v11, %v867_v44  ;;  %v932_v39 = vld [vmem:[#allocation2 + $0x78] sm:$0xf] }
  0x7a   : > { %v654_v35 = vor.u32 %v652_v5, %v651_v14  ;;  %12854 = vmatprep.mubr.msk.bf16.mxu0 %vm1398_vm11, %v11778_v23  ;;  %v1192_v36 = vrot.slane %v1190_v24, 5  ;;  %v1196_v37 = vrot.slane %v1194_v26, 4  ;;  %v1200_v38 = vshll.u32 %v14095_v29, 16  ;;  %869 = vst [vmem:[#allocation2 + $0x80] sm:$0x1] %v868_v34 }
  0x7b   : > { %12889 = vmatmul.mubr.msk.bf16.gmra.mxu1 %vm1398_vm11, %v11811_v28  ;;  %v655_v40 = vrot.slane %v651_v14, 4  ;;  %v1187_v42 = vor.u32 %v1186_v31, %v1183_v30  ;;  %v1205_v32 = vshrl.u32 %v932_v39, 16  ;;  %v1208_v43 = vshll.u32 %v932_v39, 16  ;;  %v870_v46 = vld [vmem:[#allocation2 + $0x84] sm:$0xf] }
  0x7c   : > { %v662_v45 = vor.u32 %v660_v8, %v659_v15  ;;  %v874_v47 = vld [vmem:[#allocation2 + $0x8c] sm:$0x1]  ;;  %v1197_v49 = vor.u32 %v1196_v37, %v1192_v36  ;;  %v1202_v50 = vrot.slane %v1200_v38, 5  ;;  %v664_v52 = vrot.slane %v659_v15, 4  ;;  %v467_v54 = vld [vmem:[%s13833_s15 + $0x5c] sm:$0xf] }
  0x7d   : > { %v871_v53 = vsel %vm13843_vm13, %v654_v35, %v870_v46  ;;  %v1188_v55 = vrot.slane %v1187_v42, 4  ;;  %v1207_v57 = vrot.slane %v1205_v32, 4  ;;  %v1210_v59 = vrot.slane %v1208_v43, 5  ;;  %v273_v3 = vld [vmem:[#allocation2 + $0x9c] sm:$0x1] }
  0x7e   : > { %v663_v60 = vsel %vm13856_vm15, %v655_v40, %v662_v45  ;;  %872 = vst [vmem:[#allocation2 + $0x84] sm:$0xf] %v871_v53  ;;  %v1198_v61 = vrot.slane %v1197_v49, 4  ;;  %v875_v62 = vsel %vm13800_vm7, %v664_v52, %v874_v47  ;;  %v668_v63 = vrot.slane %v666_v18, 7  ;;  %v877_v44 = vld [vmem:[#allocation2 + $0x90] sm:$0xf] }
  0x7f   : > { %873 = vst.msk [vmem:[#allocation2 + $0x88] sm:$0xf] %vm224_vm1, %v663_v60  ;;  %v669_v0 = vshll.u32 %v14076_v1, 16  ;;  %v323_v5 = vld [vmem:[#allocation2 + $0xa4] sm:$0x1]  ;;  %v1193_v8 = vsel %vm13850_vm14, %v1188_v55, %v1192_v36  ;;  %v1211_v10 = vor.u32 %v1210_v59, %v1207_v57  ;;  %v674_v11 = vshrl.u32 %v467_v54, 16 }
  0x80   : > { %v14112_v2 = vld [vmem:[%s13833_s15 + $0x60] sm:$0xf]  ;;  %v14116_v9 = vld [vmem:[#allocation2 + $0x7c] sm:$0xf]  ;;  %876 = vst [vmem:[#allocation2 + $0x8c] sm:$0x1] %v875_v62  ;;  %v1203_v13 = vsel %vm13850_vm14, %v1198_v61, %v1202_v50 }
  0x81   : > { %v677_v12 = vshll.u32 %v467_v54, 16  ;;  %v1214_v14 = vshll.u32 %v14116_v9, 16  ;;  %v1218_v1 = vshrl.u32 %v14116_v9, 16  ;;  %v11812_v15 = vcombine.low %v932_v39, %v14116_v9  ;;  %v14123_v18 = vld [vmem:[#allocation2 + $0x80] sm:$0x1] }
  0x82   : > { %v11779_v16 = vcombine.low %v1193_v8, %v1203_v13  ;;  %v1212_v4 = vrot.slane %v1211_v10, 4  ;;  %v671_v20 = vor.u32 %v669_v0, %v668_v63  ;;  %v672_v21 = vrot.slane %v668_v63, 4  ;;  %v881_v30 = vld [vmem:[#allocation2 + $0x98] sm:$0x1]  ;;  %v469_v46 = vld [vmem:[%s13833_s15 + $0x64] sm:$0xf] }
  0x83   : > { %v1216_v22 = vrot.slane %v1214_v14, 5  ;;  %v1220_v23 = vrot.slane %v1218_v1, 4  ;;  %v1224_v24 = vshll.u32 %v14123_v18, 16  ;;  %12892 = vmatprep.mubr.msk.bf16.mxu1 %vm1398_vm11, %v11812_v15  ;;  %v676_v26 = vrot.slane %v674_v11, 7  ;;  %v276_v55 = vld [vmem:[#allocation2 + $0xa8] sm:$0x1] }
  0x84   : > { %12855 = vmatmul.mubr.msk.bf16.gmra.mxu0 %vm1398_vm11, %v11779_v16  ;;  %v878_v28 = vsel %vm13843_vm13, %v671_v20, %v877_v44  ;;  %v274_v31 = vsel %vm13800_vm7, 0, %v273_v3  ;;  %v324_v34 = vsel %vm13815_vm8, 0, %v323_v5  ;;  %v683_v35 = vshrl.u32 %v14112_v2, 16  ;;  %v326_v3 = vld [vmem:[#allocation2 + $0xb0] sm:$0x1] }
  0x85   : > { %v1217_v36 = vsel %vm13850_vm14, %v1212_v4, %v1216_v22  ;;  %v1221_v37 = vor.u32 %v1220_v23, %v1216_v22  ;;  %v1226_v38 = vrot.slane %v1224_v24, 5  ;;  %v934_v39 = vld [vmem:[#allocation2 + $0x84] sm:$0xf]  ;;  %v679_v40 = vor.u32 %v677_v12, %v676_v26  ;;  %879 = vst [vmem:[#allocation2 + $0x90] sm:$0xf] %v878_v28 }
  0x86   : > { %275 = vst [vmem:[#allocation2 + $0x9c] sm:$0x1] %v274_v31  ;;  %325 = vst [vmem:[#allocation2 + $0xa4] sm:$0x1] %v324_v34  ;;  %v14137_v42 = vld [vmem:[#allocation2 + $0x88] sm:$0xf] }
  0x87   : > { %v1229_v32 = vshrl.u32 %v934_v39, 16  ;;  %v1232_v43 = vshll.u32 %v934_v39, 16  ;;  %v681_v45 = vrot.slane %v676_v26, 4  ;;  %v14140_v47 = vrot.slane %v683_v35, 7  ;;  %v14142_v50 = vld [vmem:[#allocation2 + $0x8c] sm:$0x1] }
  0x88   : > { %v1222_v49 = vrot.slane %v1221_v37, 4  ;;  %v1238_v52 = vshll.u32 %v14137_v42, 16  ;;  %v1242_v53 = vshrl.u32 %v14137_v42, 16  ;;  %v11813_v54 = vcombine.low %v934_v39, %v14137_v42  ;;  %v470_v12 = vld [vmem:[%s13833_s15 + $0x68] sm:$0xf] }
  0x89   : > { %v1231_v57 = vrot.slane %v1229_v32, 4  ;;  %v1234_v59 = vrot.slane %v1232_v43, 5  ;;  %v1248_v60 = vshll.u32 %v14142_v50, 16  ;;  %v680_v61 = vsel %vm13856_vm15, %v672_v21, %v679_v40  ;;  %v471_v40 = vld [vmem:[%s13833_s15 + $0x6c] sm:$0xf] }
  0x8a   : > { %v1227_v62 = vsel %vm13850_vm14, %v1222_v49, %v1226_v38  ;;  %v1240_v63 = vrot.slane %v1238_v52, 5  ;;  %v1244_v0 = vrot.slane %v1242_v53, 4  ;;  %12893 = vmatmul.mubr.msk.bf16.gmra.mxu1 %vm1398_vm11, %v11813_v54  ;;  %880 = vst.msk [vmem:[#allocation2 + $0x94] sm:$0xf] %vm224_vm1, %v680_v61  ;;  %v882_v44 = vsel %vm13800_vm7, %v681_v45, %v881_v30  ;;  %v279_v32 = vld [vmem:[#allocation2 + $0xb4] sm:$0x1] }
  0x8b   : > { %v11780_v5 = vcombine.low %v1217_v36, %v1227_v62  ;;  %v1235_v8 = vor.u32 %v1234_v59, %v1231_v57  ;;  %v1250_v10 = vrot.slane %v1248_v60, 5  ;;  %883 = vst [vmem:[#allocation2 + $0x98] sm:$0x1] %v882_v44  ;;  %v686_v11 = vshll.u32 %v14112_v2, 16 }
  0x8c   : > { %v1245_v13 = vor.u32 %v1244_v0, %v1240_v63  ;;  %v689_v14 = vrot.slane %v14140_v47, 4  ;;  %v691_v1 = vshrl.u32 %v469_v46, 16  ;;  %v694_v15 = vshll.u32 %v469_v46, 16  ;;  %v936_v4 = vld [vmem:[#allocation2 + $0x90] sm:$0xf] }
  0x8d   : > { %12858 = vmatprep.mubr.msk.bf16.mxu0 %vm1398_vm11, %v11780_v5  ;;  %v1236_v16 = vrot.slane %v1235_v8, 4  ;;  %v688_v20 = vor.u32 %v686_v11, %v14140_v47  ;;  %v884_v21 = vld [vmem:[#allocation2 + $0x9c] sm:$0xf]  ;;  %v277_v22 = vsel %vm13800_vm7, 0, %v276_v55  ;;  %v1253_v24 = vshrl.u32 %v936_v4, 16 }
  0x8e   : > { %v1246_v23 = vrot.slane %v1245_v13, 4  ;;  %v1256_v2 = vshll.u32 %v936_v4, 16  ;;  %v693_v26 = vrot.slane %v691_v1, 7  ;;  %278 = vst [vmem:[#allocation2 + $0xa8] sm:$0x1] %v277_v22  ;;  %v327_v31 = vsel %vm13815_vm8, 0, %v326_v3 }
  0x8f   : > { %v1241_v28 = vsel %vm13850_vm14, %v1236_v16, %v1240_v63  ;;  %v885_v30 = vsel %vm13843_vm13, %v688_v20, %v884_v21  ;;  %v700_v34 = vshrl.u32 %v470_v12, 16  ;;  %v1255_v36 = vrot.slane %v1253_v24, 4  ;;  %v888_v39 = vld [vmem:[#allocation2 + $0xa4] sm:$0x1]  ;;  %328 = vst [vmem:[#allocation2 + $0xb0] sm:$0x1] %v327_v31 }
  0x90   : > { %v1251_v35 = vsel %vm13850_vm14, %v1246_v23, %v1250_v10  ;;  %v1258_v37 = vrot.slane %v1256_v2, 5  ;;  %v696_v38 = vor.u32 %v694_v15, %v693_v26  ;;  %886 = vst [vmem:[#allocation2 + $0x9c] sm:$0xf] %v885_v30  ;;  %v698_v46 = vrot.slane %v693_v26, 4  ;;  %v329_v63 = vld [vmem:[#allocation2 + $0xbc] sm:$0x1] }
  0x91   : > { %v11781_v43 = vcombine.low %v1241_v28, %v1251_v35  ;;  %v14172_v45 = vld [vmem:[#allocation2 + $0x94] sm:$0xf]  ;;  %v702_v47 = vrot.slane %v700_v34, 7  ;;  %v703_v49 = vshll.u32 %v470_v12, 16  ;;  %v14185_v0 = vld [vmem:[#allocation2 + $0x10] sm:$0xf] }
  0x92   : > { %v14174_v52 = vld [vmem:[#allocation2 + $0x98] sm:$0x1]  ;;  %v1259_v53 = vor.u32 %v1258_v37, %v1255_v36  ;;  %v1262_v54 = vshll.u32 %v14172_v45, 16  ;;  %v1266_v55 = vshrl.u32 %v14172_v45, 16  ;;  %v11814_v57 = vcombine.low %v936_v4, %v14172_v45  ;;  %v472_v10 = vld [vmem:[%s13833_s15 + $0x70] sm:$0xf] }
  0x93   : > { %12859 = vmatmul.mubr.msk.bf16.gmra.mxu0 %vm1398_vm11, %v11781_v43  ;;  %v1272_v59 = vshll.u32 %v14174_v52, 16  ;;  %v697_v60 = vsel %vm13856_vm15, %v689_v14, %v696_v38  ;;  %v889_v61 = vsel %vm13800_vm7, %v698_v46, %v888_v39  ;;  %v705_v62 = vor.u32 %v703_v49, %v702_v47  ;;  %v14191_v11 = vld [vmem:[#allocation2 + $0x14] sm:$0x1] }
  0x94   : > { %v1964_v44 = vrot.slane %v14185_v0, 5  ;;  %v1260_v3 = vrot.slane %v1259_v53, 4  ;;  %v1264_v5 = vrot.slane %v1262_v54, 5  ;;  %v1268_v8 = vrot.slane %v1266_v55, 4  ;;  %12896 = vmatprep.mubr.msk.bf16.mxu1 %vm1398_vm11, %v11814_v57  ;;  %887 = vst.msk [vmem:[#allocation2 + $0xa0] sm:$0xf] %vm224_vm1, %v697_v60 }
  0x95   : > { %890 = vst [vmem:[#allocation2 + $0xa4] sm:$0x1] %v889_v61  ;;  %v1967_v12 = vrot.slane %v14191_v11, 5  ;;  %v708_v13 = vshrl.u32 %v471_v40, 16  ;;  %v711_v14 = vshll.u32 %v471_v40, 16  ;;  %v280_v15 = vsel %vm13800_vm7, 0, %v279_v32 }
  0x96   : > { %v891_v1 = vld [vmem:[#allocation2 + $0xa8] sm:$0xf]  ;;  %v1269_v16 = vor.u32 %v1268_v8, %v1264_v5  ;;  %v1274_v4 = vrot.slane %v1272_v59, 5  ;;  %281 = vst [vmem:[#allocation2 + $0xb4] sm:$0x1] %v280_v15  ;;  %v330_v21 = vsel %vm13815_vm8, 0, %v329_v63  ;;  %v1265_v23 = vsel %vm13850_vm14, %v1260_v3, %v1264_v5 }
  0x97   : > { %v892_v20 = vsel %vm13843_vm13, %v705_v62, %v891_v1  ;;  %v473_v22 = vld [vmem:[%s13833_s15 + $0x74] sm:$0xf]  ;;  %v938_v24 = vld [vmem:[#allocation2 + $0x9c] sm:$0xf]  ;;  %v706_v2 = vrot.slane %v702_v47, 4  ;;  %v710_v26 = vrot.slane %v708_v13, 7 }
  0x98   : > { %893 = vst [vmem:[#allocation2 + $0xa8] sm:$0xf] %v892_v20  ;;  %331 = vst [vmem:[#allocation2 + $0xbc] sm:$0x1] %v330_v21  ;;  %v717_v28 = vshrl.u32 %v472_v10, 16  ;;  %v1270_v30 = vrot.slane %v1269_v16, 4 }
  0x99   : > { %v1277_v31 = vshrl.u32 %v938_v24, 16  ;;  %v1280_v34 = vshll.u32 %v938_v24, 16  ;;  %v895_v35 = vld [vmem:[#allocation2 + $0xb0] sm:$0x1]  ;;  %v720_v36 = vshll.u32 %v472_v10, 16  ;;  %v713_v37 = vor.u32 %v711_v14, %v710_v26 }
  0x9a   : > { %v715_v38 = vrot.slane %v710_v26, 4  ;;  %v719_v39 = vrot.slane %v717_v28, 7  ;;  %v725_v40 = vshrl.u32 %v473_v22, 16  ;;  %v1275_v32 = vsel %vm13850_vm14, %v1270_v30, %v1274_v4  ;;  %v14220_v3 = vld [vmem:[%s18855_s1 + $0xa] sm:$0x3]  ;;  %v13524_v0 = vld [vmem:[#allocation2 + $0xc] sm:$0xff]  }
  0x9b   : > { %v1279_v43 = vrot.slane %v1277_v31, 4  ;;  %v1282_v46 = vrot.slane %v1280_v34, 5  ;;  %v728_v49 = vshll.u32 %v473_v22, 16  ;;  %v11782_v47 = vcombine.low %v1265_v23, %v1275_v32  ;;  %v14205_v53 = vld [vmem:[#allocation2 + $0xa0] sm:$0xf] }
  0x9c   : > { %v14207_v54 = vld [vmem:[#allocation2 + $0xa4] sm:$0x1]  ;;  %v714_v55 = vsel %vm13856_vm15, %v706_v2, %v713_v37  ;;  %v896_v57 = vsel %vm13800_vm7, %v715_v38, %v895_v35  ;;  %v722_v59 = vor.u32 %v720_v36, %v719_v39  ;;  %v1286_v61 = vshll.u32 %v14205_v53, 16  ;;  %v1904_v1 = vld [vmem:[#allocation2] sm:$0xe] }
  0x9d   : > { %v1283_v60 = vor.u32 %v1282_v46, %v1279_v43  ;;  %v1290_v62 = vshrl.u32 %v14205_v53, 16  ;;  %v1296_v63 = vshll.u32 %v14207_v54, 16  ;;  %894 = vst.msk [vmem:[#allocation2 + $0xac] sm:$0xf] %vm224_vm1, %v714_v55  ;;  %897 = vst [vmem:[#allocation2 + $0xb0] sm:$0x1] %v896_v57  ;;  %12862 = vmatprep.mubr.msk.bf16.mxu0 %vm1398_vm11, %v11782_v47  ;;  %v11815_v5 = vcombine.low %v938_v24, %v14205_v53 }
  0x9e   : > { %v723_v8 = vrot.slane %v719_v39, 4  ;;  %v727_v10 = vrot.slane %v725_v40, 7  ;;  %v898_v13 = vld [vmem:[#allocation2 + $0xb4] sm:$0xf]  ;;  %v2524_v14 = vsel %vm1447_vm0, %v14018_v51, 0  ;;  %v1288_v16 = vrot.slane %v1286_v61, 5 }
  0x9f   : > { %v1284_v15 = vrot.slane %v1283_v60, 4  ;;  %v1292_v4 = vrot.slane %v1290_v62, 4  ;;  %v1298_v20 = vrot.slane %v1296_v63, 5  ;;  %v940_v21 = vld [vmem:[#allocation2 + $0xa8] sm:$0xf]  ;;  %12939 = vmatpush3.bf16.msra.mxu1 %v2524_v14  ;;  %v899_v30 = vsel %vm13843_vm13, %v722_v59, %v898_v13 }
  0xa0   : > { %12897 = vmatmul.mubr.msk.bf16.gmra.mxu1 %vm1398_vm11, %v11815_v5  ;;  %v1301_v22 = vshrl.u32 %v940_v21, 16  ;;  %v1304_v23 = vshll.u32 %v940_v21, 16  ;;  %v730_v2 = vor.u32 %v728_v49, %v727_v10  ;;  %v732_v26 = vrot.slane %v727_v10, 4  ;;  %v902_v24 = vld [vmem:[#allocation2 + $0xbc] sm:$0x1]  ;;  %13453 = vmatprep.subr.msk.bf16.mxu1 %vm1447_vm0, %v14220_v3 }
  0xa1   : > { %v1289_v51 = vsel %vm13850_vm14, %v1284_v15, %v1288_v16  ;;  %v1293_v28 = vor.u32 %v1292_v4, %v1288_v16  ;;  %vm1952_vm2 = vcmask 1042432   ;;  %v1905_v31 = vld [vmem:[#allocation2 + $0xc] sm:$0xe]  ;;  %900 = vst [vmem:[#allocation2 + $0xb4] sm:$0xf] %v899_v30  ;;  %vm1953_vm9 = vcmask 1046532  }
  0xa2   : > { %v1303_v34 = vrot.slane %v1301_v22, 4  ;;  %v1306_v35 = vrot.slane %v1304_v23, 5  ;;  %v731_v36 = vsel %vm13856_vm15, %v723_v8, %v730_v2  ;;  %v903_v37 = vsel %vm13800_vm7, %v732_v26, %v902_v24  ;;  %v13606_v40 = vld [vmem:[#allocation2 + $0x4] sm:$0xf]  ;;  %vm14250_vm10 = vmor %vm1952_vm2, %vm1953_vm9  ;;  %v13607_v63 = vld [vmem:[#allocation2 + $0x8] sm:$0x1] }
  0xa3   : > { %v1294_v38 = vrot.slane %v1293_v28, 4  ;;  %901 = vst.msk [vmem:[#allocation2 + $0xb8] sm:$0xf] %vm224_vm1, %v731_v36  ;;  %904 = vst [vmem:[#allocation2 + $0xbc] sm:$0x1] %v903_v37  ;;  %v11834_v39 = vrot.slane %v1904_v1, 9 }
  0xa4   : > { %v1957_v32 = vrot.slane %v13606_v40, 5  ;;  %v14238_v43 = vld [vmem:[#allocation2 + $0xac] sm:$0xf]  ;;  %v14240_v46 = vld [vmem:[#allocation2 + $0xb0] sm:$0x1]  ;;  %v1307_v49 = vor.u32 %v1306_v35, %v1303_v34  ;;  %v11835_v47 = vrot.slane %v1905_v31, 9 }
  0xa5   : > { %v1966_v55 = vrot.slane %v1964_v44, 4  ;;  %v1299_v57 = vsel %vm13850_vm14, %v1294_v38, %v1298_v20  ;;  %v1310_v59 = vshll.u32 %v14238_v43, 16  ;;  %v1314_v60 = vshrl.u32 %v14238_v43, 16  ;;  %v1906_v14 = vld [vmem:[#allocation2 + $0x18] sm:$0xe] }
  0xa6   : > { %v1320_v61 = vshll.u32 %v14240_v46, 16  ;;  %v18901_v62 = vmov 0  ;;  %v1960_v5 = vrot.slane %v13607_v63, 5  ;;  %v11783_v8 = vcombine.low %v1289_v51, %v1299_v57  ;;  %v13608_v40 = vld [vmem:[#allocation2 + $0x1c] sm:$0xf] }
  0xa7   : > { %v18902_v62 = vsel %vm14250_vm10, 4294967295, %v18901_v62  ;;  %v1308_v10 = vrot.slane %v1307_v49, 4  ;;  %v11816_v13 = vcombine.low %v940_v21, %v14238_v43  ;;  %v1312_v1 = vrot.slane %v1310_v59, 5  ;;  %v1907_v49 = vld [vmem:[#allocation2 + $0x24] sm:$0xe] }
  0xa8   : > { %18903 = vst [vmem:[#allocation9_spill] sm:$0xff] %v18902_v62  ;;  %v1316_v15 = vrot.slane %v1314_v60, 4  ;;  %v1959_v16 = vrot.slane %v1957_v32, 4  ;;  %12863 = vmatmul.mubr.msk.bf16.gmra.mxu0 %vm1398_vm11, %v11783_v8  ;;  %v1322_v4 = vrot.slane %v1320_v61, 5  ;;  %v14259_v20 = vsel %vm14250_vm10, %v11834_v39, %v1957_v32  ;;  %v942_v2 = vld [vmem:[#allocation2 + $0xb4] sm:$0xf] }
  0xa9   : > { %12900 = vmatprep.mubr.msk.bf16.mxu1 %vm1398_vm11, %v11816_v13  ;;  %v14265_v22 = vsel %vm14250_vm10, %v11835_v47, %v1964_v44  ;;  %v14271_v21 = vsel %vm14250_vm10, %v1966_v55, %v1967_v12  ;;  %v14277_v24 = vsel %vm1447_vm0, %v14030_v58, 0  ;;  %v11836_v51 = vrot.slane %v1906_v14, 9  ;;  %v1908_v60 = vld [vmem:[#allocation2 + $0x30] sm:$0xe]  ;;  %v13609_v13 = vld [vmem:[#allocation2 + $0x20] sm:$0x1] }
  0xaa   : > { %v1317_v23 = vor.u32 %v1316_v15, %v1312_v1  ;;  %v11852_v26 = vcombine.low %v14265_v22, %v14271_v21  ;;  %v1313_v44 = vsel %vm13850_vm14, %v1308_v10, %v1312_v1  ;;  %v14281_v28 = vld [vmem:[#allocation2 + $0xb8] sm:$0xf]  ;;  %v14283_v11 = vld [vmem:[#allocation2 + $0xbc] sm:$0x1]  ;;  %v1325_v12 = vshrl.u32 %v942_v2, 16 }
  0xab   : > { %v1328_v30 = vshll.u32 %v942_v2, 16  ;;  %v14287_v31 = vsel %vm14250_vm10, %v1959_v16, %v1960_v5  ;;  %v1334_v35 = vshll.u32 %v14281_v28, 16  ;;  %v1338_v58 = vshrl.u32 %v14281_v28, 16  ;;  %v13610_v15 = vld [vmem:[#allocation2 + $0x28] sm:$0xf] }
  0xac   : > { %v1318_v34 = vrot.slane %v1317_v23, 4  ;;  %v1344_v36 = vshll.u32 %v14283_v11, 16  ;;  %v1327_v37 = vrot.slane %v1325_v12, 4  ;;  %v11817_v39 = vcombine.low %v942_v2, %v14281_v28  ;;  %v13611_v23 = vld [vmem:[#allocation2 + $0x2c] sm:$0x1] }
  0xad   : > { %v1330_v38 = vrot.slane %v1328_v30, 5  ;;  %v1971_v32 = vrot.slane %v13608_v40, 5  ;;  %v1336_v55 = vrot.slane %v1334_v35, 5  ;;  %v1340_v57 = vrot.slane %v1338_v58, 4  ;;  %v13612_v12 = vld [vmem:[#allocation2 + $0x34] sm:$0xf] }
  0xae   : > { %v1323_v47 = vsel %vm13850_vm14, %v1318_v34, %v1322_v4  ;;  %v1346_v59 = vrot.slane %v1344_v36, 5  ;;  %12901 = vmatmul.mubr.msk.bf16.gmra.mxu1 %vm1398_vm11, %v11817_v39  ;;  %v1974_v14 = vrot.slane %v13609_v13, 5  ;;  %v11837_v1 = vrot.slane %v1907_v49, 9  ;;  %v1909_v34 = vld [vmem:[#allocation2 + $0x3c] sm:$0xe]  ;;  %v13526_v49 = vld [vmem:[#allocation2 + $0x24] sm:$0xff]  }
  0xaf   : > { %v11784_v61 = vcombine.low %v1313_v44, %v1323_v47  ;;  %v1331_v63 = vor.u32 %v1330_v38, %v1327_v37  ;;  %v14298_v5 = vsel %vm14250_vm10, %v11836_v51, %v1971_v32  ;;  %v1973_v8 = vrot.slane %v1971_v32, 4  ;;  %12940 = vmatprep.mubr.msk.bf16.mxu1 %vm1398_vm11, %v13524_v0  ;;  %v13525_v37 = vld [vmem:[#allocation2 + $0x18] sm:$0xff]   ;;  %v1910_v32 = vld [vmem:[#allocation2 + $0x48] sm:$0xe]  ;;  %v13615_v13 = vld [vmem:[#allocation2 + $0x44] sm:$0x1] }
  0xb0   : > { %v1341_v10 = vor.u32 %v1340_v57, %v1336_v55  ;;  %v1978_v16 = vrot.slane %v13610_v15, 5  ;;  %v1981_v2 = vrot.slane %v13611_v23, 5  ;;  %v11838_v44 = vrot.slane %v1908_v60, 9  ;;  %v13613_v47 = vld [vmem:[#allocation2 + $0x38] sm:$0x1] }
  0xb1   : > { %12866 = vmatprep.mubr.msk.bf16.mxu0 %vm1398_vm11, %v11784_v61  ;;  %v1332_v4 = vrot.slane %v1331_v63, 4  ;;  %v1985_v30 = vrot.slane %v13612_v12, 5  ;;  %v11851_v35 = vcombine.low %v14259_v20, %v14287_v31  ;;  %v14306_v0 = vsel %vm14250_vm10, %v1973_v8, %v1974_v14  ;;  %v1911_v60 = vld [vmem:[#allocation2 + $0x54] sm:$0xe]  ;;  %v13614_v8 = vld [vmem:[#allocation2 + $0x40] sm:$0xf] }
  0xb2   : > { %v1342_v51 = vrot.slane %v1341_v10, 4  ;;  %v1980_v58 = vrot.slane %v1978_v16, 4  ;;  %v11853_v38 = vcombine.low %v14298_v5, %v14306_v0  ;;  %v14314_v39 = vsel %vm14250_vm10, %v11837_v1, %v1978_v16  ;;  %v13616_v15 = vld [vmem:[#allocation2 + $0x4c] sm:$0xf] }
  0xb3   : > { %v1337_v36 = vsel %vm13850_vm14, %v1332_v4, %v1336_v55  ;;  %v1987_v40 = vrot.slane %v1985_v30, 4  ;;  %v1988_v55 = vrot.slane %v13613_v47, 5  ;;  %v11839_v57 = vrot.slane %v1909_v34, 9  ;;  %v13617_v4 = vld [vmem:[#allocation2 + $0x50] sm:$0x1] }
  0xb4   : > { %v1347_v20 = vsel %vm13850_vm14, %v1342_v51, %v1346_v59  ;;  %v14320_v31 = vsel %vm14250_vm10, %v1980_v58, %v1981_v2  ;;  %v14324_v63 = vsel %vm14250_vm10, %v11838_v44, %v1985_v30  ;;  %v1992_v10 = vrot.slane %v13614_v8, 5  ;;  %v1912_v2 = vld [vmem:[#allocation2 + $0x60] sm:$0xe]  ;;  %v1914_v47 = vld [vmem:[#allocation2 + $0x78] sm:$0xe] }
  0xb5   : > { %v11785_v61 = vcombine.low %v1337_v36, %v1347_v20  ;;  %v1995_v14 = vrot.slane %v13615_v13, 5  ;;  %v14328_v59 = vsel %vm14250_vm10, %v1987_v40, %v1988_v55  ;;  %v11840_v1 = vrot.slane %v1910_v32, 9  ;;  %v1913_v40 = vld [vmem:[#allocation2 + $0x6c] sm:$0xe]  ;;  %v1915_v13 = vld [vmem:[#allocation2 + $0x84] sm:$0xe] }
  0xb6   : > { %v1999_v16 = vrot.slane %v13616_v15, 5  ;;  %v2002_v23 = vrot.slane %v13617_v4, 5  ;;  %12941 = vmatmul.mubr.msk.bf16.vlgmr.msra.gmra.mxu1 %vm1398_vm11, %v13525_v37  ;;  %v11854_v44 = vcombine.low %v14314_v39, %v14320_v31  ;;  %v14336_v12 = vsel %vm14250_vm10, %v11839_v57, %v1992_v10 }
  0xb7   : > { %12867 = vmatmul.mubr.msk.bf16.gmra.mxu0 %vm1398_vm11, %v11785_v61  ;;  %v1994_v30 = vrot.slane %v1992_v10, 4  ;;  %v11841_v34 = vrot.slane %v1911_v60, 9  ;;  %12944 = vmatprep.mubr.msk.bf16.mxu1 %vm1398_vm11, %v13526_v49  ;;  %v2006_v36 = vrot.slane %v13993_v17, 5  ;;  %v2009_v37 = vrot.slane %v14002_v27, 5  ;;  %v13527_v60 = vld [vmem:[#allocation2 + $0x30] sm:$0xff]  }
  0xb8   : > { %12906 = vmatprep.mubr.msk.bf16.mxu0 %vm1398_vm11, %v11851_v35  ;;  %v14342_v51 = vsel %vm14250_vm10, %v11840_v1, %v1999_v16  ;;  %v2001_v58 = vrot.slane %v1999_v16, 4  ;;  %v11855_v32 = vcombine.low %v14324_v63, %v14328_v59  ;;  %v11842_v35 = vrot.slane %v1912_v2, 9 }
  0xb9   : > { %v14350_v20 = vsel %vm14250_vm10, %v1994_v30, %v1995_v14  ;;  %v2013_v49 = vrot.slane %v14046_v25, 5  ;;  %v14359_v17 = vsel %vm14250_vm10, %v11841_v34, %v2006_v36  ;;  %v2008_v27 = vrot.slane %v2006_v36, 4  ;;  %v1916_v34 = vld [vmem:[#allocation2 + $0x90] sm:$0xe] }
  0xba   : > { %v14355_v55 = vsel %vm14250_vm10, %v2001_v58, %v2002_v23  ;;  %v2016_v57 = vrot.slane %v14051_v33, 5  ;;  %v11856_v61 = vcombine.low %v14336_v12, %v14350_v20  ;;  %v11843_v10 = vrot.slane %v1913_v40, 9  ;;  %v13528_v33 = vld [vmem:[#allocation2 + $0x3c] sm:$0xff]  }
  0xbb   : > { %v11857_v8 = vcombine.low %v14342_v51, %v14355_v55  ;;  %v2015_v25 = vrot.slane %v2013_v49, 4  ;;  %v14368_v14 = vsel %vm14250_vm10, %v2008_v27, %v2009_v37  ;;  %v2020_v1 = vrot.slane %v14087_v19, 5  ;;  %v14391_v37 = vld [vmem:[%s18855_s1 + $0xc] sm:$0x3]  ;;  %v3446_v55 = vld [vmem:[#allocation2 + $0x18] sm:$0xe] }
  0xbc   : > { %v2023_v15 = vrot.slane %v14095_v29, 5  ;;  %v11844_v16 = vrot.slane %v1914_v47, 9  ;;  %v11858_v4 = vcombine.low %v14359_v17, %v14368_v14  ;;  %v14376_v23 = vsel %vm14250_vm10, %v11842_v35, %v2013_v49  ;;  %v1917_v49 = vld [vmem:[#allocation2 + $0x9c] sm:$0xe] }
  0xbd   : > { %v2027_v2 = vrot.slane %v14116_v9, 5  ;;  %v2030_v30 = vrot.slane %v14123_v18, 5  ;;  %v14382_v58 = vsel %vm14250_vm10, %v2015_v25, %v2016_v57  ;;  %v14386_v19 = vsel %vm14250_vm10, %v11843_v10, %v2020_v1  ;;  %v1919_v57 = vld [vmem:[#allocation2 + $0xb4] sm:$0xe] }
  0xbe   : > { %v2022_v29 = vrot.slane %v2020_v1, 4  ;;  %v11845_v36 = vrot.slane %v1915_v13, 9  ;;  %12945 = vmatmul.mubr.msk.bf16.gmra.mxu1 %vm1398_vm11, %v13527_v60  ;;  %v2034_v40 = vrot.slane %v14137_v42, 5  ;;  %v2037_v35 = vrot.slane %v14142_v50, 5  ;;  %v1918_v42 = vld [vmem:[#allocation2 + $0xa8] sm:$0xe] }
  0xbf   : > { %12907 = vmatmul.mubr.msk.bf16.vlgmr.msra.gmra.mxu0 %vm1398_vm11, %v11852_v26  ;;  %v14400_v9 = vsel %vm14250_vm10, %v11844_v16, %v2027_v2  ;;  %v2029_v18 = vrot.slane %v2027_v2, 4  ;;  %v11846_v21 = vrot.slane %v1916_v34, 9  ;;  %v2041_v26 = vrot.slane %v14172_v45, 5  ;;  %12948 = vmatprep.mubr.msk.bf16.mxu1 %vm1398_vm11, %v13528_v33  ;;  %v13529_v60 = vld [vmem:[#allocation2 + $0x48] sm:$0xff]   ;;  %v13530_v25 = vld [vmem:[#allocation2 + $0x54] sm:$0xff]  }
  0xc0   : > { %12973 = vmatpush3.bf16.msra.mxu0 %v14277_v24  ;;  %12910 = vmatprep.mubr.msk.bf16.mxu0 %vm1398_vm11, %v11853_v38  ;;  %v14411_v22 = vsel %vm14250_vm10, %v2022_v29, %v2023_v15  ;;  %v2044_v47 = vrot.slane %v14174_v52, 5  ;;  %v14424_v5 = vsel %vm14250_vm10, %v11845_v36, %v2034_v40  ;;  %v2036_v0 = vrot.slane %v2034_v40, 4  ;;  %v282_v34 = vld [vmem:[#allocation2 + $0xc0] sm:$0x1]  ;;  %v474_v29 = vld [vmem:[%s13833_s15 + $0x78] sm:$0xf] }
  0xc1   : > { %v11860_v50 = vcombine.low %v14386_v19, %v14411_v22  ;;  %v14420_v24 = vsel %vm14250_vm10, %v2029_v18, %v2030_v30  ;;  %13454 = vmatprep.subr.msk.bf16.mxu0 %vm1447_vm0, %v14391_v37  ;;  %v14432_v52 = vsel %vm14250_vm10, %v11846_v21, %v2041_v26  ;;  %v2043_v38 = vrot.slane %v2041_v26, 4 }
  0xc2   : > { %v11861_v45 = vcombine.low %v14400_v9, %v14420_v24  ;;  %v11847_v27 = vrot.slane %v1917_v49, 9  ;;  %v14436_v10 = vsel %vm14250_vm10, %v2036_v0, %v2037_v35  ;;  %v2048_v13 = vrot.slane %v14205_v53, 5  ;;  %v475_v49 = vld [vmem:[%s13833_s15 + $0x7c] sm:$0xf]  ;;  %v14488_v0 = vld [vmem:[#allocation2 + $0x10] sm:$0xf] }
  0xc3   : > { %v2051_v1 = vrot.slane %v14207_v54, 5  ;;  %v11848_v15 = vrot.slane %v1918_v42, 9  ;;  %v11862_v16 = vcombine.low %v14424_v5, %v14436_v10  ;;  %v14444_v33 = vsel %vm14250_vm10, %v2043_v38, %v2044_v47  ;;  %v14627_v24 = vld [vmem:[#allocation2 + $0x44] sm:$0x1]  ;;  %s12529_s15 = sshll.u32 %s13750_s22, 10  ;;  %s18814_s22 = scalar_lea.sflag [#allocation5], %s215_s10 }
  0xc4   : > { %v2055_v2 = vrot.slane %v14238_v43, 5  ;;  %v2058_v30 = vrot.slane %v14240_v46, 5  ;;  %v11863_v53 = vcombine.low %v14432_v52, %v14444_v33  ;;  %v14453_v54 = vsel %vm14250_vm10, %v11847_v27, %v2048_v13  ;;  %v14492_v27 = vld [vmem:[#allocation2 + $0x14] sm:$0x1]  ;;  %s18805_s25 = scalar_lea.hbm %s18859_s5, %s12529_s15 }
  0xc5   : > { %v2050_v36 = vrot.slane %v2048_v13, 4  ;;  %v11849_v18 = vrot.slane %v1919_v57, 9  ;;  %v2062_v43 = vrot.slane %v14281_v28, 5  ;;  %v2065_v46 = vrot.slane %v14283_v11, 5  ;;  %v2719_v28 = vld [vmem:[#allocation2 + $0xc] sm:$0xf] }
  0xc6   : > { %v14457_v40 = vsel %vm14250_vm10, %v11848_v15, %v2055_v2  ;;  %v2057_v35 = vrot.slane %v2055_v2, 4  ;;  %12949 = vmatmul.mubr.msk.bf16.gmra.mxu1 %vm1398_vm11, %v13529_v60  ;;  %v283_v26 = vsel %vm13800_vm7, 0, %v282_v34  ;;  %v734_v47 = vshrl.u32 %v474_v29, 16  ;;  %v13531_v15 = vld [vmem:[#allocation2 + $0x60] sm:$0xff]   ;;  %v13532_v2 = vld [vmem:[#allocation2 + $0x6c] sm:$0xff]  }
  0xc7   : > { %12911 = vmatmul.mubr.msk.bf16.gmra.mxu0 %vm1398_vm11, %v11854_v44  ;;  %v14469_v21 = vsel %vm14250_vm10, %v2050_v36, %v2051_v1  ;;  %v737_v42 = vshll.u32 %v474_v29, 16  ;;  %12952 = vmatprep.mubr.msk.bf16.mxu1 %vm1398_vm11, %v13530_v25  ;;  %v14486_v31 = vsel %vm14250_vm10, %v11849_v18, %v2062_v43  ;;  %v2064_v44 = vrot.slane %v2062_v43, 4  ;;  %284 = vst [vmem:[#allocation2 + $0xc0] sm:$0x1] %v283_v26  ;;  %v2722_v1 = vld [vmem:[#allocation2 + $0x18] sm:$0xf] }
  0xc8   : > { %12914 = vmatprep.mubr.msk.bf16.mxu0 %vm1398_vm11, %v11855_v32  ;;  %v11864_v11 = vcombine.low %v14453_v54, %v14469_v21  ;;  %v14482_v39 = vsel %vm14250_vm10, %v2057_v35, %v2058_v30  ;;  %v736_v59 = vrot.slane %v734_v47, 7  ;;  %v742_v32 = vshrl.u32 %v475_v49, 16 }
  0xc9   : > { %v745_v38 = vshll.u32 %v475_v49, 16  ;;  %v14496_v57 = vsel %vm14250_vm10, %v2064_v44, %v2065_v46  ;;  %v3720_v60 = vsel %vm1447_vm0, %v14220_v3, 0  ;;  %v2768_v25 = vshrl.u32 %v2719_v28, 16  ;;  %v2723_v3 = vld [vmem:[#allocation2 + $0x1c] sm:$0xf] }
  0xca   : > { %v2771_v13 = vshll.u32 %v2719_v28, 16  ;;  %v739_v34 = vor.u32 %v737_v42, %v736_v59  ;;  %v740_v29 = vrot.slane %v736_v59, 4  ;;  %v14502_v36 = vrot.slane %v742_v32, 7  ;;  %13007 = vmatpush3.bf16.msra.mxu1 %v3720_v60  ;;  %v14510_v28 = vld [vmem:[#allocation2 + $0x20] sm:$0x1] }
  0xcb   : > { %v2770_v18 = vrot.slane %v2768_v25, 4  ;;  %v2777_v43 = vshll.u32 %v14488_v0, 16  ;;  %v2781_v46 = vshrl.u32 %v14488_v0, 16  ;;  %v11859_v49 = vcombine.low %v14376_v23, %v14382_v58  ;;  %v3445_v44 = vld [vmem:[#allocation2 + $0xc] sm:$0xe] }
  0xcc   : > { %v2773_v35 = vrot.slane %v2771_v13, 5  ;;  %v747_v26 = vor.u32 %v745_v38, %v14502_v36  ;;  %v2787_v47 = vshll.u32 %v14492_v27, 16  ;;  %v2792_v42 = vshrl.u32 %v2722_v1, 16  ;;  %v12031_v13 = vld [vmem:[%s18855_s1 + $0xe] sm:$0x3] }
  0xcd   : > { %v2779_v32 = vrot.slane %v2777_v43, 5  ;;  %v2783_v60 = vrot.slane %v2781_v46, 4  ;;  %v2795_v25 = vshll.u32 %v2722_v1, 16  ;;  %v2805_v43 = vshrl.u32 %v2723_v3, 16  ;;  %13455 = vmatprep.subr.msk.bf16.mxu1 %vm1447_vm0, %v12031_v13 }
  0xce   : > { %v2774_v59 = vor.u32 %v2773_v35, %v2770_v18  ;;  %12953 = vmatmul.mubr.msk.bf16.gmra.mxu1 %vm1398_vm11, %v13531_v15  ;;  %v748_v38 = vsel %vm13856_vm15, %v740_v29, %v747_v26  ;;  %v905_v30 = vld [vmem:[#allocation2 + $0xc0] sm:$0xf]  ;;  %v2789_v63 = vrot.slane %v2787_v47, 5  ;;  %v2794_v18 = vrot.slane %v2792_v42, 4 }
  0xcf   : > { %12915 = vmatmul.mubr.msk.bf16.gmra.mxu0 %vm1398_vm11, %v11856_v61  ;;  %v2801_v35 = vshll.u32 %v2723_v3, 16  ;;  %12956 = vmatprep.mubr.msk.bf16.mxu1 %vm1398_vm11, %v13532_v2  ;;  %v906_v12 = vsel %vm13843_vm13, %v739_v34, %v905_v30  ;;  %908 = vst.msk [vmem:[#allocation2 + $0xc4] sm:$0xf] %vm224_vm1, %v748_v38  ;;  %v2784_v61 = vor.u32 %v2783_v60, %v2779_v32  ;;  %v2797_v1 = vrot.slane %v2795_v25, 5  ;;  %v13533_v34 = vld [vmem:[#allocation2 + $0x78] sm:$0xff]   ;;  %vm15651_vm1 = vmand %vm338_vm6, %vm235_vm3 }
  0xd0   : > { %12918 = vmatprep.mubr.msk.bf16.mxu0 %vm1398_vm11, %v11857_v8  ;;  %v2775_v20 = vrot.slane %v2774_v59, 4  ;;  %907 = vst [vmem:[#allocation2 + $0xc0] sm:$0xf] %v906_v12  ;;  %v2811_v51 = vshll.u32 %v14510_v28, 16  ;;  %v11949_v30 = vrot.slane %v3445_v44, 9  ;;  %v2807_v46 = vrot.slane %v2805_v43, 4  ;;  %vm15666_vm3 = vmand %vm338_vm6, %vm285_vm4 }
  0xd1   : > { %v14531_v29 = vrot.slane %v2801_v35, 5  ;;  %v2785_v8 = vrot.slane %v2784_v61, 4  ;;  %v2798_v2 = vor.u32 %v2797_v1, %v2794_v18  ;;  %v14539_v26 = vsel %vm1447_vm0, %v14391_v37, 0  ;;  %v13534_v59 = vld [vmem:[#allocation2 + $0x84] sm:$0xff]   ;;  %v2728_v61 = vld [vmem:[#allocation2 + $0x30] sm:$0xf] }
  0xd2   : > { %v2780_v41 = vsel %vm13850_vm14, %v2775_v20, %v2779_v32  ;;  %v3511_v47 = vrot.slane %v14488_v0, 5  ;;  %v3514_v42 = vrot.slane %v14492_v27, 5  ;;  %v11950_v32 = vrot.slane %v3446_v55, 9  ;;  %v2725_v38 = vld [vmem:[#allocation2 + $0x24] sm:$0xf] }
  0xd3   : > { %v2790_v60 = vsel %vm13850_vm14, %v2785_v8, %v2789_v63  ;;  %v14545_v25 = vrot.slane %v2798_v2, 4  ;;  %v3518_v13 = vrot.slane %v2723_v3, 5  ;;  %v2808_v18 = vor.u32 %v2807_v46, %v14531_v29  ;;  %v14552_v12 = vld [vmem:[#allocation2 + $0x28] sm:$0xf]  ;;  %v14563_v20 = vld [vmem:[#allocation2 + $0x2c] sm:$0x1] }
  0xd4   : > { %v14547_v44 = vcombine.low %v2780_v41, %v2790_v60  ;;  %v14550_v35 = vrot.slane %v2811_v51, 5  ;;  %v3513_v37 = vrot.slane %v3511_v47, 4  ;;  %v14556_v0 = vsel %vm14250_vm10, %v11949_v30, %v3511_v47  ;;  %v14589_v41 = vld [vmem:[#allocation2 + $0x34] sm:$0xf]  ;;  %v3447_v47 = vld [vmem:[#allocation2 + $0x24] sm:$0xe] }
  0xd5   : > { %v14560_v63 = vsel %vm14250_vm10, %v11950_v32, %v3518_v13  ;;  %v3520_v27 = vrot.slane %v3518_v13, 4  ;;  %v3521_v3 = vrot.slane %v14510_v28, 5  ;;  %v2809_v1 = vrot.slane %v2808_v18, 4  ;;  %v3448_v13 = vld [vmem:[#allocation2 + $0x30] sm:$0xe] }
  0xd6   : > { %12957 = vmatmul.mubr.msk.bf16.gmra.mxu1 %vm1398_vm11, %v13533_v34  ;;  %v14572_v43 = vsel %vm14250_vm10, %v3513_v37, %v3514_v42  ;;  %v2816_v51 = vshrl.u32 %v2725_v38, 16  ;;  %v2819_v55 = vshll.u32 %v2725_v38, 16  ;;  %v2804_v17 = vsel %vm13850_vm14, %v14545_v25, %v14531_v29  ;;  %v14596_v29 = vld [vmem:[#allocation2 + $0x38] sm:$0x1]  ;;  %v13535_v42 = vld [vmem:[#allocation2 + $0x90] sm:$0xff]   ;;  %v13536_v38 = vld [vmem:[#allocation2 + $0x9c] sm:$0xff]  }
  0xd7   : > { %12919 = vmatmul.mubr.msk.bf16.gmra.mxu0 %vm1398_vm11, %v11858_v4  ;;  %12960 = vmatprep.mubr.msk.bf16.mxu1 %vm1398_vm11, %v13534_v59  ;;  %v14585_v14 = vsel %vm14250_vm10, %v3520_v27, %v3521_v3  ;;  %v2825_v4 = vshll.u32 %v14552_v12, 16  ;;  %v2829_v28 = vshrl.u32 %v14552_v12, 16  ;;  %v2814_v23 = vsel %vm13850_vm14, %v2809_v1, %v14550_v35  ;;  %v13539_v52 = vld [vmem:[#allocation2 + $0xc0] sm:$0xff]  }
  0xd8   : > { %12922 = vmatprep.mubr.msk.bf16.mxu0 %vm1398_vm11, %v11859_v49  ;;  %v11966_v58 = vcombine.low %v14556_v0, %v14572_v43  ;;  %v2818_v49 = vrot.slane %v2816_v51, 4  ;;  %v2821_v8 = vrot.slane %v2819_v55, 5  ;;  %v11967_v2 = vcombine.low %v14560_v63, %v14585_v14 }
  0xd9   : > { %v2827_v30 = vrot.slane %v2825_v4, 5  ;;  %v2831_v34 = vrot.slane %v2829_v28, 4  ;;  %v2835_v46 = vshll.u32 %v14563_v20, 16  ;;  %v2840_v60 = vshrl.u32 %v2728_v61, 16 }
  0xda   : > { %v2822_v59 = vor.u32 %v2821_v8, %v2818_v49  ;;  %v2843_v25 = vshll.u32 %v2728_v61, 16  ;;  %v2849_v32 = vshll.u32 %v14589_v41, 16  ;;  %v2853_v37 = vshrl.u32 %v14589_v41, 16 }
  0xdb   : > { %v2832_v18 = vor.u32 %v2831_v34, %v2827_v30  ;;  %v2837_v35 = vrot.slane %v2835_v46, 5  ;;  %v2859_v27 = vshll.u32 %v14596_v29, 16  ;;  %v2842_v1 = vrot.slane %v2840_v60, 4  ;;  %v13537_v60 = vld [vmem:[#allocation2 + $0xa8] sm:$0xff]  }
  0xdc   : > { %v2823_v3 = vrot.slane %v2822_v59, 4  ;;  %v2845_v51 = vrot.slane %v2843_v25, 5  ;;  %v2851_v55 = vrot.slane %v2849_v32, 5  ;;  %v2855_v28 = vrot.slane %v2853_v37, 4 }
  0xdd   : > { %v2833_v4 = vrot.slane %v2832_v18, 4  ;;  %v2861_v15 = vrot.slane %v2859_v27, 5  ;;  %v11951_v49 = vrot.slane %v3447_v47, 9  ;;  %v3525_v34 = vrot.slane %v14552_v12, 5 }
  0xde   : > { %12961 = vmatmul.mubr.msk.bf16.gmra.mxu1 %vm1398_vm11, %v13535_v42  ;;  %v2828_v61 = vsel %vm13850_vm14, %v2823_v3, %v2827_v30  ;;  %v2846_v8 = vor.u32 %v2845_v51, %v2842_v1  ;;  %v3528_v46 = vrot.slane %v14563_v20, 5  ;;  %v2856_v22 = vor.u32 %v2855_v28, %v2851_v55  ;;  %v2731_v30 = vld [vmem:[#allocation2 + $0x3c] sm:$0xf]  ;;  %v2732_v42 = vld [vmem:[#allocation2 + $0x40] sm:$0xf] }
  0xdf   : > { %12923 = vmatmul.mubr.msk.bf16.gmra.mxu0 %vm1398_vm11, %v11860_v50  ;;  %12964 = vmatprep.mubr.msk.bf16.mxu1 %vm1398_vm11, %v13536_v38  ;;  %v2838_v19 = vsel %vm13850_vm14, %v2833_v4, %v2837_v35  ;;  %v11952_v50 = vrot.slane %v3448_v13, 9  ;;  %v3532_v47 = vrot.slane %v14589_v41, 5  ;;  %v14621_v59 = vcombine.low %v2804_v17, %v2814_v23  ;;  %v13538_v35 = vld [vmem:[#allocation2 + $0xb4] sm:$0xff]   ;;  %v14646_v1 = vld [vmem:[#allocation2 + $0x4c] sm:$0xf] }
  0xe0   : > { %12926 = vmatprep.mubr.msk.bf16.mxu0 %vm1398_vm11, %v11861_v45  ;;  %v2847_v12 = vrot.slane %v2846_v8, 4  ;;  %v14625_v20 = vsel %vm14250_vm10, %v11951_v49, %v3525_v34  ;;  %v3527_v9 = vrot.slane %v3525_v34, 4  ;;  %v2734_v45 = vld [vmem:[#allocation2 + $0x48] sm:$0xf]  ;;  %v14629_v25 = vcombine.low %v2828_v61, %v2838_v19  ;;  %v14654_v49 = vld [vmem:[#allocation2 + $0x50] sm:$0x1] }
  0xe1   : > { %v2857_v32 = vrot.slane %v2856_v22, 4  ;;  %v3534_v13 = vrot.slane %v3532_v47, 4  ;;  %v3535_v41 = vrot.slane %v14596_v29, 5  ;;  %v2864_v38 = vshrl.u32 %v2731_v30, 16 }
  0xe2   : > { %v2852_v17 = vsel %vm13850_vm14, %v2847_v12, %v2851_v55  ;;  %v14636_v23 = vsel %vm14250_vm10, %v3527_v9, %v3528_v46  ;;  %v2867_v18 = vshll.u32 %v2731_v30, 16  ;;  %v14644_v3 = vsel %vm14250_vm10, %v11952_v50, %v3532_v47  ;;  %v3449_v47 = vld [vmem:[#allocation2 + $0x3c] sm:$0xe]  ;;  %v3450_v12 = vld [vmem:[#allocation2 + $0x48] sm:$0xe] }
  0xe3   : > { %v2862_v37 = vsel %vm13850_vm14, %v2857_v32, %v2861_v15  ;;  %v11968_v27 = vcombine.low %v14625_v20, %v14636_v23  ;;  %v2873_v29 = vshll.u32 %v2732_v42, 16  ;;  %v14652_v55 = vsel %vm14250_vm10, %v3534_v13, %v3535_v41  ;;  %v2737_v13 = vld [vmem:[#allocation2 + $0x54] sm:$0xf] }
  0xe4   : > { %v14648_v51 = vcombine.low %v2852_v17, %v2862_v37  ;;  %v2866_v4 = vrot.slane %v2864_v38, 4  ;;  %v2869_v28 = vrot.slane %v2867_v18, 5  ;;  %v2877_v61 = vshrl.u32 %v2732_v42, 16  ;;  %v14756_v23 = vld [vmem:[#allocation2 + $0x74] sm:$0x1] }
  0xe5   : > { %v2875_v15 = vrot.slane %v2873_v29, 5  ;;  %v2883_v8 = vshll.u32 %v14627_v24, 16  ;;  %v2888_v34 = vshrl.u32 %v2734_v45, 16  ;;  %v2891_v19 = vshll.u32 %v2734_v45, 16 }
  0xe6   : > { %12965 = vmatmul.mubr.msk.bf16.gmra.mxu1 %vm1398_vm11, %v13537_v60  ;;  %v2870_v46 = vor.u32 %v2869_v28, %v2866_v4  ;;  %v2897_v22 = vshll.u32 %v14646_v1, 16  ;;  %v2901_v50 = vshrl.u32 %v14646_v1, 16  ;;  %v2879_v30 = vrot.slane %v2877_v61, 4 }
  0xe7   : > { %12927 = vmatmul.mubr.msk.bf16.gmra.mxu0 %vm1398_vm11, %v11862_v16  ;;  %12968 = vmatprep.mubr.msk.bf16.mxu1 %vm1398_vm11, %v13538_v35  ;;  %v2885_v5 = vrot.slane %v2883_v8, 5  ;;  %v2890_v10 = vrot.slane %v2888_v34, 4  ;;  %v2907_v16 = vshll.u32 %v14654_v49, 16  ;;  %v2893_v45 = vrot.slane %v2891_v19, 5 }
  0xe8   : > { %12930 = vmatprep.mubr.msk.bf16.mxu0 %vm1398_vm11, %v11863_v53  ;;  %v2871_v9 = vrot.slane %v2870_v46, 4  ;;  %v2899_v60 = vrot.slane %v2897_v22, 5  ;;  %v2903_v32 = vrot.slane %v2901_v50, 4  ;;  %v2880_v41 = vor.u32 %v2879_v30, %v2875_v15  ;;  %v14685_v22 = vld [vmem:[#allocation2 + $0x5c] sm:$0x1] }
  0xe9   : > { %v2909_v17 = vrot.slane %v2907_v16, 5  ;;  %v11953_v38 = vrot.slane %v3449_v47, 9  ;;  %v3539_v18 = vrot.slane %v2732_v42, 5  ;;  %v2894_v53 = vor.u32 %v2893_v45, %v2890_v10  ;;  %v2740_v10 = vld [vmem:[#allocation2 + $0x60] sm:$0xf] }
  0xea   : > { %v2876_v33 = vsel %vm13850_vm14, %v2871_v9, %v2875_v15  ;;  %v2904_v35 = vor.u32 %v2903_v32, %v2899_v60  ;;  %v3542_v37 = vrot.slane %v14627_v24, 5  ;;  %v2881_v29 = vrot.slane %v2880_v41, 4  ;;  %v2738_v24 = vld [vmem:[#allocation2 + $0x58] sm:$0xf]  ;;  %v14698_v16 = vld [vmem:[#allocation2 + $0x64] sm:$0xf] }
  0xeb   : > { %v14675_v4 = vsel %vm14250_vm10, %v11953_v38, %v3539_v18  ;;  %v3541_v28 = vrot.slane %v3539_v18, 4  ;;  %v11954_v61 = vrot.slane %v3450_v12, 9  ;;  %v2895_v8 = vrot.slane %v2894_v53, 4  ;;  %v14714_v45 = vld [vmem:[#allocation2 + $0x68] sm:$0x1] }
  0xec   : > { %v2905_v34 = vrot.slane %v2904_v35, 4  ;;  %v3546_v46 = vrot.slane %v14646_v1, 5  ;;  %v3549_v42 = vrot.slane %v14654_v49, 5  ;;  %v2886_v15 = vsel %vm13850_vm14, %v2881_v29, %v2885_v5 }
  0xed   : > { %v14683_v19 = vsel %vm14250_vm10, %v3541_v28, %v3542_v37  ;;  %v2912_v50 = vshrl.u32 %v2737_v13, 16  ;;  %v2915_v47 = vshll.u32 %v2737_v13, 16  ;;  %v11969_v1 = vcombine.low %v14644_v3, %v14652_v55 }
  0xee   : > { %12969 = vmatmul.mubr.msk.bf16.gmra.mxu1 %vm1398_vm11, %v13539_v52  ;;  %v2900_v49 = vsel %vm13850_vm14, %v2895_v8, %v2899_v60  ;;  %v2910_v30 = vsel %vm13850_vm14, %v2905_v34, %v2909_v17  ;;  %v3548_v5 = vrot.slane %v3546_v46, 4  ;;  %v18904_v54 = vcombine.low %v14457_v40, %v14482_v39  ;;  %v3451_v52 = vld [vmem:[#allocation2 + $0x54] sm:$0xe] }
  0xef   : > { %12931 = vmatmul.mubr.msk.bf16.gmra.mxu0 %vm1398_vm11, %v11864_v11  ;;  %13008 = vmatprep.mubr.msk.bf16.mxu1 %vm1398_vm11, %v11966_v58  ;;  %v14708_v21 = vcombine.low %v2876_v33, %v2886_v15  ;;  %v14710_v11 = vcombine.low %v2900_v49, %v2910_v30  ;;  %v11970_v12 = vcombine.low %v14675_v4, %v14683_v19  ;;  %v2914_v9 = vrot.slane %v2912_v50, 4  ;;  %v3452_v50 = vld [vmem:[#allocation2 + $0x60] sm:$0xe] }
  0xf0   : > { %12934 = vmatprep.mubr.msk.bf16.mxu0 %vm1398_vm11, %v18904_v54  ;;  %v14718_v40 = vsel %vm14250_vm10, %v11954_v61, %v3546_v46  ;;  %v2917_v39 = vrot.slane %v2915_v47, 5  ;;  %v2921_v60 = vshll.u32 %v2738_v24, 16  ;;  %v2925_v32 = vshrl.u32 %v2738_v24, 16  ;;  %v2743_v54 = vld [vmem:[#allocation2 + $0x6c] sm:$0xf] }
  0xf1   : > { %v14722_v0 = vsel %vm14250_vm10, %v3548_v5, %v3549_v42  ;;  %v2931_v43 = vshll.u32 %v14685_v22, 16  ;;  %v2936_v58 = vshrl.u32 %v2740_v10, 16  ;;  %v2939_v13 = vshll.u32 %v2740_v10, 16 }
  0xf2   : > { %v2918_v41 = vor.u32 %v2917_v39, %v2914_v9  ;;  %v2923_v17 = vrot.slane %v2921_v60, 5  ;;  %v2927_v38 = vrot.slane %v2925_v32, 4  ;;  %v2945_v18 = vshll.u32 %v14698_v16, 16 }
  0xf3   : > { %v2933_v33 = vrot.slane %v2931_v43, 5  ;;  %v2938_v53 = vrot.slane %v2936_v58, 4  ;;  %v2941_v35 = vrot.slane %v2939_v13, 5  ;;  %v2949_v37 = vshrl.u32 %v14698_v16, 16 }
  0xf4   : > { %v2919_v29 = vrot.slane %v2918_v41, 4  ;;  %v2928_v28 = vor.u32 %v2927_v38, %v2923_v17  ;;  %v2947_v61 = vrot.slane %v2945_v18, 5  ;;  %v2955_v8 = vshll.u32 %v14714_v45, 16 }
  0xf5   : > { %v2942_v34 = vor.u32 %v2941_v35, %v2938_v53  ;;  %v2951_v46 = vrot.slane %v2949_v37, 4  ;;  %v11955_v42 = vrot.slane %v3451_v52, 9  ;;  %v3553_v15 = vrot.slane %v2738_v24, 5  ;;  %v14773_v52 = vld [vmem:[#allocation2 + $0x7c] sm:$0xf] }
  0xf6   : > { %v18905_v47 = vcombine.low %v14486_v31, %v14496_v57  ;;  %13009 = vmatmul.mubr.msk.bf16.vlgmr.msra.gmra.mxu1 %vm1398_vm11, %v11967_v2  ;;  %v2924_v49 = vsel %vm13850_vm14, %v2919_v29, %v2923_v17  ;;  %v2929_v30 = vrot.slane %v2928_v28, 4  ;;  %v2957_v5 = vrot.slane %v2955_v8, 5  ;;  %v14749_v2 = vld [vmem:[#allocation2 + $0x70] sm:$0xf]  ;;  %v14782_v37 = vld [vmem:[#allocation2 + $0x80] sm:$0x1] }
  0xf7   : > { %v3556_v10 = vrot.slane %v14685_v22, 5  ;;  %13012 = vmatprep.mubr.msk.bf16.mxu1 %vm1398_vm11, %v11968_v27  ;;  %v2943_v31 = vrot.slane %v2942_v34, 4  ;;  %v2952_v57 = vor.u32 %v2951_v46, %v2947_v61  ;;  %v14747_v63 = vsel %vm14250_vm10, %v11955_v42, %v3553_v15  ;;  %v3453_v29 = vld [vmem:[#allocation2 + $0x6c] sm:$0xe]  ;;  %v3454_v46 = vld [vmem:[#allocation2 + $0x78] sm:$0xe] }
  0xf8   : > { %12935 = vmatmul.mubr.msk.bf16.gmra.mxu0 %vm1398_vm11, %v18905_v47  ;;  %v3555_v14 = vrot.slane %v3553_v15, 4  ;;  %v11971_v24 = vcombine.low %v14718_v40, %v14722_v0  ;;  %v11956_v22 = vrot.slane %v3452_v50, 9  ;;  %v3560_v20 = vrot.slane %v14698_v16, 5  ;;  %v2746_v16 = vld [vmem:[#allocation2 + $0x78] sm:$0xf] }
  0xf9   : > { %12974 = vmatprep.mubr.msk.bf16.mxu0 %vm1398_vm11, %v14547_v44  ;;  %v2934_v44 = vsel %vm13850_vm14, %v2929_v30, %v2933_v33  ;;  %v2948_v27 = vsel %vm13850_vm14, %v2943_v31, %v2947_v61  ;;  %v2953_v9 = vrot.slane %v2952_v57, 4  ;;  %v3563_v60 = vrot.slane %v14714_v45, 5  ;;  %v14791_v42 = vld [vmem:[%s18855_s1 + $0x10] sm:$0x3] }
  0xfa   : > { %v14762_v39 = vsel %vm14250_vm10, %v3555_v14, %v3556_v10  ;;  %v14765_v32 = vcombine.low %v2924_v49, %v2934_v44  ;;  %v3562_v58 = vrot.slane %v3560_v20, 4  ;;  %v2960_v13 = vshrl.u32 %v2743_v54, 16 }
  0xfb   : > { %v11972_v43 = vcombine.low %v14747_v63, %v14762_v39  ;;  %v2958_v41 = vsel %vm13850_vm14, %v2953_v9, %v2957_v5  ;;  %v2963_v17 = vshll.u32 %v2743_v54, 16  ;;  %v2969_v38 = vshll.u32 %v14749_v2, 16 }
  0xfc   : > { %v2973_v18 = vshrl.u32 %v14749_v2, 16  ;;  %v14775_v33 = vcombine.low %v2948_v27, %v2958_v41  ;;  %v14779_v45 = vsel %vm14250_vm10, %v11956_v22, %v3560_v20  ;;  %v2962_v53 = vrot.slane %v2960_v13, 4  ;;  %v14826_v41 = vld [vmem:[#allocation2 + $0x8c] sm:$0x1] }
  0xfd   : > { %v2979_v35 = vshll.u32 %v14756_v23, 16  ;;  %v14786_v28 = vsel %vm14250_vm10, %v3562_v58, %v3563_v60  ;;  %v2965_v61 = vrot.slane %v2963_v17, 5  ;;  %v2971_v8 = vrot.slane %v2969_v38, 5  ;;  %v2749_v60 = vld [vmem:[#allocation2 + $0x84] sm:$0xf] }
  0xfe   : > { %v2975_v34 = vrot.slane %v2973_v18, 4  ;;  %13013 = vmatmul.mubr.msk.bf16.gmra.mxu1 %vm1398_vm11, %v11969_v1  ;;  %v2984_v50 = vshrl.u32 %v2746_v16, 16  ;;  %v2987_v47 = vshll.u32 %v2746_v16, 16  ;;  %v2993_v49 = vshll.u32 %v14773_v52, 16  ;;  %v14820_v58 = vld [vmem:[#allocation2 + $0x88] sm:$0xf] }
  0xff   : > { %v2981_v15 = vrot.slane %v2979_v35, 5  ;;  %v2966_v30 = vor.u32 %v2965_v61, %v2962_v53  ;;  %v2997_v10 = vshrl.u32 %v14773_v52, 16  ;;  %13016 = vmatprep.mubr.msk.bf16.mxu1 %vm1398_vm11, %v11970_v12  ;;  %v11957_v54 = vrot.slane %v3453_v29, 9  ;;  %v2752_v17 = vld [vmem:[#allocation2 + $0x90] sm:$0xf] }
 0x100   : > { %12975 = vmatmul.mubr.msk.bf16.vlgmr.msra.gmra.mxu0 %vm1398_vm11, %v14621_v59  ;;  %v2976_v5 = vor.u32 %v2975_v34, %v2971_v8  ;;  %v3003_v59 = vshll.u32 %v14782_v37, 16  ;;  %v2986_v3 = vrot.slane %v2984_v50, 4  ;;  %v2989_v55 = vrot.slane %v2987_v47, 5 }
 0x101   : > { %13041 = vmatpush3.bf16.msra.mxu0 %v14539_v26  ;;  %12978 = vmatprep.mubr.msk.bf16.mxu0 %vm1398_vm11, %v14629_v25  ;;  %v2995_v1 = vrot.slane %v2993_v49, 5  ;;  %v14811_v26 = vpop.f32.mrf.mxu1  ;;  %v2967_v25 = vrot.slane %v2966_v30, 4  ;;  %v2999_v57 = vrot.slane %v2997_v10, 4  ;;  %v3567_v22 = vrot.slane %v14749_v2, 5  ;;  %v14866_v34 = vpop.f32.mrf.mxu0 }
 0x102   : > { %13456 = vmatprep.subr.msk.bf16.mxu0 %vm1447_vm0, %v14791_v42  ;;  %v2977_v31 = vrot.slane %v2976_v5, 4  ;;  %v3005_v14 = vrot.slane %v3003_v59, 5  ;;  %v2990_v44 = vor.u32 %v2989_v55, %v2986_v3  ;;  %v3570_v4 = vrot.slane %v14756_v23, 5  ;;  %v3455_v3 = vld [vmem:[#allocation2 + $0x84] sm:$0xe] }
 0x103   : > { %v11958_v19 = vrot.slane %v3454_v46, 9  ;;  %v2972_v12 = vsel %vm13850_vm14, %v2967_v25, %v2971_v8  ;;  %v3000_v27 = vor.u32 %v2999_v57, %v2995_v1  ;;  %v3574_v9 = vrot.slane %v14773_v52, 5  ;;  %v14828_v38 = vpop.f32.mrf.mxu1 }
 0x104   : > { %v2982_v20 = vsel %vm13850_vm14, %v2977_v31, %v2981_v15  ;;  %v11973_v13 = vcombine.low %v14779_v45, %v14786_v28  ;;  %v2991_v16 = vrot.slane %v2990_v44, 4  ;;  %v3568_v2 = vsel %vm14250_vm10, %v11957_v54, %v3567_v22 }
 0x105   : > { %v3569_v23 = vrot.slane %v3567_v22, 4  ;;  %v14830_v18 = vcombine.low %v2972_v12, %v2982_v20  ;;  %v3001_v53 = vrot.slane %v3000_v27, 4  ;;  %v3576_v52 = vrot.slane %v3574_v9, 4  ;;  %v14868_v46 = vpop.f32.mrf.mxu1  ;;  %v14877_v22 = vpop.f32.mrf.mxu0 }
 0x106   : > { %v3577_v35 = vrot.slane %v14782_v37, 5  ;;  %13017 = vmatmul.mubr.msk.bf16.gmra.mxu1 %vm1398_vm11, %v11971_v24  ;;  %v2996_v45 = vsel %vm13850_vm14, %v2991_v16, %v2995_v1  ;;  %v3008_v28 = vshrl.u32 %v2749_v60, 16  ;;  %v3011_v61 = vshll.u32 %v2749_v60, 16  ;;  %v14856_v37 = vld [vmem:[#allocation2 + $0x94] sm:$0xf] }
 0x107   : > { %v3571_v29 = vsel %vm14250_vm10, %v3569_v23, %v3570_v4  ;;  %13020 = vmatprep.mubr.msk.bf16.mxu1 %vm1398_vm11, %v11972_v43  ;;  %v14853_v0 = vsel %vm14250_vm10, %v11958_v19, %v3574_v9  ;;  %v3017_v24 = vshll.u32 %v14820_v58, 16  ;;  %v14864_v43 = vld [vmem:[#allocation2 + $0x98] sm:$0x1]  ;;  %v3021_v50 = vshrl.u32 %v14820_v58, 16  ;;  %v14879_v4 = vpop.f32.mrf.mxu1  ;;  %v3456_v9 = vld [vmem:[#allocation2 + $0x90] sm:$0xe] }
 0x108   : > { %12979 = vmatmul.mubr.msk.bf16.gmra.mxu0 %vm1398_vm11, %v14648_v51  ;;  %v3006_v51 = vsel %vm13850_vm14, %v3001_v53, %v3005_v14  ;;  %v11974_v40 = vcombine.low %v3568_v2, %v3571_v29  ;;  %v3010_v63 = vrot.slane %v3008_v28, 4  ;;  %v3013_v39 = vrot.slane %v3011_v61, 5  ;;  %18906 = vst [vmem:[#allocation10_spill] sm:$0xff] %v14879_v4  ;;  %v14896_v28 = vpop.f32.mrf.mxu0 }
 0x109   : > { %12982 = vmatprep.mubr.msk.bf16.mxu0 %vm1398_vm11, %v14708_v21  ;;  %v14858_v8 = vcombine.low %v2996_v45, %v3006_v51  ;;  %v14862_v21 = vsel %vm14250_vm10, %v3576_v52, %v3577_v35  ;;  %v3019_v15 = vrot.slane %v3017_v24, 5  ;;  %v3027_v47 = vshll.u32 %v14826_v41, 16 }
 0x10a   : > { %v3032_v49 = vshrl.u32 %v2752_v17, 16  ;;  %v3014_v30 = vor.u32 %v3013_v39, %v3010_v63  ;;  %v3035_v5 = vshll.u32 %v2752_v17, 16  ;;  %v3041_v10 = vshll.u32 %v14856_v37, 16  ;;  %v2755_v17 = vld [vmem:[#allocation2 + $0x9c] sm:$0xf] }
 0x10b   : > { %v3045_v59 = vshrl.u32 %v14856_v37, 16  ;;  %v11975_v55 = vcombine.low %v14853_v0, %v14862_v21  ;;  %v3023_v1 = vrot.slane %v3021_v50, 4  ;;  %v3051_v25 = vshll.u32 %v14864_v43, 16  ;;  %v14913_v50 = vld [vmem:[#allocation2 + $0xac] sm:$0xf] }
 0x10c   : > { %v3034_v54 = vrot.slane %v3032_v49, 4  ;;  %v3015_v31 = vrot.slane %v3014_v30, 4  ;;  %v3037_v57 = vrot.slane %v3035_v5, 5  ;;  %v3043_v14 = vrot.slane %v3041_v10, 5 }
 0x10d   : > { %v3047_v44 = vrot.slane %v3045_v59, 4  ;;  %v3024_v19 = vor.u32 %v3023_v1, %v3019_v15  ;;  %v3029_v12 = vrot.slane %v3027_v47, 5  ;;  %v11959_v20 = vrot.slane %v3455_v3, 9 }
 0x10e   : > { %v3581_v27 = vrot.slane %v14820_v58, 5  ;;  %13021 = vmatmul.mubr.msk.bf16.gmra.mxu1 %vm1398_vm11, %v11973_v13  ;;  %v3038_v60 = vor.u32 %v3037_v57, %v3034_v54  ;;  %v3053_v2 = vrot.slane %v3051_v25, 5  ;;  %v3584_v23 = vrot.slane %v14826_v41, 5  ;;  %v14893_v13 = vld [vmem:[#allocation2 + $0xa0] sm:$0xf]  ;;  %v14920_v54 = vpop.f32.mrf.mxu0 }
 0x10f   : > { %v3048_v16 = vor.u32 %v3047_v44, %v3043_v14  ;;  %13024 = vmatprep.mubr.msk.bf16.mxu1 %vm1398_vm11, %v11974_v40  ;;  %v3020_v58 = vsel %vm13850_vm14, %v3015_v31, %v3019_v15  ;;  %v3025_v53 = vrot.slane %v3024_v19, 4  ;;  %v11960_v29 = vrot.slane %v3456_v9, 9  ;;  %v14904_v40 = vld [vmem:[#allocation2 + $0xa4] sm:$0x1]  ;;  %v2758_v15 = vld [vmem:[#allocation2 + $0xa8] sm:$0xf] }
 0x110   : > { %12983 = vmatmul.mubr.msk.bf16.gmra.mxu0 %vm1398_vm11, %v14710_v11  ;;  %v3582_v11 = vsel %vm14250_vm10, %v11959_v20, %v3581_v27  ;;  %v3583_v52 = vrot.slane %v3581_v27, 4  ;;  %v3039_v35 = vrot.slane %v3038_v60, 4  ;;  %v3588_v41 = vrot.slane %v14856_v37, 5  ;;  %18907 = vst [vmem:[#allocation11_spill] sm:$0xff] %v14920_v54  ;;  %v14926_v31 = vld [vmem:[#allocation2 + $0xb0] sm:$0x1] }
 0x111   : > { %12986 = vmatprep.mubr.msk.bf16.mxu0 %vm1398_vm11, %v14765_v32  ;;  %v3049_v45 = vrot.slane %v3048_v16, 4  ;;  %v14898_v32 = vpop.f32.mrf.mxu1  ;;  %v3030_v61 = vsel %vm13850_vm14, %v3025_v53, %v3029_v12  ;;  %v3056_v0 = vshrl.u32 %v2755_v17, 16  ;;  %v3059_v24 = vshll.u32 %v2755_v17, 16  ;;  %v3457_v9 = vld [vmem:[#allocation2 + $0x9c] sm:$0xe] }
 0x112   : > { %v3585_v51 = vsel %vm14250_vm10, %v3583_v52, %v3584_v23  ;;  %v14906_v21 = vcombine.low %v3020_v58, %v3030_v61  ;;  %v3044_v63 = vsel %vm13850_vm14, %v3039_v35, %v3043_v14  ;;  %v3591_v39 = vrot.slane %v14864_v43, 5  ;;  %v3458_v53 = vld [vmem:[#allocation2 + $0xa8] sm:$0xe] }
 0x113   : > { %v3054_v37 = vsel %vm13850_vm14, %v3049_v45, %v3053_v2  ;;  %v11976_v49 = vcombine.low %v3582_v11, %v3585_v51  ;;  %v3590_v30 = vrot.slane %v3588_v41, 4  ;;  %v3058_v5 = vrot.slane %v3056_v0, 4  ;;  %v14922_v25 = vpop.f32.mrf.mxu1  ;;  %v14941_v11 = vpop.f32.mrf.mxu0 }
 0x114   : > { %v14915_v47 = vcombine.low %v3044_v63, %v3054_v37  ;;  %v3061_v10 = vrot.slane %v3059_v24, 5  ;;  %v3065_v59 = vshll.u32 %v14893_v13, 16  ;;  %v3069_v3 = vshrl.u32 %v14893_v13, 16  ;;  %v2761_v24 = vld [vmem:[#allocation2 + $0xb4] sm:$0xf] }
 0x115   : > { %v3075_v1 = vshll.u32 %v14904_v40, 16  ;;  %v3589_v43 = vsel %vm14250_vm10, %v11960_v29, %v3588_v41  ;;  %v3080_v57 = vshrl.u32 %v2758_v15, 16  ;;  %v3083_v14 = vshll.u32 %v2758_v15, 16  ;;  %v14943_v52 = vpop.f32.mrf.mxu1 }
 0x116   : > { %v3089_v44 = vshll.u32 %v14913_v50, 16  ;;  %13025 = vmatmul.mubr.msk.bf16.gmra.mxu1 %vm1398_vm11, %v11975_v55  ;;  %v3592_v19 = vsel %vm14250_vm10, %v3590_v30, %v3591_v39  ;;  %v3062_v12 = vor.u32 %v3061_v10, %v3058_v5  ;;  %v3067_v20 = vrot.slane %v3065_v59, 5  ;;  %v2762_v5 = vld [vmem:[#allocation2 + $0xb8] sm:$0xf]  ;;  %v14958_v10 = vpop.f32.mrf.mxu0 }
 0x117   : > { %v3071_v27 = vrot.slane %v3069_v3, 4  ;;  %13028 = vmatprep.mubr.msk.bf16.mxu1 %vm1398_vm11, %v11976_v49  ;;  %v3077_v60 = vrot.slane %v3075_v1, 5  ;;  %v3082_v16 = vrot.slane %v3080_v57, 4  ;;  %v3085_v2 = vrot.slane %v3083_v14, 5  ;;  %v14960_v59 = vpop.f32.mrf.mxu1  ;;  %v2763_v57 = vld [vmem:[#allocation2 + $0xbc] sm:$0x1] }
 0x118   : > { %12987 = vmatmul.mubr.msk.bf16.gmra.mxu0 %vm1398_vm11, %v14775_v33  ;;  %v14937_v23 = vrot.slane %v3089_v44, 5  ;;  %v3063_v33 = vrot.slane %v3062_v12, 4  ;;  %v3093_v55 = vshrl.u32 %v14913_v50, 16  ;;  %v3099_v58 = vshll.u32 %v14926_v31, 16  ;;  %18908 = vst [vmem:[#allocation12_spill] sm:$0xff] %v14960_v59 }
 0x119   : > { %12990 = vmatprep.mubr.msk.bf16.mxu0 %vm1398_vm11, %v14830_v18  ;;  %v3072_v17 = vor.u32 %v3071_v27, %v3067_v20  ;;  %v3086_v35 = vor.u32 %v3085_v2, %v3082_v16  ;;  %v11961_v18 = vrot.slane %v3457_v9, 9  ;;  %v3595_v45 = vrot.slane %v14893_v13, 5  ;;  %v332_v44 = vld [vmem:[#allocation2 + $0xc8] sm:$0x1]  ;;  %v2764_v16 = vld [vmem:[#allocation2 + $0xc0] sm:$0xf] }
 0x11a   : > { %v3598_v29 = vrot.slane %v14904_v40, 5  ;;  %v11977_v41 = vcombine.low %v3589_v43, %v3592_v19  ;;  %v3068_v61 = vsel %vm13850_vm14, %v3063_v33, %v3067_v20  ;;  %v3095_v0 = vrot.slane %v3093_v55, 4  ;;  %v3459_v55 = vld [vmem:[#allocation2 + $0xb4] sm:$0xe] }
 0x11b   : > { %v3073_v51 = vrot.slane %v3072_v17, 4  ;;  %v14949_v63 = vrot.slane %v3086_v35, 4  ;;  %v3596_v37 = vsel %vm14250_vm10, %v11961_v18, %v3595_v45  ;;  %v3597_v39 = vrot.slane %v3595_v45, 4 }
 0x11c   : > { %v11962_v15 = vrot.slane %v3458_v53, 9  ;;  %v3096_v13 = vor.u32 %v3095_v0, %v14937_v23  ;;  %v3602_v40 = vrot.slane %v14913_v50, 5  ;;  %v3605_v30 = vrot.slane %v14926_v31, 5  ;;  %v14986_v53 = vpop.f32.mrf.mxu1 }
 0x11d   : > { %v3078_v49 = vsel %vm13850_vm14, %v3073_v51, %v3077_v60  ;;  %v14962_v1 = vrot.slane %v3099_v58, 5  ;;  %v3599_v43 = vsel %vm14250_vm10, %v3597_v39, %v3598_v29  ;;  %v3104_v14 = vshrl.u32 %v2761_v24, 16  ;;  %v14984_v58 = vpop.f32.mrf.mxu0 }
 0x11e   : > { %v11929_v3 = vcombine.low %v3068_v61, %v3078_v49  ;;  %13029 = vmatmul.mubr.msk.bf16.gmra.mxu1 %vm1398_vm11, %v11977_v41  ;;  %v3097_v50 = vrot.slane %v3096_v13, 4  ;;  %v11978_v31 = vcombine.low %v3596_v37, %v3599_v43  ;;  %v3603_v19 = vsel %vm14250_vm10, %v11962_v15, %v3602_v40 }
 0x11f   : > { %v3604_v12 = vrot.slane %v3602_v40, 4  ;;  %v3106_v20 = vrot.slane %v3104_v14, 4  ;;  %v3107_v27 = vshll.u32 %v2761_v24, 16  ;;  %v3113_v9 = vshll.u32 %v2762_v5, 16  ;;  %v14993_v13 = vpop.f32.mrf.mxu0  ;;  %v14995_v40 = vpop.f32.mrf.mxu1 }
 0x120   : > { %12991 = vmatmul.mubr.msk.bf16.gmra.mxu0 %vm1398_vm11, %v14858_v8  ;;  %v3117_v60 = vshrl.u32 %v2762_v5, 16  ;;  %v3092_v8 = vsel %vm13850_vm14, %v14949_v63, %v14937_v23  ;;  %13032 = vmatprep.mubr.msk.bf16.mxu1 %vm1398_vm11, %v11978_v31  ;;  %v3123_v33 = vshll.u32 %v2763_v57, 16  ;;  %v333_v17 = vsel %vm13815_vm8, 0, %v332_v44  ;;  %18909 = vst [vmem:[#allocation13_spill] sm:$0xff] %v14993_v13 }
 0x121   : > { %12994 = vmatprep.mubr.msk.bf16.mxu0 %vm1398_vm11, %v14906_v21  ;;  %v3606_v2 = vsel %vm14250_vm10, %v3604_v12, %v3605_v30  ;;  %v14982_v21 = vld [vmem:[#allocation2 + $0xc4] sm:$0xf]  ;;  %v3102_v23 = vsel %vm13850_vm14, %v3097_v50, %v14962_v1  ;;  %v3109_v18 = vrot.slane %v3107_v27, 5  ;;  %v3115_v45 = vrot.slane %v3113_v9, 5  ;;  %334 = vst [vmem:[#allocation2 + $0xc8] sm:$0x1] %v333_v17 }
 0x122   : > { %v11979_v35 = vcombine.low %v3603_v19, %v3606_v2  ;;  %v3119_v29 = vrot.slane %v3117_v60, 4  ;;  %v3125_v41 = vrot.slane %v3123_v33, 5  ;;  %v3128_v61 = vshrl.u32 %v2764_v16, 16  ;;  %v3460_v19 = vld [vmem:[#allocation2 + $0xc0] sm:$0xe]  ;;  %v15020_v33 = vpop.f32.mrf.mxu1 }
 0x123   : > { %v3131_v7 = vshll.u32 %v2764_v16, 16  ;;  %v3110_v51 = vor.u32 %v3109_v18, %v3106_v20  ;;  %v3137_v0 = vshll.u32 %v14982_v21, 16  ;;  %v3141_v24 = vshrl.u32 %v14982_v21, 16  ;;  %v13618_v60 = vld [vmem:[%s18855_s1 + $0xe] sm:$0x3] }
 0x124   : > { %v11963_v63 = vrot.slane %v3459_v55, 9  ;;  %v3120_v37 = vor.u32 %v3119_v29, %v3115_v45  ;;  %v3130_v39 = vrot.slane %v3128_v61, 4  ;;  %v3609_v49 = vrot.slane %v2762_v5, 5  ;;  %v15018_v2 = vpop.f32.mrf.mxu0  ;;  %v15026_v29 = vld [vmem:[#allocation2 + $0x20] sm:$0x1] }
 0x125   : > { %v3133_v15 = vrot.slane %v3131_v7, 5  ;;  %v3111_v30 = vrot.slane %v3110_v51, 4  ;;  %v14997_v1 = vrot.slane %v3137_v0, 5  ;;  %v3143_v43 = vrot.slane %v3141_v24, 4  ;;  %v15039_v24 = vld [vmem:[#allocation2 + $0x28] sm:$0xf] }
 0x126   : > { %v3612_v14 = vrot.slane %v2763_v57, 5  ;;  %13033 = vmatmul.mubr.msk.bf16.gmra.mxu1 %vm1398_vm11, %v11979_v35  ;;  %v3121_v44 = vrot.slane %v3120_v37, 4  ;;  %v3610_v31 = vsel %vm14250_vm10, %v11963_v63, %v3609_v49  ;;  %v3611_v5 = vrot.slane %v3609_v49, 4  ;;  %v4274_v57 = vld [vmem:[#allocation2 + $0x18] sm:$0xf] }
 0x127   : > { %v3134_v50 = vor.u32 %v3133_v15, %v3130_v39  ;;  %v3116_v12 = vsel %vm13850_vm14, %v3111_v30, %v3115_v45  ;;  %v3144_v20 = vor.u32 %v3143_v43, %v14997_v1  ;;  %v4805_v16 = vsel %vm1447_vm0, %v13618_v60, 0  ;;  %v15049_v39 = vpop.f32.mrf.mxu0  ;;  %v15051_v15 = vpop.f32.mrf.mxu1 }
 0x128   : > { %12995 = vmatmul.mubr.msk.bf16.gmra.mxu0 %vm1398_vm11, %v14915_v47  ;;  %v3126_v47 = vsel %vm13850_vm14, %v3121_v44, %v3125_v41  ;;  %v909_v27 = vld [vmem:[#allocation2 + $0xc8] sm:$0x1]  ;;  %v3613_v9 = vsel %vm14250_vm10, %v3611_v5, %v3612_v14  ;;  %v11930_v17 = vcombine.low %v3092_v8, %v3102_v23  ;;  %v18910_v55 = vrot.slane %v14502_v36, 4  ;;  %13075 = vmatpush3.bf16.msra.mxu1 %v4805_v16  ;;  %v4277_v41 = vld [vmem:[#allocation2 + $0x24] sm:$0xf] }
 0x129   : > { %12998 = vmatprep.mubr.msk.bf16.mxu0 %vm1398_vm11, %v11929_v3  ;;  %v15016_v3 = vld [vmem:[#allocation2 + $0x1c] sm:$0xf]  ;;  %v11980_v18 = vcombine.low %v3610_v31, %v3613_v9  ;;  %v11964_v45 = vrot.slane %v3460_v19, 9  ;;  %v11931_v61 = vcombine.low %v3116_v12, %v3126_v47  ;;  %v15028_v7 = vrot.slane %v3134_v50, 4  ;;  %v15062_v9 = vpop.f32.mrf.mxu0  ;;  %v15064_v60 = vpop.f32.mrf.mxu1 }
 0x12a   : > { %v910_v35 = vsel %vm13800_vm7, %v18910_v55, %v909_v27  ;;  %v3616_v51 = vrot.slane %v14982_v21, 5  ;;  %v15033_v8 = vadd.f32 %v14811_v26, %v14866_v34  ;;  %v15035_v36 = vrot.slane %v3144_v20, 4  ;;  %v15047_v26 = vld [vmem:[#allocation2 + $0x2c] sm:$0x1]  ;;  %vm16148_vm7 = vmand %vm335_vm5, %vm285_vm4 }
 0x12b   : > { %911 = vst [vmem:[#allocation2 + $0xc8] sm:$0x1] %v910_v35  ;;  %13036 = vmatprep.mubr.msk.bf16.mxu1 %vm1398_vm11, %v11980_v18  ;;  %v4323_v6 = vshrl.u32 %v4274_v57, 16  ;;  %v4326_v23 = vshll.u32 %v4274_v57, 16  ;;  %v4332_v0 = vshll.u32 %v15016_v3, 16  ;;  %v4336_v63 = vshrl.u32 %v15016_v3, 16 }
 0x12c   : > { %v4342_v37 = vshll.u32 %v15026_v29, 16  ;;  %v15045_v21 = vadd.f32 %v14828_v38, %v14877_v22  ;;  %v4347_v34 = vshrl.u32 %v4277_v41, 16  ;;  %v4350_v14 = vshll.u32 %v4277_v41, 16 }
 0x12d   : > { %v4325_v49 = vrot.slane %v4323_v6, 4  ;;  %v4328_v30 = vrot.slane %v4326_v23, 5  ;;  %v4334_v43 = vrot.slane %v4332_v0, 5  ;;  %v3140_v44 = vsel %vm13850_vm14, %v15028_v7, %v14997_v1 }
 0x12e   : > { %v4338_v38 = vrot.slane %v4336_v63, 4  ;;  %v4349_v22 = vrot.slane %v4347_v34, 4  ;;  %v4356_v50 = vshll.u32 %v15039_v24, 16  ;;  %v4352_v5 = vrot.slane %v4350_v14, 5  ;;  %v15074_v34 = vld [vmem:[#allocation2 + $0x34] sm:$0xf] }
 0x12f   : > { %v4329_v31 = vor.u32 %v4328_v30, %v4325_v49  ;;  %v4360_v19 = vshrl.u32 %v15039_v24, 16  ;;  %v4366_v12 = vshll.u32 %v15047_v26, 16  ;;  %v3618_v20 = vrot.slane %v3616_v51, 4  ;;  %v15086_v30 = vpop.f32.mrf.mxu0 }
 0x130   : > { %12999 = vmatmul.mubr.msk.bf16.gmra.mxu0 %vm1398_vm11, %v11930_v17  ;;  %v4339_v57 = vor.u32 %v4338_v38, %v4334_v43  ;;  %v4344_v47 = vrot.slane %v4342_v37, 5  ;;  %v4358_v27 = vrot.slane %v4356_v50, 5  ;;  %v3617_v16 = vsel %vm14250_vm10, %v11964_v45, %v3616_v51  ;;  %v4280_v37 = vld [vmem:[#allocation2 + $0x30] sm:$0xf] }
 0x131   : > { %13002 = vmatprep.mubr.msk.bf16.mxu0 %vm1398_vm11, %v11931_v61  ;;  %v4330_v17 = vrot.slane %v4329_v31, 4  ;;  %v4353_v55 = vor.u32 %v4352_v5, %v4349_v22  ;;  %v4362_v35 = vrot.slane %v4360_v19, 4  ;;  %v15070_v7 = vadd.f32 %v14868_v46, %v14896_v28  ;;  %v15084_v28 = vld [vmem:[#allocation2 + $0x38] sm:$0x1] }
 0x132   : > { %v2766_v1 = vld [vmem:[#allocation2 + $0xc8] sm:$0x1]  ;;  %v4340_v61 = vrot.slane %v4339_v57, 4  ;;  %v4368_v63 = vrot.slane %v4366_v12, 5  ;;  %v15082_v46 = vadd.f32 %v14898_v32, %v14941_v11  ;;  %v13540_v5 = vld [vmem:[#allocation2 + $0x18] sm:$0xff]   ;;  %v4371_v19 = vshrl.u32 %v4280_v37, 16 }
 0x133   : > { %v3147_v18 = vshll.u32 %v2766_v1, 16  ;;  %v3619_v41 = vrot.slane %v2766_v1, 5  ;;  %v4335_v6 = vsel %vm13850_vm14, %v4330_v17, %v4334_v43  ;;  %v4354_v23 = vrot.slane %v4353_v55, 4  ;;  %v15088_v43 = vpop.f32.mrf.mxu1  ;;  %v4283_v12 = vld [vmem:[#allocation2 + $0x3c] sm:$0xf] }
 0x134   : > { %v4363_v0 = vor.u32 %v4362_v35, %v4358_v27  ;;  %v4345_v49 = vsel %vm13850_vm14, %v4340_v61, %v4344_v47  ;;  %v4374_v32 = vshll.u32 %v4280_v37, 16  ;;  %v4380_v11 = vshll.u32 %v15074_v34, 16  ;;  %v15101_v1 = vld [vmem:[#allocation2 + $0x40] sm:$0xf]  ;;  %v15104_v55 = vld [vmem:[#allocation2 + $0x44] sm:$0x1]  ;;  %v15106_v35 = vpop.f32.mrf.mxu0 }
 0x135   : > { %v3149_v45 = vrot.slane %v3147_v18, 5  ;;  %v3620_v51 = vsel %vm14250_vm10, %v3618_v20, %v3619_v41  ;;  %v12032_v38 = vcombine.low %v4335_v6, %v4345_v49  ;;  %v4359_v22 = vsel %vm13850_vm14, %v4354_v23, %v4358_v27 }
 0x136   : > { %v11981_v14 = vcombine.low %v3617_v16, %v3620_v51  ;;  %v4364_v50 = vrot.slane %v4363_v0, 4  ;;  %v4384_v47 = vshrl.u32 %v15074_v34, 16  ;;  %v4390_v27 = vshll.u32 %v15084_v28, 16 }
 0x137   : > { %v3150_v31 = vsel %vm13850_vm14, %v15035_v36, %v3149_v45  ;;  %v4373_v36 = vrot.slane %v4371_v19, 4  ;;  %v4376_v16 = vrot.slane %v4374_v32, 5  ;;  %v4382_v17 = vrot.slane %v4380_v11, 5  ;;  %v15121_v19 = vpop.f32.mrf.mxu0  ;;  %v13541_v32 = vld [vmem:[#allocation2 + $0x24] sm:$0xff]  }
 0x138   : > { %v11932_v20 = vcombine.low %v3140_v44, %v3150_v31  ;;  %13037 = vmatmul.mubr.msk.bf16.gmra.mxu1 %vm1398_vm11, %v11981_v14  ;;  %v4369_v57 = vsel %vm13850_vm14, %v4364_v50, %v4368_v63  ;;  %v15108_v44 = vpop.f32.mrf.mxu1  ;;  %v4386_v41 = vrot.slane %v4384_v47, 4  ;;  %v15113_v61 = vadd.f32 %v14922_v25, %v14958_v10  ;;  %v15119_v10 = vld [vmem:[#allocation2 + $0x4c] sm:$0xf]  ;;  %v13542_v47 = vld [vmem:[#allocation2 + $0x30] sm:$0xff]  }
 0x139   : > { %13076 = vmatprep.mubr.msk.bf16.mxu1 %vm1398_vm11, %v12032_v38  ;;  %v12033_v18 = vcombine.low %v4359_v22, %v4369_v57  ;;  %v4395_v6 = vshrl.u32 %v4283_v12, 16  ;;  %v4377_v23 = vor.u32 %v4376_v16, %v4373_v36  ;;  %v4398_v0 = vshll.u32 %v4283_v12, 16  ;;  %v4286_v38 = vld [vmem:[#allocation2 + $0x48] sm:$0xf] }
 0x13a   : > { %13003 = vmatmul.mubr.msk.bf16.gmra.mxu0 %vm1398_vm11, %v11932_v20  ;;  %v4404_v63 = vshll.u32 %v15101_v1, 16  ;;  %v4408_v37 = vshrl.u32 %v15101_v1, 16  ;;  %v4387_v45 = vor.u32 %v4386_v41, %v4382_v17  ;;  %v4392_v51 = vrot.slane %v4390_v27, 5 }
 0x13b   : > { %13042 = vmatprep.mubr.msk.bf16.mxu0 %vm1398_vm11, %v13540_v5  ;;  %v4397_v49 = vrot.slane %v4395_v6, 4  ;;  %v4414_v14 = vshll.u32 %v15104_v55, 16  ;;  %v4378_v22 = vrot.slane %v4377_v23, 4  ;;  %v4400_v50 = vrot.slane %v4398_v0, 5  ;;  %v15123_v5 = vpop.f32.mrf.mxu1  ;;  %v15137_v6 = vld [vmem:[#allocation2 + $0x50] sm:$0x1] }
 0x13c   : > { %v4406_v31 = vrot.slane %v4404_v63, 5  ;;  %v4410_v25 = vrot.slane %v4408_v37, 4  ;;  %18911 = vst [vmem:[#allocation14_spill] sm:$0xff] %v15123_v5  ;;  %v5275_v11 = vsel %vm1447_vm0, %v14791_v42, 0  ;;  %v4388_v12 = vrot.slane %v4387_v45, 4 }
 0x13d   : > { %v4416_v20 = vrot.slane %v4414_v14, 5  ;;  %v15129_v57 = vadd.f32 %v14943_v52, %v14984_v58  ;;  %v4383_v27 = vsel %vm13850_vm14, %v4378_v22, %v4382_v17  ;;  %v4401_v36 = vor.u32 %v4400_v50, %v4397_v49  ;;  %v4289_v45 = vld [vmem:[#allocation2 + $0x54] sm:$0xf]  ;;  %v15144_v49 = vpop.f32.mrf.mxu0 }
 0x13e   : > { %v4411_v16 = vor.u32 %v4410_v25, %v4406_v31  ;;  %v15135_v41 = vadd.f32 %v14986_v53, %v15018_v2  ;;  %v4393_v42 = vsel %vm13850_vm14, %v4388_v12, %v4392_v51  ;;  %v4419_v23 = vshrl.u32 %v4286_v38, 16  ;;  %v15146_v53 = vpop.f32.mrf.mxu1  ;;  %v15161_v12 = vld [vmem:[#allocation2 + $0x5c] sm:$0x1] }
 0x13f   : > { %v4422_v52 = vshll.u32 %v4286_v38, 16  ;;  %v4428_v58 = vshll.u32 %v15119_v10, 16  ;;  %v12034_v0 = vcombine.low %v4383_v27, %v4393_v42  ;;  %v4402_v63 = vrot.slane %v4401_v36, 4  ;;  %v15150_v38 = vld [vmem:[#allocation2 + $0x58] sm:$0xf] }
 0x140   : > { %13077 = vmatmul.mubr.msk.bf16.vlgmr.msra.gmra.mxu1 %vm1398_vm11, %v12033_v18  ;;  %v4412_v17 = vrot.slane %v4411_v16, 4  ;;  %v4432_v37 = vshrl.u32 %v15119_v10, 16  ;;  %v4421_v2 = vrot.slane %v4419_v23, 4  ;;  %v4438_v51 = vshll.u32 %v15137_v6, 16 }
 0x141   : > { %v4424_v18 = vrot.slane %v4422_v52, 5  ;;  %v4430_v14 = vrot.slane %v4428_v58, 5  ;;  %v4407_v22 = vsel %vm13850_vm14, %v4402_v63, %v4406_v31  ;;  %13080 = vmatprep.mubr.msk.bf16.mxu1 %vm1398_vm11, %v12034_v0  ;;  %v4443_v16 = vshrl.u32 %v4289_v45, 16  ;;  %v15166_v52 = vpop.f32.mrf.mxu0  ;;  %v15168_v58 = vpop.f32.mrf.mxu1 }
 0x142   : > { %13043 = vmatmul.mubr.msk.bf16.vlgmr.msra.gmra.mxu0 %vm1398_vm11, %v13541_v32  ;;  %v4417_v50 = vsel %vm13850_vm14, %v4412_v17, %v4416_v20  ;;  %v4434_v25 = vrot.slane %v4432_v37, 4  ;;  %v15159_v32 = vadd.f32 %v14995_v40, %v15049_v39  ;;  %v4446_v23 = vshll.u32 %v4289_v45, 16  ;;  %18912 = vst [vmem:[#allocation15_spill] sm:$0xff] %v15166_v52  ;;  %v13544_v40 = vld [vmem:[#allocation2 + $0x48] sm:$0xff]   ;;  %v4292_v17 = vld [vmem:[#allocation2 + $0x60] sm:$0xf] }
 0x143   : > { %13109 = vmatpush3.bf16.msra.mxu0 %v5275_v11  ;;  %13046 = vmatprep.mubr.msk.bf16.mxu0 %vm1398_vm11, %v13542_v47  ;;  %v12035_v27 = vcombine.low %v4407_v22, %v4417_v50  ;;  %v4425_v36 = vor.u32 %v4424_v18, %v4421_v2  ;;  %v4440_v11 = vrot.slane %v4438_v51, 5  ;;  %v13543_v47 = vld [vmem:[#allocation2 + $0x3c] sm:$0xff]   ;;  %v4452_v31 = vshll.u32 %v15150_v38, 16  ;;  %v15171_v22 = vld [vmem:[#allocation2 + $0x64] sm:$0xf] }
 0x144   : > { %v4435_v42 = vor.u32 %v4434_v25, %v4430_v14  ;;  %v4456_v20 = vshrl.u32 %v15150_v38, 16  ;;  %v4445_v63 = vrot.slane %v4443_v16, 4  ;;  %v4462_v0 = vshll.u32 %v15161_v12, 16 }
 0x145   : > { %v4426_v39 = vrot.slane %v4425_v36, 4  ;;  %v4448_v2 = vrot.slane %v4446_v23, 5  ;;  %v4454_v18 = vrot.slane %v4452_v31, 5  ;;  %v15178_v25 = vadd.f32 %v15020_v33, %v15062_v9  ;;  %v15180_v36 = vld [vmem:[#allocation2 + $0x68] sm:$0x1] }
 0x146   : > { %v4436_v37 = vrot.slane %v4435_v42, 4  ;;  %v4458_v51 = vrot.slane %v4456_v20, 4  ;;  %v4464_v50 = vrot.slane %v4462_v0, 5  ;;  %v15186_v31 = vadd.f32 %v15064_v60, %v15106_v35  ;;  %v15188_v20 = vpop.f32.mrf.mxu1  ;;  %v4295_v0 = vld [vmem:[#allocation2 + $0x6c] sm:$0xf] }
 0x147   : > { %v4431_v45 = vsel %vm13850_vm14, %v4426_v39, %v4430_v14  ;;  %v4449_v42 = vor.u32 %v4448_v2, %v4445_v63  ;;  %v4467_v39 = vshrl.u32 %v4292_v17, 16  ;;  %v4470_v33 = vshll.u32 %v4292_v17, 16  ;;  %v15195_v35 = vld [vmem:[#allocation2 + $0x70] sm:$0xf] }
 0x148   : > { %13081 = vmatmul.mubr.msk.bf16.gmra.mxu1 %vm1398_vm11, %v12035_v27  ;;  %v4441_v16 = vsel %vm13850_vm14, %v4436_v37, %v4440_v11  ;;  %v4459_v23 = vor.u32 %v4458_v51, %v4454_v18  ;;  %18913 = vst [vmem:[#allocation16_spill] sm:$0xff] %v15186_v31  ;;  %v12856_v27 = vpop.f32.mrf.mxu0  ;;  %v4476_v9 = vshll.u32 %v15171_v22, 16  ;;  %v4480_v37 = vshrl.u32 %v15171_v22, 16  ;;  %v15208_v59 = vpop.f32.mrf.mxu1 }
 0x149   : > { %v12036_v14 = vcombine.low %v4431_v45, %v4441_v16  ;;  %v4450_v11 = vrot.slane %v4449_v42, 4  ;;  %v4486_v60 = vshll.u32 %v15180_v36, 16  ;;  %v4469_v2 = vrot.slane %v4467_v39, 4  ;;  %v15202_v45 = vld [vmem:[#allocation2 + $0x74] sm:$0x1]  ;;  %18915 = vst [vmem:[#allocation18_spill] sm:$0xff] %v15208_v59 }
 0x14a   : > { %13047 = vmatmul.mubr.msk.bf16.gmra.mxu0 %vm1398_vm11, %v13543_v47  ;;  %v4460_v63 = vrot.slane %v4459_v23, 4  ;;  %v4472_v47 = vrot.slane %v4470_v33, 5  ;;  %v4478_v51 = vrot.slane %v4476_v9, 5  ;;  %v15200_v17 = vadd.f32 %v15088_v43, %v15121_v19  ;;  %v1549_v56 = vpop.f32.mrf.mxu0  ;;  %v13546_v43 = vld [vmem:[#allocation2 + $0x60] sm:$0xff]  }
 0x14b   : > { %13050 = vmatprep.mubr.msk.bf16.mxu0 %vm1398_vm11, %v13544_v40  ;;  %13084 = vmatprep.mubr.msk.bf16.mxu1 %vm1398_vm11, %v12036_v14  ;;  %v4455_v40 = vsel %vm13850_vm14, %v4450_v11, %v4454_v18  ;;  %v4482_v42 = vrot.slane %v4480_v37, 4  ;;  %v4488_v23 = vrot.slane %v4486_v60, 5  ;;  %v13545_v14 = vld [vmem:[#allocation2 + $0x54] sm:$0xff]   ;;  %v4491_v9 = vshrl.u32 %v4295_v0, 16 }
 0x14c   : > { %18914 = vst [vmem:[#allocation17_spill] sm:$0xff] %v15200_v17  ;;  %v4465_v16 = vsel %vm13850_vm14, %v4460_v63, %v4464_v50  ;;  %v4473_v33 = vor.u32 %v4472_v47, %v4469_v2  ;;  %v4494_v13 = vshll.u32 %v4295_v0, 16  ;;  %v4500_v4 = vshll.u32 %v15195_v35, 16  ;;  %v4298_v37 = vld [vmem:[#allocation2 + $0x78] sm:$0xf]  ;;  %v12857_v0 = vpop.f32.mrf.mxu0  ;;  %v12894_v47 = vpop.f32.mrf.mxu1 }
 0x14d   : > { %v12037_v39 = vcombine.low %v4455_v40, %v4465_v16  ;;  %v4483_v19 = vor.u32 %v4482_v42, %v4478_v51  ;;  %v4504_v54 = vshrl.u32 %v15195_v35, 16  ;;  %v4510_v18 = vshll.u32 %v15202_v45, 16  ;;  %v15214_v2 = vld [vmem:[#allocation2 + $0x7c] sm:$0xf] }
 0x14e   : > { %v4474_v50 = vrot.slane %v4473_v33, 4  ;;  %v4493_v11 = vrot.slane %v4491_v9, 4  ;;  %v4496_v63 = vrot.slane %v4494_v13, 5  ;;  %v4502_v59 = vrot.slane %v4500_v4, 5  ;;  %v15223_v13 = vld [vmem:[#allocation2 + $0x80] sm:$0x1] }
 0x14f   : > { %v4484_v60 = vrot.slane %v4483_v19, 4  ;;  %v4506_v40 = vrot.slane %v4504_v54, 4  ;;  %v4512_v5 = vrot.slane %v4510_v18, 5  ;;  %v15229_v33 = vadd.f32 %v15146_v53, %v12856_v27  ;;  %v13547_v53 = vld [vmem:[#allocation2 + $0x6c] sm:$0xff]  }
 0x150   : > { %13085 = vmatmul.mubr.msk.bf16.gmra.mxu1 %vm1398_vm11, %v12037_v39  ;;  %v4479_v16 = vsel %vm13850_vm14, %v4474_v50, %v4478_v51  ;;  %v4497_v42 = vor.u32 %v4496_v63, %v4493_v11  ;;  %v15221_v39 = vadd.f32 %v15108_v44, %v15144_v49  ;;  %v4518_v19 = vshll.u32 %v4298_v37, 16  ;;  %v4301_v50 = vld [vmem:[#allocation2 + $0x84] sm:$0xf]  ;;  %v15234_v63 = vld [vmem:[#allocation2 + $0x88] sm:$0xf] }
 0x151   : > { %v4489_v4 = vsel %vm13850_vm14, %v4484_v60, %v4488_v23  ;;  %v4507_v54 = vor.u32 %v4506_v40, %v4502_v59  ;;  %18917 = vst [vmem:[#allocation20_spill] sm:$0xff] %v15229_v33  ;;  %v4524_v18 = vshll.u32 %v15214_v2, 16  ;;  %v4528_v11 = vshrl.u32 %v15214_v2, 16  ;;  %v15236_v23 = vpop.f32.mrf.mxu0  ;;  %v1857_v60 = vpop.f32.mrf.mxu1 }
 0x152   : > { %13051 = vmatmul.mubr.msk.bf16.gmra.mxu0 %vm1398_vm11, %v13545_v14  ;;  %18916 = vst [vmem:[#allocation19_spill] sm:$0xff] %v15221_v39  ;;  %v4515_v14 = vshrl.u32 %v4298_v37, 16  ;;  %v12038_v9 = vcombine.low %v4479_v16, %v4489_v4  ;;  %v4498_v51 = vrot.slane %v4497_v42, 4  ;;  %18918 = vst [vmem:[#allocation21_spill] sm:$0xff] %v15236_v23  ;;  %v4520_v37 = vrot.slane %v4518_v19, 5 }
 0x153   : > { %13054 = vmatprep.mubr.msk.bf16.mxu0 %vm1398_vm11, %v13546_v43  ;;  %v4508_v44 = vrot.slane %v4507_v54, 4  ;;  %v4534_v43 = vshll.u32 %v15223_v13, 16  ;;  %v4526_v40 = vrot.slane %v4524_v18, 5  ;;  %v15242_v16 = vadd.f32 %v15168_v58, %v1549_v56  ;;  %v15244_v42 = vld [vmem:[#allocation2 + $0x8c] sm:$0x1]  ;;  %v13548_v54 = vld [vmem:[#allocation2 + $0x78] sm:$0xff]   ;;  %v12860_v58 = vpop.f32.mrf.mxu0 }
 0x154   : > { %v4517_v49 = vrot.slane %v4515_v14, 4  ;;  %13088 = vmatprep.mubr.msk.bf16.mxu1 %vm1398_vm11, %v12038_v9  ;;  %v4503_v27 = vsel %vm13850_vm14, %v4498_v51, %v4502_v59  ;;  %v4530_v14 = vrot.slane %v4528_v11, 4  ;;  %v4539_v33 = vshrl.u32 %v4301_v50, 16  ;;  %v4304_v18 = vld [vmem:[#allocation2 + $0x90] sm:$0xf] }
 0x155   : > { %18919 = vst [vmem:[#allocation22_spill] sm:$0xff] %v15242_v16  ;;  %v4513_v4 = vsel %vm13850_vm14, %v4508_v44, %v4512_v5  ;;  %v4536_v23 = vrot.slane %v4534_v43, 5  ;;  %v4542_v9 = vshll.u32 %v4301_v50, 16  ;;  %v4548_v17 = vshll.u32 %v15234_v63, 16  ;;  %v15251_v16 = vpop.f32.mrf.mxu1  ;;  %v15258_v11 = vld [vmem:[#allocation2 + $0x94] sm:$0xf] }
 0x156   : > { %v12039_v39 = vcombine.low %v4503_v27, %v4513_v4  ;;  %v4521_v52 = vor.u32 %v4520_v37, %v4517_v49  ;;  %v4531_v59 = vor.u32 %v4530_v14, %v4526_v40  ;;  %v4541_v51 = vrot.slane %v4539_v33, 4  ;;  %18921 = vst [vmem:[#allocation24_spill] sm:$0xff] %v15258_v11 }
 0x157   : > { %v4552_v19 = vshrl.u32 %v15234_v63, 16  ;;  %v4558_v56 = vshll.u32 %v15244_v42, 16  ;;  %v4544_v44 = vrot.slane %v4542_v9, 5  ;;  %v4550_v49 = vrot.slane %v4548_v17, 5 }
 0x158   : > { %13089 = vmatmul.mubr.msk.bf16.gmra.mxu1 %vm1398_vm11, %v12039_v39  ;;  %v4522_v5 = vrot.slane %v4521_v52, 4  ;;  %v15256_v50 = vadd.f32 %v15188_v20, %v12857_v0  ;;  %v4532_v43 = vrot.slane %v4531_v59, 4  ;;  %v15264_v39 = vadd.f32 %v12894_v47, %v12860_v58  ;;  %v15266_v52 = vld [vmem:[#allocation2 + $0x98] sm:$0x1]  ;;  %v4307_v59 = vld [vmem:[#allocation2 + $0x9c] sm:$0xf] }
 0x159   : > { %v4554_v27 = vrot.slane %v4552_v19, 4  ;;  %v4560_v37 = vrot.slane %v4558_v56, 5  ;;  %v4545_v4 = vor.u32 %v4544_v44, %v4541_v51  ;;  %18923 = vst [vmem:[#allocation26_spill] sm:$0xff] %v15266_v52  ;;  %v4563_v17 = vshrl.u32 %v4304_v18, 16  ;;  %v15271_v19 = vpop.f32.mrf.mxu1  ;;  %v13549_v56 = vld [vmem:[#allocation2 + $0x84] sm:$0xff]   ;;  %v13550_v51 = vld [vmem:[#allocation2 + $0x90] sm:$0xff]  }
 0x15a   : > { %13055 = vmatmul.mubr.msk.bf16.gmra.mxu0 %vm1398_vm11, %v13547_v53  ;;  %18920 = vst [vmem:[#allocation23_spill] sm:$0xff] %v15256_v50  ;;  %v4527_v53 = vsel %vm13850_vm14, %v4522_v5, %v4526_v40  ;;  %18922 = vst [vmem:[#allocation25_spill] sm:$0xff] %v15264_v39  ;;  %v4537_v20 = vsel %vm13850_vm14, %v4532_v43, %v4536_v23  ;;  %v4566_v14 = vshll.u32 %v4304_v18, 16  ;;  %v4572_v9 = vshll.u32 %v15258_v11, 16  ;;  %v15275_v43 = vld [vmem:[#allocation2 + $0xa0] sm:$0xf] }
 0x15b   : > { %13058 = vmatprep.mubr.msk.bf16.mxu0 %vm1398_vm11, %v13548_v54  ;;  %v4555_v0 = vor.u32 %v4554_v27, %v4550_v49  ;;  %v1565_v54 = vpop.f32.mrf.mxu0  ;;  %18924 = vst [vmem:[#allocation27_spill] sm:$0xff] %v15271_v19  ;;  %v12040_v33 = vcombine.low %v4527_v53, %v4537_v20  ;;  %v4546_v40 = vrot.slane %v4545_v4, 4  ;;  %v4565_v47 = vrot.slane %v4563_v17, 4  ;;  %18925 = vst [vmem:[#allocation28_spill] sm:$0xff] %v15275_v43  ;;  %v15282_v53 = vld [vmem:[#allocation2 + $0xa4] sm:$0x1] }
 0x15c   : > { %v4576_v58 = vshrl.u32 %v15258_v11, 16  ;;  %v4568_v44 = vrot.slane %v4566_v14, 5  ;;  %v4574_v39 = vrot.slane %v4572_v9, 5  ;;  %v4582_v23 = vshll.u32 %v15266_v52, 16  ;;  %18927 = vst [vmem:[#allocation30_spill] sm:$0xff] %v15282_v53 }
 0x15d   : > { %v4556_v5 = vrot.slane %v4555_v0, 4  ;;  %13092 = vmatprep.mubr.msk.bf16.mxu1 %vm1398_vm11, %v12040_v33  ;;  %v4551_v18 = vsel %vm13850_vm14, %v4546_v40, %v4550_v49  ;;  %v15280_v19 = vadd.f32 %v1857_v60, %v1565_v54  ;;  %v4587_v4 = vshrl.u32 %v4307_v59, 16  ;;  %v12861_v9 = vpop.f32.mrf.mxu0  ;;  %v4310_v60 = vld [vmem:[#allocation2 + $0xa8] sm:$0xf] }
 0x15e   : > { %v4578_v27 = vrot.slane %v4576_v58, 4  ;;  %v4569_v20 = vor.u32 %v4568_v44, %v4565_v47  ;;  %v4584_v0 = vrot.slane %v4582_v23, 5  ;;  %v4590_v14 = vshll.u32 %v4307_v59, 16  ;;  %v15291_v47 = vld [vmem:[#allocation2 + $0xac] sm:$0xf] }
 0x15f   : > { %18926 = vst [vmem:[#allocation29_spill] sm:$0xff] %v15280_v19  ;;  %v4561_v17 = vsel %vm13850_vm14, %v4556_v5, %v4560_v37  ;;  %v4589_v31 = vrot.slane %v4587_v4, 4  ;;  %v4596_v49 = vshll.u32 %v15275_v43, 16  ;;  %v4600_v58 = vshrl.u32 %v15275_v43, 16  ;;  %18928 = vst [vmem:[#allocation31_spill] sm:$0xff] %v15291_v47 }
 0x160   : > { %v12898_v50 = vpop.f32.mrf.mxu1  ;;  %v12041_v33 = vcombine.low %v4551_v18, %v4561_v17  ;;  %v4579_v52 = vor.u32 %v4578_v27, %v4574_v39  ;;  %v4570_v54 = vrot.slane %v4569_v20, 4  ;;  %v4592_v40 = vrot.slane %v4590_v14, 5  ;;  %v15300_v17 = vpop.f32.mrf.mxu0  ;;  %v15302_v20 = vld [vmem:[#allocation2 + $0xb0] sm:$0x1]  ;;  %v13551_v14 = vld [vmem:[#allocation2 + $0x9c] sm:$0xff]  }
 0x161   : > { %v4606_v37 = vshll.u32 %v15282_v53, 16  ;;  %v4598_v44 = vrot.slane %v4596_v49, 5  ;;  %v15296_v23 = vadd.f32 %v15251_v16, %v12861_v9  ;;  %v4602_v27 = vrot.slane %v4600_v58, 4  ;;  %18930 = vst [vmem:[#allocation33_spill] sm:$0xff] %v15300_v17  ;;  %18931 = vst [vmem:[#allocation34_spill] sm:$0xff] %v15302_v20 }
 0x162   : > { %13059 = vmatmul.mubr.msk.bf16.gmra.mxu0 %vm1398_vm11, %v13549_v56  ;;  %v1873_v59 = vpop.f32.mrf.mxu1  ;;  %13093 = vmatmul.mubr.msk.bf16.gmra.mxu1 %vm1398_vm11, %v12041_v33  ;;  %v4580_v56 = vrot.slane %v4579_v52, 4  ;;  %v4593_v18 = vor.u32 %v4592_v40, %v4589_v31  ;;  %v4611_v33 = vshrl.u32 %v4310_v60, 16  ;;  %v4614_v52 = vshll.u32 %v4310_v60, 16  ;;  %v4313_v16 = vld [vmem:[#allocation2 + $0xb4] sm:$0xf] }
 0x163   : > { %13062 = vmatprep.mubr.msk.bf16.mxu0 %vm1398_vm11, %v13550_v51  ;;  %18929 = vst [vmem:[#allocation32_spill] sm:$0xff] %v15296_v23  ;;  %v4575_v51 = vsel %vm13850_vm14, %v4570_v54, %v4574_v39  ;;  %v4608_v4 = vrot.slane %v4606_v37, 5  ;;  %v4620_v49 = vshll.u32 %v15291_v47, 16  ;;  %v4603_v19 = vor.u32 %v4602_v27, %v4598_v44  ;;  %v13552_v39 = vld [vmem:[#allocation2 + $0xa8] sm:$0xff]   ;;  %v15309_v53 = vld [vmem:[#allocation2 + $0xb8] sm:$0xf] }
 0x164   : > { %v4585_v5 = vsel %vm13850_vm14, %v4580_v56, %v4584_v0  ;;  %v4594_v23 = vrot.slane %v4593_v18, 4  ;;  %v4624_v31 = vshrl.u32 %v15291_v47, 16  ;;  %v12899_v54 = vpop.f32.mrf.mxu1  ;;  %v4613_v40 = vrot.slane %v4611_v33, 4  ;;  %18932 = vst [vmem:[#allocation35_spill] sm:$0xff] %v15309_v53 }
 0x165   : > { %v12042_v9 = vcombine.low %v4575_v51, %v4585_v5  ;;  %v4616_v58 = vrot.slane %v4614_v52, 5  ;;  %v4622_v37 = vrot.slane %v4620_v49, 5  ;;  %v4630_v17 = vshll.u32 %v15302_v20, 16  ;;  %v15317_v52 = vld [vmem:[#allocation2 + $0xbc] sm:$0x1] }
 0x166   : > { %v4599_v0 = vsel %vm13850_vm14, %v4594_v23, %v4598_v44  ;;  %v4604_v60 = vrot.slane %v4603_v19, 4  ;;  %v4626_v56 = vrot.slane %v4624_v31, 4  ;;  %v4635_v51 = vshrl.u32 %v4313_v16, 16  ;;  %18934 = vst [vmem:[#allocation37_spill] sm:$0xff] %v15317_v52  ;;  %v15323_v31 = vpop.f32.mrf.mxu1 }
 0x167   : > { %13096 = vmatprep.mubr.msk.bf16.mxu1 %vm1398_vm11, %v12042_v9  ;;  %v4617_v27 = vor.u32 %v4616_v58, %v4613_v40  ;;  %v4632_v33 = vrot.slane %v4630_v17, 5  ;;  %v4638_v49 = vshll.u32 %v4313_v16, 16  ;;  %v4644_v23 = vshll.u32 %v15309_v53, 16  ;;  %18935 = vst [vmem:[#allocation38_spill] sm:$0xff] %v15323_v31 }
 0x168   : > { %v12864_v5 = vpop.f32.mrf.mxu0  ;;  %v4609_v20 = vsel %vm13850_vm14, %v4604_v60, %v4608_v4  ;;  %v4627_v9 = vor.u32 %v4626_v56, %v4622_v37  ;;  %v4637_v19 = vrot.slane %v4635_v51, 4  ;;  %v4654_v4 = vshll.u32 %v15317_v52, 16  ;;  %v13553_v60 = vld [vmem:[#allocation2 + $0xb4] sm:$0xff]  }
 0x169   : > { %v15315_v18 = vadd.f32 %v12898_v50, %v12864_v5  ;;  %v12043_v50 = vcombine.low %v4599_v0, %v4609_v20  ;;  %v4618_v5 = vrot.slane %v4617_v27, 4  ;;  %v4640_v17 = vrot.slane %v4638_v49, 5  ;;  %v15334_v20 = vld [vmem:[#allocation2 + $0xc4] sm:$0xf]  ;;  %v4319_v0 = vld [vmem:[#allocation2 + $0xcc] sm:$0xf] }
 0x16a   : > { %13063 = vmatmul.mubr.msk.bf16.gmra.mxu0 %vm1398_vm11, %v13551_v14  ;;  %v1581_v44 = vpop.f32.mrf.mxu0  ;;  %v4316_v14 = vld [vmem:[#allocation2 + $0xc0] sm:$0xf]  ;;  %v4628_v58 = vrot.slane %v4627_v9, 4  ;;  %v4646_v16 = vrot.slane %v4644_v23, 5  ;;  %18938 = vst [vmem:[#allocation41_spill] sm:$0xff] %v15334_v20  ;;  %vm6603_vm0 = vcmask 1043456  }
 0x16b   : > { %18933 = vst [vmem:[#allocation36_spill] sm:$0xff] %v15315_v18  ;;  %13066 = vmatprep.mubr.msk.bf16.mxu0 %vm1398_vm11, %v13552_v39  ;;  %v15325_v40 = vadd.f32 %v1873_v59, %v1581_v44  ;;  %v4648_v18 = vshrl.u32 %v15309_v53, 16  ;;  %13097 = vmatmul.mubr.msk.bf16.gmra.mxu1 %vm1398_vm11, %v12043_v50  ;;  %v4623_v56 = vsel %vm13850_vm14, %v4618_v5, %v4622_v37  ;;  %v4659_v59 = vshrl.u32 %v4316_v14, 16  ;;  %v13554_v44 = vld [vmem:[#allocation2 + $0xc0] sm:$0xff]   ;;  %v15339_v50 = vld [vmem:[#allocation2 + $0xc8] sm:$0x1] }
 0x16c   : > { %v12865_v39 = vpop.f32.mrf.mxu0  ;;  %v4641_v51 = vor.u32 %v4640_v17, %v4637_v19  ;;  %v4633_v49 = vsel %vm13850_vm14, %v4628_v58, %v4632_v33  ;;  %18939 = vst [vmem:[#allocation42_spill] sm:$0xff] %v15339_v50  ;;  %v4656_v19 = vrot.slane %v4654_v4, 5  ;;  %v15343_v53 = vld [vmem:[#allocation2 + $0xd0] sm:$0xf]  ;;  %v4678_v33 = vshll.u32 %v15339_v50, 16 }
 0x16d   : > { %18936 = vst [vmem:[#allocation39_spill] sm:$0xff] %v15325_v40  ;;  %v15332_v31 = vadd.f32 %v12899_v54, %v12865_v39  ;;  %v4650_v9 = vrot.slane %v4648_v18, 4  ;;  %v4662_v40 = vshll.u32 %v4316_v14, 16  ;;  %v12044_v52 = vcombine.low %v4623_v56, %v4633_v49  ;;  %v15353_v49 = vld [vmem:[#allocation2 + $0xd4] sm:$0x1] }
 0x16e   : > { %v12902_v23 = vpop.f32.mrf.mxu1  ;;  %v4642_v37 = vrot.slane %v4641_v51, 4  ;;  %v4661_v54 = vrot.slane %v4659_v59, 4  ;;  %v4668_v39 = vshll.u32 %v15334_v20, 16  ;;  %v4683_v14 = vshrl.u32 %v4319_v0, 16 }
 0x16f   : > { %18937 = vst [vmem:[#allocation40_spill] sm:$0xff] %v15332_v31  ;;  %v4651_v5 = vor.u32 %v4650_v9, %v4646_v16  ;;  %v4664_v17 = vrot.slane %v4662_v40, 5  ;;  %v4672_v31 = vshrl.u32 %v15334_v20, 16  ;;  %13100 = vmatprep.mubr.msk.bf16.mxu1 %vm1398_vm11, %v12044_v52  ;;  %v4686_v58 = vshll.u32 %v4319_v0, 16  ;;  %v15350_v40 = vpop.f32.mrf.mxu0 }
 0x170   : > { %v1889_v27 = vpop.f32.mrf.mxu1  ;;  %v4647_v18 = vsel %vm13850_vm14, %v4642_v37, %v4646_v16  ;;  %18940 = vst [vmem:[#allocation43_spill] sm:$0xff] %v15350_v40  ;;  %v4670_v51 = vrot.slane %v4668_v39, 5  ;;  %v4680_v9 = vrot.slane %v4678_v33, 5  ;;  %v4685_v52 = vrot.slane %v4683_v14, 4  ;;  %v5000_v37 = vld [vmem:[#allocation2 + $0x18] sm:$0xe] }
 0x171   : > { %v4652_v4 = vrot.slane %v4651_v5, 4  ;;  %v4665_v56 = vor.u32 %v4664_v17, %v4661_v54  ;;  %v4674_v59 = vrot.slane %v4672_v31, 4  ;;  %v4688_v20 = vrot.slane %v4686_v58, 5  ;;  %v13555_v31 = vld [vmem:[#allocation2 + $0xcc] sm:$0xff]   ;;  %v5001_v14 = vld [vmem:[#allocation2 + $0x24] sm:$0xe] }
 0x172   : > { %13067 = vmatmul.mubr.msk.bf16.gmra.mxu0 %vm1398_vm11, %v13553_v60  ;;  %v12903_v60 = vpop.f32.mrf.mxu1  ;;  %v4692_v16 = vshll.u32 %v15343_v53, 16  ;;  %v4696_v40 = vshrl.u32 %v15343_v53, 16  ;;  %v4702_v33 = vshll.u32 %v15353_v49, 16  ;;  %vm6554_vm6 = vcmask 64512  }
 0x173   : > { %13070 = vmatprep.mubr.msk.bf16.mxu0 %vm1398_vm11, %v13554_v44  ;;  %v4657_v0 = vsel %vm13850_vm14, %v4652_v4, %v4656_v19  ;;  %v4666_v5 = vrot.slane %v4665_v56, 4  ;;  %v4675_v50 = vor.u32 %v4674_v59, %v4670_v51  ;;  %v4689_v17 = vor.u32 %v4688_v20, %v4685_v52 }
 0x174   : > { %v15359_v44 = vpop.f32.mrf.mxu1  ;;  %v12045_v54 = vcombine.low %v4647_v18, %v4657_v0  ;;  %v4694_v39 = vrot.slane %v4692_v16, 5  ;;  %v4698_v11 = vrot.slane %v4696_v40, 4  ;;  %v12064_v19 = vrot.slane %v5000_v37, 9  ;;  %v5002_v40 = vld [vmem:[#allocation2 + $0x30] sm:$0xe] }
 0x175   : > { %18941 = vst [vmem:[#allocation44_spill] sm:$0xff] %v15359_v44  ;;  %v4671_v47 = vsel %vm13850_vm14, %v4666_v5, %v4670_v51  ;;  %v4676_v43 = vrot.slane %v4675_v50, 4  ;;  %v4690_v59 = vrot.slane %v4689_v17, 4  ;;  %v4704_v18 = vrot.slane %v4702_v33, 5 }
 0x176   : > { %v12942_v4 = vpop.f32.mrf.mxu1  ;;  %13101 = vmatmul.mubr.msk.bf16.gmra.mxu1 %vm1398_vm11, %v12045_v54  ;;  %v5066_v20 = vrot.slane %v15016_v3, 5  ;;  %v4699_v0 = vor.u32 %v4698_v11, %v4694_v39  ;;  %v5069_v44 = vrot.slane %v15026_v29, 5  ;;  %v12065_v51 = vrot.slane %v5001_v14, 9 }
 0x177   : > { %v12868_v58 = vpop.f32.mrf.mxu0  ;;  %v4681_v52 = vsel %vm13850_vm14, %v4676_v43, %v4680_v9  ;;  %v4695_v5 = vsel %vm13850_vm14, %v4690_v59, %v4694_v39  ;;  %v5003_v43 = vld [vmem:[#allocation2 + $0x3c] sm:$0xe]  ;;  %v18942_v29 = vrot.slane %v15039_v24, 5  ;;  %v12066_v39 = vrot.slane %v5002_v40, 9 }
 0x178   : > { %v15365_v56 = vadd.f32 %v12902_v23, %v12868_v58  ;;  %v15371_v50 = vpop.f32.mrf.mxu1  ;;  %v12046_v37 = vcombine.low %v4671_v47, %v4681_v52  ;;  %v5067_v3 = vsel %vm14250_vm10, %v12064_v19, %v5066_v20  ;;  %v4700_v9 = vrot.slane %v4699_v0, 4  ;;  %v5004_v19 = vld [vmem:[#allocation2 + $0x48] sm:$0xe] }
 0x179   : > { %v1597_v16 = vpop.f32.mrf.mxu0  ;;  %v5068_v54 = vrot.slane %v5066_v20, 4  ;;  %v5074_v17 = vsel %vm14250_vm10, %v12065_v51, %v18942_v29  ;;  %v5080_v14 = vrot.slane %v15074_v34, 5  ;;  %v5083_v58 = vrot.slane %v15084_v28, 5  ;;  %v5005_v34 = vld [vmem:[#allocation2 + $0x54] sm:$0xe] }
 0x17a   : > { %13071 = vmatmul.mubr.msk.bf16.gmra.mxu0 %vm1398_vm11, %v13555_v31  ;;  %v15374_v23 = vadd.f32 %v1889_v27, %v1597_v16  ;;  %v18943_v31 = vmov %v18942_v29  ;;  %v12943_v27 = vpop.f32.mrf.mxu1  ;;  %13104 = vmatprep.mubr.msk.bf16.mxu1 %vm1398_vm11, %v12046_v37  ;;  %v4705_v59 = vsel %vm13850_vm14, %v4700_v9, %v4704_v18  ;;  %v18944_v52 = vrot.slane %v15047_v26, 5 }
 0x17b   : > { %v12869_v11 = vpop.f32.mrf.mxu0  ;;  %v5075_v47 = vrot.slane %v18943_v31, 4  ;;  %v5070_v24 = vsel %vm14250_vm10, %v5068_v54, %v5069_v44  ;;  %v12067_v0 = vrot.slane %v5003_v43, 9  ;;  %v5104_v28 = vrot.slane %v15161_v12, 5 }
 0x17c   : > { %v15387_v33 = vadd.f32 %v12903_v60, %v12869_v11  ;;  %v15401_v16 = vpop.f32.mrf.mxu1  ;;  %v12047_v51 = vcombine.low %v4695_v5, %v4705_v59  ;;  %v12081_v40 = vcombine.low %v5067_v3, %v5070_v24  ;;  %v5081_v9 = vsel %vm14250_vm10, %v12066_v39, %v5080_v14 }
 0x17d   : > { %v15393_v20 = vpop.f32.mrf.mxu0  ;;  %v5077_v60 = vsel %vm14250_vm10, %v5075_v47, %v18944_v52  ;;  %v5082_v11 = vrot.slane %v5080_v14, 4  ;;  %v5087_v44 = vrot.slane %v15101_v1, 5  ;;  %v12068_v54 = vrot.slane %v5004_v19, 9 }
 0x17e   : > { %v12082_v37 = vcombine.low %v5074_v17, %v5077_v60  ;;  %v12946_v26 = vpop.f32.mrf.mxu1  ;;  %13105 = vmatmul.mubr.msk.bf16.gmra.mxu1 %vm1398_vm11, %v12047_v51  ;;  %13110 = vmatprep.mubr.msk.bf16.mxu0 %vm1398_vm11, %v12081_v40  ;;  %v5094_v12 = vrot.slane %v15119_v10, 5  ;;  %v5097_v5 = vrot.slane %v15137_v6, 5  ;;  %v12069_v3 = vrot.slane %v5005_v34, 9 }
 0x17f   : > { %v12908_v18 = vpop.f32.mrf.mxu0  ;;  %v5084_v17 = vsel %vm14250_vm10, %v5082_v11, %v5083_v58  ;;  %v5088_v1 = vsel %vm14250_vm10, %v12067_v0, %v5087_v44  ;;  %v5089_v31 = vrot.slane %v5087_v44, 4  ;;  %v5101_v39 = vrot.slane %v15150_v38, 5 }
 0x180   : > { %v2331_v43 = vadd.f32 %v12908_v18, %v15033_v8  ;;  %v2576_v47 = vpop.f32.mrf.mxu1  ;;  %v12083_v10 = vcombine.low %v5081_v9, %v5084_v17  ;;  %v5095_v6 = vsel %vm14250_vm10, %v12068_v54, %v5094_v12  ;;  %v18945_v58 = vrot.slane %v15104_v55, 5  ;;  %v5007_v55 = vld [vmem:[#allocation2 + $0x6c] sm:$0xe] }
 0x181   : > { %v2202_v29 = vpop.f32.mrf.mxu0  ;;  %v5096_v52 = vrot.slane %v5094_v12, 4  ;;  %v15429_v38 = vsel %vm14250_vm10, %v12069_v3, %v5101_v39  ;;  %v5103_v60 = vrot.slane %v5101_v39, 4  ;;  %v5111_v3 = vrot.slane %v15180_v36, 5 }
 0x182   : > { %13111 = vmatmul.mubr.msk.bf16.vlgmr.msra.gmra.mxu0 %vm1398_vm11, %v12082_v37  ;;  %v2329_v8 = vadd.f32 %v2202_v29, %v15045_v21  ;;  %v15419_v14 = vadd.f32 %v12942_v4, %v2331_v43  ;;  %v5091_v59 = vsel %vm14250_vm10, %v5089_v31, %v18945_v58  ;;  %v12947_v24 = vpop.f32.mrf.mxu1  ;;  %v5006_v21 = vld [vmem:[#allocation2 + $0x60] sm:$0xe]  ;;  %v5118_v4 = vrot.slane %v15202_v45, 5 }
 0x183   : > { %v12909_v19 = vpop.f32.mrf.mxu0  ;;  %13114 = vmatprep.mubr.msk.bf16.mxu0 %vm1398_vm11, %v12083_v10  ;;  %v12084_v40 = vcombine.low %v5088_v1, %v5091_v59  ;;  %v5098_v37 = vsel %vm14250_vm10, %v5096_v52, %v5097_v5  ;;  %v5105_v9 = vsel %vm14250_vm10, %v5103_v60, %v5104_v28  ;;  %v5108_v45 = vrot.slane %v15171_v22, 5  ;;  %v5009_v1 = vld [vmem:[#allocation2 + $0x84] sm:$0xe] }
 0x184   : > { %v2332_v0 = vadd.f32 %v12909_v19, %v15070_v7  ;;  %v15434_v34 = vadd.f32 %v15371_v50, %v2329_v8  ;;  %v15441_v18 = vpop.f32.mrf.mxu1  ;;  %v12085_v50 = vcombine.low %v5095_v6, %v5098_v37  ;;  %v12086_v11 = vcombine.low %v15429_v38, %v5105_v9  ;;  %v5008_v38 = vld [vmem:[#allocation2 + $0x78] sm:$0xe] }
 0x185   : > { %v15437_v51 = vpop.f32.mrf.mxu0  ;;  %v12070_v44 = vrot.slane %v5006_v21, 9  ;;  %v5110_v12 = vrot.slane %v5108_v45, 4  ;;  %v12071_v29 = vrot.slane %v5007_v55, 9  ;;  %v5115_v5 = vrot.slane %v15195_v35, 5 }
 0x186   : > { %v15446_v7 = vadd.f32 %v12943_v27, %v2332_v0  ;;  %v12950_v43 = vpop.f32.mrf.mxu1  ;;  %v5122_v35 = vrot.slane %v15214_v2, 5  ;;  %v12073_v58 = vrot.slane %v5009_v1, 9  ;;  %v5132_v2 = vrot.slane %v15244_v42, 5 }
 0x187   : > { %v12912_v54 = vpop.f32.mrf.mxu0  ;;  %v5116_v22 = vsel %vm14250_vm10, %v12071_v29, %v5115_v5  ;;  %v5117_v27 = vrot.slane %v5115_v5, 4  ;;  %v5109_v36 = vsel %vm14250_vm10, %v12070_v44, %v5108_v45  ;;  %v5112_v6 = vsel %vm14250_vm10, %v5110_v12, %v5111_v3 }
 0x188   : > { %v2335_v17 = vadd.f32 %v12912_v54, %v15082_v46  ;;  %v2592_v31 = vpop.f32.mrf.mxu1  ;;  %v5124_v9 = vrot.slane %v5122_v35, 4  ;;  %v5125_v45 = vrot.slane %v15223_v13, 5  ;;  %v1813_v3 = vadd.f32 %v15051_v15, %v15086_v30 }
 0x189   : > { %v2218_v28 = vpop.f32.mrf.mxu0  ;;  %v5119_v19 = vsel %vm14250_vm10, %v5117_v27, %v5118_v4  ;;  %vm11094_vm4 = vcmask 58368   ;;  %vm11609_vm8 = vcmask 1042434   ;;  %vm11613_vm12 = vcmask 1044484  }
 0x18a   : > { %13115 = vmatmul.mubr.msk.bf16.gmra.mxu0 %vm1398_vm11, %v12084_v40  ;;  %v2333_v39 = vadd.f32 %v2218_v28, %v15113_v61  ;;  %v15456_v8 = vadd.f32 %v12946_v26, %v2335_v17  ;;  %v12951_v46 = vpop.f32.mrf.mxu1  ;;  %v5129_v61 = vrot.slane %v15234_v63, 5  ;;  %v12088_v52 = vcombine.low %v5116_v22, %v5119_v19 }
 0x18b   : > { %v12913_v10 = vpop.f32.mrf.mxu0  ;;  %13118 = vmatprep.mubr.msk.bf16.mxu0 %vm1398_vm11, %v12085_v50  ;;  %v12087_v40 = vcombine.low %v5109_v36, %v5112_v6  ;;  %v18948_v6 = vld [vmem:[#allocation26_spill] sm:$0xff]  ;;  %vm11615_vm13 = vcmask 1045509  }
 0x18c   : > { %v2336_v26 = vadd.f32 %v12913_v10, %v15129_v57  ;;  %v15468_v59 = vadd.f32 %v2576_v47, %v2333_v39  ;;  %v15473_v21 = vpop.f32.mrf.mxu1  ;;  %v15477_v0 = vsel %vm14250_vm10, %v12073_v58, %v5129_v61  ;;  %v5131_v4 = vrot.slane %v5129_v61, 4 }
 0x18d   : > { %v15471_v60 = vpop.f32.mrf.mxu0  ;;  %v12072_v47 = vrot.slane %v5008_v38, 9  ;;  %v5139_v19 = vrot.slane %v18948_v6, 5 }
 0x18e   : > { %v15479_v55 = vadd.f32 %v12947_v24, %v2336_v26  ;;  %v12954_v57 = vpop.f32.mrf.mxu1  ;;  %v15483_v37 = vsel %vm14250_vm10, %v5131_v4, %v5132_v2  ;;  %v18949_v26 = vld [vmem:[#allocation17_spill] sm:$0xff] }
 0x18f   : > { %v12916_v63 = vpop.f32.mrf.mxu0  ;;  %v12090_v50 = vcombine.low %v15477_v0, %v15483_v37  ;;  %v5123_v13 = vsel %vm14250_vm10, %v12072_v47, %v5122_v35  ;;  %v18950_v0 = vld [vmem:[#allocation15_spill] sm:$0xff]  ;;  %v5011_v37 = vld [vmem:[#allocation2 + $0x9c] sm:$0xe] }
 0x190   : > { %v2339_v42 = vadd.f32 %v12916_v63, %v15135_v41  ;;  %v2608_v54 = vpop.f32.mrf.mxu1 }
 0x191   : > { %v2234_v44 = vpop.f32.mrf.mxu0 }
 0x192   : > { %13119 = vmatmul.mubr.msk.bf16.gmra.mxu0 %vm1398_vm11, %v12086_v11  ;;  %v2337_v24 = vadd.f32 %v2234_v44, %v15159_v32  ;;  %v15491_v12 = vadd.f32 %v12950_v43, %v2339_v42  ;;  %v12955_v41 = vpop.f32.mrf.mxu1  ;;  %v5126_v11 = vsel %vm14250_vm10, %v5124_v9, %v5125_v45  ;;  %v5010_v32 = vld [vmem:[#allocation2 + $0x90] sm:$0xe]  ;;  %v18946_v43 = vld [vmem:[#allocation24_spill] sm:$0xff] }
 0x193   : > { %v12917_v29 = vpop.f32.mrf.mxu0  ;;  %13122 = vmatprep.mubr.msk.bf16.mxu0 %vm1398_vm11, %v12087_v40  ;;  %v5136_v1 = vrot.slane %v18946_v43, 5  ;;  %v12089_v39 = vcombine.low %v5123_v13, %v5126_v11  ;;  %v12074_v35 = vrot.slane %v5010_v32, 9  ;;  %v18952_v42 = vld [vmem:[#allocation28_spill] sm:$0xff]  ;;  %v18953_v45 = vld [vmem:[#allocation19_spill] sm:$0xff]  ;;  %v12075_v43 = vrot.slane %v5011_v37, 9 }
 0x194   : > { %v2340_v5 = vadd.f32 %v12917_v29, %v15178_v25  ;;  %v15499_v17 = vadd.f32 %v2592_v31, %v2337_v24  ;;  %v15504_v22 = vpop.f32.mrf.mxu1  ;;  %v18947_v25 = vld [vmem:[#allocation16_spill] sm:$0xff]  ;;  %v5143_v9 = vrot.slane %v18952_v42, 5  ;;  %v5012_v24 = vld [vmem:[#allocation2 + $0xa8] sm:$0xe] }
 0x195   : > { %v2237_v28 = vpop.f32.mrf.mxu0  ;;  %v5138_v10 = vrot.slane %v5136_v1, 4  ;;  %v5137_v47 = vsel %vm14250_vm10, %v12074_v35, %v5136_v1 }
 0x196   : > { %v15506_v15 = vadd.f32 %v2237_v28, %v1813_v3  ;;  %v15508_v30 = vadd.f32 %v12951_v46, %v2340_v5  ;;  %v12958_v36 = vpop.f32.mrf.mxu1  ;;  %v18951_v46 = vld [vmem:[#allocation14_spill] sm:$0xff]  ;;  %v18954_v3 = vld [vmem:[#allocation31_spill] sm:$0xff] }
 0x197   : > { %v12920_v27 = vpop.f32.mrf.mxu0  ;;  %v1829_v4 = vadd.f32 %v18951_v46, %v18950_v0  ;;  %v5150_v29 = vrot.slane %v18954_v3, 5  ;;  %v18958_v0 = vld [vmem:[#allocation22_spill] sm:$0xff] }
 0x198   : > { %v2343_v31 = vadd.f32 %v12920_v27, %v18947_v25  ;;  %v2624_v61 = vpop.f32.mrf.mxu1  ;;  %v5145_v27 = vrot.slane %v5143_v9, 4  ;;  %v12076_v25 = vrot.slane %v5012_v24, 9 }
 0x199   : > { %v2250_v58 = vpop.f32.mrf.mxu0  ;;  %v5152_v6 = vrot.slane %v5150_v29, 4 }
 0x19a   : > { %13123 = vmatmul.mubr.msk.bf16.gmra.mxu0 %vm1398_vm11, %v12088_v52  ;;  %v2341_v38 = vadd.f32 %v2250_v58, %v18949_v26  ;;  %v15514_v2 = vadd.f32 %v12954_v57, %v2343_v31  ;;  %v12959_v40 = vpop.f32.mrf.mxu1  ;;  %v5140_v57 = vsel %vm14250_vm10, %v5138_v10, %v5139_v19  ;;  %v18956_v31 = vld [vmem:[#allocation20_spill] sm:$0xff]  ;;  %v18957_v19 = vld [vmem:[#allocation34_spill] sm:$0xff]  ;;  %v5151_v42 = vsel %vm14250_vm10, %v12076_v25, %v5150_v29 }
 0x19b   : > { %v12921_v63 = vpop.f32.mrf.mxu0  ;;  %13126 = vmatprep.mubr.msk.bf16.mxu0 %vm1398_vm11, %v12089_v39  ;;  %v12091_v28 = vcombine.low %v5137_v47, %v5140_v57  ;;  %v18955_v39 = vld [vmem:[#allocation30_spill] sm:$0xff]  ;;  %v5153_v58 = vrot.slane %v18957_v19, 5  ;;  %v18960_v57 = vld [vmem:[#allocation23_spill] sm:$0xff] }
 0x19c   : > { %v2344_v44 = vadd.f32 %v12921_v63, %v18953_v45  ;;  %v15523_v52 = vadd.f32 %v2608_v54, %v2341_v38  ;;  %v15528_v5 = vpop.f32.mrf.mxu1  ;;  %v5146_v54 = vrot.slane %v18955_v39, 5  ;;  %v5144_v63 = vsel %vm14250_vm10, %v12075_v43, %v5143_v9  ;;  %v5013_v45 = vld [vmem:[#allocation2 + $0xb4] sm:$0xe] }
 0x19d   : > { %v2253_v13 = vpop.f32.mrf.mxu0  ;;  %v5154_v3 = vsel %vm14250_vm10, %v5152_v6, %v5153_v58  ;;  %v12077_v39 = vrot.slane %v5013_v45, 9 }
 0x19e   : > { %v15530_v11 = vadd.f32 %v2253_v13, %v1829_v4  ;;  %v15532_v32 = vadd.f32 %v12955_v41, %v2344_v44  ;;  %v12962_v35 = vpop.f32.mrf.mxu1  ;;  %v5147_v47 = vsel %vm14250_vm10, %v5145_v27, %v5146_v54  ;;  %v18959_v44 = vld [vmem:[#allocation35_spill] sm:$0xff]  ;;  %v5014_v13 = vld [vmem:[#allocation2 + $0xc0] sm:$0xe]  ;;  %v12093_v25 = vcombine.low %v5151_v42, %v5154_v3 }
 0x19f   : > { %v12924_v1 = vpop.f32.mrf.mxu0  ;;  %v12092_v29 = vcombine.low %v5144_v63, %v5147_v47 }
 0x1a0   : > { %v2347_v10 = vadd.f32 %v12924_v1, %v18956_v31  ;;  %v2640_v38 = vpop.f32.mrf.mxu1  ;;  %v18961_v1 = vld [vmem:[#allocation41_spill] sm:$0xff] }
 0x1a1   : > { %v2266_v26 = vpop.f32.mrf.mxu0  ;;  %v5164_v9 = vrot.slane %v18961_v1, 5  ;;  %v5171_v1 = vrot.slane %v15343_v53, 5 }
 0x1a2   : > { %13127 = vmatmul.mubr.msk.bf16.gmra.mxu0 %vm1398_vm11, %v12090_v50  ;;  %v2345_v41 = vadd.f32 %v2266_v26, %v18958_v0  ;;  %v15539_v46 = vadd.f32 %v12958_v36, %v2347_v10  ;;  %v12963_v37 = vpop.f32.mrf.mxu1  ;;  %v5157_v50 = vrot.slane %v18959_v44, 5  ;;  %v18962_v10 = vld [vmem:[#allocation37_spill] sm:$0xff]  ;;  %v12078_v26 = vrot.slane %v5014_v13, 9 }
 0x1a3   : > { %v12925_v4 = vpop.f32.mrf.mxu0  ;;  %13130 = vmatprep.mubr.msk.bf16.mxu0 %vm1398_vm11, %v12091_v28  ;;  %v18963_v0 = vld [vmem:[#allocation25_spill] sm:$0xff]  ;;  %v5166_v58 = vrot.slane %v5164_v9, 4 }
 0x1a4   : > { %v2348_v24 = vadd.f32 %v12925_v4, %v18960_v57  ;;  %v15550_v36 = vadd.f32 %v2624_v61, %v2345_v41  ;;  %v15557_v28 = vpop.f32.mrf.mxu1  ;;  %v5159_v31 = vrot.slane %v5157_v50, 4  ;;  %v5160_v61 = vrot.slane %v18962_v10, 5  ;;  %v18964_v41 = vld [vmem:[#allocation42_spill] sm:$0xff] }
 0x1a5   : > { %v15555_v43 = vpop.f32.mrf.mxu0  ;;  %v5167_v4 = vrot.slane %v18964_v41, 5  ;;  %v5158_v47 = vsel %vm14250_vm10, %v12077_v39, %v5157_v50  ;;  %v5165_v13 = vsel %vm14250_vm10, %v12078_v26, %v5164_v9  ;;  %v5174_v41 = vrot.slane %v15353_v49, 5 }
 0x1a6   : > { %v15559_v27 = vadd.f32 %v12959_v40, %v2348_v24  ;;  %v12966_v19 = vpop.f32.mrf.mxu1  ;;  %v18965_v40 = vld [vmem:[#allocation29_spill] sm:$0xff]  ;;  %v5161_v45 = vsel %vm14250_vm10, %v5159_v31, %v5160_v61 }
 0x1a7   : > { %v12928_v54 = vpop.f32.mrf.mxu0  ;;  %v5168_v39 = vsel %vm14250_vm10, %v5166_v58, %v5167_v4  ;;  %v12094_v61 = vcombine.low %v5158_v47, %v5161_v45  ;;  %v18967_v4 = vld [vmem:[#allocation36_spill] sm:$0xff] }
 0x1a8   : > { %v2351_v6 = vadd.f32 %v12928_v54, %v18963_v0  ;;  %v2656_v57 = vpop.f32.mrf.mxu1  ;;  %v12095_v0 = vcombine.low %v5165_v13, %v5168_v39  ;;  %v18969_v13 = vld [vmem:[#allocation40_spill] sm:$0xff] }
 0x1a9   : > { %v2282_v44 = vpop.f32.mrf.mxu0 }
 0x1aa   : > { %13131 = vmatmul.mubr.msk.bf16.gmra.mxu0 %vm1398_vm11, %v12092_v29  ;;  %v2349_v24 = vadd.f32 %v2282_v44, %v18965_v40  ;;  %v15566_v63 = vadd.f32 %v12962_v35, %v2351_v6  ;;  %v12967_v3 = vpop.f32.mrf.mxu1  ;;  %v12146_v35 = vld [vmem:[%s18857_s3 + $0x4] sm:$0xf]  ;;  %v18966_v29 = vld [vmem:[#allocation32_spill] sm:$0xff]  ;;  %v5173_v6 = vrot.slane %v5171_v1, 4 }
 0x1ab   : > { %v12929_v42 = vpop.f32.mrf.mxu0  ;;  %13134 = vmatprep.mubr.msk.bf16.mxu0 %vm1398_vm11, %v12093_v25  ;;  %v5015_v25 = vld [vmem:[#allocation2 + $0xcc] sm:$0xe]  ;;  %13457 = vmatprep.subr.msk.bf16.mxu1 %vm6603_vm0, %v12146_v35  ;;  %v6605_v31 = vsel %vm6603_vm0, %v12146_v35, 0 }
 0x1ac   : > { %v2352_v54 = vadd.f32 %v12929_v42, %v18966_v29  ;;  %v15580_v50 = vadd.f32 %v2640_v38, %v2349_v24  ;;  %v15588_v53 = vpop.f32.mrf.mxu1  ;;  %13143 = vmatpush3.bf16.msra.mxu1 %v6605_v31  ;;  %v12079_v38 = vrot.slane %v5015_v25, 9  ;;  %v18968_v42 = vld [vmem:[#allocation39_spill] sm:$0xff]  ;;  %v5175_v49 = vsel %vm14250_vm10, %v5173_v6, %v5174_v41 }
 0x1ad   : > { %v15586_v9 = vpop.f32.mrf.mxu0 }
 0x1ae   : > { %v15590_v10 = vadd.f32 %v12963_v37, %v2352_v54  ;;  %v12970_v58 = vpop.f32.mrf.mxu1  ;;  %v5172_v47 = vsel %vm14250_vm10, %v12079_v38, %v5171_v1 }
 0x1af   : > { %v12932_v26 = vpop.f32.mrf.mxu0 }
 0x1b0   : > { %v2355_v44 = vadd.f32 %v12932_v26, %v18967_v4  ;;  %v2672_v24 = vpop.f32.mrf.mxu1 }
 0x1b1   : > { %v2298_v40 = vpop.f32.mrf.mxu0 }
 0x1b2   : > { %13135 = vmatmul.mubr.msk.bf16.gmra.mxu0 %vm1398_vm11, %v12094_v61  ;;  %v2353_v35 = vadd.f32 %v2298_v40, %v18968_v42  ;;  %v15596_v29 = vadd.f32 %v12966_v19, %v2355_v44  ;;  %v12971_v45 = vpop.f32.mrf.mxu1  ;;  %v12096_v61 = vcombine.low %v5172_v47, %v5175_v49 }
 0x1b3   : > { %v12933_v37 = vpop.f32.mrf.mxu0  ;;  %13138 = vmatprep.mubr.msk.bf16.mxu0 %vm1398_vm11, %v12095_v0 }
 0x1b4   : > { %v2356_v54 = vadd.f32 %v12933_v37, %v18969_v13  ;;  %v15604_v39 = vadd.f32 %v2656_v57, %v2353_v35  ;;  %v15608_v31 = vpop.f32.mrf.mxu1 }
 0x1b5   : > { %v15606_v25 = vpop.f32.mrf.mxu0 }
 0x1b6   : > { %v15610_v19 = vadd.f32 %v12967_v3, %v2356_v54  ;;  %v15612_v0 = vpop.f32.mrf.mxu1 }
 0x1b7   : > { %18970 = vst [vmem:[#allocation24_spill] sm:$0xff] %v15612_v0 }
 0x1b8   : > { %v12936_v26 = vpop.f32.mrf.mxu0  ;;  %v15615_v4 = vpop.f32.mrf.mxu1 }
 0x1b9   : > { %v2359_v1 = vadd.f32 %v12936_v26, %v15365_v56  ;;  %18971 = vst [vmem:[#allocation16_spill] sm:$0xff] %v15615_v4 }
 0x1ba   : > { %v2314_v38 = vpop.f32.mrf.mxu0  ;;  %13139 = vmatmul.mubr.msk.bf16.gmra.mxu0 %vm1398_vm11, %v12096_v61  ;;  %v15621_v44 = vpop.f32.mrf.mxu1  ;;  %vm11611_vm11 = vcmask 1043459  }
 0x1bb   : > { %v2357_v57 = vadd.f32 %v2314_v38, %v15374_v23  ;;  %v15619_v6 = vadd.f32 %v12970_v58, %v2359_v1  ;;  %18972 = vst [vmem:[#allocation26_spill] sm:$0xff] %v15621_v44  ;;  %v350_v38 = vld [vmem:[#allocation3 + $0x18] sm:$0x1] }
 0x1bc   : > { %v12937_v41 = vpop.f32.mrf.mxu0  ;;  %v15628_v35 = vpop.f32.mrf.mxu1 }
 0x1bd   : > { %v2360_v3 = vadd.f32 %v12937_v41, %v15387_v33  ;;  %v15624_v40 = vadd.f32 %v2672_v24, %v2357_v57  ;;  %18973 = vst [vmem:[#allocation17_spill] sm:$0xff] %v15628_v35 }
 0x1be   : > { %v15626_v42 = vpop.f32.mrf.mxu0  ;;  %v15632_v47 = vpop.f32.mrf.mxu1 }
 0x1bf   : > { %v15630_v56 = vadd.f32 %v12971_v45, %v2360_v3  ;;  %18974 = vst [vmem:[#allocation15_spill] sm:$0xff] %v15632_v47 }
 0x1c0   : > { %v12976_v37 = vpop.f32.mrf.mxu0  ;;  %v15637_v49 = vpop.f32.mrf.mxu1 }
 0x1c1   : > { %v15635_v23 = vadd.f32 %v12976_v37, %v15419_v14  ;;  %18976 = vst [vmem:[#allocation28_spill] sm:$0xff] %v15637_v49 }
 0x1c2   : > { %v3286_v58 = vpop.f32.mrf.mxu0  ;;  %v13015_v24 = vpop.f32.mrf.mxu1 }
 0x1c3   : > { %18975 = vst [vmem:[#allocation14_spill] sm:$0xff] %v15635_v23  ;;  %v15640_v13 = vadd.f32 %v3286_v58, %v15434_v34 }
 0x1c4   : > { %v12977_v33 = vpop.f32.mrf.mxu0  ;;  %v15647_v45 = vpop.f32.mrf.mxu1 }
 0x1c5   : > { %18977 = vst [vmem:[#allocation19_spill] sm:$0xff] %v15640_v13  ;;  %v15643_v54 = vadd.f32 %v12977_v33, %v15446_v7  ;;  %18979 = vst [vmem:[#allocation30_spill] sm:$0xff] %v15647_v45  ;;  %v351_v7 = vsel %vm15651_vm1, 0, %v350_v38  ;;  %v347_v38 = vld [vmem:[#allocation3 + $0xc] sm:$0x1] }
 0x1c6   : > { %v15645_v61 = vpop.f32.mrf.mxu0  ;;  %v13018_v1 = vpop.f32.mrf.mxu1  ;;  %352 = vst [vmem:[#allocation3 + $0x18] sm:$0x1] %v351_v7 }
 0x1c7   : > { %18978 = vst [vmem:[#allocation31_spill] sm:$0xff] %v15643_v54 }
 0x1c8   : > { %v12980_v26 = vpop.f32.mrf.mxu0  ;;  %v3788_v41 = vpop.f32.mrf.mxu1 }
 0x1c9   : > { %v15656_v34 = vadd.f32 %v12980_v26, %v15456_v8 }
 0x1ca   : > { %v3302_v57 = vpop.f32.mrf.mxu0  ;;  %v13019_v58 = vpop.f32.mrf.mxu1 }
 0x1cb   : > { %18982 = vst [vmem:[#allocation20_spill] sm:$0xff] %v15656_v34  ;;  %v15661_v3 = vadd.f32 %v3302_v57, %v15468_v59  ;;  %v348_v59 = vsel %vm15651_vm1, 0, %v347_v38  ;;  %v396_v34 = vld [vmem:[#allocation3 + $0x14] sm:$0x1] }
 0x1cc   : > { %v12981_v37 = vpop.f32.mrf.mxu0  ;;  %v15672_v26 = vpop.f32.mrf.mxu1  ;;  %349 = vst [vmem:[#allocation3 + $0xc] sm:$0x1] %v348_v59  ;;  %v356_v59 = vld [vmem:[#allocation3 + $0x30] sm:$0x1] }
 0x1cd   : > { %18983 = vst [vmem:[#allocation34_spill] sm:$0xff] %v15661_v3  ;;  %v3420_v33 = vadd.f32 %v12981_v37, %v15479_v55  ;;  %18986 = vst [vmem:[#allocation22_spill] sm:$0xff] %v15672_v26  ;;  %v399_v55 = vld [vmem:[#allocation3 + $0x20] sm:$0x1] }
 0x1ce   : > { %v15670_v8 = vpop.f32.mrf.mxu0  ;;  %v13022_v57 = vpop.f32.mrf.mxu1  ;;  %v400_v49 = vsel %vm15666_vm3, 0, %v399_v55  ;;  %v357_v55 = vsel %vm15651_vm1, 0, %v356_v59  ;;  %v402_v59 = vld [vmem:[#allocation3 + $0x2c] sm:$0x1] }
 0x1cf   : > { %v15674_v45 = vadd.f32 %v13015_v24, %v3420_v33  ;;  %401 = vst [vmem:[#allocation3 + $0x20] sm:$0x1] %v400_v49  ;;  %v397_v33 = vsel %vm15666_vm3, 0, %v396_v34  ;;  %358 = vst [vmem:[#allocation3 + $0x30] sm:$0x1] %v357_v55 }
 0x1d0   : > { %v12984_v7 = vpop.f32.mrf.mxu0  ;;  %v3804_v47 = vpop.f32.mrf.mxu1  ;;  %398 = vst [vmem:[#allocation3 + $0x14] sm:$0x1] %v397_v33 }
 0x1d1   : > { %v3423_v37 = vadd.f32 %v12984_v7, %v15491_v12 }
 0x1d2   : > { %v3318_v3 = vpop.f32.mrf.mxu0  ;;  %v13023_v35 = vpop.f32.mrf.mxu1 }
 0x1d3   : > { %v3421_v26 = vadd.f32 %v3318_v3, %v15499_v17  ;;  %v15682_v24 = vadd.f32 %v13018_v1, %v3423_v37  ;;  %v353_v17 = vld [vmem:[#allocation3 + $0x24] sm:$0x1] }
 0x1d4   : > { %v12985_v38 = vpop.f32.mrf.mxu0  ;;  %v15693_v44 = vpop.f32.mrf.mxu1  ;;  %v354_v34 = vsel %vm15651_vm1, 0, %v353_v17 }
 0x1d5   : > { %v3424_v12 = vadd.f32 %v12985_v38, %v15508_v30  ;;  %v15687_v7 = vadd.f32 %v3788_v41, %v3421_v26  ;;  %18987 = vst [vmem:[#allocation35_spill] sm:$0xff] %v15693_v44  ;;  %355 = vst [vmem:[#allocation3 + $0x24] sm:$0x1] %v354_v34  ;;  %v405_v30 = vld [vmem:[#allocation3 + $0x38] sm:$0x1] }
 0x1d6   : > { %v15691_v49 = vpop.f32.mrf.mxu0  ;;  %v13026_v37 = vpop.f32.mrf.mxu1  ;;  %v406_v26 = vsel %vm15666_vm3, 0, %v405_v30 }
 0x1d7   : > { %v15695_v1 = vadd.f32 %v13019_v58, %v3424_v12  ;;  %407 = vst [vmem:[#allocation3 + $0x38] sm:$0x1] %v406_v26  ;;  %v403_v12 = vsel %vm15666_vm3, 0, %v402_v59 }
 0x1d8   : > { %v12988_v3 = vpop.f32.mrf.mxu0  ;;  %v3820_v38 = vpop.f32.mrf.mxu1  ;;  %404 = vst [vmem:[#allocation3 + $0x2c] sm:$0x1] %v403_v12  ;;  %v411_v12 = vld [vmem:[#allocation3 + $0x50] sm:$0x1] }
 0x1d9   : > { %v3427_v41 = vadd.f32 %v12988_v3, %v15514_v2  ;;  %v362_v3 = vld [vmem:[#allocation3 + $0x48] sm:$0x1] }
 0x1da   : > { %v3334_v33 = vpop.f32.mrf.mxu0  ;;  %v13027_v44 = vpop.f32.mrf.mxu1 }
 0x1db   : > { %v3425_v55 = vadd.f32 %v3334_v33, %v15523_v52  ;;  %v15703_v58 = vadd.f32 %v13022_v57, %v3427_v41  ;;  %v363_v52 = vsel %vm15651_vm1, 0, %v362_v3  ;;  %v359_v41 = vld [vmem:[#allocation3 + $0x3c] sm:$0x1] }
 0x1dc   : > { %v12989_v17 = vpop.f32.mrf.mxu0  ;;  %v15712_v54 = vpop.f32.mrf.mxu1  ;;  %364 = vst [vmem:[#allocation3 + $0x48] sm:$0x1] %v363_v52  ;;  %v360_v59 = vsel %vm15651_vm1, 0, %v359_v41  ;;  %v408_v52 = vld [vmem:[#allocation3 + $0x44] sm:$0x1] }
 0x1dd   : > { %v3428_v34 = vadd.f32 %v12989_v17, %v15532_v32  ;;  %v15708_v2 = vadd.f32 %v3804_v47, %v3425_v55  ;;  %18989 = vst [vmem:[#allocation41_spill] sm:$0xff] %v15712_v54  ;;  %361 = vst [vmem:[#allocation3 + $0x3c] sm:$0x1] %v360_v59 }
 0x1de   : > { %v15710_v30 = vpop.f32.mrf.mxu0  ;;  %v13030_v33 = vpop.f32.mrf.mxu1 }
 0x1df   : > { %18988 = vst [vmem:[#allocation23_spill] sm:$0xff] %v15710_v30  ;;  %v15716_v57 = vadd.f32 %v13023_v35, %v3428_v34  ;;  %v412_v35 = vsel %vm15666_vm3, 0, %v411_v12 }
 0x1e0   : > { %v12992_v26 = vpop.f32.mrf.mxu0  ;;  %v3836_v55 = vpop.f32.mrf.mxu1  ;;  %413 = vst [vmem:[#allocation3 + $0x50] sm:$0x1] %v412_v35  ;;  %v6071_v35 = vld [vmem:[#allocation3] sm:$0xf] }
 0x1e1   : > { %v3431_v32 = vadd.f32 %v12992_v26, %v15539_v46  ;;  %v409_v46 = vsel %vm15666_vm3, 0, %v408_v52 }
 0x1e2   : > { %v3350_v47 = vpop.f32.mrf.mxu0  ;;  %v13031_v3 = vpop.f32.mrf.mxu1  ;;  %410 = vst [vmem:[#allocation3 + $0x44] sm:$0x1] %v409_v46 }
 0x1e3   : > { %v3429_v17 = vadd.f32 %v3350_v47, %v15550_v36  ;;  %v15722_v54 = vadd.f32 %v13026_v37, %v3431_v32  ;;  %v368_v36 = vld [vmem:[#allocation3 + $0x60] sm:$0x1] }
 0x1e4   : > { %v12993_v34 = vpop.f32.mrf.mxu0  ;;  %v15733_v59 = vpop.f32.mrf.mxu1  ;;  %v369_v32 = vsel %vm15651_vm1, 0, %v368_v36  ;;  %v365_v36 = vld [vmem:[#allocation3 + $0x54] sm:$0x1] }
 0x1e5   : > { %v3432_v30 = vadd.f32 %v12993_v34, %v15559_v27  ;;  %v15727_v41 = vadd.f32 %v3820_v38, %v3429_v17  ;;  %18991 = vst [vmem:[#allocation25_spill] sm:$0xff] %v15733_v59  ;;  %v6103_v27 = vld [vmem:[%s18857_s3] sm:$0xf]  ;;  %370 = vst [vmem:[#allocation3 + $0x60] sm:$0x1] %v369_v32  ;;  %v366_v32 = vsel %vm15651_vm1, 0, %v365_v36 }
 0x1e6   : > { %v15731_v26 = vpop.f32.mrf.mxu0  ;;  %13458 = vmatprep.subr.msk.bf16.mxu0 %vm6603_vm0, %v6103_v27  ;;  %v6897_v47 = vsel %vm6603_vm0, %v6103_v27, 0  ;;  %v13034_v17 = vpop.f32.mrf.mxu1  ;;  %367 = vst [vmem:[#allocation3 + $0x54] sm:$0x1] %v366_v32 }
 0x1e7   : > { %18990 = vst [vmem:[#allocation37_spill] sm:$0xff] %v15731_v26  ;;  %v15735_v37 = vadd.f32 %v13027_v44, %v3432_v30  ;;  %13177 = vmatpush3.bf16.msra.mxu0 %v6897_v47  ;;  %v6072_v44 = vld [vmem:[#allocation3 + $0x4] sm:$0xf]  ;;  %v417_v47 = vld [vmem:[#allocation3 + $0x68] sm:$0x1] }
 0x1e8   : > { %v12996_v38 = vpop.f32.mrf.mxu0  ;;  %v12179_v34 = vcombine.low %v6071_v35, %v6072_v44  ;;  %v6130_v13 = vshll.u32 %v6072_v44, 16 }
 0x1e9   : > { %v3435_v12 = vadd.f32 %v12996_v38, %v15566_v63  ;;  %v3852_v38 = vpop.f32.mrf.mxu1 }
 0x1ea   : > { %v3366_v30 = vpop.f32.mrf.mxu0  ;;  %13178 = vmatprep.mubr.msk.bf16.mxu0 %vm6554_vm6, %v12179_v34 }
 0x1eb   : > { %v3433_v52 = vadd.f32 %v3366_v30, %v15580_v50  ;;  %v15746_v46 = vadd.f32 %v13030_v33, %v3435_v12  ;;  %v418_v50 = vsel %vm15666_vm3, 0, %v417_v47  ;;  %v414_v12 = vld [vmem:[#allocation3 + $0x5c] sm:$0x1] }
 0x1ec   : > { %v12997_v59 = vpop.f32.mrf.mxu0  ;;  %419 = vst [vmem:[#allocation3 + $0x68] sm:$0x1] %v418_v50  ;;  %v415_v34 = vsel %vm15666_vm3, 0, %v414_v12 }
 0x1ed   : > { %v3436_v63 = vadd.f32 %v12997_v59, %v15590_v10  ;;  %v15752_v27 = vadd.f32 %v3836_v55, %v3433_v52  ;;  %v13035_v55 = vpop.f32.mrf.mxu1  ;;  %416 = vst [vmem:[#allocation3 + $0x5c] sm:$0x1] %v415_v34  ;;  %v374_v52 = vld [vmem:[#allocation3 + $0x78] sm:$0x1]  ;;  %v6121_v34 = vshrl.u32 %v6071_v35, 16 }
 0x1ee   : > { %v15754_v26 = vpop.f32.mrf.mxu0 }
 0x1ef   : > { %18992 = vst [vmem:[#allocation42_spill] sm:$0xff] %v15754_v26  ;;  %v15758_v33 = vadd.f32 %v13031_v3, %v3436_v63  ;;  %v375_v3 = vsel %vm15651_vm1, 0, %v374_v52  ;;  %v15771_v12 = vpop.f32.mrf.mxu1  ;;  %v6124_v26 = vshll.u32 %v6071_v35, 16  ;;  %v6123_v4 = vrot.slane %v6121_v34, 4 }
 0x1f0   : > { %v13000_v30 = vpop.f32.mrf.mxu0  ;;  %376 = vst [vmem:[#allocation3 + $0x78] sm:$0x1] %v375_v3  ;;  %18993 = vst [vmem:[#allocation29_spill] sm:$0xff] %v15771_v12  ;;  %v6132_v12 = vrot.slane %v6130_v13, 5 }
 0x1f1   : > { %v3439_v10 = vadd.f32 %v13000_v30, %v15596_v29  ;;  %v6126_v52 = vrot.slane %v6124_v26, 5 }
 0x1f2   : > { %v3382_v59 = vpop.f32.mrf.mxu0 }
 0x1f3   : > { %v3437_v36 = vadd.f32 %v3382_v59, %v15604_v39  ;;  %v15764_v32 = vadd.f32 %v13034_v17, %v3439_v10  ;;  %v6134_v17 = vshrl.u32 %v6072_v44, 16  ;;  %v6127_v26 = vor.u32 %v6126_v52, %v6123_v4  ;;  %v423_v52 = vld [vmem:[#allocation3 + $0x80] sm:$0x1] }
 0x1f4   : > { %v13001_v63 = vpop.f32.mrf.mxu0 }
 0x1f5   : > { %v3440_v47 = vadd.f32 %v13001_v63, %v15610_v19  ;;  %v15769_v50 = vadd.f32 %v3852_v38, %v3437_v36  ;;  %v371_v19 = vld [vmem:[#allocation3 + $0x6c] sm:$0x1] }
 0x1f6   : > { %v15773_v29 = vpop.f32.mrf.mxu0  ;;  %v372_v63 = vsel %vm15651_vm1, 0, %v371_v19 }
 0x1f7   : > { %18994 = vst [vmem:[#allocation32_spill] sm:$0xff] %v15773_v29  ;;  %v15775_v30 = vadd.f32 %v13035_v55, %v3440_v47  ;;  %v6136_v55 = vrot.slane %v6134_v17, 4  ;;  %373 = vst [vmem:[#allocation3 + $0x6c] sm:$0x1] %v372_v63  ;;  %v6104_v29 = vld [vmem:[#allocation3 + $0x8] sm:$0x1] }
 0x1f8   : > { %v13038_v39 = vpop.f32.mrf.mxu1  ;;  %v6128_v17 = vrot.slane %v6127_v26, 4  ;;  %v380_v26 = vld [vmem:[#allocation3 + $0x90] sm:$0x1] }
 0x1f9   : > { %18995 = vst [vmem:[#allocation36_spill] sm:$0xff] %v15775_v30  ;;  %v6137_v44 = vor.u32 %v6136_v55, %v6132_v12  ;;  %v424_v55 = vsel %vm15666_vm3, 0, %v423_v52 }
 0x1fa   : > { %v13004_v10 = vpop.f32.mrf.mxu0  ;;  %v3868_v59 = vpop.f32.mrf.mxu1  ;;  %v6133_v4 = vsel %vm13850_vm14, %v6128_v17, %v6132_v12  ;;  %425 = vst [vmem:[#allocation3 + $0x80] sm:$0x1] %v424_v55  ;;  %v15824_v17 = vld [vmem:[%s18857_s3 + $0x8] sm:$0xf] }
 0x1fb   : > { %v3443_v3 = vadd.f32 %v13004_v10, %v15619_v6  ;;  %v6140_v6 = vshll.u32 %v6104_v29, 16  ;;  %18997 = vst [vmem:[#allocation40_spill] sm:$0xff] %v15824_v17  ;;  %13459 = vmatprep.subr.msk.bf16.mxu1 %vm6603_vm0, %v15824_v17 }
 0x1fc   : > { %v3398_v38 = vpop.f32.mrf.mxu0  ;;  %v13039_v36 = vpop.f32.mrf.mxu1 }
 0x1fd   : > { %v3441_v47 = vadd.f32 %v3398_v38, %v15624_v40  ;;  %v15781_v35 = vadd.f32 %v13038_v39, %v3443_v3  ;;  %v6138_v40 = vrot.slane %v6137_v44, 4  ;;  %v6142_v39 = vrot.slane %v6140_v6, 5 }
 0x1fe   : > { %v13005_v0 = vpop.f32.mrf.mxu0  ;;  %v15783_v34 = vpop.f32.mrf.mxu1 }
 0x1ff   : > { %v3444_v10 = vadd.f32 %v13005_v0, %v15630_v56  ;;  %v15786_v23 = vadd.f32 %v3868_v59, %v3441_v47  ;;  %v6143_v0 = vsel %vm13850_vm14, %v6138_v40, %v6142_v39  ;;  %v420_v47 = vld [vmem:[#allocation3 + $0x74] sm:$0x1] }
 0x200   : > { %v15788_v30 = vpop.f32.mrf.mxu0  ;;  %v15790_v13 = vpop.f32.mrf.mxu1  ;;  %v12147_v56 = vcombine.low %v6133_v4, %v6143_v0  ;;  %v421_v12 = vsel %vm15666_vm3, 0, %v420_v47 }
 0x201   : > { %v15792_v3 = vadd.f32 %v13039_v36, %v3444_v10  ;;  %422 = vst [vmem:[#allocation3 + $0x74] sm:$0x1] %v421_v12  ;;  %v381_v10 = vsel %vm15651_vm1, 0, %v380_v26 }
 0x202   : > { %v15794_v19 = vpop.f32.mrf.mxu0  ;;  %v15796_v38 = vpop.f32.mrf.mxu1  ;;  %13144 = vmatprep.mubr.msk.bf16.mxu1 %vm6554_vm6, %v12147_v56  ;;  %382 = vst [vmem:[#allocation3 + $0x90] sm:$0x1] %v381_v10  ;;  %v377_v56 = vld [vmem:[#allocation3 + $0x84] sm:$0x1] }
 0x203   : > { %v378_v52 = vsel %vm15651_vm1, 0, %v377_v56 }
 0x204   : > { %v15802_v29 = vpop.f32.mrf.mxu0  ;;  %v15804_v59 = vpop.f32.mrf.mxu1  ;;  %379 = vst [vmem:[#allocation3 + $0x84] sm:$0x1] %v378_v52 }
 0x206   : > { %v15807_v36 = vpop.f32.mrf.mxu0  ;;  %v15809_v63 = vpop.f32.mrf.mxu1 }
 0x208   : > { %v15815_v44 = vpop.f32.mrf.mxu0  ;;  %v15817_v6 = vpop.f32.mrf.mxu1 }
 0x209   : > { %18996 = vst [vmem:[#allocation39_spill] sm:$0xff] %v15817_v6 }
 0x20a   : > { %v15828_v40 = vpop.f32.mrf.mxu0  ;;  %v15830_v39 = vpop.f32.mrf.mxu1 }
 0x20b   : > { %18998 = vst [vmem:[#allocation45_spill] sm:$0xff] %v15830_v39 }
 0x20c   : > { %v15832_v4 = vpop.f32.mrf.mxu0  ;;  %v15834_v0 = vpop.f32.mrf.mxu1 }
 0x20d   : > { %18999 = vst [vmem:[#allocation46_spill] sm:$0xff] %v15834_v0 }
 0x20e   : > { %v13049_v55 = vpop.f32.mrf.mxu0  ;;  %v15838_v47 = vpop.f32.mrf.mxu1 }
 0x20f   : > { %19000 = vst [vmem:[#allocation47_spill] sm:$0xff] %v15838_v47  ;;  %v15841_v12 = vadd.f32 %v13049_v55, %v15674_v45  ;;  %v429_v55 = vld [vmem:[#allocation3 + $0x98] sm:$0x1] }
 0x210   : > { %v15843_v26 = vpop.f32.mrf.mxu0  ;;  %v15845_v10 = vpop.f32.mrf.mxu1 }
 0x211   : > { %19001 = vst [vmem:[#allocation48_spill] sm:$0xff] %v15845_v10 }
 0x212   : > { %v13052_v48 = vpop.f32.mrf.mxu0  ;;  %v15847_v39 = vpop.f32.mrf.mxu1 }
 0x213   : > { %19002 = vst [vmem:[#allocation49_spill] sm:$0xff] %v15847_v39  ;;  %v15850_v0 = vadd.f32 %v13052_v48, %v15682_v24  ;;  %v430_v39 = vsel %vm15666_vm3, 0, %v429_v55 }
 0x214   : > { %v4147_v6 = vpop.f32.mrf.mxu0  ;;  %v15852_v17 = vpop.f32.mrf.mxu1  ;;  %431 = vst [vmem:[#allocation3 + $0x98] sm:$0x1] %v430_v39 }
 0x215   : > { %19003 = vst [vmem:[#allocation50_spill] sm:$0xff] %v15850_v0  ;;  %19004 = vst [vmem:[#allocation51_spill] sm:$0xff] %v15852_v17  ;;  %v15855_v56 = vadd.f32 %v4147_v6, %v15687_v7  ;;  %v426_v17 = vld [vmem:[#allocation3 + $0x8c] sm:$0x1]  ;;  %v386_v0 = vld [vmem:[#allocation3 + $0xa8] sm:$0x1] }
 0x216   : > { %v13053_v52 = vpop.f32.mrf.mxu0  ;;  %v15857_v47 = vpop.f32.mrf.mxu1  ;;  %v427_v6 = vsel %vm15666_vm3, 0, %v426_v17 }
 0x217   : > { %19005 = vst [vmem:[#allocation52_spill] sm:$0xff] %v15855_v56  ;;  %19006 = vst [vmem:[#allocation53_spill] sm:$0xff] %v15857_v47  ;;  %v15860_v45 = vadd.f32 %v13053_v52, %v15695_v1  ;;  %v387_v1 = vsel %vm15651_vm1, 0, %v386_v0 }
 0x218   : > { %v15862_v10 = vpop.f32.mrf.mxu0  ;;  %v15866_v24 = vpop.f32.mrf.mxu1  ;;  %428 = vst [vmem:[#allocation3 + $0x8c] sm:$0x1] %v427_v6  ;;  %388 = vst [vmem:[#allocation3 + $0xa8] sm:$0x1] %v387_v1 }
 0x219   : > { %19007 = vst [vmem:[#allocation54_spill] sm:$0xff] %v15860_v45  ;;  %19008 = vst [vmem:[#allocation55_spill] sm:$0xff] %v15866_v24  ;;  %v19035_v45 = vld [vmem:[#allocation38_spill] sm:$0xff] }
 0x21a   : > { %v13056_v48 = vpop.f32.mrf.mxu0  ;;  %v15875_v47 = vpop.f32.mrf.mxu1 }
 0x21b   : > { %v15869_v7 = vadd.f32 %v13056_v48, %v15703_v58  ;;  %19010 = vst [vmem:[#allocation57_spill] sm:$0xff] %v15875_v47  ;;  %v383_v48 = vld [vmem:[#allocation3 + $0x9c] sm:$0x1] }
 0x21c   : > { %v4163_v52 = vpop.f32.mrf.mxu0  ;;  %v15880_v24 = vpop.f32.mrf.mxu1  ;;  %v384_v0 = vsel %vm15651_vm1, 0, %v383_v48 }
 0x21d   : > { %19009 = vst [vmem:[#allocation56_spill] sm:$0xff] %v15869_v7  ;;  %v15878_v39 = vadd.f32 %v4163_v52, %v15708_v2  ;;  %19012 = vst [vmem:[#allocation59_spill] sm:$0xff] %v15880_v24 }
 0x21e   : > { %v13057_v55 = vpop.f32.mrf.mxu0  ;;  %v15887_v17 = vpop.f32.mrf.mxu1  ;;  %385 = vst [vmem:[#allocation3 + $0x9c] sm:$0x1] %v384_v0 }
 0x21f   : > { %19011 = vst [vmem:[#allocation58_spill] sm:$0xff] %v15878_v39  ;;  %v15883_v58 = vadd.f32 %v13057_v55, %v15716_v57  ;;  %19014 = vst [vmem:[#allocation61_spill] sm:$0xff] %v15887_v17 }
 0x220   : > { %v15885_v7 = vpop.f32.mrf.mxu0 }
 0x221   : > { %19013 = vst [vmem:[#allocation60_spill] sm:$0xff] %v15883_v58 }
 0x222   : > { %v13060_v6 = vpop.f32.mrf.mxu0  ;;  %v15894_v52 = vpop.f32.mrf.mxu1 }
 0x223   : > { %v15892_v1 = vadd.f32 %v13060_v6, %v15722_v54  ;;  %19016 = vst [vmem:[#allocation63_spill] sm:$0xff] %v15894_v52  ;;  %v435_v54 = vld [vmem:[#allocation3 + $0xb0] sm:$0x1] }
 0x224   : > { %v4179_v2 = vpop.f32.mrf.mxu0  ;;  %v15899_v55 = vpop.f32.mrf.mxu1  ;;  %v19077_v62 = vld [vmem:[#allocation59_spill] sm:$0xff] }
 0x225   : > { %19015 = vst [vmem:[#allocation62_spill] sm:$0xff] %v15892_v1  ;;  %v15897_v24 = vadd.f32 %v4179_v2, %v15727_v41  ;;  %19018 = vst [vmem:[#allocation65_spill] sm:$0xff] %v15899_v55  ;;  %v436_v41 = vsel %vm15666_vm3, 0, %v435_v54  ;;  %v19024_v55 = vld [vmem:[#allocation11_spill] sm:$0xff] }
 0x226   : > { %v13061_v57 = vpop.f32.mrf.mxu0  ;;  %v15906_v48 = vpop.f32.mrf.mxu1  ;;  %437 = vst [vmem:[#allocation3 + $0xb0] sm:$0x1] %v436_v41 }
 0x227   : > { %19017 = vst [vmem:[#allocation64_spill] sm:$0xff] %v15897_v24  ;;  %v15902_v58 = vadd.f32 %v13061_v57, %v15735_v37  ;;  %19021 = vst [vmem:[#allocation68_spill] sm:$0xff] %v15906_v48  ;;  %v19025_v24 = vld [vmem:[#allocation10_spill] sm:$0xff] }
 0x228   : > { %v15904_v17 = vpop.f32.mrf.mxu0  ;;  %v15908_v47 = vpop.f32.mrf.mxu1  ;;  %v1781_v37 = vadd.f32 %v19025_v24, %v19024_v55  ;;  %v19030_v24 = vld [vmem:[#allocation21_spill] sm:$0xff]  ;;  %v19031_v55 = vld [vmem:[#allocation18_spill] sm:$0xff] }
 0x229   : > { %19019 = vst [vmem:[#allocation66_spill] sm:$0xff] %v15902_v58  ;;  %19020 = vst [vmem:[#allocation67_spill] sm:$0xff] %v15904_v17  ;;  %v432_v58 = vld [vmem:[#allocation3 + $0xa4] sm:$0x1] }
 0x22a   : > { %v13064_v0 = vpop.f32.mrf.mxu0  ;;  %19022 = vst [vmem:[#allocation69_spill] sm:$0xff] %v15908_v47  ;;  %v433_v47 = vsel %vm15666_vm3, 0, %v432_v58  ;;  %v2330_v54 = vadd.f32 %v15437_v51, %v1781_v37  ;;  %v19034_v58 = vld [vmem:[#allocation43_spill] sm:$0xff]  ;;  %v19036_v51 = vld [vmem:[#allocation44_spill] sm:$0xff] }
 0x22b   : > { %v15911_v6 = vadd.f32 %v13064_v0, %v15746_v46  ;;  %v15920_v48 = vpop.f32.mrf.mxu1  ;;  %v392_v46 = vld [vmem:[#allocation3 + $0xc0] sm:$0x1]  ;;  %v19028_v0 = vld [vmem:[#allocation13_spill] sm:$0xff]  ;;  %434 = vst [vmem:[#allocation3 + $0xa4] sm:$0x1] %v433_v47  ;;  %v1877_v17 = vadd.f32 %v19035_v45, %v19034_v58 }
 0x22c   : > { %v4195_v2 = vpop.f32.mrf.mxu0  ;;  %19027 = vst [vmem:[#allocation10_spill] sm:$0xff] %v15920_v48  ;;  %v19033_v48 = vld [vmem:[#allocation27_spill] sm:$0xff]  ;;  %v389_v45 = vld [vmem:[#allocation3 + $0xb4] sm:$0x1] }
 0x22d   : > { %19023 = vst [vmem:[#allocation70_spill] sm:$0xff] %v15911_v6  ;;  %v15918_v57 = vadd.f32 %v4195_v2, %v15752_v27  ;;  %v19029_v6 = vld [vmem:[#allocation12_spill] sm:$0xff]  ;;  %v393_v27 = vsel %vm15651_vm1, 0, %v392_v46  ;;  %v1845_v2 = vadd.f32 %v19031_v55, %v19030_v24  ;;  %v15938_v56 = vpop.f32.mrf.mxu1  ;;  %v2354_v46 = vadd.f32 %v15606_v25, %v1877_v17 }
 0x22e   : > { %v13065_v52 = vpop.f32.mrf.mxu0  ;;  %v1797_v1 = vadd.f32 %v19029_v6, %v19028_v0  ;;  %394 = vst [vmem:[#allocation3 + $0xc0] sm:$0x1] %v393_v27  ;;  %v2688_v0 = vadd.f32 %v15401_v16, %v2330_v54  ;;  %v2696_v25 = vadd.f32 %v15473_v21, %v15506_v15  ;;  %v19037_v15 = vld [vmem:[#allocation36_spill] sm:$0xff] }
 0x22f   : > { %19026 = vst [vmem:[#allocation11_spill] sm:$0xff] %v15918_v57  ;;  %v15928_v41 = vadd.f32 %v13065_v52, %v15758_v33  ;;  %v19032_v57 = vld [vmem:[#allocation33_spill] sm:$0xff]  ;;  %v1893_v33 = vadd.f32 %v19036_v51, %v15393_v20  ;;  %v2346_v52 = vadd.f32 %v15555_v43, %v1845_v2  ;;  %v390_v20 = vsel %vm15651_vm1, 0, %v389_v45  ;;  %v19039_v2 = vld [vmem:[#allocation24_spill] sm:$0xff]  ;;  %v19042_v51 = vld [vmem:[#allocation23_spill] sm:$0xff] }
 0x230   : > { %v1861_v39 = vadd.f32 %v19033_v48, %v19032_v57  ;;  %v15940_v6 = vpop.f32.mrf.mxu0  ;;  %v2334_v47 = vadd.f32 %v15471_v60, %v1797_v1  ;;  %v15948_v48 = vpop.f32.mrf.mxu1  ;;  %391 = vst [vmem:[#allocation3 + $0xb4] sm:$0x1] %v390_v20  ;;  %v2712_v1 = vadd.f32 %v15588_v53, %v2354_v46  ;;  %v3422_v21 = vadd.f32 %v15691_v49, %v2696_v25  ;;  %v19048_v45 = vld [vmem:[#allocation15_spill] sm:$0xff]  ;;  %v19050_v20 = vld [vmem:[#allocation28_spill] sm:$0xff] }
 0x231   : > { %v2358_v24 = vadd.f32 %v15626_v42, %v1893_v33  ;;  %v2700_v42 = vadd.f32 %v15504_v22, %v15530_v11  ;;  %v19040_v22 = vld [vmem:[#allocation19_spill] sm:$0xff]  ;;  %v19041_v11 = vld [vmem:[#allocation16_spill] sm:$0xff]  ;;  %v19043_v33 = vld [vmem:[#allocation37_spill] sm:$0xff] }
 0x232   : > { %v2350_v37 = vadd.f32 %v15586_v9, %v1861_v39  ;;  %v13068_v57 = vpop.f32.mrf.mxu0  ;;  %v15957_v60 = vpop.f32.mrf.mxu1  ;;  %v2692_v9 = vadd.f32 %v15441_v18, %v2334_v47  ;;  %v3414_v39 = vadd.f32 %v15645_v61, %v2688_v0 }
 0x233   : > { %v15953_v27 = vadd.f32 %v13068_v57, %v15764_v32  ;;  %v2704_v32 = vadd.f32 %v15528_v5, %v2346_v52  ;;  %v2716_v18 = vadd.f32 %v15608_v31, %v2358_v24  ;;  %v3883_v5 = vadd.f32 %v19041_v11, %v19040_v22  ;;  %v19045_v52 = vld [vmem:[#allocation26_spill] sm:$0xff]  ;;  %v19047_v57 = vld [vmem:[#allocation20_spill] sm:$0xff] }
 0x234   : > { %v4211_v43 = vpop.f32.mrf.mxu0  ;;  %v2708_v17 = vadd.f32 %v15557_v28, %v2350_v37  ;;  %v3418_v55 = vadd.f32 %v15670_v8, %v2692_v9  ;;  %v3426_v28 = vadd.f32 %v19042_v51, %v2700_v42  ;;  %v19044_v8 = vld [vmem:[#allocation31_spill] sm:$0xff]  ;;  %v19046_v37 = vld [vmem:[#allocation17_spill] sm:$0xff]  ;;  %v3889_v0 = vadd.f32 %v19048_v45, %v19047_v57  ;;  %v19049_v24 = vld [vmem:[#allocation34_spill] sm:$0xff] }
 0x235   : > { %v15964_v16 = vadd.f32 %v4211_v43, %v15769_v50  ;;  %v19038_v50 = vld [vmem:[#allocation14_spill] sm:$0xff]  ;;  %v3430_v53 = vadd.f32 %v19043_v33, %v2704_v32  ;;  %v3886_v49 = vadd.f32 %v19045_v52, %v19044_v8  ;;  %v3884_v46 = vadd.f32 %v19046_v37, %v3414_v39  ;;  %v19052_v42 = vld [vmem:[#allocation32_spill] sm:$0xff]  ;;  %v19055_v52 = vld [vmem:[#allocation35_spill] sm:$0xff] }
 0x236   : > { %v13069_v54 = vpop.f32.mrf.mxu0  ;;  %v3885_v58 = vadd.f32 %v19039_v2, %v19038_v50  ;;  %v15983_v47 = vpop.f32.mrf.mxu1  ;;  %v3887_v43 = vadd.f32 %v19050_v20, %v19049_v24  ;;  %v19051_v9 = vld [vmem:[#allocation42_spill] sm:$0xff]  ;;  %v3442_v32 = vadd.f32 %v15788_v30, %v2716_v18  ;;  %v4242_v33 = vadd.f32 %v15802_v29, %v3883_v5  ;;  %v19056_v37 = vld [vmem:[#allocation41_spill] sm:$0xff] }
 0x237   : > { %v15975_v61 = vadd.f32 %v13069_v54, %v19037_v15  ;;  %v3434_v25 = vadd.f32 %v19051_v9, %v2708_v17  ;;  %v3438_v54 = vadd.f32 %v19052_v42, %v2712_v1  ;;  %v19053_v22 = vld [vmem:[#allocation30_spill] sm:$0xff]  ;;  %v3896_v17 = vadd.f32 %v19055_v52, %v3426_v28  ;;  %v19057_v5 = vld [vmem:[#allocation25_spill] sm:$0xff] }
 0x238   : > { %v15985_v31 = vpop.f32.mrf.mxu0  ;;  %v4244_v15 = vadd.f32 %v15794_v19, %v3885_v58  ;;  %v15998_v50 = vpop.f32.mrf.mxu1  ;;  %v3888_v11 = vadd.f32 %v19053_v22, %v3418_v55  ;;  %v19054_v39 = vld [vmem:[#allocation22_spill] sm:$0xff]  ;;  %v3900_v1 = vadd.f32 %v19056_v37, %v3430_v53  ;;  %v4245_v30 = vadd.f32 %v15807_v36, %v3886_v49  ;;  %v19058_v57 = vld [vmem:[#allocation29_spill] sm:$0xff]  ;;  %v19066_v22 = vld [vmem:[#allocation52_spill] sm:$0xff] }
 0x239   : > { %v3892_v51 = vadd.f32 %v19054_v39, %v3422_v21  ;;  %v4243_v19 = vadd.f32 %v15815_v44, %v3884_v46  ;;  %v4248_v55 = vadd.f32 %v15828_v40, %v3889_v0  ;;  %v4246_v21 = vadd.f32 %v15832_v4, %v3887_v43  ;;  %v441_v45 = vld [vmem:[#allocation3 + $0xc8] sm:$0x1]  ;;  %v19059_v43 = vld [vmem:[#allocation40_spill] sm:$0xff]  ;;  %v19062_v42 = vld [vmem:[#allocation46_spill] sm:$0xff] }
 0x23a   : > { %v13072_v2 = vpop.f32.mrf.mxu0  ;;  %v16010_v18 = vpop.f32.mrf.mxu1  ;;  %v4247_v29 = vadd.f32 %v15843_v26, %v3888_v11  ;;  %v3904_v28 = vadd.f32 %v19057_v5, %v3434_v25  ;;  %v3908_v53 = vadd.f32 %v19058_v57, %v3438_v54  ;;  %v3912_v36 = vadd.f32 %v15783_v34, %v3442_v32  ;;  %v19064_v32 = vld [vmem:[#allocation50_spill] sm:$0xff]  ;;  %v19067_v11 = vld [vmem:[#allocation49_spill] sm:$0xff]  ;;  %v19073_v5 = vld [vmem:[#allocation55_spill] sm:$0xff] }
 0x23b   : > { %v16004_v8 = vadd.f32 %v13072_v2, %v15781_v35  ;;  %v4970_v44 = vadd.f32 %v15790_v13, %v4244_v15  ;;  %v4968_v40 = vadd.f32 %v15796_v38, %v4242_v33  ;;  %v4251_v4 = vadd.f32 %v15862_v10, %v3892_v51  ;;  %v19060_v38 = vld [vmem:[#allocation39_spill] sm:$0xff]  ;;  %v19065_v15 = vld [vmem:[#allocation48_spill] sm:$0xff] }
 0x23c   : > { %v4227_v58 = vpop.f32.mrf.mxu0  ;;  %v4940_v49 = vpop.f32.mrf.mxu1  ;;  %v4971_v0 = vadd.f32 %v15804_v59, %v4245_v30  ;;  %v4969_v24 = vadd.f32 %v15809_v63, %v4243_v19  ;;  %v4255_v34 = vadd.f32 %v15885_v7, %v3896_v17  ;;  %v16034_v9 = vsel %vm6603_vm0, %v19059_v43, 0  ;;  %v19063_v59 = vld [vmem:[#allocation47_spill] sm:$0xff]  ;;  %v19069_v30 = vld [vmem:[#allocation54_spill] sm:$0xff]  ;;  %v19076_v43 = vld [vmem:[#allocation60_spill] sm:$0xff] }
 0x23d   : > { %v16016_v35 = vadd.f32 %v4227_v58, %v15786_v23  ;;  %v442_v23 = vsel %vm15666_vm3, 0, %v441_v45  ;;  %v4974_v10 = vadd.f32 %v19060_v38, %v4248_v55  ;;  %v16042_v54 = vadd.f32 %v19062_v42, %v15841_v12  ;;  %v438_v7 = vld [vmem:[#allocation3 + $0xbc] sm:$0x1]  ;;  %v16059_v12 = vld [vmem:[%s18856_s2] ss:$0 sm:$0xff] }
 0x23e   : > { %v13073_v46 = vpop.f32.mrf.mxu0  ;;  %v13106_v13 = vpop.f32.mrf.mxu1  ;;  %443 = vst [vmem:[#allocation3 + $0xc8] sm:$0x1] %v442_v23  ;;  %v16045_v63 = vadd.f32 %v19063_v59, %v4247_v29  ;;  %v16049_v2 = vadd.f32 %v19065_v15, %v19064_v32  ;;  %v16053_v39 = vadd.f32 %v19067_v11, %v19066_v22  ;;  %v19068_v51 = vld [vmem:[#allocation67_spill] sm:$0xff]  ;;  %v439_v37 = vsel %vm15666_vm3, 0, %v438_v7  ;;  %v19071_v55 = vld [vmem:[#allocation53_spill] sm:$0xff]  ;;  %v19072_v29 = vld [vmem:[#allocation56_spill] sm:$0xff] }
 0x23f   : > { %v16025_v26 = vadd.f32 %v13073_v46, %v15792_v3  ;;  %v19061_v3 = vld [vmem:[#allocation45_spill] sm:$0xff]  ;;  %v4259_v33 = vadd.f32 %v19068_v51, %v3900_v1  ;;  %v19070_v19 = vld [vmem:[#allocation51_spill] sm:$0xff]  ;;  %v16072_v1 = vadd.f32 %v19073_v5, %v19072_v29  ;;  %440 = vst [vmem:[#allocation3 + $0xbc] sm:$0x1] %v439_v37  ;;  %v19074_v46 = vld [vmem:[#allocation58_spill] sm:$0xff]  ;;  %v16080_v38 = vadd.f32 %v19077_v62, %v19076_v43 }
 0x240   : > { %v4230_v20 = vpop.f32.mrf.mxu0  ;;  %v16038_v25 = vadd.f32 %v19061_v3, %v4246_v21  ;;  %v4953_v52 = vpop.f32.mrf.mxu1  ;;  %v16065_v58 = vadd.f32 %v19070_v19, %v19069_v30  ;;  %v16068_v21 = vadd.f32 %v19071_v55, %v4251_v4  ;;  %v19075_v45 = vld [vmem:[#allocation57_spill] sm:$0xff]  ;;  %v4263_v4 = vadd.f32 %v15940_v6, %v3904_v28  ;;  %v19079_v7 = vld [vmem:[#allocation62_spill] sm:$0xff]  ;;  %v19080_v32 = vld [vmem:[#allocation63_spill] sm:$0xff] }
 0x241   : > { %v16076_v23 = vadd.f32 %v19075_v45, %v19074_v46  ;;  %v19078_v3 = vld [vmem:[#allocation61_spill] sm:$0xff]  ;;  %v16088_v15 = vadd.f32 %v19080_v32, %v19079_v7  ;;  %v19083_v30 = vld [vmem:[#allocation66_spill] sm:$0xff]  ;;  %v19084_v19 = vld [vmem:[#allocation68_spill] sm:$0xff]  ;;  %v4267_v46 = vadd.f32 %v15985_v31, %v3908_v53  ;;  %v16121_v7 = vadd.f32 %v15983_v47, %v15953_v27 }
 0x242   : > { %v13112_v17 = vpop.f32.mrf.mxu0  ;;  %v16083_v42 = vadd.f32 %v19078_v3, %v4255_v34  ;;  %v19082_v22 = vld [vmem:[#allocation65_spill] sm:$0xff]  ;;  %v13107_v51 = vpop.f32.mrf.mxu1  ;;  %v16097_v55 = vadd.f32 %v19084_v19, %v19083_v30  ;;  %v19086_v6 = vld [vmem:[#allocation70_spill] sm:$0xff]  ;;  %v19088_v43 = vld [vmem:[#allocation11_spill] sm:$0xff]  ;;  %v4271_v31 = vadd.f32 %v4230_v20, %v3912_v36  ;;  %v16135_v27 = vadd.f32 %v13106_v13, %v16004_v8 }
 0x243   : > { %v5440_v57 = vadd.f32 %v13112_v17, %v4970_v44  ;;  %v19081_v44 = vld [vmem:[#allocation64_spill] sm:$0xff]  ;;  %v19085_v34 = vld [vmem:[#allocation69_spill] sm:$0xff]  ;;  %v19087_v28 = vld [vmem:[#allocation10_spill] sm:$0xff]  ;;  %v16109_v62 = vadd.f32 %v15938_v56, %v19088_v43  ;;  %v16138_v47 = vadd.f32 %v4953_v52, %v16016_v35 }
 0x244   : > { %v5311_v59 = vpop.f32.mrf.mxu0  ;;  %v16092_v11 = vadd.f32 %v19082_v22, %v19081_v44  ;;  %v16100_v29 = vadd.f32 %v19085_v34, %v4259_v33  ;;  %v16104_v5 = vadd.f32 %v19087_v28, %v19086_v6  ;;  %v16117_v33 = vadd.f32 %v15957_v60, %v4263_v4  ;;  %v4956_v32 = vpop.f32.mrf.mxu1  ;;  %v5966_v52 = vld [vmem:[#allocation3 + $0x18] sm:$0xf] }
 0x245   : > { %v5479_v17 = vadd.f32 %v16059_v12, %v5440_v57  ;;  %v5438_v37 = vadd.f32 %v5311_v59, %v4968_v40  ;;  %v16114_v59 = vadd.f32 %v15948_v48, %v15928_v41  ;;  %v16130_v41 = vadd.f32 %v16010_v18, %v15975_v61 }
 0x246   : > { %v13113_v45 = vpop.f32.mrf.mxu0  ;;  %v16132_v48 = vadd.f32 %v4940_v49, %v4267_v46  ;;  %v16141_v4 = vadd.f32 %v13107_v51, %v16025_v26 }
 0x247   : > { %v5511_v57 = vmax.f32 %v5479_v17, 0.0  ;;  %v5477_v40 = vadd.f32 %v16059_v12, %v5438_v37  ;;  %v5441_v3 = vadd.f32 %v13113_v45, %v4971_v0  ;;  %v16126_v0 = vadd.f32 %v15998_v50, %v15964_v16  ;;  %v5959_v45 = vld [vmem:[#allocation3 + $0xc] sm:$0xf] }
 0x248   : > { %v5314_v53 = vpop.f32.mrf.mxu0  ;;  %v16143_v16 = vadd.f32 %v4956_v32, %v4271_v31 }
 0x249   : > { %v12499_v56 = vpack.c.bf16 %v5511_v57, %v5511_v57  ;;  %v5509_v44 = vmax.f32 %v5477_v40, 0.0  ;;  %v5480_v22 = vadd.f32 %v16059_v12, %v5441_v3  ;;  %v5439_v17 = vadd.f32 %v5314_v53, %v4969_v24 }
 0x24a   : > { %v13116_v60 = vpop.f32.mrf.mxu0 }
 0x24b   : > { %v5655_v36 = vshrl.u32 %v12499_v56, 16  ;;  %v12497_v20 = vpack.c.bf16 %v5509_v44, %v5509_v44  ;;  %v5512_v24 = vmax.f32 %v5480_v22, 0.0  ;;  %v5478_v61 = vadd.f32 %v16059_v12, %v5439_v17 }
 0x24c   : > { %v5444_v50 = vadd.f32 %v13116_v60, %v4974_v10  ;;  %v5327_v18 = vpop.f32.mrf.mxu0  ;;  %v5658_v37 = vshll.u32 %v12499_v56, 16 }
 0x24d   : > { %v5657_v49 = vrot.slane %v5655_v36, 7  ;;  %v5638_v8 = vshrl.u32 %v12497_v20, 16  ;;  %v12500_v13 = vpack.c.bf16 %v5512_v24, %v5512_v24  ;;  %v5641_v30 = vshll.u32 %v12497_v20, 16 }
 0x24e   : > { %v5510_v26 = vmax.f32 %v5478_v61, 0.0  ;;  %v5483_v51 = vadd.f32 %v16059_v12, %v5444_v50  ;;  %v5442_v19 = vadd.f32 %v5327_v18, %v16038_v25  ;;  %v13117_v34 = vpop.f32.mrf.mxu0  ;;  %v5970_v25 = vld [vmem:[#allocation3 + $0x20] sm:$0x1] }
 0x24f   : > { %v5660_v10 = vor.u32 %v5658_v37, %v5657_v49  ;;  %v5661_v6 = vrot.slane %v5657_v49, 4  ;;  %v5640_v28 = vrot.slane %v5638_v8, 7  ;;  %v5663_v46 = vshrl.u32 %v12500_v13, 16 }
 0x250   : > { %v5666_v43 = vshll.u32 %v12500_v13, 16  ;;  %v12498_v57 = vpack.c.bf16 %v5510_v26, %v5510_v26  ;;  %v5515_v40 = vmax.f32 %v5483_v51, 0.0  ;;  %v5481_v3 = vadd.f32 %v16059_v12, %v5442_v19  ;;  %v5330_v31 = vpop.f32.mrf.mxu0  ;;  %v5963_v19 = vld [vmem:[#allocation3 + $0x14] sm:$0x1] }
 0x251   : > { %v5967_v53 = vsel %vm16148_vm7, %v5660_v10, %v5966_v52  ;;  %v5643_v32 = vor.u32 %v5641_v30, %v5640_v28  ;;  %v5644_v56 = vrot.slane %v5640_v28, 4  ;;  %v5665_v44 = vrot.slane %v5663_v46, 7 }
 0x252   : > { %5968 = vst [vmem:[#allocation3 + $0x18] sm:$0xf] %v5967_v53  ;;  %v5646_v22 = vshrl.u32 %v12498_v57, 16  ;;  %v5649_v17 = vshll.u32 %v12498_v57, 16  ;;  %v12503_v60 = vpack.c.bf16 %v5515_v40, %v5515_v40  ;;  %v5513_v36 = vmax.f32 %v5481_v3, 0.0  ;;  %v13120_v20 = vpop.f32.mrf.mxu0 }
 0x253   : > { %v5960_v24 = vsel %vm16148_vm7, %v5643_v32, %v5959_v45  ;;  %v5668_v61 = vor.u32 %v5666_v43, %v5665_v44  ;;  %v5670_v50 = vrot.slane %v5665_v44, 4  ;;  %v5445_v18 = vadd.f32 %v13117_v34, %v16042_v54  ;;  %v5980_v57 = vld [vmem:[#allocation3 + $0x30] sm:$0xf] }
 0x254   : > { %5961 = vst [vmem:[#allocation3 + $0xc] sm:$0xf] %v5960_v24  ;;  %v5648_v49 = vrot.slane %v5646_v22, 7  ;;  %v5689_v37 = vshrl.u32 %v12503_v60, 16  ;;  %v5692_v8 = vshll.u32 %v12503_v60, 16  ;;  %v12501_v13 = vpack.c.bf16 %v5513_v36, %v5513_v36  ;;  %v5343_v52 = vpop.f32.mrf.mxu0 }
 0x255   : > { %v5669_v26 = vsel %vm13856_vm15, %v5661_v6, %v5668_v61  ;;  %v5971_v51 = vsel %vm15651_vm1, %v5670_v50, %v5970_v25  ;;  %v5484_v10 = vadd.f32 %v16059_v12, %v5445_v18  ;;  %v5443_v28 = vadd.f32 %v5330_v31, %v16045_v63 }
 0x256   : > { %5969 = vst.msk [vmem:[#allocation3 + $0x1c] sm:$0xf] %vm335_vm5, %v5669_v26  ;;  %5972 = vst [vmem:[#allocation3 + $0x20] sm:$0x1] %v5971_v51  ;;  %v5651_v54 = vor.u32 %v5649_v17, %v5648_v49  ;;  %v5653_v34 = vrot.slane %v5648_v49, 4  ;;  %v5691_v46 = vrot.slane %v5689_v37, 7  ;;  %v13121_v43 = vpop.f32.mrf.mxu0  ;;  %v5448_v53 = vadd.f32 %v13120_v20, %v16049_v2 }
 0x257   : > { %v5672_v45 = vshrl.u32 %v12501_v13, 16  ;;  %v5675_v40 = vshll.u32 %v12501_v13, 16  ;;  %v5516_v3 = vmax.f32 %v5484_v10, 0.0  ;;  %v5482_v6 = vadd.f32 %v16059_v12, %v5443_v28  ;;  %v5973_v20 = vld [vmem:[#allocation3 + $0x24] sm:$0xf] }
 0x258   : > { %v5652_v32 = vsel %vm13856_vm15, %v5644_v56, %v5651_v54  ;;  %v5964_v63 = vsel %vm15651_vm1, %v5653_v34, %v5963_v19  ;;  %v5694_v31 = vor.u32 %v5692_v8, %v5691_v46  ;;  %v5695_v44 = vrot.slane %v5691_v46, 4  ;;  %v5346_v25 = vpop.f32.mrf.mxu0 }
 0x259   : > { %5962 = vst.msk [vmem:[#allocation3 + $0x10] sm:$0xf] %vm335_vm5, %v5652_v32  ;;  %5965 = vst [vmem:[#allocation3 + $0x14] sm:$0x1] %v5964_v63  ;;  %v5674_v22 = vrot.slane %v5672_v45, 7  ;;  %v12504_v17 = vpack.c.bf16 %v5516_v3, %v5516_v3  ;;  %v5514_v60 = vmax.f32 %v5482_v6, 0.0  ;;  %v5487_v36 = vadd.f32 %v16059_v12, %v5448_v53 }
 0x25a   : > { %v5981_v2 = vsel %vm16148_vm7, %v5694_v31, %v5980_v57  ;;  %v5446_v56 = vadd.f32 %v5343_v52, %v16053_v39  ;;  %v5449_v24 = vadd.f32 %v13121_v43, %v16065_v58  ;;  %v5447_v61 = vadd.f32 %v5346_v25, %v16068_v21  ;;  %v13124_v50 = vpop.f32.mrf.mxu0  ;;  %v5984_v58 = vld [vmem:[#allocation3 + $0x38] sm:$0x1] }
 0x25b   : > { %5982 = vst [vmem:[#allocation3 + $0x30] sm:$0xf] %v5981_v2  ;;  %v5677_v18 = vor.u32 %v5675_v40, %v5674_v22  ;;  %v5678_v49 = vrot.slane %v5674_v22, 4  ;;  %v5697_v37 = vshrl.u32 %v12504_v17, 16  ;;  %v5700_v8 = vshll.u32 %v12504_v17, 16 }
 0x25c   : > { %v12502_v13 = vpack.c.bf16 %v5514_v60, %v5514_v60  ;;  %v5519_v26 = vmax.f32 %v5487_v36, 0.0  ;;  %v5485_v51 = vadd.f32 %v16059_v12, %v5446_v56  ;;  %v5488_v19 = vadd.f32 %v16059_v12, %v5449_v24  ;;  %v5359_v10 = vpop.f32.mrf.mxu0  ;;  %v5977_v22 = vld [vmem:[#allocation3 + $0x2c] sm:$0x1]  ;;  %v5994_v56 = vld [vmem:[#allocation3 + $0x48] sm:$0xf] }
 0x25d   : > { %v5974_v39 = vsel %vm16148_vm7, %v5677_v18, %v5973_v20  ;;  %v5699_v52 = vrot.slane %v5697_v37, 7  ;;  %v5486_v21 = vadd.f32 %v16059_v12, %v5447_v61  ;;  %v5452_v28 = vadd.f32 %v13124_v50, %v16072_v1 }
 0x25e   : > { %5975 = vst [vmem:[#allocation3 + $0x24] sm:$0xf] %v5974_v39  ;;  %v5680_v54 = vshrl.u32 %v12502_v13, 16  ;;  %v5683_v34 = vshll.u32 %v12502_v13, 16  ;;  %v12507_v46 = vpack.c.bf16 %v5519_v26, %v5519_v26  ;;  %v5517_v45 = vmax.f32 %v5485_v51, 0.0  ;;  %v13125_v43 = vpop.f32.mrf.mxu0 }
 0x25f   : > { %v5702_v57 = vor.u32 %v5700_v8, %v5699_v52  ;;  %v5704_v40 = vrot.slane %v5699_v52, 4  ;;  %v5520_v3 = vmax.f32 %v5488_v19, 0.0  ;;  %v5518_v6 = vmax.f32 %v5486_v21, 0.0  ;;  %v5987_v19 = vld [vmem:[#allocation3 + $0x3c] sm:$0xf] }
 0x260   : > { %v5682_v53 = vrot.slane %v5680_v54, 7  ;;  %v5723_v32 = vshrl.u32 %v12507_v46, 16  ;;  %v5726_v63 = vshll.u32 %v12507_v46, 16  ;;  %v12505_v31 = vpack.c.bf16 %v5517_v45, %v5517_v45  ;;  %v5362_v61 = vpop.f32.mrf.mxu0  ;;  %v12260_v39 = vld [vmem:[%s18857_s3 + $0xc] sm:$0xf] }
 0x261   : > { %v5703_v25 = vsel %vm13856_vm15, %v5695_v44, %v5702_v57  ;;  %v5985_v1 = vsel %vm15651_vm1, %v5704_v40, %v5984_v58  ;;  %v12508_v17 = vpack.c.bf16 %v5520_v3, %v5520_v3  ;;  %v12506_v60 = vpack.c.bf16 %v5518_v6, %v5518_v6  ;;  %v5998_v21 = vld [vmem:[#allocation3 + $0x50] sm:$0x1]  ;;  %13460 = vmatprep.subr.msk.bf16.mxu0 %vm6603_vm0, %v12260_v39 }
 0x262   : > { %5983 = vst.msk [vmem:[#allocation3 + $0x34] sm:$0xf] %vm335_vm5, %v5703_v25  ;;  %5986 = vst [vmem:[#allocation3 + $0x38] sm:$0x1] %v5985_v1  ;;  %v5685_v36 = vor.u32 %v5683_v34, %v5682_v53  ;;  %v5687_v2 = vrot.slane %v5682_v53, 4  ;;  %v5725_v20 = vrot.slane %v5723_v32, 7  ;;  %v5491_v46 = vadd.f32 %v16059_v12, %v5452_v28  ;;  %v13128_v40 = vpop.f32.mrf.mxu0 }
 0x263   : > { %v5706_v24 = vshrl.u32 %v12505_v31, 16  ;;  %v5709_v50 = vshll.u32 %v12505_v31, 16  ;;  %v5731_v18 = vshrl.u32 %v12508_v17, 16  ;;  %v5734_v37 = vshll.u32 %v12508_v17, 16  ;;  %v6073_v17 = vld [vmem:[#allocation3 + $0xc] sm:$0xf] }
 0x264   : > { %v5714_v8 = vshrl.u32 %v12506_v60, 16  ;;  %v5686_v44 = vsel %vm13856_vm15, %v5678_v49, %v5685_v36  ;;  %v5978_v13 = vsel %vm15651_vm1, %v5687_v2, %v5977_v22  ;;  %v5728_v26 = vor.u32 %v5726_v63, %v5725_v20  ;;  %v5991_v63 = vld [vmem:[#allocation3 + $0x44] sm:$0x1] }
 0x265   : > { %v5729_v51 = vrot.slane %v5725_v20, 4  ;;  %5976 = vst.msk [vmem:[#allocation3 + $0x28] sm:$0xf] %vm335_vm5, %v5686_v44  ;;  %5979 = vst [vmem:[#allocation3 + $0x2c] sm:$0x1] %v5978_v13  ;;  %v5708_v52 = vrot.slane %v5706_v24, 7  ;;  %v5450_v45 = vadd.f32 %v5359_v10, %v16076_v23  ;;  %v5453_v57 = vadd.f32 %v13125_v43, %v16080_v38  ;;  %v16218_v20 = vpop.f32.mrf.mxu0 }
 0x266   : > { %v5733_v58 = vrot.slane %v5731_v18, 7  ;;  %v5716_v54 = vrot.slane %v5714_v8, 7  ;;  %v5717_v34 = vshll.u32 %v12506_v60, 16  ;;  %v5995_v49 = vsel %vm16148_vm7, %v5728_v26, %v5994_v56  ;;  %v6008_v26 = vld [vmem:[#allocation3 + $0x60] sm:$0xf] }
 0x267   : > { %5996 = vst [vmem:[#allocation3 + $0x48] sm:$0xf] %v5995_v49  ;;  %v5711_v3 = vor.u32 %v5709_v50, %v5708_v52  ;;  %v5712_v6 = vrot.slane %v5708_v52, 4  ;;  %v5523_v1 = vmax.f32 %v5491_v46, 0.0  ;;  %v5489_v22 = vadd.f32 %v16059_v12, %v5450_v45  ;;  %v16225_v52 = vld [vmem:[#allocation3 + $0x10] sm:$0xf] }
 0x268   : > { %v5736_v53 = vor.u32 %v5734_v37, %v5733_v58  ;;  %v5738_v32 = vrot.slane %v5733_v58, 4  ;;  %v5719_v31 = vor.u32 %v5717_v34, %v5716_v54  ;;  %v5721_v25 = vrot.slane %v5716_v54, 4  ;;  %v13129_v34 = vpop.f32.mrf.mxu0 }
 0x269   : > { %v5988_v28 = vsel %vm16148_vm7, %v5711_v3, %v5987_v19  ;;  %v5492_v10 = vadd.f32 %v16059_v12, %v5453_v57  ;;  %v12511_v36 = vpack.c.bf16 %v5523_v1, %v5523_v1  ;;  %v5521_v2 = vmax.f32 %v5489_v22, 0.0 }
 0x26a   : > { %v5737_v23 = vsel %vm13856_vm15, %v5729_v51, %v5736_v53  ;;  %v5999_v38 = vsel %vm15651_vm1, %v5738_v32, %v5998_v21  ;;  %5989 = vst [vmem:[#allocation3 + $0x3c] sm:$0xf] %v5988_v28  ;;  %v5720_v43 = vsel %vm13856_vm15, %v5712_v6, %v5719_v31  ;;  %v5992_v60 = vsel %vm15651_vm1, %v5721_v25, %v5991_v63  ;;  %v6001_v32 = vld [vmem:[#allocation3 + $0x54] sm:$0xf] }
 0x26b   : > { %5997 = vst.msk [vmem:[#allocation3 + $0x4c] sm:$0xf] %vm335_vm5, %v5737_v23  ;;  %6000 = vst [vmem:[#allocation3 + $0x50] sm:$0x1] %v5999_v38  ;;  %v5524_v56 = vmax.f32 %v5492_v10, 0.0  ;;  %v5451_v24 = vadd.f32 %v5362_v61, %v16083_v42  ;;  %v5456_v50 = vadd.f32 %v13128_v40, %v16088_v15  ;;  %v6145_v18 = vshrl.u32 %v6073_v17, 16 }
 0x26c   : > { %5990 = vst.msk [vmem:[#allocation3 + $0x40] sm:$0xf] %vm335_vm5, %v5720_v43  ;;  %5993 = vst [vmem:[#allocation3 + $0x44] sm:$0x1] %v5992_v60  ;;  %v5757_v37 = vshrl.u32 %v12511_v36, 16  ;;  %v5760_v8 = vshll.u32 %v12511_v36, 16  ;;  %v12509_v44 = vpack.c.bf16 %v5521_v2, %v5521_v2  ;;  %v12180_v1 = vcombine.low %v6073_v17, %v16225_v52  ;;  %v5378_v43 = vpop.f32.mrf.mxu0 }
 0x26d   : > { %v6148_v13 = vshll.u32 %v6073_v17, 16  ;;  %v12512_v51 = vpack.c.bf16 %v5524_v56, %v5524_v56  ;;  %v5490_v19 = vadd.f32 %v16059_v12, %v5451_v24  ;;  %v5495_v39 = vadd.f32 %v16059_v12, %v5456_v50  ;;  %v6075_v15 = vld [vmem:[#allocation3 + $0x18] sm:$0xf]  ;;  %v6012_v38 = vld [vmem:[#allocation3 + $0x68] sm:$0x1] }
 0x26e   : > { %v16227_v58 = vrot.slane %v6145_v18, 4  ;;  %v5759_v21 = vrot.slane %v5757_v37, 7  ;;  %v5740_v54 = vshrl.u32 %v12509_v44, 16  ;;  %v5743_v42 = vshll.u32 %v12509_v44, 16  ;;  %13179 = vmatmul.mubr.msk.bf16.vlgmr.msra.gmra.mxu0 %vm6554_vm6, %v12180_v1  ;;  %v16236_v24 = vld [vmem:[#allocation3 + $0x1c] sm:$0xf] }
 0x26f   : > { %v16229_v61 = vrot.slane %v6148_v13, 5  ;;  %v5765_v49 = vshrl.u32 %v12512_v51, 16  ;;  %v5768_v46 = vshll.u32 %v12512_v51, 16  ;;  %v5522_v45 = vmax.f32 %v5490_v19, 0.0  ;;  %v6005_v50 = vld [vmem:[#allocation3 + $0x5c] sm:$0x1] }
 0x270   : > { %v5527_v57 = vmax.f32 %v5495_v39, 0.0  ;;  %v5762_v40 = vor.u32 %v5760_v8, %v5759_v21  ;;  %v5763_v3 = vrot.slane %v5759_v21, 4  ;;  %v5742_v6 = vrot.slane %v5740_v54, 7  ;;  %v6022_v39 = vld [vmem:[#allocation3 + $0x78] sm:$0xf] }
 0x271   : > { %v6158_v53 = vshrl.u32 %v16225_v52, 16  ;;  %v5767_v63 = vrot.slane %v5765_v49, 7  ;;  %v12510_v31 = vpack.c.bf16 %v5522_v45, %v5522_v45  ;;  %v6169_v10 = vshrl.u32 %v6075_v15, 16  ;;  %v13132_v49 = vpop.f32.mrf.mxu0 }
 0x272   : > { %v12515_v25 = vpack.c.bf16 %v5527_v57, %v5527_v57  ;;  %v6009_v22 = vsel %vm16148_vm7, %v5762_v40, %v6008_v26  ;;  %v5745_v28 = vor.u32 %v5743_v42, %v5742_v6  ;;  %v5746_v23 = vrot.slane %v5742_v6, 4  ;;  %v16256_v6 = vld [vmem:[#allocation3 + $0x28] sm:$0xf] }
 0x273   : > { %6010 = vst [vmem:[#allocation3 + $0x60] sm:$0xf] %v6009_v22  ;;  %v5770_v60 = vor.u32 %v5768_v46, %v5767_v63  ;;  %v5772_v36 = vrot.slane %v5767_v63, 4  ;;  %v5748_v2 = vshrl.u32 %v12510_v31, 16  ;;  %v5751_v56 = vshll.u32 %v12510_v31, 16 }
 0x274   : > { %v6002_v17 = vsel %vm16148_vm7, %v5745_v28, %v6001_v32  ;;  %v5791_v18 = vshrl.u32 %v12515_v25, 16  ;;  %v5794_v37 = vshll.u32 %v12515_v25, 16  ;;  %v16240_v8 = vrot.slane %v6169_v10, 4  ;;  %v6077_v46 = vld [vmem:[#allocation3 + $0x24] sm:$0xf] }
 0x275   : > { %6003 = vst [vmem:[#allocation3 + $0x54] sm:$0xf] %v6002_v17  ;;  %v5771_v44 = vsel %vm13856_vm15, %v5763_v3, %v5770_v60  ;;  %v6013_v13 = vsel %vm15651_vm1, %v5772_v36, %v6012_v38  ;;  %v5750_v26 = vrot.slane %v5748_v2, 7  ;;  %v6172_v51 = vshll.u32 %v6075_v15, 16  ;;  %v16278_v2 = vpop.f32.mrf.mxu0 }
 0x276   : > { %6011 = vst.msk [vmem:[#allocation3 + $0x64] sm:$0xf] %vm335_vm5, %v5771_v44  ;;  %6014 = vst [vmem:[#allocation3 + $0x68] sm:$0x1] %v6013_v13  ;;  %v16247_v19 = vrot.slane %v5791_v18, 7  ;;  %v6182_v21 = vshrl.u32 %v16236_v24, 16  ;;  %v12181_v54 = vcombine.low %v6075_v15, %v16236_v24  ;;  %v5454_v42 = vadd.f32 %v16218_v20, %v16092_v11 }
 0x277   : > { %v5753_v45 = vor.u32 %v5751_v56, %v5750_v26  ;;  %v5755_v57 = vrot.slane %v5750_v26, 4  ;;  %v16253_v40 = vrot.slane %v6172_v51, 5  ;;  %v5457_v3 = vadd.f32 %v13129_v34, %v16097_v55  ;;  %v6015_v51 = vld [vmem:[#allocation3 + $0x6c] sm:$0xf] }
 0x278   : > { %v5796_v32 = vor.u32 %v5794_v37, %v16247_v19  ;;  %v5797_v63 = vrot.slane %v16247_v19, 4  ;;  %13182 = vmatprep.mubr.msk.bf16.mxu0 %vm6554_vm6, %v12181_v54  ;;  %v5493_v15 = vadd.f32 %v16059_v12, %v5454_v42  ;;  %v5455_v11 = vadd.f32 %v5378_v43, %v16100_v29 }
 0x279   : > { %v5754_v20 = vsel %vm13856_vm15, %v5746_v23, %v5753_v45  ;;  %v6006_v31 = vsel %vm15651_vm1, %v5755_v57, %v6005_v50  ;;  %v5496_v55 = vadd.f32 %v16059_v12, %v5457_v3  ;;  %v5460_v34 = vadd.f32 %v13132_v49, %v16104_v5  ;;  %v6026_v45 = vld [vmem:[#allocation3 + $0x80] sm:$0x1] }
 0x27a   : > { %6004 = vst.msk [vmem:[#allocation3 + $0x58] sm:$0xf] %vm335_vm5, %v5754_v20  ;;  %6007 = vst [vmem:[#allocation3 + $0x5c] sm:$0x1] %v6006_v31  ;;  %v6023_v25 = vsel %vm16148_vm7, %v5796_v32, %v6022_v39  ;;  %v5525_v1 = vmax.f32 %v5493_v15, 0.0  ;;  %v5494_v22 = vadd.f32 %v16059_v12, %v5455_v11  ;;  %v6193_v29 = vshrl.u32 %v6077_v46, 16  ;;  %v13133_v15 = vpop.f32.mrf.mxu0 }
 0x27b   : > { %6024 = vst [vmem:[#allocation3 + $0x78] sm:$0xf] %v6023_v25  ;;  %v5528_v28 = vmax.f32 %v5496_v55, 0.0  ;;  %v5499_v23 = vadd.f32 %v16059_v12, %v5460_v34  ;;  %v6196_v38 = vshll.u32 %v6077_v46, 16  ;;  %v6206_v10 = vshrl.u32 %v16256_v6, 16 }
 0x27c   : > { %v12513_v43 = vpack.c.bf16 %v5525_v1, %v5525_v1  ;;  %v5526_v60 = vmax.f32 %v5494_v22, 0.0  ;;  %v16275_v5 = vrot.slane %v6193_v29, 4  ;;  %v12182_v36 = vcombine.low %v6077_v46, %v16256_v6  ;;  %v6105_v20 = vld [vmem:[#allocation3 + $0x14] sm:$0x1]  ;;  %v6036_v22 = vld [vmem:[#allocation3 + $0x90] sm:$0xf] }
 0x27d   : > { %v12516_v56 = vpack.c.bf16 %v5528_v28, %v5528_v28  ;;  %v5531_v17 = vmax.f32 %v5499_v23, 0.0  ;;  %v16280_v50 = vrot.slane %v6196_v38, 5  ;;  %v6151_v18 = vor.u32 %v16229_v61, %v16227_v58  ;;  %v6019_v1 = vld [vmem:[#allocation3 + $0x74] sm:$0x1] }
 0x27e   : > { %v5774_v37 = vshrl.u32 %v12513_v43, 16  ;;  %v5777_v44 = vshll.u32 %v12513_v43, 16  ;;  %v12514_v13 = vpack.c.bf16 %v5526_v60, %v5526_v60  ;;  %13183 = vmatmul.mubr.msk.bf16.gmra.mxu0 %vm6554_vm6, %v12182_v36  ;;  %v6154_v26 = vshll.u32 %v16225_v52, 16  ;;  %v6079_v36 = vld [vmem:[#allocation3 + $0x30] sm:$0xf] }
 0x27f   : > { %v5799_v39 = vshrl.u32 %v12516_v56, 16  ;;  %v5802_v54 = vshll.u32 %v12516_v56, 16  ;;  %v12519_v42 = vpack.c.bf16 %v5531_v17, %v5531_v17  ;;  %v6152_v49 = vrot.slane %v6151_v18, 4  ;;  %v16294_v18 = vld [vmem:[#allocation3 + $0x34] sm:$0xf] }
 0x280   : > { %v5776_v46 = vrot.slane %v5774_v37, 7  ;;  %v5782_v57 = vshrl.u32 %v12514_v13, 16  ;;  %v5785_v3 = vshll.u32 %v12514_v13, 16  ;;  %v6156_v32 = vrot.slane %v6154_v26, 5  ;;  %v5394_v37 = vpop.f32.mrf.mxu0 }
 0x281   : > { %v5801_v11 = vrot.slane %v5799_v39, 7  ;;  %v5825_v58 = vshrl.u32 %v12519_v42, 16  ;;  %v5828_v61 = vshll.u32 %v12519_v42, 16  ;;  %v6160_v31 = vrot.slane %v6158_v53, 4 }
 0x282   : > { %v5779_v55 = vor.u32 %v5777_v44, %v5776_v46  ;;  %v5780_v34 = vrot.slane %v5776_v46, 4  ;;  %v5784_v25 = vrot.slane %v5782_v57, 7  ;;  %v6157_v28 = vsel %vm13850_vm14, %v6152_v49, %v6156_v32  ;;  %v6106_v49 = vld [vmem:[#allocation3 + $0x20] sm:$0x1] }
 0x283   : > { %v5804_v23 = vor.u32 %v5802_v54, %v5801_v11  ;;  %v5806_v38 = vrot.slane %v5801_v11, 4  ;;  %v16290_v43 = vrot.slane %v5825_v58, 7  ;;  %v6161_v60 = vor.u32 %v6160_v31, %v6156_v32 }
 0x284   : > { %v6016_v56 = vsel %vm16148_vm7, %v5779_v55, %v6015_v51  ;;  %v5787_v17 = vor.u32 %v5785_v3, %v5784_v25  ;;  %v5789_v52 = vrot.slane %v5784_v25, 4  ;;  %v6164_v53 = vshll.u32 %v6105_v20, 16  ;;  %v6081_v25 = vld [vmem:[#allocation3 + $0x3c] sm:$0xf] }
 0x285   : > { %6017 = vst [vmem:[#allocation3 + $0x6c] sm:$0xf] %v6016_v56  ;;  %v5805_v44 = vsel %vm13856_vm15, %v5797_v63, %v5804_v23  ;;  %v6027_v13 = vsel %vm15651_vm1, %v5806_v38, %v6026_v45  ;;  %v5830_v26 = vor.u32 %v5828_v61, %v16290_v43  ;;  %v5831_v39 = vrot.slane %v16290_v43, 4  ;;  %v13136_v61 = vpop.f32.mrf.mxu0 }
 0x286   : > { %6025 = vst.msk [vmem:[#allocation3 + $0x7c] sm:$0xf] %vm335_vm5, %v5805_v44  ;;  %6028 = vst [vmem:[#allocation3 + $0x80] sm:$0x1] %v6027_v13  ;;  %v5788_v51 = vsel %vm13856_vm15, %v5780_v34, %v5787_v17  ;;  %v6020_v54 = vsel %vm15651_vm1, %v5789_v52, %v6019_v1  ;;  %v6162_v19 = vrot.slane %v6161_v60, 4  ;;  %v6166_v42 = vrot.slane %v6164_v53, 5 }
 0x287   : > { %6018 = vst.msk [vmem:[#allocation3 + $0x70] sm:$0xf] %vm335_vm5, %v5788_v51  ;;  %6021 = vst [vmem:[#allocation3 + $0x74] sm:$0x1] %v6020_v54  ;;  %v6037_v63 = vsel %vm16148_vm7, %v5830_v26, %v6036_v22  ;;  %v6217_v46 = vshrl.u32 %v6079_v36, 16  ;;  %v6220_v45 = vshll.u32 %v6079_v36, 16  ;;  %v12183_v32 = vcombine.low %v6079_v36, %v16294_v18 }
 0x288   : > { %v6230_v57 = vshrl.u32 %v16294_v18, 16  ;;  %6038 = vst [vmem:[#allocation3 + $0x90] sm:$0xf] %v6037_v63  ;;  %v6167_v3 = vsel %vm13850_vm14, %v6162_v19, %v6166_v42  ;;  %v5458_v11 = vadd.f32 %v16278_v2, %v16109_v62  ;;  %v6175_v58 = vor.u32 %v16253_v40, %v16240_v8  ;;  %v16332_v8 = vld [vmem:[%s18857_s3 + $0x10] sm:$0xf] }
 0x289   : > { %v12148_v20 = vcombine.low %v6157_v28, %v6167_v3  ;;  %v16320_v31 = vrot.slane %v6217_v46, 4  ;;  %v16322_v55 = vrot.slane %v6220_v45, 5  ;;  %v6178_v34 = vshll.u32 %v16236_v24, 16  ;;  %13186 = vmatprep.mubr.msk.bf16.mxu0 %vm6554_vm6, %v12183_v32  ;;  %v6029_v32 = vld [vmem:[#allocation3 + $0x84] sm:$0xf] }
 0x28a   : > { %v5497_v1 = vadd.f32 %v16059_v12, %v5458_v11  ;;  %v6176_v22 = vrot.slane %v6175_v58, 4  ;;  %v6184_v62 = vrot.slane %v6182_v21, 4  ;;  %v6188_v2 = vshll.u32 %v6106_v49, 16  ;;  %v16339_v21 = vld [vmem:[#allocation3 + $0x40] sm:$0xf]  ;;  %v5407_v49 = vpop.f32.mrf.mxu0 }
 0x28b   : > { %13145 = vmatmul.mubr.msk.bf16.vlgmr.msra.gmra.mxu1 %vm6554_vm6, %v12148_v20  ;;  %v6180_v40 = vrot.slane %v6178_v34, 5  ;;  %v5461_v28 = vadd.f32 %v13133_v15, %v16114_v59  ;;  %v5459_v23 = vadd.f32 %v5394_v37, %v16117_v33  ;;  %v5464_v38 = vadd.f32 %v13136_v61, %v16121_v7 }
 0x28c   : > { %13211 = vmatpush3.bf16.msra.mxu1 %v16034_v9  ;;  %v5529_v60 = vmax.f32 %v5497_v1, 0.0  ;;  %v6190_v24 = vrot.slane %v6188_v2, 5  ;;  %v6241_v36 = vshrl.u32 %v6081_v25, 16  ;;  %v6244_v56 = vshll.u32 %v6081_v25, 16 }
 0x28d   : > { %v6181_v17 = vsel %vm13850_vm14, %v6176_v22, %v6180_v40  ;;  %v6185_v52 = vor.u32 %v6184_v62, %v6180_v40  ;;  %v5500_v53 = vadd.f32 %v16059_v12, %v5461_v28  ;;  %v5498_v59 = vadd.f32 %v16059_v12, %v5459_v23  ;;  %13461 = vmatprep.subr.msk.bf16.mxu1 %vm6603_vm0, %v16332_v8  ;;  %v16360_v22 = vld [vmem:[#allocation3 + $0x2c] sm:$0x1]  ;;  %v6040_v40 = vld [vmem:[#allocation3 + $0x98] sm:$0x1]  ;;  %v13137_v23 = vpop.f32.mrf.mxu0 }
 0x28e   : > { %v12517_v33 = vpack.c.bf16 %v5529_v60, %v5529_v60  ;;  %v5503_v9 = vadd.f32 %v16059_v12, %v5464_v38  ;;  %v16348_v7 = vrot.slane %v6241_v36, 4  ;;  %v16350_v15 = vrot.slane %v6244_v56, 5 }
 0x28f   : > { %v6186_v37 = vrot.slane %v6185_v52, 4  ;;  %v5532_v44 = vmax.f32 %v5500_v53, 0.0  ;;  %v5530_v13 = vmax.f32 %v5498_v59, 0.0  ;;  %v6254_v26 = vshrl.u32 %v16339_v21, 16  ;;  %v6095_v14 = vld [vmem:[#allocation3 + $0x90] sm:$0xf] }
 0x290   : > { %v5808_v51 = vshrl.u32 %v12517_v33, 16  ;;  %v5811_v54 = vshll.u32 %v12517_v33, 16  ;;  %v5535_v19 = vmax.f32 %v5503_v9, 0.0  ;;  %v12184_v42 = vcombine.low %v6081_v25, %v16339_v21  ;;  %v6083_v33 = vld [vmem:[#allocation3 + $0x48] sm:$0xf] }
 0x291   : > { %v6191_v63 = vsel %vm13850_vm14, %v6186_v37, %v6190_v24  ;;  %v12520_v46 = vpack.c.bf16 %v5532_v44, %v5532_v44  ;;  %v12518_v12 = vpack.c.bf16 %v5530_v13, %v5530_v13  ;;  %v6199_v45 = vor.u32 %v16280_v50, %v16275_v5  ;;  %v6033_v5 = vld [vmem:[#allocation3 + $0x8c] sm:$0x1]  ;;  %v6050_v24 = vld [vmem:[#allocation3 + $0xa8] sm:$0xf] }
 0x292   : > { %v5810_v3 = vrot.slane %v5808_v51, 7  ;;  %v12149_v11 = vcombine.low %v6181_v17, %v6191_v63  ;;  %v12523_v58 = vpack.c.bf16 %v5535_v19, %v5535_v19  ;;  %13187 = vmatmul.mubr.msk.bf16.gmra.mxu0 %vm6554_vm6, %v12184_v42  ;;  %v6202_v61 = vshll.u32 %v16256_v6, 16  ;;  %v16374_v63 = vld [vmem:[#allocation3 + $0x4c] sm:$0xf]  ;;  %v5410_v6 = vpop.f32.mrf.mxu0 }
 0x293   : > { %v5833_v20 = vshrl.u32 %v12520_v46, 16  ;;  %v5836_v34 = vshll.u32 %v12520_v46, 16  ;;  %v5816_v25 = vshrl.u32 %v12518_v12, 16  ;;  %v5819_v1 = vshll.u32 %v12518_v12, 16 }
 0x294   : > { %v5813_v62 = vor.u32 %v5811_v54, %v5810_v3  ;;  %v5814_v2 = vrot.slane %v5810_v3, 4  ;;  %13148 = vmatprep.mubr.msk.bf16.mxu1 %vm6554_vm6, %v12149_v11  ;;  %v5859_v50 = vshrl.u32 %v12523_v58, 16  ;;  %v5862_v28 = vshll.u32 %v12523_v58, 16 }
 0x295   : > { %v5835_v38 = vrot.slane %v5833_v20, 7  ;;  %v5818_v60 = vrot.slane %v5816_v25, 7  ;;  %v6200_v36 = vrot.slane %v6199_v45, 4  ;;  %v6204_v56 = vrot.slane %v6202_v61, 5 }
 0x296   : > { %v6030_v17 = vsel %vm16148_vm7, %v5813_v62, %v6029_v32  ;;  %v16365_v52 = vrot.slane %v5859_v50, 7  ;;  %v6208_v53 = vrot.slane %v6206_v10, 4  ;;  %v6212_v59 = vshll.u32 %v16360_v22, 16 }
 0x297   : > { %6031 = vst [vmem:[#allocation3 + $0x84] sm:$0xf] %v6030_v17  ;;  %v5838_v9 = vor.u32 %v5836_v34, %v5835_v38  ;;  %v5840_v37 = vrot.slane %v5835_v38, 4  ;;  %v5821_v44 = vor.u32 %v5819_v1, %v5818_v60  ;;  %v5823_v13 = vrot.slane %v5818_v60, 4  ;;  %v16393_v34 = vld [vmem:[#allocation3 + $0x38] sm:$0x1] }
 0x298   : > { %v5864_v51 = vor.u32 %v5862_v28, %v16365_v52  ;;  %v5865_v54 = vrot.slane %v16365_v52, 4  ;;  %v6205_v19 = vsel %vm13850_vm14, %v6200_v36, %v6204_v56  ;;  %v6209_v42 = vor.u32 %v6208_v53, %v6204_v56  ;;  %v16418_v53 = vld [vmem:[#allocation3 + $0x58] sm:$0xf] }
 0x299   : > { %v5839_v10 = vsel %vm13856_vm15, %v5831_v39, %v5838_v9  ;;  %v6041_v46 = vsel %vm15651_vm1, %v5840_v37, %v6040_v40  ;;  %v5822_v12 = vsel %vm13856_vm15, %v5814_v2, %v5821_v44  ;;  %v6034_v45 = vsel %vm15651_vm1, %v5823_v13, %v6033_v5  ;;  %v13140_v40 = vpop.f32.mrf.mxu0  ;;  %v6085_v5 = vld [vmem:[#allocation3 + $0x54] sm:$0xf] }
 0x29a   : > { %6039 = vst.msk [vmem:[#allocation3 + $0x94] sm:$0xf] %vm335_vm5, %v5839_v10  ;;  %6042 = vst [vmem:[#allocation3 + $0x98] sm:$0x1] %v6041_v46  ;;  %v6051_v43 = vsel %vm16148_vm7, %v5864_v51, %v6050_v24  ;;  %v6210_v3 = vrot.slane %v6209_v42, 4  ;;  %v6214_v39 = vrot.slane %v6212_v59, 5  ;;  %v12185_v61 = vcombine.low %v6083_v33, %v16374_v63 }
 0x29b   : > { %6032 = vst.msk [vmem:[#allocation3 + $0x88] sm:$0xf] %vm335_vm5, %v5822_v12  ;;  %6035 = vst [vmem:[#allocation3 + $0x8c] sm:$0x1] %v6034_v45  ;;  %v6265_v32 = vshrl.u32 %v6083_v33, 16  ;;  %v6268_v11 = vshll.u32 %v6083_v33, 16  ;;  %v5462_v20 = vadd.f32 %v5407_v49, %v16126_v0  ;;  %v6223_v62 = vor.u32 %v16322_v55, %v16320_v31 }
 0x29c   : > { %6052 = vst [vmem:[#allocation3 + $0xa8] sm:$0xf] %v6051_v43  ;;  %v6278_v58 = vshrl.u32 %v16374_v63, 16  ;;  %v6215_v25 = vsel %vm13850_vm14, %v6210_v3, %v6214_v39  ;;  %v6226_v2 = vshll.u32 %v16294_v18, 16  ;;  %13190 = vmatprep.mubr.msk.bf16.mxu0 %vm6554_vm6, %v12185_v61  ;;  %v16408_v0 = vld [vmem:[%s18856_s2] ss:$0 sm:$0xff]  ;;  %v5465_v24 = vadd.f32 %v13137_v23, %v16130_v41 }
 0x29d   : > { %v16397_v1 = vrot.slane %v6265_v32, 4  ;;  %v12150_v50 = vcombine.low %v6205_v19, %v6215_v25  ;;  %v16402_v28 = vrot.slane %v6268_v11, 5  ;;  %v5501_v49 = vadd.f32 %v16408_v0, %v5462_v20  ;;  %v6043_v61 = vld [vmem:[#allocation3 + $0x9c] sm:$0xf] }
 0x29e   : > { %v6232_v38 = vrot.slane %v6230_v57, 4  ;;  %v6224_v31 = vrot.slane %v6223_v62, 4  ;;  %v6228_v55 = vrot.slane %v6226_v2, 5  ;;  %v6236_v60 = vshll.u32 %v16393_v34, 16 }
 0x29f   : > { %13149 = vmatmul.mubr.msk.bf16.gmra.mxu1 %vm6554_vm6, %v12150_v50  ;;  %v5533_v36 = vmax.f32 %v5501_v49, 0.0  ;;  %v5463_v56 = vadd.f32 %v5410_v6, %v16132_v48  ;;  %v5468_v17 = vadd.f32 %v13140_v40, %v16135_v27  ;;  %v6289_v59 = vshrl.u32 %v6085_v5, 16 }
 0x2a0   : > { %v6229_v18 = vsel %vm13850_vm14, %v6224_v31, %v6228_v55  ;;  %v6233_v57 = vor.u32 %v6232_v38, %v6228_v55  ;;  %v6238_v33 = vrot.slane %v6236_v60, 5  ;;  %v5504_v9 = vadd.f32 %v16408_v0, %v5465_v24  ;;  %v16438_v38 = vld [vmem:[#allocation3 + $0x44] sm:$0x1]  ;;  %v5423_v31 = vpop.f32.mrf.mxu0  ;;  %v6054_v60 = vld [vmem:[#allocation3 + $0xb0] sm:$0x1] }
 0x2a1   : > { %v12521_v37 = vpack.c.bf16 %v5533_v36, %v5533_v36  ;;  %v5502_v41 = vadd.f32 %v16408_v0, %v5463_v56  ;;  %v5507_v23 = vadd.f32 %v16408_v0, %v5468_v17  ;;  %v16425_v44 = vrot.slane %v6289_v59, 4 }
 0x2a2   : > { %v6234_v48 = vrot.slane %v6233_v57, 4  ;;  %v5536_v13 = vmax.f32 %v5504_v9, 0.0  ;;  %v6292_v27 = vshll.u32 %v6085_v5, 16  ;;  %v6302_v51 = vshrl.u32 %v16418_v53, 16 }
 0x2a3   : > { %v5842_v19 = vshrl.u32 %v12521_v37, 16  ;;  %v5845_v42 = vshll.u32 %v12521_v37, 16  ;;  %v5534_v6 = vmax.f32 %v5502_v41, 0.0  ;;  %v5539_v10 = vmax.f32 %v5507_v23, 0.0  ;;  %v6064_v37 = vld [vmem:[#allocation3 + $0xc0] sm:$0xf] }
 0x2a4   : > { %v6239_v46 = vsel %vm13850_vm14, %v6234_v48, %v6238_v33  ;;  %v12524_v12 = vpack.c.bf16 %v5536_v13, %v5536_v13  ;;  %v16430_v45 = vrot.slane %v6292_v27, 5  ;;  %v12186_v43 = vcombine.low %v6085_v5, %v16418_v53 }
 0x2a5   : > { %v5844_v3 = vrot.slane %v5842_v19, 7  ;;  %v12151_v39 = vcombine.low %v6229_v18, %v6239_v46  ;;  %v12522_v32 = vpack.c.bf16 %v5534_v6, %v5534_v6  ;;  %v12527_v11 = vpack.c.bf16 %v5539_v10, %v5539_v10  ;;  %v6087_v19 = vld [vmem:[#allocation3 + $0x60] sm:$0xf]  ;;  %v13141_v6 = vpop.f32.mrf.mxu0 }
 0x2a6   : > { %v5867_v20 = vshrl.u32 %v12524_v12, 16  ;;  %v5870_v25 = vshll.u32 %v12524_v12, 16  ;;  %13191 = vmatmul.mubr.msk.bf16.gmra.mxu0 %vm6554_vm6, %v12186_v43  ;;  %v6247_v62 = vor.u32 %v16350_v15, %v16348_v7  ;;  %v6250_v2 = vshll.u32 %v16339_v21, 16  ;;  %v6047_v15 = vld [vmem:[#allocation3 + $0xa4] sm:$0x1] }
 0x2a7   : > { %v5847_v40 = vor.u32 %v5845_v42, %v5844_v3  ;;  %v5848_v50 = vrot.slane %v5844_v3, 4  ;;  %13152 = vmatprep.mubr.msk.bf16.mxu1 %vm6554_vm6, %v12151_v39  ;;  %v5850_v49 = vshrl.u32 %v12522_v32, 16  ;;  %v5853_v5 = vshll.u32 %v12522_v32, 16  ;;  %v16449_v42 = vld [vmem:[#allocation3 + $0x64] sm:$0xf] }
 0x2a8   : > { %v5869_v55 = vrot.slane %v5867_v20, 7  ;;  %v5893_v24 = vshrl.u32 %v12527_v11, 16  ;;  %v5896_v36 = vshll.u32 %v12527_v11, 16  ;;  %v6248_v56 = vrot.slane %v6247_v62, 4 }
 0x2a9   : > { %v6044_v17 = vsel %vm16148_vm7, %v5847_v40, %v6043_v61  ;;  %v5852_v7 = vrot.slane %v5850_v49, 7  ;;  %v6252_v59 = vrot.slane %v6250_v2, 5  ;;  %v6256_v18 = vrot.slane %v6254_v26, 4  ;;  %v16468_v61 = vld [vmem:[#allocation3 + $0x50] sm:$0x1]  ;;  %v5426_v40 = vpop.f32.mrf.mxu0 }
 0x2aa   : > { %6045 = vst [vmem:[#allocation3 + $0x9c] sm:$0xf] %v6044_v17  ;;  %v5872_v57 = vor.u32 %v5870_v25, %v5869_v55  ;;  %v5874_v33 = vrot.slane %v5869_v55, 4  ;;  %v16444_v9 = vrot.slane %v5893_v24, 7  ;;  %v6260_v41 = vshll.u32 %v16438_v38, 16 }
 0x2ab   : > { %v5855_v23 = vor.u32 %v5853_v5, %v5852_v7  ;;  %v5857_v48 = vrot.slane %v5852_v7, 4  ;;  %v6253_v13 = vsel %vm13850_vm14, %v6248_v56, %v6252_v59  ;;  %v6257_v27 = vor.u32 %v6256_v18, %v6252_v59  ;;  %v16481_v24 = vld [vmem:[#allocation3 + $0x70] sm:$0xf] }
 0x2ac   : > { %v5873_v21 = vsel %vm13856_vm15, %v5865_v54, %v5872_v57  ;;  %v6055_v26 = vsel %vm15651_vm1, %v5874_v33, %v6054_v60  ;;  %v5898_v10 = vor.u32 %v5896_v36, %v16444_v9  ;;  %v5899_v46 = vrot.slane %v16444_v9, 4 }
 0x2ad   : > { %6053 = vst.msk [vmem:[#allocation3 + $0xac] sm:$0xf] %vm335_vm5, %v5873_v21  ;;  %6056 = vst [vmem:[#allocation3 + $0xb0] sm:$0x1] %v6055_v26  ;;  %v5856_v12 = vsel %vm13856_vm15, %v5848_v50, %v5855_v23  ;;  %v6048_v43 = vsel %vm15651_vm1, %v5857_v48, %v6047_v15  ;;  %v6258_v52 = vrot.slane %v6257_v27, 4  ;;  %v6262_v3 = vrot.slane %v6260_v41, 5 }
 0x2ae   : > { %6046 = vst.msk [vmem:[#allocation3 + $0xa0] sm:$0xf] %vm335_vm5, %v5856_v12  ;;  %6049 = vst [vmem:[#allocation3 + $0xa4] sm:$0x1] %v6048_v43  ;;  %v6065_v54 = vsel %vm16148_vm7, %v5898_v10, %v6064_v37  ;;  %v6313_v39 = vshrl.u32 %v6087_v19, 16  ;;  %v6316_v32 = vshll.u32 %v6087_v19, 16  ;;  %v12187_v25 = vcombine.low %v6087_v19, %v16449_v42 }
 0x2af   : > { %v6326_v11 = vshrl.u32 %v16449_v42, 16  ;;  %6066 = vst [vmem:[#allocation3 + $0xc0] sm:$0xf] %v6065_v54  ;;  %v6263_v20 = vsel %vm13850_vm14, %v6258_v52, %v6262_v3  ;;  %v5466_v62 = vadd.f32 %v5423_v31, %v16138_v47  ;;  %v6271_v2 = vor.u32 %v16402_v28, %v16397_v1  ;;  %v6089_v50 = vld [vmem:[#allocation3 + $0x6c] sm:$0xf] }
 0x2b0   : > { %v12152_v49 = vcombine.low %v6253_v13, %v6263_v20  ;;  %v16476_v5 = vrot.slane %v6313_v39, 4  ;;  %v16478_v55 = vrot.slane %v6316_v32, 5  ;;  %v6274_v60 = vshll.u32 %v16374_v63, 16  ;;  %13194 = vmatprep.mubr.msk.bf16.mxu0 %vm6554_vm6, %v12187_v25  ;;  %v16501_v13 = vld [vmem:[#allocation3 + $0x5c] sm:$0x1] }
 0x2b1   : > { %v5505_v36 = vadd.f32 %v16408_v0, %v5466_v62  ;;  %v6272_v56 = vrot.slane %v6271_v2, 4  ;;  %v6280_v47 = vrot.slane %v6278_v58, 4  ;;  %v6284_v1 = vshll.u32 %v16468_v61, 16  ;;  %v6057_v43 = vld [vmem:[#allocation3 + $0xb4] sm:$0xf] }
 0x2b2   : > { %13153 = vmatmul.mubr.msk.bf16.gmra.mxu1 %vm6554_vm6, %v12152_v49  ;;  %v6276_v28 = vrot.slane %v6274_v60, 5  ;;  %v5469_v31 = vadd.f32 %v13141_v6, %v16141_v4  ;;  %v5467_v17 = vadd.f32 %v5426_v40, %v16143_v16  ;;  %v6337_v7 = vshrl.u32 %v6089_v50, 16  ;;  %v16512_v49 = vld [vmem:[#allocation3 + $0x7c] sm:$0xf] }
 0x2b3   : > { %v5537_v15 = vmax.f32 %v5505_v36, 0.0  ;;  %v6286_v59 = vrot.slane %v6284_v1, 5  ;;  %v6340_v18 = vshll.u32 %v6089_v50, 16  ;;  %v6350_v57 = vshrl.u32 %v16481_v24, 16  ;;  %v6068_v1 = vld [vmem:[#allocation3 + $0xc8] sm:$0x1] }
 0x2b4   : > { %v6277_v33 = vsel %vm13850_vm14, %v6272_v56, %v6276_v28  ;;  %v6281_v37 = vor.u32 %v6280_v47, %v6276_v28  ;;  %v5508_v58 = vadd.f32 %v16408_v0, %v5469_v31  ;;  %v5506_v41 = vadd.f32 %v16408_v0, %v5467_v17 }
 0x2b5   : > { %v12525_v23 = vpack.c.bf16 %v5537_v15, %v5537_v15  ;;  %v16496_v48 = vrot.slane %v6337_v7, 4  ;;  %v16498_v4 = vrot.slane %v6340_v18, 5  ;;  %v12188_v16 = vcombine.low %v6089_v50, %v16481_v24  ;;  %v6061_v15 = vld [vmem:[#allocation3 + $0xbc] sm:$0x1] }
 0x2b6   : > { %v6282_v27 = vrot.slane %v6281_v37, 4  ;;  %v5540_v19 = vmax.f32 %v5508_v58, 0.0  ;;  %v5538_v6 = vmax.f32 %v5506_v41, 0.0  ;;  %v6295_v21 = vor.u32 %v16430_v45, %v16425_v44  ;;  %v6091_v45 = vld [vmem:[#allocation3 + $0x78] sm:$0xf] }
 0x2b7   : > { %v5876_v26 = vshrl.u32 %v12525_v23, 16  ;;  %v5879_v10 = vshll.u32 %v12525_v23, 16  ;;  %13195 = vmatmul.mubr.msk.bf16.gmra.mxu0 %vm6554_vm6, %v12188_v16  ;;  %v6298_v0 = vshll.u32 %v16418_v53, 16  ;;  %v6304_v12 = vrot.slane %v6302_v51, 4  ;;  %v16520_v16 = vld [vmem:[#allocation3 + $0x68] sm:$0x1] }
 0x2b8   : > { %v6287_v52 = vsel %vm13850_vm14, %v6282_v27, %v6286_v59  ;;  %v12528_v3 = vpack.c.bf16 %v5540_v19, %v5540_v19  ;;  %v12526_v54 = vpack.c.bf16 %v5538_v6, %v5538_v6  ;;  %v6296_v39 = vrot.slane %v6295_v21, 4  ;;  %v6093_v27 = vld [vmem:[#allocation3 + $0x84] sm:$0xf] }
 0x2b9   : > { %v5878_v32 = vrot.slane %v5876_v26, 7  ;;  %v12153_v20 = vcombine.low %v6277_v33, %v6287_v52  ;;  %v6300_v25 = vrot.slane %v6298_v0, 5  ;;  %v6308_v44 = vshll.u32 %v16501_v13, 16  ;;  %v16525_v26 = vld [vmem:[#allocation3 + $0x88] sm:$0xf] }
 0x2ba   : > { %v5901_v62 = vshrl.u32 %v12528_v3, 16  ;;  %v5904_v2 = vshll.u32 %v12528_v3, 16  ;;  %v5884_v40 = vshrl.u32 %v12526_v54, 16  ;;  %v5887_v50 = vshll.u32 %v12526_v54, 16  ;;  %v16545_v3 = vld [vmem:[#allocation3 + $0x74] sm:$0x1] }
 0x2bb   : > { %v5881_v51 = vor.u32 %v5879_v10, %v5878_v32  ;;  %v5882_v60 = vrot.slane %v5878_v32, 4  ;;  %13156 = vmatprep.mubr.msk.bf16.mxu1 %vm6554_vm6, %v12153_v20  ;;  %v6301_v36 = vsel %vm13850_vm14, %v6296_v39, %v6300_v25  ;;  %v6305_v56 = vor.u32 %v6304_v12, %v6300_v25 }
 0x2bc   : > { %v5903_v47 = vrot.slane %v5901_v62, 7  ;;  %v5886_v28 = vrot.slane %v5884_v40, 7  ;;  %v6310_v31 = vrot.slane %v6308_v44, 5  ;;  %v6361_v17 = vshrl.u32 %v6091_v45, 16  ;;  %v16554_v40 = vld [vmem:[#allocation3 + $0x94] sm:$0xf] }
 0x2bd   : > { %v6058_v7 = vsel %vm16148_vm7, %v5881_v51, %v6057_v43  ;;  %v6306_v59 = vrot.slane %v6305_v56, 4  ;;  %v6364_v18 = vshll.u32 %v6091_v45, 16  ;;  %v6374_v33 = vshrl.u32 %v16512_v49, 16 }
 0x2be   : > { %6059 = vst [vmem:[#allocation3 + $0xb4] sm:$0xf] %v6058_v7  ;;  %v5906_v37 = vor.u32 %v5904_v2, %v5903_v47  ;;  %v5908_v58 = vrot.slane %v5903_v47, 4  ;;  %v5889_v41 = vor.u32 %v5887_v50, %v5886_v28  ;;  %v5891_v23 = vrot.slane %v5886_v28, 4 }
 0x2bf   : > { %v6311_v19 = vsel %vm13850_vm14, %v6306_v59, %v6310_v31  ;;  %v6363_v6 = vrot.slane %v6361_v17, 4  ;;  %v6366_v21 = vrot.slane %v6364_v18, 5  ;;  %v12189_v35 = vcombine.low %v6091_v45, %v16512_v49  ;;  %v16564_v17 = vld [vmem:[#allocation3 + $0x80] sm:$0x1] }
 0x2c0   : > { %v5907_v10 = vsel %vm13856_vm15, %v5899_v46, %v5906_v37  ;;  %v6069_v0 = vsel %vm15651_vm1, %v5908_v58, %v6068_v1  ;;  %v5890_v12 = vsel %vm13856_vm15, %v5882_v60, %v5889_v41  ;;  %v6062_v43 = vsel %vm15651_vm1, %v5891_v23, %v6061_v15  ;;  %v16568_v58 = vld [vmem:[#allocation3 + $0xa0] sm:$0xf] }
 0x2c1   : > { %6067 = vst.msk [vmem:[#allocation3 + $0xc4] sm:$0xf] %vm335_vm5, %v5907_v10  ;;  %6070 = vst [vmem:[#allocation3 + $0xc8] sm:$0x1] %v6069_v0  ;;  %v12154_v52 = vcombine.low %v6301_v36, %v6311_v19  ;;  %13198 = vmatprep.mubr.msk.bf16.mxu0 %vm6554_vm6, %v12189_v35  ;;  %v6319_v9 = vor.u32 %v16478_v55, %v16476_v5  ;;  %v6322_v46 = vshll.u32 %v16449_v42, 16  ;;  %v6328_v30 = vrot.slane %v6326_v11, 4 }
 0x2c2   : > { %6060 = vst.msk [vmem:[#allocation3 + $0xb8] sm:$0xf] %vm335_vm5, %v5890_v12  ;;  %6063 = vst [vmem:[#allocation3 + $0xbc] sm:$0x1] %v6062_v43  ;;  %v6332_v54 = vshll.u32 %v16520_v16, 16  ;;  %v6385_v39 = vshrl.u32 %v6093_v27, 16  ;;  %v12190_v5 = vcombine.low %v6093_v27, %v16525_v26  ;;  %v6343_v55 = vor.u32 %v16498_v4, %v16496_v48 }
 0x2c3   : > { %v6388_v32 = vshll.u32 %v6093_v27, 16  ;;  %v6398_v20 = vshrl.u32 %v16525_v26, 16  ;;  %13157 = vmatmul.mubr.msk.bf16.gmra.mxu1 %vm6554_vm6, %v12154_v52  ;;  %v6320_v25 = vrot.slane %v6319_v9, 4  ;;  %v6324_v44 = vrot.slane %v6322_v46, 5 }
 0x2c4   : > { %v6334_v45 = vrot.slane %v6332_v54, 5  ;;  %v6387_v11 = vrot.slane %v6385_v39, 4  ;;  %v6346_v2 = vshll.u32 %v16481_v24, 16  ;;  %13199 = vmatmul.mubr.msk.bf16.gmra.mxu0 %vm6554_vm6, %v12190_v5  ;;  %v6344_v60 = vrot.slane %v6343_v55, 4  ;;  %v6099_v39 = vld [vmem:[#allocation3 + $0xa8] sm:$0xf] }
 0x2c5   : > { %v6390_v62 = vrot.slane %v6388_v32, 5  ;;  %v6325_v50 = vsel %vm13850_vm14, %v6320_v25, %v6324_v44  ;;  %v6329_v51 = vor.u32 %v6328_v30, %v6324_v44  ;;  %v6352_v36 = vrot.slane %v6350_v57, 4  ;;  %v6097_v57 = vld [vmem:[#allocation3 + $0x9c] sm:$0xf]  ;;  %v16586_v5 = vld [vmem:[#allocation3 + $0xac] sm:$0xf] }
 0x2c6   : > { %v6348_v56 = vrot.slane %v6346_v2, 5  ;;  %v6356_v48 = vshll.u32 %v16545_v3, 16  ;;  %v6409_v4 = vshrl.u32 %v6095_v14, 16  ;;  %v6412_v47 = vshll.u32 %v6095_v14, 16 }
 0x2c7   : > { %v6330_v1 = vrot.slane %v6329_v51, 4  ;;  %v6422_v28 = vshrl.u32 %v16554_v40, 16  ;;  %v12191_v31 = vcombine.low %v6095_v14, %v16554_v40  ;;  %v6367_v7 = vor.u32 %v6366_v21, %v6363_v6  ;;  %v16582_v14 = vld [vmem:[#allocation3 + $0x8c] sm:$0x1]  ;;  %v16590_v51 = vld [vmem:[#allocation3 + $0x98] sm:$0x1] }
 0x2c8   : > { %v6349_v15 = vsel %vm13850_vm14, %v6344_v60, %v6348_v56  ;;  %v6353_v59 = vor.u32 %v6352_v36, %v6348_v56  ;;  %v6358_v18 = vrot.slane %v6356_v48, 5  ;;  %v6411_v37 = vrot.slane %v6409_v4, 4  ;;  %v6101_v56 = vld [vmem:[#allocation3 + $0xb4] sm:$0xf] }
 0x2c9   : > { %v6335_v41 = vsel %vm13850_vm14, %v6330_v1, %v6334_v45  ;;  %v6414_v23 = vrot.slane %v6412_v47, 5  ;;  %13202 = vmatprep.mubr.msk.bf16.mxu0 %vm6554_vm6, %v12191_v31  ;;  %v6368_v27 = vrot.slane %v6367_v7, 4  ;;  %v6370_v19 = vshll.u32 %v16512_v49, 16 }
 0x2ca   : > { %v12155_v35 = vcombine.low %v6325_v50, %v6335_v41  ;;  %v6354_v6 = vrot.slane %v6353_v59, 4  ;;  %v6376_v21 = vrot.slane %v6374_v33, 4  ;;  %v6380_v10 = vshll.u32 %v16564_v17, 16  ;;  %v16598_v59 = vld [vmem:[#allocation3 + $0xb8] sm:$0xf] }
 0x2cb   : > { %v6372_v0 = vrot.slane %v6370_v19, 5  ;;  %v6433_v12 = vshrl.u32 %v6097_v57, 16  ;;  %v6436_v43 = vshll.u32 %v6097_v57, 16  ;;  %v6446_v52 = vshrl.u32 %v16568_v58, 16 }
 0x2cc   : > { %13160 = vmatprep.mubr.msk.bf16.mxu1 %vm6554_vm6, %v12155_v35  ;;  %v6359_v9 = vsel %vm13850_vm14, %v6354_v6, %v6358_v18  ;;  %v6382_v46 = vrot.slane %v6380_v10, 5  ;;  %v12192_v30 = vcombine.low %v6097_v57, %v16568_v58  ;;  %v6391_v54 = vor.u32 %v6390_v62, %v6387_v11 }
 0x2cd   : > { %v12156_v33 = vcombine.low %v6349_v15, %v6359_v9  ;;  %v6373_v32 = vsel %vm13850_vm14, %v6368_v27, %v6372_v0  ;;  %v6377_v25 = vor.u32 %v6376_v21, %v6372_v0  ;;  %v6435_v44 = vrot.slane %v6433_v12, 4 }
 0x2ce   : > { %v6438_v55 = vrot.slane %v6436_v43, 5  ;;  %13203 = vmatmul.mubr.msk.bf16.gmra.mxu0 %vm6554_vm6, %v12192_v30  ;;  %v6392_v45 = vrot.slane %v6391_v54, 4  ;;  %v6394_v2 = vshll.u32 %v16525_v26, 16  ;;  %v6400_v50 = vrot.slane %v6398_v20, 4  ;;  %v13572_v54 = vld [vmem:[#allocation3 + $0xc] sm:$0xff]  }
 0x2cf   : > { %13161 = vmatmul.mubr.msk.bf16.gmra.mxu1 %vm6554_vm6, %v12156_v33  ;;  %v6378_v11 = vrot.slane %v6377_v25, 4  ;;  %v6404_v62 = vshll.u32 %v16582_v14, 16  ;;  %v6457_v60 = vshrl.u32 %v6099_v39, 16  ;;  %v6460_v36 = vshll.u32 %v6099_v39, 16  ;;  %v16614_v25 = vld [vmem:[#allocation3 + $0xb0] sm:$0x1] }
 0x2d0   : > { %v6396_v48 = vrot.slane %v6394_v2, 5  ;;  %v6470_v4 = vshrl.u32 %v16586_v5, 16  ;;  %v12193_v47 = vcombine.low %v6099_v39, %v16586_v5  ;;  %v6415_v1 = vor.u32 %v6414_v23, %v6411_v37 }
 0x2d1   : > { %v6383_v31 = vsel %vm13850_vm14, %v6378_v11, %v6382_v46  ;;  %v6406_v20 = vrot.slane %v6404_v62, 5  ;;  %v6459_v7 = vrot.slane %v6457_v60, 4  ;;  %v6462_v15 = vrot.slane %v6460_v36, 5  ;;  %v16608_v46 = vld [vmem:[#allocation3 + $0xa4] sm:$0x1] }
 0x2d2   : > { %v12157_v18 = vcombine.low %v6373_v32, %v6383_v31  ;;  %v6397_v57 = vsel %vm13850_vm14, %v6392_v45, %v6396_v48  ;;  %v6401_v41 = vor.u32 %v6400_v50, %v6396_v48  ;;  %13206 = vmatprep.mubr.msk.bf16.mxu0 %vm6554_vm6, %v12193_v47  ;;  %v6416_v27 = vrot.slane %v6415_v1, 4  ;;  %v13620_v47 = vld [vmem:[%s18857_s3 + $0xc] sm:$0xf] }
 0x2d3   : > { %v6418_v19 = vshll.u32 %v16554_v40, 16  ;;  %v6424_v35 = vrot.slane %v6422_v28, 4  ;;  %v6428_v37 = vshll.u32 %v16590_v51, 16  ;;  %v6481_v23 = vshrl.u32 %v6101_v56, 16 }
 0x2d4   : > { %13164 = vmatprep.mubr.msk.bf16.mxu1 %vm6554_vm6, %v12157_v18  ;;  %v6402_v6 = vrot.slane %v6401_v41, 4  ;;  %v6484_v21 = vshll.u32 %v6101_v56, 16  ;;  %v6494_v10 = vshrl.u32 %v16598_v59, 16  ;;  %v12194_v0 = vcombine.low %v6101_v56, %v16598_v59  ;;  %v16634_v18 = vld [vmem:[#allocation3 + $0xbc] sm:$0x1] }
 0x2d5   : > { %v6420_v12 = vrot.slane %v6418_v19, 5  ;;  %v6430_v43 = vrot.slane %v6428_v37, 5  ;;  %v6483_v9 = vrot.slane %v6481_v23, 4  ;;  %v6439_v30 = vor.u32 %v6438_v55, %v6435_v44  ;;  %v7060_v19 = vld [vmem:[#allocation3] sm:$0xe]  ;;  %v13573_v23 = vld [vmem:[#allocation3 + $0x18] sm:$0xff]  }
 0x2d6   : > { %v6407_v28 = vsel %vm13850_vm14, %v6402_v6, %v6406_v20  ;;  %v6486_v39 = vrot.slane %v6484_v21, 5  ;;  %13207 = vmatmul.mubr.msk.bf16.gmra.mxu0 %vm6554_vm6, %v12194_v0  ;;  %v6442_v33 = vshll.u32 %v16568_v58, 16  ;;  %v6448_v32 = vrot.slane %v6446_v52, 4  ;;  %v16624_v52 = vld [vmem:[%s18857_s3 + $0x14] sm:$0xf] }
 0x2d7   : > { %v12158_v45 = vcombine.low %v6397_v57, %v6407_v28  ;;  %v6421_v2 = vsel %vm13850_vm14, %v6416_v27, %v6420_v12  ;;  %v6425_v50 = vor.u32 %v6424_v35, %v6420_v12  ;;  %v6440_v11 = vrot.slane %v6439_v30, 4  ;;  %13246 = vmatprep.mubr.msk.bf16.mxu0 %vm6554_vm6, %v13572_v54  ;;  %v13574_v54 = vld [vmem:[#allocation3 + $0x24] sm:$0xff]  }
 0x2d8   : > { %v6444_v44 = vrot.slane %v6442_v33, 5  ;;  %v6452_v55 = vshll.u32 %v16608_v46, 16  ;;  %v6463_v62 = vor.u32 %v6462_v15, %v6459_v7  ;;  %v6466_v60 = vshll.u32 %v16586_v5, 16  ;;  %v13621_v33 = vld [vmem:[#allocation3 + $0x4] sm:$0xf] }
 0x2d9   : > { %13165 = vmatmul.mubr.msk.bf16.gmra.mxu1 %vm6554_vm6, %v12158_v45  ;;  %v6426_v36 = vrot.slane %v6425_v50, 4  ;;  %v6472_v56 = vrot.slane %v6470_v4, 4  ;;  %v6476_v48 = vshll.u32 %v16614_v25, 16  ;;  %v7677_v1 = vsel %vm6603_vm0, %v13620_v47, 0 }
 0x2da   : > { %v6445_v31 = vsel %vm13850_vm14, %v6440_v11, %v6444_v44  ;;  %v6449_v20 = vor.u32 %v6448_v32, %v6444_v44  ;;  %v6454_v7 = vrot.slane %v6452_v55, 5  ;;  %v6464_v15 = vrot.slane %v6463_v62, 4  ;;  %13245 = vmatpush3.bf16.msra.mxu0 %v7677_v1  ;;  %v13622_v11 = vld [vmem:[#allocation3 + $0x8] sm:$0x1] }
 0x2db   : > { %v6431_v4 = vsel %vm13850_vm14, %v6426_v36, %v6430_v43  ;;  %v6468_v57 = vrot.slane %v6466_v60, 5  ;;  %v6478_v41 = vrot.slane %v6476_v48, 5  ;;  %v6487_v27 = vor.u32 %v6486_v39, %v6483_v9  ;;  %13462 = vmatprep.subr.msk.bf16.mxu0 %vm6603_vm0, %v16624_v52  ;;  %v7062_v48 = vld [vmem:[#allocation3 + $0x18] sm:$0xe] }
 0x2dc   : > { %v12159_v35 = vcombine.low %v6421_v2, %v6431_v4  ;;  %v6450_v37 = vrot.slane %v6449_v20, 4  ;;  %v6490_v6 = vshll.u32 %v16598_v59, 16  ;;  %v6496_v21 = vrot.slane %v6494_v10, 4  ;;  %v7061_v10 = vld [vmem:[#allocation3 + $0xc] sm:$0xe] }
 0x2dd   : > { %v6469_v0 = vsel %vm13850_vm14, %v6464_v15, %v6468_v57  ;;  %v6473_v12 = vor.u32 %v6472_v56, %v6468_v57  ;;  %v6488_v30 = vrot.slane %v6487_v27, 4  ;;  %v6500_v43 = vshll.u32 %v16634_v18, 16  ;;  %v7063_v4 = vld [vmem:[#allocation3 + $0x24] sm:$0xe] }
 0x2de   : > { %13168 = vmatprep.mubr.msk.bf16.mxu1 %vm6554_vm6, %v12159_v35  ;;  %v6455_v9 = vsel %vm13850_vm14, %v6450_v37, %v6454_v7  ;;  %13247 = vmatmul.mubr.msk.bf16.vlgmr.msra.gmra.mxu0 %vm6554_vm6, %v13573_v23  ;;  %v6492_v28 = vrot.slane %v6490_v6, 5  ;;  %v12211_v39 = vrot.slane %v7060_v19, 9  ;;  %v7110_v32 = vrot.slane %v13621_v33, 5  ;;  %v13624_v7 = vld [vmem:[#allocation3 + $0x14] sm:$0x1]  ;;  %v13576_v33 = vld [vmem:[#allocation3 + $0x3c] sm:$0xff]  }
 0x2df   : > { %v12160_v45 = vcombine.low %v6445_v31, %v6455_v9  ;;  %v6474_v2 = vrot.slane %v6473_v12, 4  ;;  %v6502_v50 = vrot.slane %v6500_v43, 5  ;;  %13250 = vmatprep.mubr.msk.bf16.mxu0 %vm6554_vm6, %v13574_v54  ;;  %v7113_v44 = vrot.slane %v13622_v11, 5  ;;  %v13623_v31 = vld [vmem:[#allocation3 + $0x10] sm:$0xf] }
 0x2e0   : > { %v6493_v55 = vsel %vm13850_vm14, %v6488_v30, %v6492_v28  ;;  %v6497_v62 = vor.u32 %v6496_v21, %v6492_v28  ;;  %v7111_v36 = vsel %vm14250_vm10, %v12211_v39, %v7110_v32  ;;  %v7112_v56 = vrot.slane %v7110_v32, 4  ;;  %v7064_v21 = vld [vmem:[#allocation3 + $0x30] sm:$0xe]  ;;  %v13625_v30 = vld [vmem:[#allocation3 + $0x1c] sm:$0xf] }
 0x2e1   : > { %13169 = vmatmul.mubr.msk.bf16.gmra.mxu1 %vm6554_vm6, %v12160_v45  ;;  %v6479_v47 = vsel %vm13850_vm14, %v6474_v2, %v6478_v41  ;;  %v12212_v1 = vrot.slane %v7061_v10, 9  ;;  %v7117_v20 = vrot.slane %v13623_v31, 5  ;;  %v7120_v15 = vrot.slane %v13624_v7, 5  ;;  %v13575_v12 = vld [vmem:[#allocation3 + $0x30] sm:$0xff]   ;;  %v13626_v54 = vld [vmem:[#allocation3 + $0x20] sm:$0x1] }
 0x2e2   : > { %v12161_v57 = vcombine.low %v6469_v0, %v6479_v47  ;;  %v6498_v27 = vrot.slane %v6497_v62, 4  ;;  %v7114_v19 = vsel %vm14250_vm10, %v7112_v56, %v7113_v44  ;;  %v16660_v35 = vsel %vm6603_vm0, %v16332_v8, 0  ;;  %v13627_v32 = vld [vmem:[#allocation3 + $0x28] sm:$0xf]  ;;  %v7065_v2 = vld [vmem:[#allocation3 + $0x3c] sm:$0xe] }
 0x2e3   : > { %v12228_v37 = vcombine.low %v7111_v36, %v7114_v19  ;;  %v16664_v23 = vsel %vm14250_vm10, %v12212_v1, %v7117_v20  ;;  %v7119_v41 = vrot.slane %v7117_v20, 4  ;;  %v12213_v6 = vrot.slane %v7062_v48, 9  ;;  %v7066_v47 = vld [vmem:[#allocation3 + $0x48] sm:$0xe]  ;;  %v13629_v20 = vld [vmem:[#allocation3 + $0x40] sm:$0xf] }
 0x2e4   : > { %13172 = vmatprep.mubr.msk.bf16.mxu1 %vm6554_vm6, %v12161_v57  ;;  %v6503_v0 = vsel %vm13850_vm14, %v6498_v27, %v6502_v50  ;;  %v7124_v43 = vrot.slane %v13625_v30, 5  ;;  %v7127_v9 = vrot.slane %v13626_v54, 5  ;;  %v12214_v8 = vrot.slane %v7063_v4, 9  ;;  %v7067_v4 = vld [vmem:[#allocation3 + $0x54] sm:$0xe] }
 0x2e5   : > { %v12162_v28 = vcombine.low %v6493_v55, %v6503_v0  ;;  %v16671_v39 = vsel %vm14250_vm10, %v7119_v41, %v7120_v15  ;;  %v7131_v10 = vrot.slane %v13627_v32, 5  ;;  %v7134_v45 = vrot.slane %v16360_v22, 5  ;;  %v13628_v22 = vld [vmem:[#allocation3 + $0x34] sm:$0xf] }
 0x2e6   : > { %13251 = vmatmul.mubr.msk.bf16.gmra.mxu0 %vm6554_vm6, %v13575_v12  ;;  %v12229_v50 = vcombine.low %v16664_v23, %v16671_v39  ;;  %v16679_v11 = vsel %vm14250_vm10, %v12213_v6, %v7124_v43  ;;  %v7126_v44 = vrot.slane %v7124_v43, 4  ;;  %v12215_v55 = vrot.slane %v7064_v21, 9  ;;  %v7068_v21 = vld [vmem:[#allocation3 + $0x60] sm:$0xe]  ;;  %v7069_v39 = vld [vmem:[#allocation3 + $0x6c] sm:$0xe] }
 0x2e7   : > { %13254 = vmatprep.mubr.msk.bf16.mxu0 %vm6554_vm6, %v13576_v33  ;;  %v16684_v62 = vsel %vm14250_vm10, %v12214_v8, %v7131_v10  ;;  %v7133_v36 = vrot.slane %v7131_v10, 4  ;;  %v7138_v56 = vrot.slane %v13628_v22, 5  ;;  %v7141_v48 = vrot.slane %v16393_v34, 5  ;;  %v13578_v33 = vld [vmem:[#allocation3 + $0x54] sm:$0xff]  }
 0x2e8   : > { %v7128_v1 = vsel %vm14250_vm10, %v7126_v44, %v7127_v9  ;;  %v12216_v31 = vrot.slane %v7065_v2, 9  ;;  %v7145_v7 = vrot.slane %v13629_v20, 5  ;;  %v7148_v15 = vrot.slane %v16438_v38, 5 }
 0x2e9   : > { %13173 = vmatmul.mubr.msk.bf16.gmra.mxu1 %vm6554_vm6, %v12162_v28  ;;  %v12230_v57 = vcombine.low %v16679_v11, %v7128_v1  ;;  %v16694_v27 = vsel %vm14250_vm10, %v7133_v36, %v7134_v45  ;;  %v16698_v34 = vsel %vm14250_vm10, %v12215_v55, %v7138_v56  ;;  %v7140_v19 = vrot.slane %v7138_v56, 4  ;;  %v7070_v11 = vld [vmem:[#allocation3 + $0x78] sm:$0xe]  ;;  %v7071_v56 = vld [vmem:[#allocation3 + $0x84] sm:$0xe] }
 0x2ea   : > { %13212 = vmatprep.mubr.msk.bf16.mxu1 %vm6554_vm6, %v12228_v37  ;;  %v12231_v23 = vcombine.low %v16684_v62, %v16694_v27  ;;  %v16705_v38 = vsel %vm14250_vm10, %v12216_v31, %v7145_v7  ;;  %v7147_v41 = vrot.slane %v7145_v7, 4  ;;  %v12217_v6 = vrot.slane %v7066_v47, 9  ;;  %v13577_v37 = vld [vmem:[#allocation3 + $0x48] sm:$0xff]   ;;  %v16754_v1 = vld [vmem:[%s18857_s3 + $0x18] sm:$0xf] }
 0x2eb   : > { %v16709_v0 = vsel %vm14250_vm10, %v7140_v19, %v7141_v48  ;;  %v7152_v12 = vrot.slane %v16374_v63, 5  ;;  %v7155_v30 = vrot.slane %v16468_v61, 5  ;;  %v12218_v43 = vrot.slane %v7067_v4, 9  ;;  %v7072_v7 = vld [vmem:[#allocation3 + $0x90] sm:$0xe] }
 0x2ec   : > { %v12232_v54 = vcombine.low %v16698_v34, %v16709_v0  ;;  %v16717_v9 = vsel %vm14250_vm10, %v7147_v41, %v7148_v15  ;;  %v7159_v8 = vrot.slane %v16418_v53, 5  ;;  %v7162_v28 = vrot.slane %v16501_v13, 5 }
 0x2ed   : > { %v12233_v63 = vcombine.low %v16705_v38, %v16717_v9  ;;  %v16725_v61 = vsel %vm14250_vm10, %v12217_v6, %v7152_v12  ;;  %v7154_v32 = vrot.slane %v7152_v12, 4  ;;  %v12219_v10 = vrot.slane %v7068_v21, 9  ;;  %v7073_v21 = vld [vmem:[#allocation3 + $0x9c] sm:$0xe]  ;;  %v8598_v12 = vld [vmem:[#allocation3 + $0xc] sm:$0xe] }
 0x2ee   : > { %13255 = vmatmul.mubr.msk.bf16.gmra.mxu0 %vm6554_vm6, %v13577_v37  ;;  %v16730_v45 = vsel %vm14250_vm10, %v12218_v43, %v7159_v8  ;;  %v7161_v53 = vrot.slane %v7159_v8, 4  ;;  %v7166_v13 = vrot.slane %v16449_v42, 5  ;;  %v7169_v2 = vrot.slane %v16520_v16, 5  ;;  %v16787_v8 = vld [vmem:[#allocation3 + $0x10] sm:$0xf] }
 0x2ef   : > { %13258 = vmatprep.mubr.msk.bf16.mxu0 %vm6554_vm6, %v13578_v33  ;;  %v16737_v44 = vsel %vm14250_vm10, %v7154_v32, %v7155_v30  ;;  %v12220_v55 = vrot.slane %v7069_v39, 9  ;;  %v7173_v36 = vrot.slane %v16481_v24, 5  ;;  %v7176_v22 = vrot.slane %v16545_v3, 5  ;;  %v16795_v32 = vld [vmem:[#allocation3 + $0x14] sm:$0x1] }
 0x2f0   : > { %v12234_v48 = vcombine.low %v16725_v61, %v16737_v44  ;;  %v16745_v42 = vsel %vm14250_vm10, %v7161_v53, %v7162_v28  ;;  %v16749_v16 = vsel %vm14250_vm10, %v12219_v10, %v7166_v13  ;;  %v7168_v47 = vrot.slane %v7166_v13, 4  ;;  %v16924_v61 = vld [vmem:[#allocation3 + $0x38] sm:$0x1]  ;;  %v13583_v44 = vld [vmem:[#allocation3 + $0x90] sm:$0xff]  }
 0x2f1   : > { %13213 = vmatmul.mubr.msk.bf16.vlgmr.msra.gmra.mxu1 %vm6554_vm6, %v12229_v50  ;;  %v12235_v24 = vcombine.low %v16730_v45, %v16745_v42  ;;  %v16761_v3 = vsel %vm14250_vm10, %v12220_v55, %v7173_v36  ;;  %v7175_v31 = vrot.slane %v7173_v36, 4  ;;  %v12221_v20 = vrot.slane %v7070_v11, 9  ;;  %v7074_v11 = vld [vmem:[#allocation3 + $0xa8] sm:$0xe] }
 0x2f2   : > { %13279 = vmatpush3.bf16.msra.mxu1 %v16660_v35  ;;  %13216 = vmatprep.mubr.msk.bf16.mxu1 %vm6554_vm6, %v12230_v57  ;;  %v16767_v15 = vsel %vm14250_vm10, %v7168_v47, %v7169_v2  ;;  %v7180_v50 = vrot.slane %v16512_v49, 5  ;;  %v7183_v4 = vrot.slane %v16564_v17, 5  ;;  %v12222_v19 = vrot.slane %v7071_v56, 9  ;;  %v13579_v49 = vld [vmem:[#allocation3 + $0x60] sm:$0xff]   ;;  %v16821_v47 = vld [vmem:[#allocation3 + $0x1c] sm:$0xf] }
 0x2f3   : > { %v12236_v41 = vcombine.low %v16749_v16, %v16767_v15  ;;  %v16775_v6 = vsel %vm14250_vm10, %v7175_v31, %v7176_v22  ;;  %v7187_v35 = vrot.slane %v16525_v26, 5  ;;  %v7190_v57 = vrot.slane %v16582_v14, 5  ;;  %13463 = vmatprep.subr.msk.bf16.mxu1 %vm6603_vm0, %v16754_v1  ;;  %v13580_v26 = vld [vmem:[#allocation3 + $0x6c] sm:$0xff]   ;;  %v8599_v31 = vld [vmem:[#allocation3 + $0x18] sm:$0xe] }
 0x2f4   : > { %v12237_v17 = vcombine.low %v16761_v3, %v16775_v6  ;;  %v16785_v30 = vsel %vm14250_vm10, %v12221_v20, %v7180_v50  ;;  %v7182_v43 = vrot.slane %v7180_v50, 4  ;;  %v12223_v37 = vrot.slane %v7072_v7, 9 }
 0x2f5   : > { %v16791_v14 = vsel %vm14250_vm10, %v12222_v19, %v7187_v35  ;;  %v7189_v28 = vrot.slane %v7187_v35, 4  ;;  %v7194_v39 = vrot.slane %v16554_v40, 5  ;;  %v7197_v33 = vrot.slane %v16590_v51, 5  ;;  %v16833_v19 = vld [vmem:[#allocation3 + $0x20] sm:$0x1] }
 0x2f6   : > { %13259 = vmatmul.mubr.msk.bf16.gmra.mxu0 %vm6554_vm6, %v13579_v49  ;;  %v16800_v10 = vsel %vm14250_vm10, %v7182_v43, %v7183_v4  ;;  %v12224_v53 = vrot.slane %v7073_v21, 9  ;;  %v7201_v13 = vrot.slane %v16568_v58, 5  ;;  %v7204_v2 = vrot.slane %v16608_v46, 5  ;;  %v12408_v21 = vld [vmem:[%s18857_s3 + $0x1c] sm:$0xf] }
 0x2f7   : > { %13262 = vmatprep.mubr.msk.bf16.mxu0 %vm6554_vm6, %v13580_v26  ;;  %v12238_v40 = vcombine.low %v16785_v30, %v16800_v10  ;;  %v16809_v51 = vsel %vm14250_vm10, %v7189_v28, %v7190_v57  ;;  %v16813_v55 = vsel %vm14250_vm10, %v12223_v37, %v7194_v39  ;;  %v7196_v36 = vrot.slane %v7194_v39, 4  ;;  %v7075_v57 = vld [vmem:[#allocation3 + $0xb4] sm:$0xe]  ;;  %v8600_v49 = vld [vmem:[#allocation3 + $0x24] sm:$0xe] }
 0x2f8   : > { %v12239_v58 = vcombine.low %v16791_v14, %v16809_v51  ;;  %v16819_v46 = vsel %vm14250_vm10, %v12224_v53, %v7201_v13  ;;  %v7203_v22 = vrot.slane %v7201_v13, 4  ;;  %v12326_v56 = vrot.slane %v8598_v12, 9  ;;  %v16863_v28 = vld [vmem:[#allocation3 + $0x28] sm:$0xf] }
 0x2f9   : > { %13217 = vmatmul.mubr.msk.bf16.gmra.mxu1 %vm6554_vm6, %v12231_v23  ;;  %v16829_v20 = vsel %vm14250_vm10, %v7196_v36, %v7197_v33  ;;  %v8664_v7 = vrot.slane %v16787_v8, 5  ;;  %v8667_v50 = vrot.slane %v16795_v32, 5  ;;  %v12225_v4 = vrot.slane %v7074_v11, 9  ;;  %v13582_v39 = vld [vmem:[#allocation3 + $0x84] sm:$0xff]  }
 0x2fa   : > { %13220 = vmatprep.mubr.msk.bf16.mxu1 %vm6554_vm6, %v12232_v54  ;;  %v12240_v62 = vcombine.low %v16813_v55, %v16829_v20  ;;  %v16843_v27 = vsel %vm14250_vm10, %v7203_v22, %v7204_v2  ;;  %v7208_v23 = vrot.slane %v16586_v5, 5  ;;  %v7211_v35 = vrot.slane %v16614_v25, 5  ;;  %v13581_v5 = vld [vmem:[#allocation3 + $0x78] sm:$0xff]   ;;  %v16871_v2 = vld [vmem:[#allocation3 + $0x2c] sm:$0x1] }
 0x2fb   : > { %v12241_v34 = vcombine.low %v16819_v46, %v16843_v27  ;;  %v16854_v0 = vsel %vm14250_vm10, %v12326_v56, %v8664_v7  ;;  %v8666_v54 = vrot.slane %v8664_v7, 4  ;;  %v8873_v12 = vsel %vm6603_vm0, %v16624_v52, 0  ;;  %v17058_v55 = vld [vmem:[#allocation3 + $0x68] sm:$0x1] }
 0x2fc   : > { %v16860_v25 = vsel %vm14250_vm10, %v12225_v4, %v7208_v23  ;;  %v7210_v43 = vrot.slane %v7208_v23, 4  ;;  %13313 = vmatpush3.bf16.msra.mxu0 %v8873_v12  ;;  %v12327_v37 = vrot.slane %v8599_v31, 9  ;;  %v8671_v26 = vrot.slane %v16821_v47, 5  ;;  %v7872_v31 = vld [vmem:[#allocation3 + $0xc] sm:$0xf] }
 0x2fd   : > { %v16867_v33 = vsel %vm14250_vm10, %v8666_v54, %v8667_v50  ;;  %v8674_v52 = vrot.slane %v16833_v19, 5  ;;  %v12226_v53 = vrot.slane %v7075_v57, 9  ;;  %v7215_v13 = vrot.slane %v16598_v59, 5  ;;  %13464 = vmatprep.subr.msk.bf16.mxu0 %vm6603_vm0, %v12408_v21  ;;  %v7887_v20 = vld [vmem:[#allocation3 + $0x48] sm:$0xf] }
 0x2fe   : > { %13263 = vmatmul.mubr.msk.bf16.gmra.mxu0 %vm6554_vm6, %v13581_v5  ;;  %v12343_v11 = vcombine.low %v16854_v0, %v16867_v33  ;;  %v16879_v36 = vsel %vm14250_vm10, %v7210_v43, %v7211_v35  ;;  %v16883_v22 = vsel %vm14250_vm10, %v12327_v37, %v8671_v26  ;;  %v8673_v56 = vrot.slane %v8671_v26, 4  ;;  %v16909_v43 = vld [vmem:[#allocation3 + $0x34] sm:$0xf]  ;;  %v7875_v26 = vld [vmem:[#allocation3 + $0x18] sm:$0xf] }
 0x2ff   : > { %13266 = vmatprep.mubr.msk.bf16.mxu0 %vm6554_vm6, %v13582_v39  ;;  %v16890_v7 = vsel %vm14250_vm10, %v12226_v53, %v7215_v13  ;;  %v7217_v50 = vrot.slane %v7215_v13, 4  ;;  %v7218_v4 = vrot.slane %v16634_v18, 5  ;;  %v12328_v35 = vrot.slane %v8600_v49, 9  ;;  %v8601_v49 = vld [vmem:[#allocation3 + $0x30] sm:$0xe] }
 0x300   : > { %v16895_v23 = vsel %vm14250_vm10, %v8673_v56, %v8674_v52  ;;  %v8678_v57 = vrot.slane %v16863_v28, 5  ;;  %v8681_v21 = vrot.slane %v16871_v2, 5  ;;  %v7921_v12 = vshrl.u32 %v7872_v31, 16 }
 0x301   : > { %13221 = vmatmul.mubr.msk.bf16.gmra.mxu1 %vm6554_vm6, %v12233_v63  ;;  %v12344_v54 = vcombine.low %v16883_v22, %v16895_v23  ;;  %v16907_v18 = vsel %vm14250_vm10, %v7217_v50, %v7218_v4  ;;  %v7924_v5 = vshll.u32 %v7872_v31, 16  ;;  %v7930_v37 = vshll.u32 %v16787_v8, 16  ;;  %v13584_v4 = vld [vmem:[#allocation3 + $0x9c] sm:$0xff]   ;;  %v7890_v22 = vld [vmem:[#allocation3 + $0x54] sm:$0xf] }
 0x302   : > { %13224 = vmatprep.mubr.msk.bf16.mxu1 %vm6554_vm6, %v12234_v48  ;;  %v16919_v9 = vsel %vm14250_vm10, %v12328_v35, %v8678_v57  ;;  %v8680_v63 = vrot.slane %v8678_v57, 4  ;;  %v7923_v39 = vrot.slane %v7921_v12, 4  ;;  %v7934_v53 = vshrl.u32 %v16787_v8, 16 }
 0x303   : > { %v7926_v52 = vrot.slane %v7924_v5, 5  ;;  %v7940_v13 = vshll.u32 %v16795_v32, 16  ;;  %v7932_v56 = vrot.slane %v7930_v37, 5  ;;  %v12329_v31 = vrot.slane %v8601_v49, 9  ;;  %v8602_v49 = vld [vmem:[#allocation3 + $0x3c] sm:$0xe] }
 0x304   : > { %v16928_v48 = vsel %vm14250_vm10, %v8680_v63, %v8681_v21  ;;  %v8685_v50 = vrot.slane %v16909_v43, 5  ;;  %v7936_v12 = vrot.slane %v7934_v53, 4  ;;  %v8688_v21 = vrot.slane %v16924_v61, 5 }
 0x305   : > { %v12345_v35 = vcombine.low %v16919_v9, %v16928_v48  ;;  %v7927_v57 = vor.u32 %v7926_v52, %v7923_v39  ;;  %v7942_v8 = vrot.slane %v7940_v13, 5  ;;  %v7945_v63 = vshrl.u32 %v7875_v26, 16  ;;  %v16941_v52 = vld [vmem:[#allocation3 + $0x40] sm:$0xf] }
 0x306   : > { %13267 = vmatmul.mubr.msk.bf16.gmra.mxu0 %vm6554_vm6, %v13583_v44  ;;  %v16936_v32 = vsel %vm14250_vm10, %v12329_v31, %v8685_v50  ;;  %v8687_v5 = vrot.slane %v8685_v50, 4  ;;  %v7937_v38 = vor.u32 %v7936_v12, %v7932_v56  ;;  %v7948_v59 = vshll.u32 %v7875_v26, 16  ;;  %v16949_v50 = vld [vmem:[#allocation3 + $0x44] sm:$0x1] }
 0x307   : > { %13270 = vmatprep.mubr.msk.bf16.mxu0 %vm6554_vm6, %v13584_v4  ;;  %v7928_v37 = vrot.slane %v7927_v57, 4  ;;  %v7954_v39 = vshll.u32 %v16821_v47, 16  ;;  %v7947_v13 = vrot.slane %v7945_v63, 4  ;;  %v7958_v44 = vshrl.u32 %v16821_v47, 16  ;;  %v13585_v63 = vld [vmem:[#allocation3 + $0xa8] sm:$0xff]  }
 0x308   : > { %v16945_v53 = vsel %vm14250_vm10, %v8687_v5, %v8688_v21  ;;  %v7964_v31 = vshll.u32 %v16833_v19, 16  ;;  %v7938_v4 = vrot.slane %v7937_v38, 4  ;;  %v7950_v12 = vrot.slane %v7948_v59, 5  ;;  %v7878_v5 = vld [vmem:[#allocation3 + $0x24] sm:$0xf] }
 0x309   : > { %13225 = vmatmul.mubr.msk.bf16.gmra.mxu1 %vm6554_vm6, %v12235_v24  ;;  %v7933_v26 = vsel %vm13850_vm14, %v7928_v37, %v7932_v56  ;;  %v12346_v57 = vcombine.low %v16936_v32, %v16945_v53  ;;  %v7956_v47 = vrot.slane %v7954_v39, 5  ;;  %v7960_v19 = vrot.slane %v7958_v44, 4  ;;  %v7881_v44 = vld [vmem:[#allocation3 + $0x30] sm:$0xf] }
 0x30a   : > { %13228 = vmatprep.mubr.msk.bf16.mxu1 %vm6554_vm6, %v12236_v41  ;;  %v7966_v21 = vrot.slane %v7964_v31, 5  ;;  %v12330_v45 = vrot.slane %v8602_v49, 9  ;;  %v7943_v42 = vsel %vm13850_vm14, %v7938_v4, %v7942_v8  ;;  %v7951_v24 = vor.u32 %v7950_v12, %v7947_v13  ;;  %v13586_v41 = vld [vmem:[#allocation3 + $0xb4] sm:$0xff]  }
 0x30b   : > { %v8692_v38 = vrot.slane %v16941_v52, 5  ;;  %v8695_v56 = vrot.slane %v16949_v50, 5  ;;  %v16967_v59 = vcombine.low %v7933_v26, %v7943_v42  ;;  %v7961_v37 = vor.u32 %v7960_v19, %v7956_v47 }
 0x30c   : > { %v16971_v16 = vsel %vm6603_vm0, %v16754_v1, 0  ;;  %v7969_v15 = vshrl.u32 %v7878_v5, 16  ;;  %v7952_v39 = vrot.slane %v7951_v24, 4  ;;  %v7972_v13 = vshll.u32 %v7878_v5, 16  ;;  %v8603_v1 = vld [vmem:[#allocation3 + $0x48] sm:$0xe] }
 0x30d   : > { %v16975_v49 = vsel %vm14250_vm10, %v12330_v45, %v8692_v38  ;;  %v8694_v8 = vrot.slane %v8692_v38, 4  ;;  %v7962_v31 = vrot.slane %v7961_v37, 4  ;;  %v7978_v4 = vshll.u32 %v16863_v28, 16  ;;  %v16988_v24 = vld [vmem:[#allocation3 + $0x4c] sm:$0xf] }
 0x30e   : > { %13271 = vmatmul.mubr.msk.bf16.gmra.mxu0 %vm6554_vm6, %v13585_v63  ;;  %v7971_v26 = vrot.slane %v7969_v15, 4  ;;  %v7982_v12 = vshrl.u32 %v16863_v28, 16  ;;  %v7957_v19 = vsel %vm13850_vm14, %v7952_v39, %v7956_v47  ;;  %v7974_v5 = vrot.slane %v7972_v13, 5  ;;  %v16990_v38 = vld [vmem:[#allocation3 + $0x50] sm:$0x1] }
 0x30f   : > { %13274 = vmatprep.mubr.msk.bf16.mxu0 %vm6554_vm6, %v13586_v41  ;;  %v16985_v45 = vsel %vm14250_vm10, %v8694_v8, %v8695_v56  ;;  %v7988_v42 = vshll.u32 %v16871_v2, 16  ;;  %v7967_v28 = vsel %vm13850_vm14, %v7962_v31, %v7966_v21  ;;  %v7980_v37 = vrot.slane %v7978_v4, 5  ;;  %v7884_v4 = vld [vmem:[#allocation3 + $0x3c] sm:$0xf] }
 0x310   : > { %v12347_v63 = vcombine.low %v16975_v49, %v16985_v45  ;;  %v7984_v15 = vrot.slane %v7982_v12, 4  ;;  %v17000_v47 = vcombine.low %v7957_v19, %v7967_v28  ;;  %v7975_v2 = vor.u32 %v7974_v5, %v7971_v26  ;;  %v8604_v26 = vld [vmem:[#allocation3 + $0x54] sm:$0xe]  ;;  %v13587_v12 = vld [vmem:[#allocation3 + $0xc0] sm:$0xff]   ;;  %v17014_v19 = vld [vmem:[#allocation3 + $0x58] sm:$0xf] }
 0x311   : > { %13229 = vmatmul.mubr.msk.bf16.gmra.mxu1 %vm6554_vm6, %v12237_v17  ;;  %v7990_v56 = vrot.slane %v7988_v42, 5  ;;  %v12331_v41 = vrot.slane %v8603_v1, 9  ;;  %v8699_v39 = vrot.slane %v16988_v24, 5  ;;  %v8702_v8 = vrot.slane %v16990_v38, 5 }
 0x312   : > { %13232 = vmatprep.mubr.msk.bf16.mxu1 %vm6554_vm6, %v12238_v40  ;;  %v7985_v21 = vor.u32 %v7984_v15, %v7980_v37  ;;  %v7993_v13 = vshrl.u32 %v7881_v44, 16  ;;  %v7976_v31 = vrot.slane %v7975_v2, 4  ;;  %v7996_v3 = vshll.u32 %v7881_v44, 16  ;;  %v17018_v15 = vld [vmem:[#allocation3 + $0x5c] sm:$0x1] }
 0x313   : > { %v8002_v6 = vshll.u32 %v16909_v43, 16  ;;  %v8006_v17 = vshrl.u32 %v16909_v43, 16  ;;  %v17012_v30 = vsel %vm14250_vm10, %v12331_v41, %v8699_v39  ;;  %v8701_v10 = vrot.slane %v8699_v39, 4 }
 0x314   : > { %v7986_v1 = vrot.slane %v7985_v21, 4  ;;  %v7995_v40 = vrot.slane %v7993_v13, 4  ;;  %v7981_v5 = vsel %vm13850_vm14, %v7976_v31, %v7980_v37  ;;  %v7998_v44 = vrot.slane %v7996_v3, 5 }
 0x315   : > { %v8004_v42 = vrot.slane %v8002_v6, 5  ;;  %v8008_v28 = vrot.slane %v8006_v17, 4  ;;  %v17025_v2 = vsel %vm14250_vm10, %v8701_v10, %v8702_v8  ;;  %v8012_v41 = vshll.u32 %v16924_v61, 16  ;;  %v17043_v17 = vld [vmem:[#allocation3 + $0x64] sm:$0xf] }
 0x316   : > { %13275 = vmatmul.mubr.msk.bf16.gmra.mxu0 %vm6554_vm6, %v13587_v12  ;;  %v7991_v43 = vsel %vm13850_vm14, %v7986_v1, %v7990_v56  ;;  %v12332_v21 = vrot.slane %v8604_v26, 9  ;;  %v12348_v39 = vcombine.low %v17012_v30, %v17025_v2  ;;  %v7999_v13 = vor.u32 %v7998_v44, %v7995_v40 }
 0x317   : > { %13314 = vmatprep.mubr.msk.bf16.mxu0 %vm6554_vm6, %v12343_v11  ;;  %v17032_v37 = vcombine.low %v7981_v5, %v7991_v43  ;;  %v8009_v31 = vor.u32 %v8008_v28, %v8004_v42  ;;  %v8014_v56 = vrot.slane %v8012_v41, 5  ;;  %v8706_v3 = vrot.slane %v17014_v19, 5 }
 0x318   : > { %v8709_v8 = vrot.slane %v17018_v15, 5  ;;  %v8017_v6 = vshrl.u32 %v7884_v4, 16  ;;  %v8000_v0 = vrot.slane %v7999_v13, 4  ;;  %v8020_v11 = vshll.u32 %v7884_v4, 16 }
 0x319   : > { %13233 = vmatmul.mubr.msk.bf16.gmra.mxu1 %vm6554_vm6, %v12239_v58  ;;  %v8010_v33 = vrot.slane %v8009_v31, 4  ;;  %v8026_v61 = vshll.u32 %v16941_v52, 16  ;;  %v17051_v26 = vsel %vm14250_vm10, %v12332_v21, %v8706_v3  ;;  %v8708_v12 = vrot.slane %v8706_v3, 4  ;;  %v8605_v58 = vld [vmem:[#allocation3 + $0x60] sm:$0xe] }
 0x31a   : > { %13236 = vmatprep.mubr.msk.bf16.mxu1 %vm6554_vm6, %v12240_v62  ;;  %v8019_v14 = vrot.slane %v8017_v6, 4  ;;  %v8030_v51 = vshrl.u32 %v16941_v52, 16  ;;  %v8005_v4 = vsel %vm13850_vm14, %v8000_v0, %v8004_v42  ;;  %v8022_v10 = vrot.slane %v8020_v11, 5  ;;  %v8606_v11 = vld [vmem:[#allocation3 + $0x6c] sm:$0xe] }
 0x31b   : > { %v8015_v1 = vsel %vm13850_vm14, %v8010_v33, %v8014_v56  ;;  %v8028_v40 = vrot.slane %v8026_v61, 5  ;;  %v17064_v5 = vsel %vm14250_vm10, %v8708_v12, %v8709_v8  ;;  %v8036_v52 = vshll.u32 %v16949_v50, 16  ;;  %v17096_v12 = vld [vmem:[#allocation3 + $0x70] sm:$0xf] }
 0x31c   : > { %v17060_v62 = vcombine.low %v8005_v4, %v8015_v1  ;;  %v8032_v44 = vrot.slane %v8030_v51, 4  ;;  %v12349_v42 = vcombine.low %v17051_v26, %v17064_v5  ;;  %v8023_v28 = vor.u32 %v8022_v10, %v8019_v14  ;;  %v17098_v14 = vld [vmem:[#allocation3 + $0x74] sm:$0x1] }
 0x31d   : > { %v12333_v43 = vrot.slane %v8605_v58, 9  ;;  %v8713_v41 = vrot.slane %v17043_v17, 5  ;;  %v8038_v13 = vrot.slane %v8036_v52, 5  ;;  %v8716_v31 = vrot.slane %v17058_v55, 5 }
 0x31e   : > { %13315 = vmatmul.mubr.msk.bf16.vlgmr.msra.gmra.mxu0 %vm6554_vm6, %v12344_v54  ;;  %v8033_v21 = vor.u32 %v8032_v44, %v8028_v40  ;;  %v8041_v56 = vshrl.u32 %v7887_v20, 16  ;;  %v8024_v50 = vrot.slane %v8023_v28, 4  ;;  %v8044_v6 = vshll.u32 %v7887_v20, 16 }
 0x31f   : > { %13318 = vmatprep.mubr.msk.bf16.mxu0 %vm6554_vm6, %v12345_v35  ;;  %v17081_v3 = vsel %vm14250_vm10, %v12333_v43, %v8713_v41  ;;  %v8715_v8 = vrot.slane %v8713_v41, 4  ;;  %v8050_v0 = vshll.u32 %v16988_v24, 16  ;;  %v8054_v33 = vshrl.u32 %v16988_v24, 16  ;;  %v8607_v43 = vld [vmem:[#allocation3 + $0x78] sm:$0xe] }
 0x320   : > { %v8034_v23 = vrot.slane %v8033_v21, 4  ;;  %v8043_v54 = vrot.slane %v8041_v56, 4  ;;  %v8029_v9 = vsel %vm13850_vm14, %v8024_v50, %v8028_v40  ;;  %v8046_v35 = vrot.slane %v8044_v6, 5  ;;  %v7893_v41 = vld [vmem:[#allocation3 + $0x60] sm:$0xf] }
 0x321   : > { %13237 = vmatmul.mubr.msk.bf16.gmra.mxu1 %vm6554_vm6, %v12241_v34  ;;  %v17093_v48 = vsel %vm14250_vm10, %v8715_v8, %v8716_v31  ;;  %v8060_v61 = vshll.u32 %v16990_v38, 16  ;;  %v19094_v24 = vcombine.low %v16860_v25, %v16879_v36  ;;  %v8052_v34 = vrot.slane %v8050_v0, 5  ;;  %v17122_v50 = vld [vmem:[#allocation3 + $0x7c] sm:$0xf]  ;;  %v17130_v8 = vld [vmem:[#allocation3 + $0x80] sm:$0x1] }
 0x322   : > { %v8039_v46 = vsel %vm13850_vm14, %v8034_v23, %v8038_v13  ;;  %v12350_v27 = vcombine.low %v17081_v3, %v17093_v48  ;;  %v8056_v51 = vrot.slane %v8054_v33, 4  ;;  %v8047_v38 = vor.u32 %v8046_v35, %v8043_v54  ;;  %v8610_v3 = vld [vmem:[#allocation3 + $0x9c] sm:$0xe]  ;;  %v7902_v48 = vld [vmem:[#allocation3 + $0x84] sm:$0xf] }
 0x323   : > { %13240 = vmatprep.mubr.msk.bf16.mxu1 %vm6554_vm6, %v19094_v24  ;;  %v17108_v58 = vcombine.low %v8029_v9, %v8039_v46  ;;  %v8062_v4 = vrot.slane %v8060_v61, 5  ;;  %v12334_v1 = vrot.slane %v8606_v11, 9  ;;  %v8720_v40 = vrot.slane %v17096_v12, 5  ;;  %v8608_v46 = vld [vmem:[#allocation3 + $0x84] sm:$0xe] }
 0x324   : > { %v8057_v10 = vor.u32 %v8056_v51, %v8052_v34  ;;  %v8723_v25 = vrot.slane %v17098_v14, 5  ;;  %v8065_v36 = vshrl.u32 %v7890_v22, 16  ;;  %v8048_v20 = vrot.slane %v8047_v38, 4 }
 0x325   : > { %v8068_v44 = vshll.u32 %v7890_v22, 16  ;;  %v8074_v52 = vshll.u32 %v17014_v19, 16  ;;  %v8078_v28 = vshrl.u32 %v17014_v19, 16  ;;  %v17120_v13 = vsel %vm14250_vm10, %v12334_v1, %v8720_v40 }
 0x326   : > { %13319 = vmatmul.mubr.msk.bf16.gmra.mxu0 %vm6554_vm6, %v12346_v57  ;;  %v8058_v21 = vrot.slane %v8057_v10, 4  ;;  %v8722_v31 = vrot.slane %v8720_v40, 4  ;;  %v8067_v56 = vrot.slane %v8065_v36, 4  ;;  %v8053_v19 = vsel %vm13850_vm14, %v8048_v20, %v8052_v34  ;;  %v17163_v36 = vld [vmem:[#allocation3 + $0x8c] sm:$0x1] }
 0x327   : > { %13322 = vmatprep.mubr.msk.bf16.mxu0 %vm6554_vm6, %v12347_v63  ;;  %v8070_v32 = vrot.slane %v8068_v44, 5  ;;  %v8076_v53 = vrot.slane %v8074_v52, 5  ;;  %v8080_v57 = vrot.slane %v8078_v28, 4  ;;  %v8084_v23 = vshll.u32 %v17018_v15, 16  ;;  %v7896_v20 = vld [vmem:[#allocation3 + $0x6c] sm:$0xf] }
 0x328   : > { %v8063_v6 = vsel %vm13850_vm14, %v8058_v21, %v8062_v4  ;;  %v17136_v22 = vsel %vm14250_vm10, %v8722_v31, %v8723_v25  ;;  %v12335_v49 = vrot.slane %v8607_v43, 9  ;;  %v19095_v45 = vcombine.low %v16890_v7, %v16907_v18  ;;  %v17157_v4 = vld [vmem:[#allocation3 + $0x88] sm:$0xf] }
 0x329   : > { %v17143_v63 = vcombine.low %v8053_v19, %v8063_v6  ;;  %v12351_v54 = vcombine.low %v17120_v13, %v17136_v22  ;;  %v8071_v0 = vor.u32 %v8070_v32, %v8067_v56  ;;  %v8081_v33 = vor.u32 %v8080_v57, %v8076_v53  ;;  %v8609_v32 = vld [vmem:[#allocation3 + $0x90] sm:$0xe]  ;;  %v17237_v13 = vld [vmem:[#allocation3 + $0xa0] sm:$0xf] }
 0x32a   : > { %13241 = vmatmul.mubr.msk.bf16.gmra.mxu1 %vm6554_vm6, %v19095_v45  ;;  %v8086_v11 = vrot.slane %v8084_v23, 5  ;;  %v8727_v9 = vrot.slane %v17122_v50, 5  ;;  %v8730_v15 = vrot.slane %v17130_v8, 5  ;;  %v8089_v35 = vshrl.u32 %v7893_v41, 16 }
 0x32b   : > { %13280 = vmatprep.mubr.msk.bf16.mxu1 %vm6554_vm6, %v16967_v59  ;;  %v8072_v61 = vrot.slane %v8071_v0, 4  ;;  %v8082_v7 = vrot.slane %v8081_v33, 4  ;;  %v8092_v18 = vshll.u32 %v7893_v41, 16  ;;  %v8098_v24 = vshll.u32 %v17043_v17, 16  ;;  %v17207_v33 = vld [vmem:[#allocation3 + $0x94] sm:$0xf] }
 0x32c   : > { %v17154_v34 = vsel %vm14250_vm10, %v12335_v49, %v8727_v9  ;;  %v8729_v51 = vrot.slane %v8727_v9, 4  ;;  %v8091_v38 = vrot.slane %v8089_v35, 4  ;;  %v8102_v59 = vshrl.u32 %v17043_v17, 16 }
 0x32d   : > { %v8077_v1 = vsel %vm13850_vm14, %v8072_v61, %v8076_v53  ;;  %v8087_v10 = vsel %vm13850_vm14, %v8082_v7, %v8086_v11  ;;  %v8094_v40 = vrot.slane %v8092_v18, 5  ;;  %v8100_v25 = vrot.slane %v8098_v24, 5 }
 0x32e   : > { %13323 = vmatmul.mubr.msk.bf16.gmra.mxu0 %vm6554_vm6, %v12348_v39  ;;  %v17169_v44 = vcombine.low %v8077_v1, %v8087_v10  ;;  %v17173_v17 = vsel %vm14250_vm10, %v8729_v51, %v8730_v15  ;;  %v8104_v52 = vrot.slane %v8102_v59, 4  ;;  %v8108_v28 = vshll.u32 %v17058_v55, 16  ;;  %v17187_v55 = vld [vmem:[%s18857_s3 + $0x20] sm:$0xf] }
 0x32f   : > { %13326 = vmatprep.mubr.msk.bf16.mxu0 %vm6554_vm6, %v12349_v42  ;;  %v12352_v43 = vcombine.low %v17154_v34, %v17173_v17  ;;  %v8095_v30 = vor.u32 %v8094_v40, %v8091_v38  ;;  %v12336_v2 = vrot.slane %v8608_v46, 9  ;;  %v8734_v39 = vrot.slane %v17157_v4, 5 }
 0x330   : > { %v8105_v41 = vor.u32 %v8104_v52, %v8100_v25  ;;  %v8110_v21 = vrot.slane %v8108_v28, 5  ;;  %v8737_v31 = vrot.slane %v17163_v36, 5  ;;  %v8113_v56 = vshrl.u32 %v7896_v20, 16 }
 0x331   : > { %v8096_v26 = vrot.slane %v8095_v30, 4  ;;  %v17193_v5 = vsel %vm14250_vm10, %v12336_v2, %v8734_v39  ;;  %v8736_v42 = vrot.slane %v8734_v39, 4  ;;  %v8116_v19 = vshll.u32 %v7896_v20, 16  ;;  %v17243_v30 = vld [vmem:[#allocation3 + $0xa4] sm:$0x1] }
 0x332   : > { %13281 = vmatmul.mubr.msk.bf16.vlgmr.msra.gmra.mxu1 %vm6554_vm6, %v17000_v47  ;;  %v8106_v53 = vrot.slane %v8105_v41, 4  ;;  %v8115_v57 = vrot.slane %v8113_v56, 4  ;;  %v8122_v6 = vshll.u32 %v17096_v12, 16  ;;  %v8126_v23 = vshrl.u32 %v17096_v12, 16  ;;  %v7899_v47 = vld [vmem:[#allocation3 + $0x78] sm:$0xf] }
 0x333   : > { %13347 = vmatpush3.bf16.msra.mxu1 %v16971_v16  ;;  %13284 = vmatprep.mubr.msk.bf16.mxu1 %vm6554_vm6, %v17032_v37  ;;  %v8101_v49 = vsel %vm13850_vm14, %v8096_v26, %v8100_v25  ;;  %v17204_v45 = vsel %vm14250_vm10, %v8736_v42, %v8737_v31  ;;  %v8118_v0 = vrot.slane %v8116_v19, 5  ;;  %v8132_v16 = vshll.u32 %v17098_v14, 16  ;;  %v17209_v37 = vld [vmem:[#allocation3 + $0x98] sm:$0x1] }
 0x334   : > { %13465 = vmatprep.subr.msk.bf16.mxu1 %vm6603_vm0, %v17187_v55  ;;  %v8111_v12 = vsel %vm13850_vm14, %v8106_v53, %v8110_v21  ;;  %v12353_v11 = vcombine.low %v17193_v5, %v17204_v45  ;;  %v8124_v9 = vrot.slane %v8122_v6, 5  ;;  %v8128_v15 = vrot.slane %v8126_v23, 4  ;;  %v8611_v23 = vld [vmem:[#allocation3 + $0xa8] sm:$0xe] }
 0x335   : > { %v17217_v35 = vcombine.low %v8101_v49, %v8111_v12  ;;  %v8119_v61 = vor.u32 %v8118_v0, %v8115_v57  ;;  %v8134_v7 = vrot.slane %v8132_v16, 5  ;;  %v12337_v14 = vrot.slane %v8609_v32, 9  ;;  %v17270_v16 = vld [vmem:[#allocation3 + $0xac] sm:$0xf] }
 0x336   : > { %13327 = vmatmul.mubr.msk.bf16.gmra.mxu0 %vm6554_vm6, %v12350_v27  ;;  %v8129_v18 = vor.u32 %v8128_v15, %v8124_v9  ;;  %v8741_v24 = vrot.slane %v17207_v33, 5  ;;  %v8744_v46 = vrot.slane %v17209_v37, 5  ;;  %v8137_v51 = vshrl.u32 %v7899_v47, 16  ;;  %v17231_v27 = vpop.f32.mrf.mxu0  ;;  %v7905_v15 = vld [vmem:[#allocation3 + $0x90] sm:$0xf] }
 0x337   : > { %13330 = vmatprep.mubr.msk.bf16.mxu0 %vm6554_vm6, %v12351_v54  ;;  %v8120_v38 = vrot.slane %v8119_v61, 4  ;;  %v8140_v59 = vshll.u32 %v7899_v47, 16  ;;  %v8146_v1 = vshll.u32 %v17122_v50, 16  ;;  %v8150_v10 = vshrl.u32 %v17122_v50, 16 }
 0x338   : > { %v8130_v40 = vrot.slane %v8129_v18, 4  ;;  %v17235_v25 = vsel %vm14250_vm10, %v12337_v14, %v8741_v24  ;;  %v8743_v20 = vrot.slane %v8741_v24, 4  ;;  %v8139_v52 = vrot.slane %v8137_v51, 4  ;;  %v17258_v5 = vpop.f32.mrf.mxu0 }
 0x339   : > { %v8125_v22 = vsel %vm13850_vm14, %v8120_v38, %v8124_v9  ;;  %v8142_v50 = vrot.slane %v8140_v59, 5  ;;  %v8148_v54 = vrot.slane %v8146_v1, 5  ;;  %v8152_v28 = vrot.slane %v8150_v10, 4 }
 0x33a   : > { %13285 = vmatmul.mubr.msk.bf16.gmra.mxu1 %vm6554_vm6, %v17060_v62  ;;  %v8135_v2 = vsel %vm13850_vm14, %v8130_v40, %v8134_v7  ;;  %v17251_v39 = vsel %vm14250_vm10, %v8743_v20, %v8744_v46  ;;  %v8156_v62 = vshll.u32 %v17130_v8, 16  ;;  %v12338_v41 = vrot.slane %v8610_v3, 9  ;;  %v17279_v61 = vpop.f32.mrf.mxu0 }
 0x33b   : > { %13288 = vmatprep.mubr.msk.bf16.mxu1 %vm6554_vm6, %v17108_v58  ;;  %v17254_v21 = vcombine.low %v8125_v22, %v8135_v2  ;;  %v12354_v31 = vcombine.low %v17235_v25, %v17251_v39  ;;  %v8143_v56 = vor.u32 %v8142_v50, %v8139_v52  ;;  %v8153_v26 = vor.u32 %v8152_v28, %v8148_v54  ;;  %v8612_v50 = vld [vmem:[#allocation3 + $0xb4] sm:$0xe] }
 0x33c   : > { %v8158_v58 = vrot.slane %v8156_v62, 5  ;;  %v8748_v42 = vrot.slane %v17237_v13, 5  ;;  %v8751_v19 = vrot.slane %v17243_v30, 5  ;;  %v8161_v32 = vshrl.u32 %v7902_v48, 16  ;;  %v17294_v25 = vpop.f32.mrf.mxu0  ;;  %v17303_v62 = vld [vmem:[#allocation3 + $0xb8] sm:$0xf] }
 0x33d   : > { %v8144_v53 = vrot.slane %v8143_v56, 4  ;;  %v8154_v57 = vrot.slane %v8153_v26, 4  ;;  %v8164_v6 = vshll.u32 %v7902_v48, 16  ;;  %v8170_v8 = vshll.u32 %v17157_v4, 16 }
 0x33e   : > { %13331 = vmatmul.mubr.msk.bf16.gmra.mxu0 %vm6554_vm6, %v12352_v43  ;;  %v8749_v47 = vsel %vm14250_vm10, %v12338_v41, %v8748_v42  ;;  %v8750_v49 = vrot.slane %v8748_v42, 4  ;;  %v8163_v45 = vrot.slane %v8161_v32, 4  ;;  %v8174_v0 = vshrl.u32 %v17157_v4, 16  ;;  %v17277_v43 = vld [vmem:[#allocation3 + $0xb0] sm:$0x1] }
 0x33f   : > { %13334 = vmatprep.mubr.msk.bf16.mxu0 %vm6554_vm6, %v12353_v11  ;;  %v8149_v12 = vsel %vm13850_vm14, %v8144_v53, %v8148_v54  ;;  %v8159_v9 = vsel %vm13850_vm14, %v8154_v57, %v8158_v58  ;;  %v8166_v34 = vrot.slane %v8164_v6, 5  ;;  %v8172_v17 = vrot.slane %v8170_v8, 5  ;;  %v17305_v41 = vld [vmem:[#allocation3 + $0xbc] sm:$0x1]  ;;  %v17311_v57 = vpop.f32.mrf.mxu0 }
 0x340   : > { %v17281_v7 = vcombine.low %v8149_v12, %v8159_v9  ;;  %v8752_v4 = vsel %vm14250_vm10, %v8750_v49, %v8751_v19  ;;  %v8176_v14 = vrot.slane %v8174_v0, 4  ;;  %v8180_v11 = vshll.u32 %v17163_v36, 16  ;;  %v8613_v0 = vld [vmem:[#allocation3 + $0xc0] sm:$0xe]  ;;  %v7911_v12 = vld [vmem:[#allocation3 + $0xa8] sm:$0xf] }
 0x341   : > { %v12355_v18 = vcombine.low %v8749_v47, %v8752_v4  ;;  %v8167_v24 = vor.u32 %v8166_v34, %v8163_v45  ;;  %v12339_v46 = vrot.slane %v8611_v23, 9  ;;  %v8755_v51 = vrot.slane %v17270_v16, 5  ;;  %v17323_v4 = vld [vmem:[#allocation3 + $0xc4] sm:$0xf] }
 0x342   : > { %13289 = vmatmul.mubr.msk.bf16.gmra.mxu1 %vm6554_vm6, %v17143_v63  ;;  %v8177_v38 = vor.u32 %v8176_v14, %v8172_v17  ;;  %v8182_v59 = vrot.slane %v8180_v11, 5  ;;  %v8758_v1 = vrot.slane %v17277_v43, 5  ;;  %v8185_v10 = vshrl.u32 %v7905_v15, 16  ;;  %v7908_v63 = vld [vmem:[#allocation3 + $0x9c] sm:$0xf] }
 0x343   : > { %13292 = vmatprep.mubr.msk.bf16.mxu1 %vm6554_vm6, %v17169_v44  ;;  %v8168_v3 = vrot.slane %v8167_v24, 4  ;;  %v8756_v36 = vsel %vm14250_vm10, %v12339_v46, %v8755_v51  ;;  %v8757_v48 = vrot.slane %v8755_v51, 4  ;;  %v8188_v40 = vshll.u32 %v7905_v15, 16  ;;  %v17329_v24 = vpop.f32.mrf.mxu0 }
 0x344   : > { %v8178_v20 = vrot.slane %v8177_v38, 4  ;;  %v8187_v52 = vrot.slane %v8185_v10, 4  ;;  %v8194_v22 = vshll.u32 %v17207_v33, 16  ;;  %v8198_v44 = vshrl.u32 %v17207_v33, 16 }
 0x345   : > { %v8173_v54 = vsel %vm13850_vm14, %v8168_v3, %v8172_v17  ;;  %v8759_v28 = vsel %vm14250_vm10, %v8757_v48, %v8758_v1  ;;  %v8190_v2 = vrot.slane %v8188_v40, 5  ;;  %v8204_v39 = vshll.u32 %v17209_v37, 16 }
 0x346   : > { %13335 = vmatmul.mubr.msk.bf16.gmra.mxu0 %vm6554_vm6, %v12354_v31  ;;  %v8183_v56 = vsel %vm13850_vm14, %v8178_v20, %v8182_v59  ;;  %v12356_v33 = vcombine.low %v8756_v36, %v8759_v28  ;;  %v8196_v26 = vrot.slane %v8194_v22, 5  ;;  %v8200_v58 = vrot.slane %v8198_v44, 4  ;;  %v17343_v44 = vpop.f32.mrf.mxu0 }
 0x347   : > { %13338 = vmatprep.mubr.msk.bf16.mxu0 %vm6554_vm6, %v12355_v18  ;;  %v12304_v42 = vcombine.low %v8173_v54, %v8183_v56  ;;  %v8191_v19 = vor.u32 %v8190_v2, %v8187_v52  ;;  %v8206_v32 = vrot.slane %v8204_v39, 5  ;;  %v12340_v53 = vrot.slane %v8612_v50, 9  ;;  %v9427_v39 = vld [vmem:[#allocation3 + $0x18] sm:$0xf] }
 0x348   : > { %v8201_v37 = vor.u32 %v8200_v58, %v8196_v26  ;;  %v8762_v6 = vrot.slane %v17303_v62, 5  ;;  %v8765_v8 = vrot.slane %v17305_v41, 5  ;;  %v8209_v31 = vshrl.u32 %v7908_v63, 16 }
 0x349   : > { %v8192_v23 = vrot.slane %v8191_v19, 4  ;;  %v8212_v47 = vshll.u32 %v7908_v63, 16  ;;  %v8218_v49 = vshll.u32 %v17237_v13, 16  ;;  %v8222_v45 = vshrl.u32 %v17237_v13, 16  ;;  %v17327_v13 = vld [vmem:[#allocation3 + $0xc8] sm:$0x1] }
 0x34a   : > { %13293 = vmatmul.mubr.msk.bf16.gmra.mxu1 %vm6554_vm6, %v17217_v35  ;;  %v8202_v9 = vrot.slane %v8201_v37, 4  ;;  %v8763_v34 = vsel %vm14250_vm10, %v12340_v53, %v8762_v6  ;;  %v8764_v17 = vrot.slane %v8762_v6, 4  ;;  %v8211_v15 = vrot.slane %v8209_v31, 4  ;;  %v17354_v19 = vld [vmem:[#allocation3 + $0x1c] sm:$0xf] }
 0x34b   : > { %13296 = vmatprep.mubr.msk.bf16.mxu1 %vm6554_vm6, %v17254_v21  ;;  %v8197_v35 = vsel %vm13850_vm14, %v8192_v23, %v8196_v26  ;;  %v8214_v14 = vrot.slane %v8212_v47, 5  ;;  %v8220_v11 = vrot.slane %v8218_v49, 5  ;;  %v8224_v18 = vrot.slane %v8222_v45, 4  ;;  %v7914_v47 = vld [vmem:[#allocation3 + $0xb4] sm:$0xf]  ;;  %v17362_v49 = vpop.f32.mrf.mxu1  ;;  %v17364_v45 = vpop.f32.mrf.mxu0 }
 0x34c   : > { %v8207_v21 = vsel %vm13850_vm14, %v8202_v9, %v8206_v32  ;;  %v8766_v46 = vsel %vm14250_vm10, %v8764_v17, %v8765_v8  ;;  %v8228_v51 = vshll.u32 %v17243_v30, 16  ;;  %v12341_v38 = vrot.slane %v8613_v0, 9  ;;  %19096 = vst [vmem:[#allocation13_spill] sm:$0xff] %v17364_v45  ;;  %v13593_v45 = vld [vmem:[#allocation3 + $0x54] sm:$0xff]  }
 0x34d   : > { %v17336_v59 = vcombine.low %v8197_v35, %v8207_v21  ;;  %v12357_v1 = vcombine.low %v8763_v34, %v8766_v46  ;;  %v8215_v10 = vor.u32 %v8214_v14, %v8211_v15  ;;  %v8225_v3 = vor.u32 %v8224_v18, %v8220_v11 }
 0x34e   : > { %13339 = vmatmul.mubr.msk.bf16.gmra.mxu0 %vm6554_vm6, %v12356_v33  ;;  %v8230_v36 = vrot.slane %v8228_v51, 5  ;;  %v8769_v48 = vrot.slane %v17323_v4, 5  ;;  %v8772_v40 = vrot.slane %v17327_v13, 5  ;;  %v8233_v63 = vshrl.u32 %v7911_v12, 16 }
 0x34f   : > { %13342 = vmatprep.mubr.msk.bf16.mxu0 %vm6554_vm6, %v12357_v1  ;;  %v8216_v20 = vrot.slane %v8215_v10, 4  ;;  %v8226_v52 = vrot.slane %v8225_v3, 4  ;;  %v8236_v22 = vshll.u32 %v7911_v12, 16  ;;  %v8242_v30 = vshll.u32 %v17270_v16, 16  ;;  %v17372_v1 = vpop.f32.mrf.mxu1 }
 0x350   : > { %v8770_v50 = vsel %vm14250_vm10, %v12341_v38, %v8769_v48  ;;  %v8771_v54 = vrot.slane %v8769_v48, 4  ;;  %v8235_v28 = vrot.slane %v8233_v63, 4  ;;  %v8246_v2 = vshrl.u32 %v17270_v16, 16  ;;  %v9430_v63 = vld [vmem:[#allocation3 + $0x24] sm:$0xf] }
 0x351   : > { %v8221_v56 = vsel %vm13850_vm14, %v8216_v20, %v8220_v11  ;;  %v8231_v33 = vsel %vm13850_vm14, %v8226_v52, %v8230_v36  ;;  %v8238_v26 = vrot.slane %v8236_v22, 5  ;;  %v8244_v58 = vrot.slane %v8242_v30, 5 }
 0x352   : > { %13297 = vmatmul.mubr.msk.bf16.gmra.mxu1 %vm6554_vm6, %v17281_v7  ;;  %v12306_v32 = vcombine.low %v8221_v56, %v8231_v33  ;;  %v8773_v16 = vsel %vm14250_vm10, %v8771_v54, %v8772_v40  ;;  %v8248_v53 = vrot.slane %v8246_v2, 4  ;;  %v8252_v37 = vshll.u32 %v17277_v43, 16  ;;  %v17360_v7 = vld [vmem:[#allocation3 + $0x20] sm:$0x1]  ;;  %v17374_v10 = vpop.f32.mrf.mxu0 }
 0x353   : > { %13300 = vmatprep.mubr.msk.bf16.mxu1 %vm6554_vm6, %v12304_v42  ;;  %v12358_v6 = vcombine.low %v8770_v50, %v8773_v16  ;;  %v8239_v8 = vor.u32 %v8238_v26, %v8235_v28  ;;  %v9476_v31 = vshrl.u32 %v9427_v39, 16  ;;  %v9479_v23 = vshll.u32 %v9427_v39, 16  ;;  %v17382_v50 = vld [vmem:[#allocation3 + $0x28] sm:$0xf]  ;;  %v13630_v39 = vld [vmem:[%s18857_s3 + $0x1c] sm:$0xf] }
 0x354   : > { %v8249_v0 = vor.u32 %v8248_v53, %v8244_v58  ;;  %v8254_v42 = vrot.slane %v8252_v37, 5  ;;  %v9485_v12 = vshll.u32 %v17354_v19, 16  ;;  %v9489_v9 = vshrl.u32 %v17354_v19, 16  ;;  %v17396_v16 = vpop.f32.mrf.mxu0 }
 0x355   : > { %v8240_v34 = vrot.slane %v8239_v8, 4  ;;  %v9478_v17 = vrot.slane %v9476_v31, 4  ;;  %v9481_v43 = vrot.slane %v9479_v23, 5  ;;  %v9495_v15 = vshll.u32 %v17360_v7, 16  ;;  %v7917_v8 = vld [vmem:[#allocation3 + $0xc0] sm:$0xf] }
 0x356   : > { %13343 = vmatmul.mubr.msk.bf16.gmra.mxu0 %vm6554_vm6, %v12358_v6  ;;  %v8250_v35 = vrot.slane %v8249_v0, 4  ;;  %v9487_v14 = vrot.slane %v9485_v12, 5  ;;  %v9491_v11 = vrot.slane %v9489_v9, 4  ;;  %v8257_v18 = vshrl.u32 %v7914_v47, 16 }
 0x357   : > { %v8245_v21 = vsel %vm13850_vm14, %v8240_v34, %v8244_v58  ;;  %v9482_v46 = vor.u32 %v9481_v43, %v9478_v17  ;;  %v9497_v51 = vrot.slane %v9495_v15, 5  ;;  %v8260_v38 = vshll.u32 %v7914_v47, 16 }
 0x358   : > { %v8255_v3 = vsel %vm13850_vm14, %v8250_v35, %v8254_v42  ;;  %v9492_v36 = vor.u32 %v9491_v11, %v9487_v14  ;;  %v8259_v48 = vrot.slane %v8257_v18, 4  ;;  %v8266_v40 = vshll.u32 %v17303_v62, 16  ;;  %v17408_v11 = vpop.f32.mrf.mxu0 }
 0x359   : > { %v12307_v20 = vcombine.low %v8245_v21, %v8255_v3  ;;  %v9483_v52 = vrot.slane %v9482_v46, 4  ;;  %v8262_v22 = vrot.slane %v8260_v38, 5  ;;  %v8270_v30 = vshrl.u32 %v17303_v62, 16  ;;  %v17392_v62 = vld [vmem:[#allocation3 + $0x2c] sm:$0x1] }
 0x35a   : > { %13301 = vmatmul.mubr.msk.bf16.gmra.mxu1 %vm6554_vm6, %v17336_v59  ;;  %v9493_v54 = vrot.slane %v9492_v36, 4  ;;  %v8268_v28 = vrot.slane %v8266_v40, 5  ;;  %v8276_v2 = vshll.u32 %v17305_v41, 16  ;;  %v9958_v56 = vsel %vm6603_vm0, %v13630_v39, 0  ;;  %v9433_v38 = vld [vmem:[#allocation3 + $0x30] sm:$0xf] }
 0x35b   : > { %13304 = vmatprep.mubr.msk.bf16.mxu1 %vm6554_vm6, %v12306_v32  ;;  %v9488_v59 = vsel %vm13850_vm14, %v9483_v52, %v9487_v14  ;;  %v8263_v33 = vor.u32 %v8262_v22, %v8259_v48  ;;  %v8272_v26 = vrot.slane %v8270_v30, 4  ;;  %13381 = vmatpush3.bf16.msra.mxu0 %v9958_v56  ;;  %v9500_v58 = vshrl.u32 %v9430_v63, 16  ;;  %v17394_v32 = vpop.f32.mrf.mxu1 }
 0x35c   : > { %v9498_v41 = vsel %vm13850_vm14, %v9493_v54, %v9497_v51  ;;  %v8278_v53 = vrot.slane %v8276_v2, 5  ;;  %v9503_v37 = vshll.u32 %v9430_v63, 16  ;;  %v9509_v6 = vshll.u32 %v17382_v50, 16  ;;  %v17415_v63 = vld [vmem:[#allocation3 + $0x34] sm:$0xf] }
 0x35d   : > { %v12409_v31 = vcombine.low %v9488_v59, %v9498_v41  ;;  %v8264_v23 = vrot.slane %v8263_v33, 4  ;;  %v8273_v47 = vor.u32 %v8272_v26, %v8268_v28  ;;  %v9502_v0 = vrot.slane %v9500_v58, 4  ;;  %v17406_v14 = vpop.f32.mrf.mxu1  ;;  %v17425_v26 = vld [vmem:[#allocation3 + $0x38] sm:$0x1] }
 0x35e   : > { %v9505_v42 = vrot.slane %v9503_v37, 5  ;;  %v9511_v12 = vrot.slane %v9509_v6, 5  ;;  %v9513_v9 = vshrl.u32 %v17382_v50, 16  ;;  %v9519_v34 = vshll.u32 %v17392_v62, 16 }
 0x35f   : > { %13382 = vmatprep.mubr.msk.bf16.mxu0 %vm6554_vm6, %v12409_v31  ;;  %v8269_v17 = vsel %vm13850_vm14, %v8264_v23, %v8268_v28  ;;  %v8274_v43 = vrot.slane %v8273_v47, 4  ;;  %v8281_v15 = vshrl.u32 %v7917_v8, 16  ;;  %v8284_v35 = vshll.u32 %v7917_v8, 16  ;;  %v17418_v59 = vpop.f32.mrf.mxu1  ;;  %v9436_v8 = vld [vmem:[#allocation3 + $0x3c] sm:$0xf] }
 0x360   : > { %v9506_v18 = vor.u32 %v9505_v42, %v9502_v0  ;;  %v9515_v21 = vrot.slane %v9513_v9, 4  ;;  %v9521_v46 = vrot.slane %v9519_v34, 5  ;;  %v8290_v51 = vshll.u32 %v17323_v4, 16  ;;  %v17431_v42 = vld [vmem:[#allocation3 + $0x40] sm:$0xf] }
 0x361   : > { %v8279_v3 = vsel %vm13850_vm14, %v8274_v43, %v8278_v53  ;;  %v8283_v36 = vrot.slane %v8281_v15, 4  ;;  %v8286_v48 = vrot.slane %v8284_v35, 5  ;;  %v8294_v40 = vshrl.u32 %v17323_v4, 16  ;;  %v17436_v43 = vpop.f32.mrf.mxu1 }
 0x362   : > { %13305 = vmatmul.mubr.msk.bf16.gmra.mxu1 %vm6554_vm6, %v12307_v20  ;;  %v12308_v52 = vcombine.low %v8269_v17, %v8279_v3  ;;  %v9507_v22 = vrot.slane %v9506_v18, 4  ;;  %v9516_v30 = vor.u32 %v9515_v21, %v9511_v12  ;;  %v8292_v54 = vrot.slane %v8290_v51, 5  ;;  %v17420_v20 = vpop.f32.mrf.mxu0  ;;  %v17440_v21 = vld [vmem:[#allocation3 + $0x44] sm:$0x1] }
 0x363   : > { %v8287_v28 = vor.u32 %v8286_v48, %v8283_v36  ;;  %v8296_v2 = vrot.slane %v8294_v40, 4  ;;  %v8300_v39 = vshll.u32 %v17327_v13, 16  ;;  %v9524_v56 = vshrl.u32 %v9433_v38, 16  ;;  %v9439_v40 = vld [vmem:[#allocation3 + $0x48] sm:$0xf] }
 0x364   : > { %13308 = vmatprep.mubr.msk.bf16.mxu1 %vm6554_vm6, %v12308_v52  ;;  %v9512_v4 = vsel %vm13850_vm14, %v9507_v22, %v9511_v12  ;;  %v9517_v33 = vrot.slane %v9516_v30, 4  ;;  %v9527_v58 = vshll.u32 %v9433_v38, 16  ;;  %v9533_v41 = vshll.u32 %v17415_v63, 16 }
 0x365   : > { %v8288_v53 = vrot.slane %v8287_v28, 4  ;;  %v8297_v37 = vor.u32 %v8296_v2, %v8292_v54  ;;  %v8302_v6 = vrot.slane %v8300_v39, 5  ;;  %v9526_v13 = vrot.slane %v9524_v56, 4 }
 0x366   : > { %v9522_v31 = vsel %vm13850_vm14, %v9517_v33, %v9521_v46  ;;  %v9529_v23 = vrot.slane %v9527_v58, 5  ;;  %v9535_v47 = vrot.slane %v9533_v41, 5  ;;  %v9537_v0 = vshrl.u32 %v17415_v63, 16  ;;  %v17438_v15 = vpop.f32.mrf.mxu0  ;;  %v17448_v33 = vld [vmem:[#allocation3 + $0x4c] sm:$0xf]  ;;  %v17450_v58 = vpop.f32.mrf.mxu1 }
 0x367   : > { %v12410_v12 = vcombine.low %v9512_v4, %v9522_v31  ;;  %v8293_v9 = vsel %vm13850_vm14, %v8288_v53, %v8292_v54  ;;  %v8298_v34 = vrot.slane %v8297_v37, 4  ;;  %v9543_v17 = vshll.u32 %v17425_v26, 16  ;;  %v13588_v54 = vld [vmem:[#allocation3 + $0x18] sm:$0xff]  }
 0x368   : > { %v9530_v35 = vor.u32 %v9529_v23, %v9526_v13  ;;  %v9539_v18 = vrot.slane %v9537_v0, 4  ;;  %v9548_v46 = vshrl.u32 %v9436_v8, 16  ;;  %v9551_v51 = vshll.u32 %v9436_v8, 16  ;;  %v17452_v41 = vpop.f32.mrf.mxu0  ;;  %v17462_v0 = vld [vmem:[#allocation3 + $0x50] sm:$0x1] }
 0x369   : > { %13383 = vmatmul.mubr.msk.bf16.vlgmr.msra.gmra.mxu0 %vm6554_vm6, %v12410_v12  ;;  %v8303_v38 = vsel %vm13850_vm14, %v8298_v34, %v8302_v6  ;;  %v9545_v3 = vrot.slane %v9543_v17, 5  ;;  %v9557_v36 = vshll.u32 %v17431_v42, 16  ;;  %v9561_v48 = vshrl.u32 %v17431_v42, 16 }
 0x36a   : > { %v12309_v52 = vcombine.low %v8293_v9, %v8303_v38  ;;  %v9531_v22 = vrot.slane %v9530_v35, 4  ;;  %v9540_v30 = vor.u32 %v9539_v18, %v9535_v47  ;;  %v9550_v28 = vrot.slane %v9548_v46, 4  ;;  %v17468_v46 = vpop.f32.mrf.mxu1 }
 0x36b   : > { %v9553_v2 = vrot.slane %v9551_v51, 5  ;;  %v9559_v39 = vrot.slane %v9557_v36, 5  ;;  %v9563_v56 = vrot.slane %v9561_v48, 4  ;;  %v9567_v4 = vshll.u32 %v17440_v21, 16  ;;  %19097 = vst [vmem:[#allocation12_spill] sm:$0xff] %v17468_v46  ;;  %v17470_v51 = vpop.f32.mrf.mxu0 }
 0x36c   : > { %13309 = vmatmul.mubr.msk.bf16.gmra.mxu1 %vm6554_vm6, %v12309_v52  ;;  %v9536_v53 = vsel %vm13850_vm14, %v9531_v22, %v9535_v47  ;;  %v9541_v37 = vrot.slane %v9540_v30, 4  ;;  %v17459_v6 = vadd.f32 %v17231_v27, %v17362_v49  ;;  %v9572_v13 = vshrl.u32 %v9439_v40, 16 }
 0x36d   : > { %13348 = vmatprep.mubr.msk.bf16.mxu1 %vm6554_vm6, %v13588_v54  ;;  %v9554_v8 = vor.u32 %v9553_v2, %v9550_v28  ;;  %v9564_v31 = vor.u32 %v9563_v56, %v9559_v39  ;;  %v9569_v23 = vrot.slane %v9567_v4, 5  ;;  %v9575_v12 = vshll.u32 %v9439_v40, 16  ;;  %v9442_v40 = vld [vmem:[#allocation3 + $0x54] sm:$0xf]  ;;  %v17482_v54 = vld [vmem:[#allocation3 + $0x58] sm:$0xf] }
 0x36e   : > { %v9546_v9 = vsel %vm13850_vm14, %v9541_v37, %v9545_v3  ;;  %v9574_v34 = vrot.slane %v9572_v13, 4  ;;  %v9581_v47 = vshll.u32 %v17448_v33, 16  ;;  %v9585_v17 = vshrl.u32 %v17448_v33, 16  ;;  %v13589_v2 = vld [vmem:[#allocation3 + $0x24] sm:$0xff]   ;;  %v13590_v13 = vld [vmem:[#allocation3 + $0x30] sm:$0xff]  }
 0x36f   : > { %v12411_v35 = vcombine.low %v9536_v53, %v9546_v9  ;;  %v9555_v27 = vrot.slane %v9554_v8, 4  ;;  %v9565_v49 = vrot.slane %v9564_v31, 4  ;;  %v9577_v18 = vrot.slane %v9575_v12, 5  ;;  %v17500_v9 = vld [vmem:[#allocation3 + $0x64] sm:$0xf] }
 0x370   : > { %v9583_v38 = vrot.slane %v9581_v47, 5  ;;  %v9587_v36 = vrot.slane %v9585_v17, 4  ;;  %v9591_v48 = vshll.u32 %v17462_v0, 16  ;;  %v17480_v30 = vadd.f32 %v17258_v5, %v17372_v1  ;;  %v9445_v5 = vld [vmem:[#allocation3 + $0x60] sm:$0xf] }
 0x371   : > { %13386 = vmatprep.mubr.msk.bf16.mxu0 %vm6554_vm6, %v12411_v35  ;;  %v9560_v3 = vsel %vm13850_vm14, %v9555_v27, %v9559_v39  ;;  %v9570_v52 = vsel %vm13850_vm14, %v9565_v49, %v9569_v23  ;;  %v9578_v22 = vor.u32 %v9577_v18, %v9574_v34  ;;  %v10428_v4 = vsel %vm6603_vm0, %v17187_v55, 0  ;;  %v17490_v39 = vld [vmem:[#allocation3 + $0x5c] sm:$0x1]  ;;  %v17494_v23 = vpop.f32.mrf.mxu0  ;;  %v17508_v27 = vld [vmem:[#allocation3 + $0x68] sm:$0x1] }
 0x372   : > { %v12412_v28 = vcombine.low %v9560_v3, %v9570_v52  ;;  %v9588_v56 = vor.u32 %v9587_v36, %v9583_v38  ;;  %v17488_v53 = vadd.f32 %v17279_v61, %v17394_v32  ;;  %v9596_v8 = vshrl.u32 %v9442_v40, 16  ;;  %v17492_v1 = vpop.f32.mrf.mxu1 }
 0x373   : > { %v9579_v37 = vrot.slane %v9578_v22, 4  ;;  %v9599_v31 = vshll.u32 %v9442_v40, 16  ;;  %v9593_v12 = vrot.slane %v9591_v48, 5  ;;  %v9605_v61 = vshll.u32 %v17482_v54, 16 }
 0x374   : > { %13387 = vmatmul.mubr.msk.bf16.gmra.mxu0 %vm6554_vm6, %v12412_v28  ;;  %13349 = vmatmul.mubr.msk.bf16.vlgmr.msra.gmra.mxu1 %vm6554_vm6, %v13589_v2  ;;  %v9589_v55 = vrot.slane %v9588_v56, 4  ;;  %v9609_v32 = vshrl.u32 %v17482_v54, 16  ;;  %v9598_v34 = vrot.slane %v9596_v8, 4  ;;  %v9615_v17 = vshll.u32 %v17490_v39, 16  ;;  %v17514_v28 = vpop.f32.mrf.mxu1 }
 0x375   : > { %13415 = vmatpush3.bf16.msra.mxu1 %v10428_v4  ;;  %13352 = vmatprep.mubr.msk.bf16.mxu1 %vm6554_vm6, %v13590_v13  ;;  %v9601_v47 = vrot.slane %v9599_v31, 5  ;;  %v17506_v35 = vadd.f32 %v17311_v57, %v17418_v59  ;;  %v9584_v49 = vsel %vm13850_vm14, %v9579_v37, %v9583_v38  ;;  %v9607_v36 = vrot.slane %v9605_v61, 5  ;;  %v13591_v37 = vld [vmem:[#allocation3 + $0x3c] sm:$0xff]  }
 0x376   : > { %v9594_v18 = vsel %vm13850_vm14, %v9589_v55, %v9593_v12  ;;  %v9611_v48 = vrot.slane %v9609_v32, 4  ;;  %v9620_v52 = vshrl.u32 %v9445_v5, 16  ;;  %v9623_v22 = vshll.u32 %v9445_v5, 16  ;;  %v9448_v5 = vld [vmem:[#allocation3 + $0x6c] sm:$0xf] }
 0x377   : > { %19098 = vst [vmem:[#allocation21_spill] sm:$0xff] %v17506_v35  ;;  %v12413_v40 = vcombine.low %v9584_v49, %v9594_v18  ;;  %v9602_v3 = vor.u32 %v9601_v47, %v9598_v34  ;;  %v17516_v2 = vpop.f32.mrf.mxu0  ;;  %v9629_v59 = vshll.u32 %v17500_v9, 16  ;;  %v9633_v56 = vshrl.u32 %v17500_v9, 16  ;;  %v17528_v47 = vld [vmem:[#allocation3 + $0x70] sm:$0xf] }
 0x378   : > { %v9612_v57 = vor.u32 %v9611_v48, %v9607_v36  ;;  %v9639_v38 = vshll.u32 %v17508_v27, 16  ;;  %v9622_v13 = vrot.slane %v9620_v52, 4  ;;  %v9625_v8 = vrot.slane %v9623_v22, 5 }
 0x379   : > { %13390 = vmatprep.mubr.msk.bf16.mxu0 %vm6554_vm6, %v12413_v40  ;;  %v9603_v4 = vrot.slane %v9602_v3, 4  ;;  %v17524_v31 = vadd.f32 %v17329_v24, %v17436_v43  ;;  %v17526_v55 = vpop.f32.mrf.mxu0  ;;  %v9617_v61 = vrot.slane %v9615_v17, 5  ;;  %v9631_v32 = vrot.slane %v9629_v59, 5  ;;  %v13592_v40 = vld [vmem:[#allocation3 + $0x48] sm:$0xff]   ;;  %v17536_v24 = vld [vmem:[#allocation3 + $0x74] sm:$0x1]  ;;  %v13155_v43 = vpop.f32.mrf.mxu1 }
 0x37a   : > { %v9613_v12 = vrot.slane %v9612_v57, 4  ;;  %v9635_v34 = vrot.slane %v9633_v56, 4  ;;  %v9626_v18 = vor.u32 %v9625_v8, %v9622_v13  ;;  %v9641_v48 = vrot.slane %v9639_v38, 5 }
 0x37b   : > { %19099 = vst [vmem:[#allocation18_spill] sm:$0xff] %v17524_v31  ;;  %v9608_v49 = vsel %vm13850_vm14, %v9603_v4, %v9607_v36  ;;  %v17534_v3 = vadd.f32 %v17343_v44, %v17450_v58  ;;  %v9644_v22 = vshrl.u32 %v9448_v5, 16  ;;  %v9647_v57 = vshll.u32 %v9448_v5, 16  ;;  %v9451_v58 = vld [vmem:[#allocation3 + $0x78] sm:$0xf]  ;;  %v17544_v38 = vpop.f32.mrf.mxu0 }
 0x37c   : > { %v9618_v17 = vsel %vm13850_vm14, %v9613_v12, %v9617_v61  ;;  %13353 = vmatmul.mubr.msk.bf16.gmra.mxu1 %vm6554_vm6, %v13591_v37  ;;  %v9636_v52 = vor.u32 %v9635_v34, %v9631_v32  ;;  %v9627_v36 = vrot.slane %v9626_v18, 4  ;;  %v9653_v56 = vshll.u32 %v17528_v47, 16  ;;  %v17547_v37 = vld [vmem:[#allocation3 + $0x7c] sm:$0xf]  ;;  %v17556_v18 = vld [vmem:[#allocation3 + $0x80] sm:$0x1] }
 0x37d   : > { %19100 = vst [vmem:[#allocation33_spill] sm:$0xff] %v17534_v3  ;;  %v12414_v59 = vcombine.low %v9608_v49, %v9618_v17  ;;  %13356 = vmatprep.mubr.msk.bf16.mxu1 %vm6554_vm6, %v13592_v40  ;;  %v9657_v44 = vshrl.u32 %v17528_v47, 16  ;;  %v9646_v13 = vrot.slane %v9644_v22, 4  ;;  %v9649_v8 = vrot.slane %v9647_v57, 5  ;;  %v6676_v40 = vpop.f32.mrf.mxu1 }
 0x37e   : > { %v9637_v4 = vrot.slane %v9636_v52, 4  ;;  %v9663_v12 = vshll.u32 %v17536_v24, 16  ;;  %v9632_v5 = vsel %vm13850_vm14, %v9627_v36, %v9631_v32  ;;  %v9655_v61 = vrot.slane %v9653_v56, 5  ;;  %v17561_v36 = vpop.f32.mrf.mxu0 }
 0x37f   : > { %13391 = vmatmul.mubr.msk.bf16.gmra.mxu0 %vm6554_vm6, %v12414_v59  ;;  %v9659_v34 = vrot.slane %v9657_v44, 4  ;;  %v17554_v49 = vadd.f32 %v17374_v10, %v17492_v1  ;;  %v9650_v52 = vor.u32 %v9649_v8, %v9646_v13  ;;  %v9668_v57 = vshrl.u32 %v9451_v58, 16  ;;  %v13594_v8 = vld [vmem:[#allocation3 + $0x60] sm:$0xff]  }
 0x380   : > { %v9642_v17 = vsel %vm13850_vm14, %v9637_v4, %v9641_v48  ;;  %v9665_v22 = vrot.slane %v9663_v12, 5  ;;  %v9671_v46 = vshll.u32 %v9451_v58, 16  ;;  %v9677_v32 = vshll.u32 %v17547_v37, 16  ;;  %v17570_v12 = vld [vmem:[#allocation3 + $0x88] sm:$0xf] }
 0x381   : > { %19101 = vst [vmem:[#allocation27_spill] sm:$0xff] %v17554_v49  ;;  %v12415_v3 = vcombine.low %v9632_v5, %v9642_v17  ;;  %v9660_v59 = vor.u32 %v9659_v34, %v9655_v61  ;;  %v9651_v56 = vrot.slane %v9650_v52, 4  ;;  %v9670_v10 = vrot.slane %v9668_v57, 4  ;;  %v9454_v49 = vld [vmem:[#allocation3 + $0x84] sm:$0xf]  ;;  %19103 = vst [vmem:[#allocation38_spill] sm:$0xff] %v17570_v12 }
 0x382   : > { %v9681_v1 = vshrl.u32 %v17547_v37, 16  ;;  %v9687_v44 = vshll.u32 %v17556_v18, 16  ;;  %v9673_v4 = vrot.slane %v9671_v46, 5  ;;  %v9679_v13 = vrot.slane %v9677_v32, 5  ;;  %v17578_v46 = vld [vmem:[#allocation3 + $0x8c] sm:$0x1] }
 0x383   : > { %13394 = vmatprep.mubr.msk.bf16.mxu0 %vm6554_vm6, %v12415_v3  ;;  %v9661_v48 = vrot.slane %v9660_v59, 4  ;;  %v17568_v58 = vadd.f32 %v17396_v16, %v17514_v28  ;;  %v13158_v5 = vpop.f32.mrf.mxu1  ;;  %v9656_v34 = vsel %vm13850_vm14, %v9651_v56, %v9655_v61  ;;  %v17576_v3 = vadd.f32 %v17408_v11, %v13155_v43  ;;  %19105 = vst [vmem:[#allocation36_spill] sm:$0xff] %v17578_v46  ;;  %v9457_v43 = vld [vmem:[#allocation3 + $0x90] sm:$0xf] }
 0x384   : > { %13357 = vmatmul.mubr.msk.bf16.gmra.mxu1 %vm6554_vm6, %v13593_v45  ;;  %v9683_v17 = vrot.slane %v9681_v1, 4  ;;  %v9689_v52 = vrot.slane %v9687_v44, 5  ;;  %v9674_v16 = vor.u32 %v9673_v4, %v9670_v10  ;;  %v17584_v28 = vadd.f32 %v17420_v20, %v6676_v40  ;;  %v17586_v32 = vpop.f32.mrf.mxu0 }
 0x385   : > { %19102 = vst [vmem:[#allocation43_spill] sm:$0xff] %v17568_v58  ;;  %19104 = vst [vmem:[#allocation44_spill] sm:$0xff] %v17576_v3  ;;  %v9666_v57 = vsel %vm13850_vm14, %v9661_v48, %v9665_v22  ;;  %13360 = vmatprep.mubr.msk.bf16.mxu1 %vm6554_vm6, %v13594_v8  ;;  %v9692_v59 = vshrl.u32 %v9454_v49, 16  ;;  %v6689_v61 = vpop.f32.mrf.mxu1  ;;  %v9695_v1 = vshll.u32 %v9454_v49, 16  ;;  %v9701_v11 = vshll.u32 %v17570_v12, 16 }
 0x386   : > { %19106 = vst [vmem:[#allocation14_spill] sm:$0xff] %v17584_v28  ;;  %v12416_v45 = vcombine.low %v9656_v34, %v9666_v57  ;;  %v9684_v56 = vor.u32 %v9683_v17, %v9679_v13  ;;  %v9675_v44 = vrot.slane %v9674_v16, 4  ;;  %v9705_v22 = vshrl.u32 %v17570_v12, 16  ;;  %v17591_v48 = vld [vmem:[#allocation3 + $0x94] sm:$0xf]  ;;  %v17593_v40 = vpop.f32.mrf.mxu0 }
 0x387   : > { %v9694_v3 = vrot.slane %v9692_v59, 4  ;;  %v9711_v10 = vshll.u32 %v17578_v46, 16  ;;  %19107 = vst [vmem:[#allocation24_spill] sm:$0xff] %v17591_v48  ;;  %v13159_v20 = vpop.f32.mrf.mxu1  ;;  %v9697_v8 = vrot.slane %v9695_v1, 5  ;;  %v9703_v34 = vrot.slane %v9701_v11, 5 }
 0x388   : > { %13395 = vmatmul.mubr.msk.bf16.gmra.mxu0 %vm6554_vm6, %v12416_v45  ;;  %v9685_v4 = vrot.slane %v9684_v56, 4  ;;  %v17597_v49 = vadd.f32 %v17438_v15, %v13158_v5  ;;  %v9680_v17 = vsel %vm13850_vm14, %v9675_v44, %v9679_v13  ;;  %v9707_v57 = vrot.slane %v9705_v22, 4  ;;  %v17601_v59 = vld [vmem:[#allocation3 + $0x98] sm:$0x1]  ;;  %v17603_v58 = vpop.f32.mrf.mxu0  ;;  %v13595_v56 = vld [vmem:[#allocation3 + $0x6c] sm:$0xff]  }
 0x389   : > { %v9713_v16 = vrot.slane %v9711_v10, 5  ;;  %19109 = vst [vmem:[#allocation16_spill] sm:$0xff] %v17601_v59  ;;  %v9716_v28 = vshrl.u32 %v9457_v43, 16  ;;  %v9698_v45 = vor.u32 %v9697_v8, %v9694_v3  ;;  %v9719_v1 = vshll.u32 %v9457_v43, 16  ;;  %v13596_v44 = vld [vmem:[#allocation3 + $0x78] sm:$0xff]   ;;  %v6692_v22 = vpop.f32.mrf.mxu1 }
 0x38a   : > { %19108 = vst [vmem:[#allocation19_spill] sm:$0xff] %v17597_v49  ;;  %v9690_v46 = vsel %vm13850_vm14, %v9685_v4, %v9689_v52  ;;  %v9725_v11 = vshll.u32 %v17591_v48, 16  ;;  %v9708_v5 = vor.u32 %v9707_v57, %v9703_v34  ;;  %v9729_v13 = vshrl.u32 %v17591_v48, 16  ;;  %v17609_v10 = vpop.f32.mrf.mxu0  ;;  %v9460_v3 = vld [vmem:[#allocation3 + $0x9c] sm:$0xf] }
 0x38b   : > { %v12417_v15 = vcombine.low %v9680_v17, %v9690_v46  ;;  %v9718_v49 = vrot.slane %v9716_v28, 4  ;;  %v9699_v31 = vrot.slane %v9698_v45, 4  ;;  %v9721_v12 = vrot.slane %v9719_v1, 5  ;;  %v17621_v8 = vld [vmem:[#allocation3 + $0xa0] sm:$0xf] }
 0x38c   : > { %13361 = vmatmul.mubr.msk.bf16.gmra.mxu1 %vm6554_vm6, %v13595_v56  ;;  %v9727_v35 = vrot.slane %v9725_v11, 5  ;;  %v9735_v52 = vshll.u32 %v17601_v59, 16  ;;  %v9709_v43 = vrot.slane %v9708_v5, 4  ;;  %v9731_v46 = vrot.slane %v9729_v13, 4  ;;  %19112 = vst [vmem:[#allocation31_spill] sm:$0xff] %v17621_v8 }
 0x38d   : > { %13398 = vmatprep.mubr.msk.bf16.mxu0 %vm6554_vm6, %v12417_v15  ;;  %13364 = vmatprep.mubr.msk.bf16.mxu1 %vm6554_vm6, %v13596_v44  ;;  %v17616_v28 = vadd.f32 %v17452_v41, %v6689_v61  ;;  %v17619_v4 = vadd.f32 %v17470_v51, %v13159_v20  ;;  %v9704_v17 = vsel %vm13850_vm14, %v9699_v31, %v9703_v34  ;;  %v17628_v1 = vld [vmem:[#allocation3 + $0xa4] sm:$0x1]  ;;  %v9740_v51 = vshrl.u32 %v9460_v3, 16  ;;  %v9463_v34 = vld [vmem:[#allocation3 + $0xa8] sm:$0xf] }
 0x38e   : > { %v9722_v57 = vor.u32 %v9721_v12, %v9718_v49  ;;  %v9737_v45 = vrot.slane %v9735_v52, 5  ;;  %v17626_v56 = vadd.f32 %v17494_v23, %v6692_v22  ;;  %19114 = vst [vmem:[#allocation17_spill] sm:$0xff] %v17628_v1  ;;  %v17630_v11 = vpop.f32.mrf.mxu0  ;;  %v9714_v41 = vsel %vm13850_vm14, %v9709_v43, %v9713_v16 }
 0x38f   : > { %19110 = vst [vmem:[#allocation23_spill] sm:$0xff] %v17616_v28  ;;  %19111 = vst [vmem:[#allocation37_spill] sm:$0xff] %v17619_v4  ;;  %v9732_v61 = vor.u32 %v9731_v46, %v9727_v35  ;;  %v9743_v20 = vshll.u32 %v9460_v3, 16  ;;  %v13162_v15 = vpop.f32.mrf.mxu1  ;;  %v12418_v5 = vcombine.low %v9704_v17, %v9714_v41  ;;  %v9749_v31 = vshll.u32 %v17621_v8, 16  ;;  %v17647_v41 = vld [vmem:[#allocation3 + $0xb0] sm:$0x1] }
 0x390   : > { %19113 = vst [vmem:[#allocation26_spill] sm:$0xff] %v17626_v56  ;;  %v9723_v13 = vrot.slane %v9722_v57, 4  ;;  %v9753_v12 = vshrl.u32 %v17621_v8, 16  ;;  %v17636_v23 = vpop.f32.mrf.mxu0  ;;  %v9742_v44 = vrot.slane %v9740_v51, 4  ;;  %v9759_v52 = vshll.u32 %v17628_v1, 16  ;;  %v13597_v57 = vld [vmem:[#allocation3 + $0x84] sm:$0xff]  }
 0x391   : > { %v9733_v49 = vrot.slane %v9732_v61, 4  ;;  %v9745_v22 = vrot.slane %v9743_v20, 5  ;;  %v17639_v56 = vld [vmem:[#allocation3 + $0xac] sm:$0xf]  ;;  %v6705_v16 = vpop.f32.mrf.mxu1  ;;  %13399 = vmatmul.mubr.msk.bf16.gmra.mxu0 %vm6554_vm6, %v12418_v5  ;;  %v9751_v43 = vrot.slane %v9749_v31, 5  ;;  %v17645_v17 = vadd.f32 %v17516_v2, %v13162_v15  ;;  %19117 = vst [vmem:[#allocation34_spill] sm:$0xff] %v17647_v41 }
 0x392   : > { %19115 = vst [vmem:[#allocation20_spill] sm:$0xff] %v17639_v56  ;;  %v9728_v3 = vsel %vm13850_vm14, %v9723_v13, %v9727_v35  ;;  %v9755_v46 = vrot.slane %v9753_v12, 4  ;;  %v17649_v61 = vpop.f32.mrf.mxu0  ;;  %v9761_v4 = vrot.slane %v9759_v52, 5  ;;  %v9764_v28 = vshrl.u32 %v9463_v34, 16  ;;  %v13598_v5 = vld [vmem:[#allocation3 + $0x90] sm:$0xff]  }
 0x393   : > { %19116 = vst [vmem:[#allocation15_spill] sm:$0xff] %v17645_v17  ;;  %v9738_v51 = vsel %vm13850_vm14, %v9733_v49, %v9737_v45  ;;  %v9746_v20 = vor.u32 %v9745_v22, %v9742_v44  ;;  %v13163_v1 = vpop.f32.mrf.mxu1  ;;  %v9767_v13 = vshll.u32 %v9463_v34, 16  ;;  %v9773_v2 = vshll.u32 %v17639_v56, 16  ;;  %v9466_v44 = vld [vmem:[#allocation3 + $0xb4] sm:$0xf] }
 0x394   : > { %v12419_v8 = vcombine.low %v9728_v3, %v9738_v51  ;;  %v9756_v35 = vor.u32 %v9755_v46, %v9751_v43  ;;  %13365 = vmatmul.mubr.msk.bf16.gmra.mxu1 %vm6554_vm6, %v13597_v57  ;;  %v17655_v15 = vpop.f32.mrf.mxu0  ;;  %v9766_v12 = vrot.slane %v9764_v28, 4  ;;  %v9777_v17 = vshrl.u32 %v17639_v56, 16  ;;  %v17664_v46 = vld [vmem:[#allocation3 + $0xb8] sm:$0xf] }
 0x395   : > { %v9747_v31 = vrot.slane %v9746_v20, 4  ;;  %v9783_v45 = vshll.u32 %v17647_v41, 16  ;;  %13368 = vmatprep.mubr.msk.bf16.mxu1 %vm6554_vm6, %v13598_v5  ;;  %v6708_v49 = vpop.f32.mrf.mxu1  ;;  %v9769_v52 = vrot.slane %v9767_v13, 5  ;;  %v9775_v3 = vrot.slane %v9773_v2, 5  ;;  %19119 = vst [vmem:[#allocation42_spill] sm:$0xff] %v17664_v46 }
 0x396   : > { %13402 = vmatprep.mubr.msk.bf16.mxu0 %vm6554_vm6, %v12419_v8  ;;  %v9757_v22 = vrot.slane %v9756_v35, 4  ;;  %v17662_v34 = vadd.f32 %v17526_v55, %v6705_v16  ;;  %v17666_v57 = vpop.f32.mrf.mxu0  ;;  %v9779_v51 = vrot.slane %v9777_v17, 4  ;;  %v17671_v5 = vadd.f32 %v17544_v38, %v13163_v1  ;;  %v17673_v41 = vld [vmem:[#allocation3 + $0xbc] sm:$0x1]  ;;  %v9469_v1 = vld [vmem:[#allocation3 + $0xc0] sm:$0xf] }
 0x397   : > { %v9752_v28 = vsel %vm13850_vm14, %v9747_v31, %v9751_v43  ;;  %v9785_v20 = vrot.slane %v9783_v45, 5  ;;  %19121 = vst [vmem:[#allocation30_spill] sm:$0xff] %v17673_v41  ;;  %v9770_v35 = vor.u32 %v9769_v52, %v9766_v12  ;;  %v17678_v55 = vadd.f32 %v17561_v36, %v6708_v49  ;;  %v13599_v38 = vld [vmem:[#allocation3 + $0x9c] sm:$0xff]   ;;  %v17685_v12 = vld [vmem:[#allocation3 + $0xc4] sm:$0xf] }
 0x398   : > { %19118 = vst [vmem:[#allocation28_spill] sm:$0xff] %v17662_v34  ;;  %19120 = vst [vmem:[#allocation32_spill] sm:$0xff] %v17671_v5  ;;  %v9762_v8 = vsel %vm13850_vm14, %v9757_v22, %v9761_v4  ;;  %v9788_v16 = vshrl.u32 %v9466_v44, 16  ;;  %v17680_v13 = vpop.f32.mrf.mxu0  ;;  %v9780_v34 = vor.u32 %v9779_v51, %v9775_v3  ;;  %v9791_v43 = vshll.u32 %v9466_v44, 16 }
 0x399   : > { %19122 = vst [vmem:[#allocation22_spill] sm:$0xff] %v17678_v55  ;;  %v12420_v2 = vcombine.low %v9752_v28, %v9762_v8  ;;  %v9797_v17 = vshll.u32 %v17664_v46, 16  ;;  %v13166_v31 = vpop.f32.mrf.mxu1  ;;  %v9771_v45 = vrot.slane %v9770_v35, 4  ;;  %v9801_v56 = vshrl.u32 %v17664_v46, 16  ;;  %v13600_v28 = vld [vmem:[#allocation3 + $0xa8] sm:$0xff]  }
 0x39a   : > { %v9790_v5 = vrot.slane %v9788_v16, 4  ;;  %v9807_v4 = vshll.u32 %v17673_v41, 16  ;;  %v17687_v36 = vpop.f32.mrf.mxu0  ;;  %v9781_v49 = vrot.slane %v9780_v34, 4  ;;  %v9793_v22 = vrot.slane %v9791_v43, 5  ;;  %v17696_v55 = vld [vmem:[#allocation3 + $0xc8] sm:$0x1] }
 0x39b   : > { %13403 = vmatmul.mubr.msk.bf16.gmra.mxu0 %vm6554_vm6, %v12420_v2  ;;  %v9799_v44 = vrot.slane %v9797_v17, 5  ;;  %v17691_v52 = vadd.f32 %v17586_v32, %v13166_v31  ;;  %v6721_v51 = vpop.f32.mrf.mxu1  ;;  %v9776_v8 = vsel %vm13850_vm14, %v9771_v45, %v9775_v3  ;;  %v9803_v35 = vrot.slane %v9801_v56, 4 }
 0x39c   : > { %v9809_v16 = vrot.slane %v9807_v4, 5  ;;  %13369 = vmatmul.mubr.msk.bf16.gmra.mxu1 %vm6554_vm6, %v13599_v38  ;;  %v9812_v41 = vshrl.u32 %v9469_v1, 16  ;;  %v17698_v46 = vpop.f32.mrf.mxu0  ;;  %v9786_v34 = vsel %vm13850_vm14, %v9781_v49, %v9785_v20  ;;  %v9794_v2 = vor.u32 %v9793_v22, %v9790_v5 }
 0x39d   : > { %19123 = vst [vmem:[#allocation35_spill] sm:$0xff] %v17691_v52  ;;  %v9815_v32 = vshll.u32 %v9469_v1, 16  ;;  %v9821_v43 = vshll.u32 %v17685_v12, 16  ;;  %13372 = vmatprep.mubr.msk.bf16.mxu1 %vm6554_vm6, %v13600_v28  ;;  %v13167_v17 = vpop.f32.mrf.mxu1  ;;  %v12421_v3 = vcombine.low %v9776_v8, %v9786_v34  ;;  %v9804_v56 = vor.u32 %v9803_v35, %v9799_v44  ;;  %v10153_v28 = vld [vmem:[#allocation3 + $0x18] sm:$0xe] }
 0x39e   : > { %v9814_v31 = vrot.slane %v9812_v41, 4  ;;  %v9825_v38 = vshrl.u32 %v17685_v12, 16  ;;  %v17705_v45 = vpop.f32.mrf.mxu0  ;;  %v9795_v4 = vrot.slane %v9794_v2, 4  ;;  %v9831_v48 = vshll.u32 %v17696_v55, 16 }
 0x39f   : > { %v9817_v52 = vrot.slane %v9815_v32, 5  ;;  %v9823_v59 = vrot.slane %v9821_v43, 5  ;;  %v6724_v20 = vpop.f32.mrf.mxu1  ;;  %13406 = vmatprep.mubr.msk.bf16.mxu0 %vm6554_vm6, %v12421_v3  ;;  %v9805_v5 = vrot.slane %v9804_v56, 4  ;;  %v17710_v49 = vadd.f32 %v17593_v40, %v6721_v51  ;;  %v9472_v32 = vld [vmem:[#allocation3 + $0xcc] sm:$0xf] }
 0x3a0   : > { %v9827_v1 = vrot.slane %v9825_v38, 4  ;;  %v17713_v22 = vadd.f32 %v17603_v58, %v13167_v17  ;;  %v17715_v41 = vpop.f32.mrf.mxu0  ;;  %v9800_v8 = vsel %vm13850_vm14, %v9795_v4, %v9799_v44  ;;  %v17720_v34 = vadd.f32 %v17609_v10, %v6724_v20  ;;  %v13601_v17 = vld [vmem:[#allocation3 + $0xb4] sm:$0xff]   ;;  %v17727_v3 = vld [vmem:[#allocation3 + $0xd0] sm:$0xf] }
 0x3a1   : > { %v9818_v35 = vor.u32 %v9817_v52, %v9814_v31  ;;  %v13170_v2 = vpop.f32.mrf.mxu1  ;;  %v9810_v43 = vsel %vm13850_vm14, %v9805_v5, %v9809_v16  ;;  %v9833_v51 = vrot.slane %v9831_v48, 5  ;;  %v13602_v31 = vld [vmem:[#allocation3 + $0xc0] sm:$0xff]   ;;  %v12441_v38 = vrot.slane %v10153_v28, 9 }
 0x3a2   : > { %v9828_v40 = vor.u32 %v9827_v1, %v9823_v59  ;;  %v17725_v58 = vadd.f32 %v17630_v11, %v13170_v2  ;;  %v17729_v56 = vpop.f32.mrf.mxu0  ;;  %v12422_v44 = vcombine.low %v9800_v8, %v9810_v43  ;;  %v10219_v4 = vrot.slane %v17354_v19, 5 }
 0x3a3   : > { %v9819_v52 = vrot.slane %v9818_v35, 4  ;;  %v6737_v10 = vpop.f32.mrf.mxu1  ;;  %v9836_v11 = vshrl.u32 %v9472_v32, 16  ;;  %v9839_v16 = vshll.u32 %v9472_v32, 16  ;;  %v10222_v19 = vrot.slane %v17360_v7, 5  ;;  %v17743_v35 = vld [vmem:[#allocation3 + $0xd4] sm:$0x1] }
 0x3a4   : > { %19124 = vst [vmem:[#allocation41_spill] sm:$0xff] %v17725_v58  ;;  %v9829_v20 = vrot.slane %v9828_v40, 4  ;;  %13373 = vmatmul.mubr.msk.bf16.gmra.mxu1 %vm6554_vm6, %v13601_v17  ;;  %v17734_v48 = vadd.f32 %v17636_v23, %v6737_v10  ;;  %v17736_v5 = vpop.f32.mrf.mxu0  ;;  %13407 = vmatmul.mubr.msk.bf16.gmra.mxu0 %vm6554_vm6, %v12422_v44  ;;  %v10221_v8 = vrot.slane %v10219_v4, 4  ;;  %v9845_v23 = vshll.u32 %v17727_v3, 16  ;;  %v10154_v10 = vld [vmem:[#allocation3 + $0x24] sm:$0xe] }
 0x3a5   : > { %v9824_v1 = vsel %vm13850_vm14, %v9819_v52, %v9823_v59  ;;  %13376 = vmatprep.mubr.msk.bf16.mxu1 %vm6554_vm6, %v13602_v31  ;;  %v13171_v28 = vpop.f32.mrf.mxu1  ;;  %v9838_v43 = vrot.slane %v9836_v11, 4  ;;  %v9841_v40 = vrot.slane %v9839_v16, 5  ;;  %v9849_v31 = vshrl.u32 %v17727_v3, 16 }
 0x3a6   : > { %19125 = vst [vmem:[#allocation25_spill] sm:$0xff] %v17734_v48  ;;  %v9834_v2 = vsel %vm13850_vm14, %v9829_v20, %v9833_v51  ;;  %v17749_v32 = vadd.f32 %v17649_v61, %v13171_v28  ;;  %v17751_v17 = vpop.f32.mrf.mxu0  ;;  %v10223_v52 = vsel %vm14250_vm10, %v10221_v8, %v10222_v19  ;;  %v9847_v7 = vrot.slane %v9845_v23, 5  ;;  %v13603_v51 = vld [vmem:[#allocation3 + $0xcc] sm:$0xff]  }
 0x3a7   : > { %v12423_v59 = vcombine.low %v9824_v1, %v9834_v2  ;;  %v6740_v44 = vpop.f32.mrf.mxu1  ;;  %v10220_v61 = vsel %vm14250_vm10, %v12441_v38, %v10219_v4  ;;  %v9842_v20 = vor.u32 %v9841_v40, %v9838_v43  ;;  %v9855_v11 = vshll.u32 %v17743_v35, 16  ;;  %v10155_v23 = vld [vmem:[#allocation3 + $0x30] sm:$0xe] }
 0x3a8   : > { %19126 = vst [vmem:[#allocation29_spill] sm:$0xff] %v17749_v32  ;;  %v17757_v48 = vadd.f32 %v17655_v15, %v6740_v44  ;;  %v17762_v16 = vpop.f32.mrf.mxu0  ;;  %v17766_v1 = vadd.f32 %v17294_v25, %v17406_v14  ;;  %v12458_v8 = vcombine.low %v10220_v61, %v10223_v52  ;;  %v9851_v19 = vrot.slane %v9849_v31, 4  ;;  %v10156_v52 = vld [vmem:[#allocation3 + $0x3c] sm:$0xe]  ;;  %v19147_v32 = vld [vmem:[#allocation44_spill] sm:$0xff] }
 0x3a9   : > { %13410 = vmatprep.mubr.msk.bf16.mxu0 %vm6554_vm6, %v12423_v59  ;;  %v13174_v28 = vpop.f32.mrf.mxu1  ;;  %v10226_v15 = vrot.slane %v17382_v50, 5  ;;  %v9843_v38 = vrot.slane %v9842_v20, 4  ;;  %v12442_v4 = vrot.slane %v10154_v10, 9  ;;  %v10229_v43 = vrot.slane %v17392_v62, 5 }
 0x3aa   : > { %19127 = vst [vmem:[#allocation40_spill] sm:$0xff] %v17757_v48  ;;  %v17771_v2 = vadd.f32 %v17666_v57, %v13174_v28  ;;  %v17774_v40 = vpop.f32.mrf.mxu0  ;;  %v9852_v25 = vor.u32 %v9851_v19, %v9847_v7  ;;  %v9857_v14 = vrot.slane %v9855_v11, 5  ;;  %v10233_v59 = vrot.slane %v17415_v63, 5  ;;  %v10157_v11 = vld [vmem:[#allocation3 + $0x48] sm:$0xe] }
 0x3ab   : > { %v6753_v44 = vpop.f32.mrf.mxu1  ;;  %v10228_v48 = vrot.slane %v10226_v15, 4  ;;  %v9848_v57 = vsel %vm13850_vm14, %v9843_v38, %v9847_v7  ;;  %v10227_v62 = vsel %vm14250_vm10, %v12442_v4, %v10226_v15  ;;  %v12443_v31 = vrot.slane %v10155_v23, 9 }
 0x3ac   : > { %19128 = vst [vmem:[#allocation39_spill] sm:$0xff] %v17771_v2  ;;  %13377 = vmatmul.mubr.msk.bf16.gmra.mxu1 %vm6554_vm6, %v13603_v51  ;;  %v17779_v50 = vadd.f32 %v17680_v13, %v6753_v44  ;;  %v17785_v10 = vpop.f32.mrf.mxu0  ;;  %v9853_v61 = vrot.slane %v9852_v25, 4  ;;  %v10235_v51 = vrot.slane %v10233_v59, 4  ;;  %v10236_v13 = vrot.slane %v17425_v26, 5 }
 0x3ad   : > { %13416 = vmatprep.mubr.msk.bf16.mxu1 %vm6554_vm6, %v12458_v8  ;;  %v13175_v20 = vpop.f32.mrf.mxu1  ;;  %v10230_v63 = vsel %vm14250_vm10, %v10228_v48, %v10229_v43  ;;  %v10234_v7 = vsel %vm14250_vm10, %v12443_v31, %v10233_v59  ;;  %v12444_v15 = vrot.slane %v10156_v52, 9  ;;  %v10240_v8 = vrot.slane %v17431_v42, 5  ;;  %v10158_v42 = vld [vmem:[#allocation3 + $0x54] sm:$0xe] }
 0x3ae   : > { %19129 = vst [vmem:[#allocation45_spill] sm:$0xff] %v17779_v50  ;;  %v17792_v28 = vadd.f32 %v17687_v36, %v13175_v20  ;;  %v17796_v19 = vpop.f32.mrf.mxu0  ;;  %v9858_v23 = vsel %vm13850_vm14, %v9853_v61, %v9857_v14  ;;  %v12459_v48 = vcombine.low %v10227_v62, %v10230_v63  ;;  %v10237_v26 = vsel %vm14250_vm10, %v10235_v51, %v10236_v13  ;;  %v10159_v61 = vld [vmem:[#allocation3 + $0x60] sm:$0xe] }
 0x3af   : > { %v6756_v38 = vpop.f32.mrf.mxu1  ;;  %v10247_v4 = vrot.slane %v17448_v33, 5  ;;  %v12424_v36 = vcombine.low %v9848_v57, %v9858_v23  ;;  %v10243_v44 = vrot.slane %v17440_v21, 5  ;;  %v12445_v59 = vrot.slane %v10157_v11, 9  ;;  %v10160_v23 = vld [vmem:[#allocation3 + $0x6c] sm:$0xe] }
 0x3b0   : > { %19130 = vst [vmem:[#allocation46_spill] sm:$0xff] %v17792_v28  ;;  %v17805_v43 = vadd.f32 %v17698_v46, %v6756_v38  ;;  %v17808_v25 = vpop.f32.mrf.mxu0  ;;  %v12460_v29 = vcombine.low %v10234_v7, %v10237_v26  ;;  %v10242_v14 = vrot.slane %v10240_v8, 4  ;;  %v10250_v62 = vrot.slane %v17462_v0, 5 }
 0x3b1   : > { %v13214_v52 = vpop.f32.mrf.mxu1  ;;  %v10249_v31 = vrot.slane %v10247_v4, 4  ;;  %13411 = vmatmul.mubr.msk.bf16.gmra.mxu0 %vm6554_vm6, %v12424_v36  ;;  %v10241_v46 = vsel %vm14250_vm10, %v12444_v15, %v10240_v8  ;;  %v10248_v21 = vsel %vm14250_vm10, %v12445_v59, %v10247_v4  ;;  %v10254_v20 = vrot.slane %v17482_v54, 5 }
 0x3b2   : > { %19131 = vst [vmem:[#allocation47_spill] sm:$0xff] %v17805_v43  ;;  %v17813_v33 = vadd.f32 %v13214_v52, %v17459_v6  ;;  %v17819_v57 = vpop.f32.mrf.mxu0  ;;  %v10244_v0 = vsel %vm14250_vm10, %v10242_v14, %v10243_v44  ;;  %v12446_v13 = vrot.slane %v10158_v42, 9  ;;  %v10261_v6 = vrot.slane %v17500_v9, 5  ;;  %v10161_v44 = vld [vmem:[#allocation3 + $0x78] sm:$0xe] }
 0x3b3   : > { %v7355_v63 = vpop.f32.mrf.mxu1  ;;  %v10251_v51 = vsel %vm14250_vm10, %v10249_v31, %v10250_v62  ;;  %v12461_v7 = vcombine.low %v10241_v46, %v10244_v0  ;;  %v10257_v54 = vrot.slane %v17490_v39, 5  ;;  %v12447_v8 = vrot.slane %v10159_v61, 9 }
 0x3b4   : > { %13417 = vmatmul.mubr.msk.bf16.vlgmr.msra.gmra.mxu1 %vm6554_vm6, %v12459_v48  ;;  %v17829_v11 = vadd.f32 %v7355_v63, %v17480_v30  ;;  %v17831_v15 = vpop.f32.mrf.mxu0  ;;  %v12462_v26 = vcombine.low %v10248_v21, %v10251_v51  ;;  %v10256_v4 = vrot.slane %v10254_v20, 4  ;;  %v10263_v36 = vrot.slane %v10261_v6, 4  ;;  %v10162_v21 = vld [vmem:[#allocation3 + $0x84] sm:$0xe] }
 0x3b5   : > { %13420 = vmatprep.mubr.msk.bf16.mxu1 %vm6554_vm6, %v12460_v29  ;;  %v13215_v38 = vpop.f32.mrf.mxu1  ;;  %v10264_v9 = vrot.slane %v17508_v27, 5  ;;  %v17843_v59 = vsel %vm14250_vm10, %v12446_v13, %v10254_v20  ;;  %v17847_v39 = vsel %vm14250_vm10, %v12447_v8, %v10261_v6  ;;  %v10268_v42 = vrot.slane %v17528_v47, 5  ;;  %v19132_v13 = vld [vmem:[#allocation21_spill] sm:$0xff] }
 0x3b6   : > { %v17837_v48 = vadd.f32 %v13215_v38, %v17488_v53  ;;  %v17839_v30 = vpop.f32.mrf.mxu0  ;;  %v17852_v27 = vsel %vm14250_vm10, %v10256_v4, %v10257_v54  ;;  %v12448_v29 = vrot.slane %v10160_v23, 9  ;;  %v10275_v14 = vrot.slane %v17547_v37, 5  ;;  %v19133_v23 = vld [vmem:[#allocation38_spill] sm:$0xff] }
 0x3b7   : > { %v7358_v52 = vpop.f32.mrf.mxu1  ;;  %v17856_v53 = vsel %vm14250_vm10, %v10263_v36, %v10264_v9  ;;  %v12463_v62 = vcombine.low %v17843_v59, %v17852_v27  ;;  %v12449_v46 = vrot.slane %v10161_v44, 9  ;;  %v10270_v63 = vrot.slane %v10268_v42, 4  ;;  %v10163_v4 = vld [vmem:[#allocation3 + $0x90] sm:$0xe]  ;;  %v19134_v44 = vld [vmem:[#allocation24_spill] sm:$0xff]  ;;  %v19141_v27 = vld [vmem:[#allocation31_spill] sm:$0xff] }
 0x3b8   : > { %v17860_v31 = vadd.f32 %v7358_v52, %v17766_v1  ;;  %v17864_v61 = vpop.f32.mrf.mxu0  ;;  %v12464_v47 = vcombine.low %v17847_v39, %v17856_v53  ;;  %v10271_v0 = vrot.slane %v17536_v24, 5  ;;  %v10277_v51 = vrot.slane %v10275_v14, 4  ;;  %v19135_v39 = vld [vmem:[#allocation18_spill] sm:$0xff] }
 0x3b9   : > { %v13218_v20 = vpop.f32.mrf.mxu1  ;;  %v10278_v37 = vrot.slane %v17556_v18, 5  ;;  %v17877_v54 = vsel %vm14250_vm10, %v12448_v29, %v10268_v42  ;;  %v17881_v8 = vsel %vm14250_vm10, %v12449_v46, %v10275_v14  ;;  %v10282_v38 = vrot.slane %v19133_v23, 5  ;;  %v19136_v29 = vld [vmem:[#allocation36_spill] sm:$0xff]  ;;  %v19140_v23 = vld [vmem:[#allocation33_spill] sm:$0xff] }
 0x3ba   : > { %v17871_v1 = vadd.f32 %v13218_v20, %v19132_v13  ;;  %v17873_v6 = vpop.f32.mrf.mxu0  ;;  %v17886_v18 = vsel %vm14250_vm10, %v10270_v63, %v10271_v0  ;;  %v12450_v9 = vrot.slane %v10162_v21, 9  ;;  %v10289_v59 = vrot.slane %v19134_v44, 5  ;;  %v19137_v0 = vld [vmem:[#allocation16_spill] sm:$0xff] }
 0x3bb   : > { %v7371_v24 = vpop.f32.mrf.mxu1  ;;  %v17890_v36 = vsel %vm14250_vm10, %v10277_v51, %v10278_v37  ;;  %v10285_v14 = vrot.slane %v19136_v29, 5  ;;  %v10284_v21 = vrot.slane %v10282_v38, 4  ;;  %v12451_v20 = vrot.slane %v10163_v4, 9  ;;  %v19138_v51 = vld [vmem:[#allocation12_spill] sm:$0xff]  ;;  %v19139_v37 = vld [vmem:[#allocation13_spill] sm:$0xff] }
 0x3bc   : > { %13421 = vmatmul.mubr.msk.bf16.gmra.mxu1 %vm6554_vm6, %v12461_v7  ;;  %v7486_v42 = vadd.f32 %v7371_v24, %v19135_v39  ;;  %v17895_v52 = vpop.f32.mrf.mxu0  ;;  %v10291_v63 = vrot.slane %v10289_v59, 4  ;;  %v10292_v7 = vrot.slane %v19137_v0, 5  ;;  %v6953_v13 = vadd.f32 %v19139_v37, %v19138_v51  ;;  %v10164_v39 = vld [vmem:[#allocation3 + $0x9c] sm:$0xe]  ;;  %v19142_v37 = vld [vmem:[#allocation17_spill] sm:$0xff] }
 0x3bd   : > { %13424 = vmatprep.mubr.msk.bf16.mxu1 %vm6554_vm6, %v12462_v26  ;;  %v13219_v46 = vpop.f32.mrf.mxu1  ;;  %v10296_v53 = vrot.slane %v19141_v27, 5  ;;  %v17912_v26 = vsel %vm14250_vm10, %v12450_v9, %v10282_v38  ;;  %v17916_v4 = vsel %vm14250_vm10, %v10284_v21, %v10285_v14  ;;  %v17920_v29 = vsel %vm14250_vm10, %v12451_v20, %v10289_v59  ;;  %v19143_v59 = vld [vmem:[#allocation27_spill] sm:$0xff] }
 0x3be   : > { %v7489_v24 = vadd.f32 %v13219_v46, %v19140_v23  ;;  %v17907_v44 = vpop.f32.mrf.mxu0  ;;  %v17924_v46 = vsel %vm14250_vm10, %v10291_v63, %v10292_v7  ;;  %v12452_v14 = vrot.slane %v10164_v39, 9  ;;  %v10299_v23 = vrot.slane %v19142_v37, 5  ;;  %v10166_v63 = vld [vmem:[#allocation3 + $0xb4] sm:$0xe]  ;;  %v19145_v39 = vld [vmem:[#allocation43_spill] sm:$0xff] }
 0x3bf   : > { %v7374_v43 = vpop.f32.mrf.mxu1  ;;  %v10298_v21 = vrot.slane %v10296_v53, 4  ;;  %v19144_v7 = vld [vmem:[#allocation42_spill] sm:$0xff]  ;;  %vm11607_vm5 = vcmask 1041409   ;;  %vm11617_vm14 = vcmask 1046534   ;;  %vm11619_vm15 = vcmask 1047559  }
 0x3c0   : > { %v7487_v0 = vadd.f32 %v7374_v43, %v6953_v13  ;;  %v17926_v51 = vpop.f32.mrf.mxu0  ;;  %v10310_v43 = vrot.slane %v19144_v7, 5  ;;  %v17939_v50 = vsel %vm14250_vm10, %v12452_v14, %v10296_v53  ;;  %v12454_v7 = vrot.slane %v10166_v63, 9  ;;  %v19146_v53 = vld [vmem:[#allocation30_spill] sm:$0xff] }
 0x3c1   : > { %v13222_v9 = vpop.f32.mrf.mxu1  ;;  %v17943_v38 = vsel %vm14250_vm10, %v10298_v21, %v10299_v23  ;;  %v10313_v14 = vrot.slane %v19146_v53, 5  ;;  %v17970_v63 = vadd.f32 %v17715_v41, %v17829_v11  ;;  %v17987_v41 = vadd.f32 %v17751_v17, %v17871_v1 }
 0x3c2   : > { %v7492_v20 = vadd.f32 %v13222_v9, %v19143_v59  ;;  %v17934_v28 = vpop.f32.mrf.mxu0  ;;  %v12469_v9 = vcombine.low %v17939_v50, %v17943_v38  ;;  %v10312_v2 = vrot.slane %v10310_v43, 4  ;;  %v10320_v50 = vrot.slane %v17696_v55, 5 }
 0x3c3   : > { %v7387_v13 = vpop.f32.mrf.mxu1 }
 0x3c4   : > { %13425 = vmatmul.mubr.msk.bf16.gmra.mxu1 %vm6554_vm6, %v12463_v62  ;;  %v7490_v37 = vadd.f32 %v7387_v13, %v19145_v39  ;;  %v17947_v27 = vpop.f32.mrf.mxu0  ;;  %v17958_v62 = vsel %vm14250_vm10, %v12454_v7, %v10310_v43  ;;  %v17962_v13 = vsel %vm14250_vm10, %v10312_v2, %v10313_v14  ;;  %v17979_v2 = vadd.f32 %v17729_v56, %v17837_v48 }
 0x3c5   : > { %13428 = vmatprep.mubr.msk.bf16.mxu1 %vm6554_vm6, %v12464_v47  ;;  %v13223_v59 = vpop.f32.mrf.mxu1  ;;  %v17966_v47 = vadd.f32 %v17705_v45, %v17813_v33  ;;  %v12471_v43 = vcombine.low %v17958_v62, %v17962_v13  ;;  %v17983_v45 = vadd.f32 %v17736_v5, %v17860_v31  ;;  %v19149_v33 = vld [vmem:[#allocation19_spill] sm:$0xff]  ;;  %v17993_v14 = vadd.f32 %v17762_v16, %v7486_v42 }
 0x3c6   : > { %v7493_v58 = vadd.f32 %v13223_v59, %v19147_v32  ;;  %v17954_v21 = vpop.f32.mrf.mxu0  ;;  %v19148_v32 = vld [vmem:[#allocation14_spill] sm:$0xff]  ;;  %v17999_v56 = vadd.f32 %v17785_v10, %v7487_v0  ;;  %v18002_v5 = vadd.f32 %v17796_v19, %v7492_v20  ;;  %v18005_v17 = vadd.f32 %v17808_v25, %v7490_v37 }
 0x3c7   : > { %v7390_v23 = vpop.f32.mrf.mxu1  ;;  %v19150_v16 = vcombine.low %v17877_v54, %v17886_v18  ;;  %v19152_v25 = vcombine.low %v17881_v8, %v17890_v36  ;;  %v19154_v20 = vld [vmem:[#allocation26_spill] sm:$0xff]  ;;  %v19156_v36 = vld [vmem:[#allocation15_spill] sm:$0xff] }
 0x3c8   : > { %v7491_v39 = vadd.f32 %v7390_v23, %v19148_v32  ;;  %v17973_v59 = vpop.f32.mrf.mxu0  ;;  %v17996_v23 = vadd.f32 %v17774_v40, %v7489_v24  ;;  %v18008_v31 = vadd.f32 %v17819_v57, %v7493_v58  ;;  %v19151_v40 = vld [vmem:[#allocation23_spill] sm:$0xff]  ;;  %v19153_v57 = vld [vmem:[#allocation37_spill] sm:$0xff] }
 0x3c9   : > { %v13226_v7 = vpop.f32.mrf.mxu1 }
 0x3ca   : > { %v7496_v11 = vadd.f32 %v13226_v7, %v19149_v33  ;;  %v17990_v53 = vpop.f32.mrf.mxu0  ;;  %v18018_v10 = vadd.f32 %v17831_v15, %v7491_v39 }
 0x3cb   : > { %v7403_v48 = vpop.f32.mrf.mxu1 }
 0x3cc   : > { %13429 = vmatmul.mubr.msk.bf16.gmra.mxu1 %vm6554_vm6, %v19150_v16  ;;  %v7494_v1 = vadd.f32 %v7403_v48, %v19151_v40  ;;  %v18015_v42 = vpop.f32.mrf.mxu0  ;;  %v18021_v19 = vadd.f32 %v17839_v30, %v7496_v11  ;;  %v19155_v30 = vld [vmem:[#allocation20_spill] sm:$0xff]  ;;  %v19157_v48 = vcombine.low %v17912_v26, %v17916_v4  ;;  %v19161_v26 = vld [vmem:[#allocation34_spill] sm:$0xff] }
 0x3cd   : > { %13432 = vmatprep.mubr.msk.bf16.mxu1 %vm6554_vm6, %v19152_v25  ;;  %v13227_v58 = vpop.f32.mrf.mxu1  ;;  %v10303_v32 = vrot.slane %v19155_v30, 5  ;;  %v19158_v16 = vld [vmem:[#allocation28_spill] sm:$0xff]  ;;  %v10306_v4 = vrot.slane %v19161_v26, 5  ;;  %v10324_v26 = vrot.slane %v17727_v3, 5 }
 0x3ce   : > { %v7497_v54 = vadd.f32 %v13227_v58, %v19153_v57  ;;  %v18028_v18 = vpop.f32.mrf.mxu0  ;;  %v18031_v24 = vadd.f32 %v17864_v61, %v7494_v1  ;;  %v10165_v1 = vld [vmem:[#allocation3 + $0xa8] sm:$0xe]  ;;  %v19159_v57 = vcombine.low %v17920_v29, %v17924_v46  ;;  %v10317_v46 = vrot.slane %v17685_v12, 5 }
 0x3cf   : > { %v7406_v0 = vpop.f32.mrf.mxu1  ;;  %v10305_v25 = vrot.slane %v10303_v32, 4 }
 0x3d0   : > { %v7495_v15 = vadd.f32 %v7406_v0, %v19154_v20  ;;  %v18034_v37 = vpop.f32.mrf.mxu0  ;;  %v18038_v39 = vadd.f32 %v17873_v6, %v7497_v54  ;;  %v19160_v54 = vld [vmem:[#allocation32_spill] sm:$0xff] }
 0x3d1   : > { %v13230_v8 = vpop.f32.mrf.mxu1 }
 0x3d2   : > { %v7500_v7 = vadd.f32 %v13230_v8, %v19156_v36  ;;  %v18041_v33 = vpop.f32.mrf.mxu0  ;;  %v18044_v11 = vadd.f32 %v17895_v52, %v7495_v15  ;;  %v12453_v8 = vrot.slane %v10165_v1, 9  ;;  %v19162_v36 = vld [vmem:[#allocation22_spill] sm:$0xff] }
 0x3d3   : > { %v7419_v61 = vpop.f32.mrf.mxu1 }
 0x3d4   : > { %13433 = vmatmul.mubr.msk.bf16.gmra.mxu1 %vm6554_vm6, %v19157_v48  ;;  %v7498_v40 = vadd.f32 %v7419_v61, %v19158_v16  ;;  %v18051_v6 = vpop.f32.mrf.mxu0  ;;  %v18054_v58 = vadd.f32 %v17907_v44, %v7500_v7  ;;  %v10307_v7 = vsel %vm14250_vm10, %v10305_v25, %v10306_v4  ;;  %v19163_v16 = vld [vmem:[#allocation35_spill] sm:$0xff] }
 0x3d5   : > { %13436 = vmatprep.mubr.msk.bf16.mxu1 %vm6554_vm6, %v19159_v57  ;;  %v13231_v52 = vpop.f32.mrf.mxu1 }
 0x3d6   : > { %v7501_v0 = vadd.f32 %v13231_v52, %v19160_v54  ;;  %v18062_v20 = vpop.f32.mrf.mxu0  ;;  %v18065_v15 = vadd.f32 %v17926_v51, %v7498_v40  ;;  %v10304_v51 = vsel %vm14250_vm10, %v12453_v8, %v10303_v32 }
 0x3d7   : > { %v7422_v30 = vpop.f32.mrf.mxu1  ;;  %v12470_v52 = vcombine.low %v10304_v51, %v10307_v7  ;;  %v10326_v7 = vrot.slane %v10324_v26, 4 }
 0x3d8   : > { %v7499_v44 = vadd.f32 %v7422_v30, %v19162_v36  ;;  %v18070_v29 = vpop.f32.mrf.mxu0  ;;  %v18074_v61 = vadd.f32 %v17934_v28, %v7501_v0  ;;  %v10319_v28 = vrot.slane %v10317_v46, 4 }
 0x3d9   : > { %v13234_v48 = vpop.f32.mrf.mxu1 }
 0x3da   : > { %v7504_v57 = vadd.f32 %v13234_v48, %v19163_v16  ;;  %v18079_v40 = vpop.f32.mrf.mxu0  ;;  %v18082_v1 = vadd.f32 %v17947_v27, %v7499_v44  ;;  %v10167_v27 = vld [vmem:[#allocation3 + $0xc0] sm:$0xe]  ;;  %v10321_v36 = vsel %vm14250_vm10, %v10319_v28, %v10320_v50  ;;  %v10327_v48 = vrot.slane %v17743_v35, 5  ;;  %v19164_v16 = vld [vmem:[#allocation41_spill] sm:$0xff] }
 0x3db   : > { %v7435_v25 = vpop.f32.mrf.mxu1  ;;  %v12455_v8 = vrot.slane %v10167_v27, 9  ;;  %v19166_v27 = vld [vmem:[#allocation29_spill] sm:$0xff]  ;;  %v19167_v50 = vld [vmem:[#allocation40_spill] sm:$0xff] }
 0x3dc   : > { %13437 = vmatmul.mubr.msk.bf16.gmra.mxu1 %vm6554_vm6, %v12469_v9  ;;  %v7502_v12 = vadd.f32 %v7435_v25, %v17710_v49  ;;  %v18089_v54 = vpop.f32.mrf.mxu0  ;;  %v18092_v0 = vadd.f32 %v17954_v21, %v7504_v57  ;;  %v10168_v9 = vld [vmem:[#allocation3 + $0xcc] sm:$0xe] }
 0x3dd   : > { %13440 = vmatprep.mubr.msk.bf16.mxu1 %vm6554_vm6, %v12470_v52  ;;  %v13235_v32 = vpop.f32.mrf.mxu1  ;;  %v12456_v55 = vrot.slane %v10168_v9, 9  ;;  %v10318_v57 = vsel %vm14250_vm10, %v12455_v8, %v10317_v46 }
 0x3de   : > { %v7505_v4 = vadd.f32 %v13235_v32, %v17713_v22  ;;  %v18098_v38 = vpop.f32.mrf.mxu0  ;;  %v18101_v49 = vadd.f32 %v17973_v59, %v7502_v12  ;;  %v12472_v52 = vcombine.low %v10318_v57, %v10321_v36  ;;  %v10328_v32 = vsel %vm14250_vm10, %v10326_v7, %v10327_v48  ;;  %v19168_v36 = vld [vmem:[#allocation39_spill] sm:$0xff]  ;;  %v19170_v57 = vld [vmem:[#allocation46_spill] sm:$0xff] }
 0x3df   : > { %v7438_v30 = vpop.f32.mrf.mxu1 }
 0x3e0   : > { %v7503_v21 = vadd.f32 %v7438_v30, %v17720_v34  ;;  %v18106_v44 = vpop.f32.mrf.mxu0  ;;  %v18109_v3 = vadd.f32 %v17990_v53, %v7505_v4  ;;  %v19165_v53 = vld [vmem:[#allocation25_spill] sm:$0xff] }
 0x3e1   : > { %v13238_v22 = vpop.f32.mrf.mxu1 }
 0x3e2   : > { %v7508_v59 = vadd.f32 %v13238_v22, %v19164_v16  ;;  %v18115_v34 = vpop.f32.mrf.mxu0  ;;  %v18118_v51 = vadd.f32 %v18015_v42, %v7503_v21  ;;  %v10325_v42 = vsel %vm14250_vm10, %v12456_v55, %v10324_v26 }
 0x3e3   : > { %v7451_v25 = vpop.f32.mrf.mxu1 }
 0x3e4   : > { %13441 = vmatmul.mubr.msk.bf16.gmra.mxu1 %vm6554_vm6, %v12471_v43  ;;  %v7506_v12 = vadd.f32 %v7451_v25, %v19165_v53  ;;  %v18125_v35 = vpop.f32.mrf.mxu0  ;;  %v18128_v28 = vadd.f32 %v18028_v18, %v7508_v59  ;;  %v12473_v18 = vcombine.low %v10325_v42, %v10328_v32 }
 0x3e5   : > { %13444 = vmatprep.mubr.msk.bf16.mxu1 %vm6554_vm6, %v12472_v52  ;;  %v13239_v46 = vpop.f32.mrf.mxu1 }
 0x3e6   : > { %v7509_v62 = vadd.f32 %v13239_v46, %v19166_v27  ;;  %v13320_v13 = vpop.f32.mrf.mxu0  ;;  %v18137_v43 = vadd.f32 %v18034_v37, %v7506_v12  ;;  %v19169_v37 = vld [vmem:[#allocation45_spill] sm:$0xff]  ;;  %v19171_v12 = vld [vmem:[#allocation47_spill] sm:$0xff] }
 0x3e7   : > { %v7454_v4 = vpop.f32.mrf.mxu1 }
 0x3e8   : > { %v7507_v9 = vadd.f32 %v7454_v4, %v19167_v50  ;;  %v8925_v30 = vpop.f32.mrf.mxu0  ;;  %v18141_v21 = vadd.f32 %v18041_v33, %v7509_v62 }
 0x3ea   : > { %v13242_v8 = vpop.f32.mrf.mxu1  ;;  %v13321_v22 = vpop.f32.mrf.mxu0  ;;  %v18145_v60 = vadd.f32 %v18051_v6, %v7507_v9 }
 0x3eb   : > { %v7512_v26 = vadd.f32 %v13242_v8, %v19168_v36 }
 0x3ec   : > { %v7467_v55 = vpop.f32.mrf.mxu1  ;;  %13445 = vmatmul.mubr.msk.bf16.gmra.mxu1 %vm6554_vm6, %v12473_v18  ;;  %v8928_v48 = vpop.f32.mrf.mxu0 }
 0x3ed   : > { %v7510_v7 = vadd.f32 %v7467_v55, %v19169_v37  ;;  %v18150_v16 = vadd.f32 %v18062_v20, %v7512_v26 }
 0x3ee   : > { %v13243_v59 = vpop.f32.mrf.mxu1  ;;  %v13324_v52 = vpop.f32.mrf.mxu0 }
 0x3ef   : > { %v7513_v33 = vadd.f32 %v13243_v59, %v19170_v57  ;;  %v18154_v25 = vadd.f32 %v18070_v29, %v7510_v7 }
 0x3f0   : > { %v7470_v53 = vpop.f32.mrf.mxu1  ;;  %v8941_v46 = vpop.f32.mrf.mxu0 }
 0x3f1   : > { %v7511_v6 = vadd.f32 %v7470_v53, %v19171_v12  ;;  %v18158_v42 = vadd.f32 %v18079_v40, %v7513_v33 }
 0x3f2   : > { %v13282_v32 = vpop.f32.mrf.mxu1  ;;  %v13325_v20 = vpop.f32.mrf.mxu0 }
 0x3f3   : > { %v18161_v27 = vadd.f32 %v13282_v32, %v17966_v47  ;;  %v18164_v62 = vadd.f32 %v18089_v54, %v7511_v6 }
 0x3f4   : > { %v8439_v4 = vpop.f32.mrf.mxu1  ;;  %v8944_v29 = vpop.f32.mrf.mxu0 }
 0x3f5   : > { %v18167_v50 = vadd.f32 %v8439_v4, %v17970_v63 }
 0x3f6   : > { %v13283_v9 = vpop.f32.mrf.mxu1  ;;  %v13328_v8 = vpop.f32.mrf.mxu0 }
 0x3f7   : > { %v18170_v18 = vadd.f32 %v13283_v9, %v17979_v2 }
 0x3f8   : > { %v8442_v40 = vpop.f32.mrf.mxu1  ;;  %v8957_v47 = vpop.f32.mrf.mxu0 }
 0x3f9   : > { %v18173_v36 = vadd.f32 %v8442_v40, %v17983_v45 }
 0x3fa   : > { %v13286_v26 = vpop.f32.mrf.mxu1  ;;  %v13329_v54 = vpop.f32.mrf.mxu0 }
 0x3fb   : > { %v8572_v55 = vadd.f32 %v13286_v26, %v17987_v41 }
 0x3fc   : > { %v8455_v37 = vpop.f32.mrf.mxu1  ;;  %v8960_v63 = vpop.f32.mrf.mxu0 }
 0x3fd   : > { %v8570_v7 = vadd.f32 %v8455_v37, %v17993_v14  ;;  %v18177_v59 = vadd.f32 %v13320_v13, %v8572_v55 }
 0x3fe   : > { %v13287_v57 = vpop.f32.mrf.mxu1  ;;  %v13332_v33 = vpop.f32.mrf.mxu0 }
 0x3ff   : > { %v8573_v2 = vadd.f32 %v13287_v57, %v17996_v23  ;;  %v18180_v53 = vadd.f32 %v8925_v30, %v8570_v7 }
 0x400   : > { %v8458_v12 = vpop.f32.mrf.mxu1  ;;  %v8973_v6 = vpop.f32.mrf.mxu0 }
 0x401   : > { %v8571_v45 = vadd.f32 %v8458_v12, %v17999_v56  ;;  %v18183_v32 = vadd.f32 %v13321_v22, %v8573_v2 }
 0x402   : > { %v13290_v41 = vpop.f32.mrf.mxu1  ;;  %v13333_v9 = vpop.f32.mrf.mxu0 }
 0x403   : > { %v8576_v4 = vadd.f32 %v13290_v41, %v18002_v5  ;;  %v18186_v14 = vadd.f32 %v8928_v48, %v8571_v45 }
 0x404   : > { %v8471_v13 = vpop.f32.mrf.mxu1  ;;  %v8976_v26 = vpop.f32.mrf.mxu0 }
 0x405   : > { %v8574_v40 = vadd.f32 %v8471_v13, %v18005_v17  ;;  %v18189_v23 = vadd.f32 %v13324_v52, %v8576_v4 }
 0x406   : > { %v13291_v30 = vpop.f32.mrf.mxu1  ;;  %v13336_v37 = vpop.f32.mrf.mxu0 }
 0x407   : > { %v8577_v55 = vadd.f32 %v13291_v30, %v18008_v31  ;;  %v18192_v56 = vadd.f32 %v8941_v46, %v8574_v40 }
 0x408   : > { %v8474_v22 = vpop.f32.mrf.mxu1  ;;  %v8989_v57 = vpop.f32.mrf.mxu0 }
 0x409   : > { %v8575_v7 = vadd.f32 %v8474_v22, %v18018_v10  ;;  %v18195_v5 = vadd.f32 %v13325_v20, %v8577_v55 }
 0x40a   : > { %v13294_v48 = vpop.f32.mrf.mxu1  ;;  %v13337_v12 = vpop.f32.mrf.mxu0 }
 0x40b   : > { %v8580_v2 = vadd.f32 %v13294_v48, %v18021_v19  ;;  %v18198_v17 = vadd.f32 %v8944_v29, %v8575_v7 }
 0x40c   : > { %v8487_v52 = vpop.f32.mrf.mxu1  ;;  %v8992_v41 = vpop.f32.mrf.mxu0 }
 0x40d   : > { %v8578_v45 = vadd.f32 %v8487_v52, %v18031_v24  ;;  %v18201_v31 = vadd.f32 %v13328_v8, %v8580_v2 }
 0x40e   : > { %v13295_v46 = vpop.f32.mrf.mxu1  ;;  %v13340_v13 = vpop.f32.mrf.mxu0 }
 0x40f   : > { %v8581_v4 = vadd.f32 %v13295_v46, %v18038_v39  ;;  %v18204_v10 = vadd.f32 %v8957_v47, %v8578_v45 }
 0x410   : > { %v8490_v20 = vpop.f32.mrf.mxu1  ;;  %v9005_v30 = vpop.f32.mrf.mxu0 }
 0x411   : > { %v8579_v40 = vadd.f32 %v8490_v20, %v18044_v11  ;;  %v18207_v19 = vadd.f32 %v13329_v54, %v8581_v4 }
 0x412   : > { %v13298_v29 = vpop.f32.mrf.mxu1  ;;  %v13341_v22 = vpop.f32.mrf.mxu0 }
 0x413   : > { %v8584_v55 = vadd.f32 %v13298_v29, %v18054_v58  ;;  %v18210_v24 = vadd.f32 %v8960_v63, %v8579_v40 }
 0x414   : > { %v8503_v8 = vpop.f32.mrf.mxu1  ;;  %v9008_v47 = vpop.f32.mrf.mxu0 }
 0x415   : > { %v8582_v7 = vadd.f32 %v8503_v8, %v18065_v15  ;;  %v18213_v48 = vadd.f32 %v13332_v33, %v8584_v55 }
 0x416   : > { %v13299_v39 = vpop.f32.mrf.mxu1  ;;  %v13344_v46 = vpop.f32.mrf.mxu0 }
 0x417   : > { %v8585_v2 = vadd.f32 %v13299_v39, %v18074_v61  ;;  %v18216_v52 = vadd.f32 %v8973_v6, %v8582_v7 }
 0x418   : > { %v8506_v11 = vpop.f32.mrf.mxu1  ;;  %v9021_v61 = vpop.f32.mrf.mxu0 }
 0x419   : > { %v8583_v54 = vadd.f32 %v8506_v11, %v18082_v1  ;;  %v18219_v45 = vadd.f32 %v13333_v9, %v8585_v2 }
 0x41a   : > { %v13302_v58 = vpop.f32.mrf.mxu1 }
 0x41b   : > { %v8588_v63 = vadd.f32 %v13302_v58, %v18092_v0  ;;  %v18222_v4 = vadd.f32 %v8976_v26, %v8583_v54  ;;  %v13345_v0 = vpop.f32.mrf.mxu0 }
 0x41c   : > { %v8519_v15 = vpop.f32.mrf.mxu1 }
 0x41d   : > { %v8586_v33 = vadd.f32 %v8519_v15, %v18101_v49  ;;  %v18225_v20 = vadd.f32 %v13336_v37, %v8588_v63 }
 0x41e   : > { %v13303_v40 = vpop.f32.mrf.mxu1 }
 0x41f   : > { %v8589_v6 = vadd.f32 %v13303_v40, %v18109_v3  ;;  %v18228_v29 = vadd.f32 %v8989_v57, %v8586_v33  ;;  %v9024_v3 = vpop.f32.mrf.mxu0 }
 0x420   : > { %v8522_v1 = vpop.f32.mrf.mxu1 }
 0x421   : > { %v8587_v9 = vadd.f32 %v8522_v1, %v18118_v51  ;;  %v18231_v55 = vadd.f32 %v13337_v12, %v8589_v6 }
 0x422   : > { %v13306_v8 = vpop.f32.mrf.mxu1 }
 0x423   : > { %v8592_v26 = vadd.f32 %v13306_v8, %v18128_v28  ;;  %v18234_v7 = vadd.f32 %v8992_v41, %v8587_v9 }
 0x424   : > { %v8535_v49 = vpop.f32.mrf.mxu1 }
 0x425   : > { %v8590_v37 = vadd.f32 %v8535_v49, %v18137_v43  ;;  %v18237_v39 = vadd.f32 %v13340_v13, %v8592_v26 }
 0x426   : > { %v13307_v2 = vpop.f32.mrf.mxu1 }
 0x427   : > { %v8593_v57 = vadd.f32 %v13307_v2, %v18141_v21  ;;  %v18240_v11 = vadd.f32 %v9005_v30, %v8590_v37 }
 0x428   : > { %v8538_v51 = vpop.f32.mrf.mxu1 }
 0x429   : > { %v8591_v12 = vadd.f32 %v8538_v51, %v18145_v60  ;;  %v18243_v54 = vadd.f32 %v13341_v22, %v8593_v57  ;;  %v18245_v58 = vpop.f32.mrf.mxu0 }
 0x42b   : > { %v18247_v28 = vadd.f32 %v9008_v47, %v8591_v12  ;;  %v18249_v41 = vpop.f32.mrf.mxu0 }
 0x42c   : > { %v13310_v43 = vpop.f32.mrf.mxu1 }
 0x42d   : > { %v8596_v13 = vadd.f32 %v13310_v43, %v18150_v16  ;;  %v18252_v63 = vpop.f32.mrf.mxu0 }
 0x42e   : > { %v8551_v15 = vpop.f32.mrf.mxu1 }
 0x42f   : > { %v8594_v21 = vadd.f32 %v8551_v15, %v18154_v25  ;;  %v18255_v30 = vadd.f32 %v13344_v46, %v8596_v13  ;;  %v18257_v60 = vpop.f32.mrf.mxu0 }
 0x430   : > { %v13311_v33 = vpop.f32.mrf.mxu1 }
 0x431   : > { %v8597_v22 = vadd.f32 %v13311_v33, %v18158_v42  ;;  %v18260_v40 = vadd.f32 %v9021_v61, %v8594_v21 }
 0x432   : > { %v8554_v47 = vpop.f32.mrf.mxu1 }
 0x433   : > { %v8595_v6 = vadd.f32 %v8554_v47, %v18164_v62  ;;  %v18263_v1 = vadd.f32 %v13345_v0, %v8597_v22 }
 0x434   : > { %v18265_v16 = vpop.f32.mrf.mxu0  ;;  %v18267_v9 = vpop.f32.mrf.mxu1 }
 0x435   : > { %v18269_v8 = vadd.f32 %v9024_v3, %v8595_v6 }
 0x436   : > { %v18271_v25 = vpop.f32.mrf.mxu0  ;;  %v18273_v46 = vpop.f32.mrf.mxu1 }
 0x438   : > { %v18275_v26 = vpop.f32.mrf.mxu0  ;;  %v18277_v42 = vpop.f32.mrf.mxu1 }
 0x43a   : > { %v18279_v61 = vpop.f32.mrf.mxu1  ;;  %v18281_v49 = vpop.f32.mrf.mxu0 }
 0x43c   : > { %v13354_v62 = vpop.f32.mrf.mxu1 }
 0x43d   : > { %v18284_v0 = vadd.f32 %v13354_v62, %v18177_v59 }
 0x43e   : > { %v9284_v37 = vpop.f32.mrf.mxu1 }
 0x43f   : > { %v18286_v2 = vpop.f32.mrf.mxu0  ;;  %v18289_v3 = vadd.f32 %v9284_v37, %v18180_v53 }
 0x440   : > { %v13355_v57 = vpop.f32.mrf.mxu1 }
 0x441   : > { %v18291_v51 = vpop.f32.mrf.mxu0  ;;  %v18294_v12 = vadd.f32 %v13355_v57, %v18183_v32 }
 0x442   : > { %v9287_v43 = vpop.f32.mrf.mxu1 }
 0x443   : > { %v18296_v13 = vpop.f32.mrf.mxu0  ;;  %v18299_v15 = vadd.f32 %v9287_v43, %v18186_v14 }
 0x444   : > { %v13358_v59 = vpop.f32.mrf.mxu1 }
 0x445   : > { %v18301_v21 = vpop.f32.mrf.mxu0  ;;  %v18304_v33 = vadd.f32 %v13358_v59, %v18189_v23 }
 0x446   : > { %v9300_v53 = vpop.f32.mrf.mxu1 }
 0x447   : > { %v18307_v22 = vadd.f32 %v9300_v53, %v18192_v56 }
 0x448   : > { %v18309_v47 = vpop.f32.mrf.mxu0  ;;  %v13359_v32 = vpop.f32.mrf.mxu1 }
 0x449   : > { %v18312_v6 = vadd.f32 %v13359_v32, %v18195_v5 }
 0x44a   : > { %v18314_v62 = vpop.f32.mrf.mxu0  ;;  %v9303_v14 = vpop.f32.mrf.mxu1 }
 0x44b   : > { %19172 = vst [vmem:[#allocation50_spill] sm:$0xff] %v18314_v62  ;;  %v18317_v37 = vadd.f32 %v9303_v14, %v18198_v17 }
 0x44c   : > { %v18319_v57 = vpop.f32.mrf.mxu0  ;;  %v13362_v23 = vpop.f32.mrf.mxu1 }
 0x44d   : > { %19173 = vst [vmem:[#allocation48_spill] sm:$0xff] %v18319_v57  ;;  %v18322_v43 = vadd.f32 %v13362_v23, %v18201_v31 }
 0x44e   : > { %v18324_v56 = vpop.f32.mrf.mxu0  ;;  %v9316_v59 = vpop.f32.mrf.mxu1 }
 0x44f   : > { %19174 = vst [vmem:[#allocation52_spill] sm:$0xff] %v18324_v56  ;;  %v18327_v53 = vadd.f32 %v9316_v59, %v18204_v10 }
 0x450   : > { %v13363_v5 = vpop.f32.mrf.mxu1 }
 0x451   : > { %v18330_v32 = vadd.f32 %v13363_v5, %v18207_v19  ;;  %v18332_v62 = vpop.f32.mrf.mxu0 }
 0x452   : > { %19175 = vst [vmem:[#allocation49_spill] sm:$0xff] %v18332_v62  ;;  %v9319_v17 = vpop.f32.mrf.mxu1 }
 0x453   : > { %v18335_v14 = vadd.f32 %v9319_v17, %v18210_v24  ;;  %v18337_v57 = vpop.f32.mrf.mxu0 }
 0x454   : > { %19176 = vst [vmem:[#allocation67_spill] sm:$0xff] %v18337_v57  ;;  %v13366_v31 = vpop.f32.mrf.mxu1 }
 0x455   : > { %v18340_v23 = vadd.f32 %v13366_v31, %v18213_v48  ;;  %v18342_v56 = vpop.f32.mrf.mxu0 }
 0x456   : > { %19177 = vst [vmem:[#allocation54_spill] sm:$0xff] %v18342_v56  ;;  %v9332_v10 = vpop.f32.mrf.mxu1 }
 0x457   : > { %v18345_v59 = vadd.f32 %v9332_v10, %v18216_v52  ;;  %v18347_v19 = vpop.f32.mrf.mxu0 }
 0x458   : > { %19178 = vst [vmem:[#allocation51_spill] sm:$0xff] %v18347_v19  ;;  %v13367_v5 = vpop.f32.mrf.mxu1 }
 0x459   : > { %v18350_v62 = vadd.f32 %v13367_v5, %v18219_v45 }
 0x45a   : > { %v9335_v24 = vpop.f32.mrf.mxu1 }
 0x45b   : > { %v18352_v17 = vpop.f32.mrf.mxu0  ;;  %v18355_v57 = vadd.f32 %v9335_v24, %v18222_v4 }
 0x45c   : > { %19179 = vst [vmem:[#allocation53_spill] sm:$0xff] %v18352_v17  ;;  %v13370_v48 = vpop.f32.mrf.mxu1 }
 0x45d   : > { %19180 = vst [vmem:[#allocation56_spill] sm:$0xff] %v18355_v57  ;;  %v18357_v31 = vpop.f32.mrf.mxu0  ;;  %v18360_v56 = vadd.f32 %v13370_v48, %v18225_v20 }
 0x45e   : > { %19181 = vst [vmem:[#allocation55_spill] sm:$0xff] %v18357_v31  ;;  %v9348_v52 = vpop.f32.mrf.mxu1 }
 0x45f   : > { %v18362_v10 = vpop.f32.mrf.mxu0  ;;  %v18365_v19 = vadd.f32 %v9348_v52, %v18228_v29 }
 0x460   : > { %19182 = vst [vmem:[#allocation58_spill] sm:$0xff] %v18362_v10  ;;  %v13371_v45 = vpop.f32.mrf.mxu1 }
 0x461   : > { %v18367_v5 = vpop.f32.mrf.mxu0  ;;  %v18370_v17 = vadd.f32 %v13371_v45, %v18231_v55 }
 0x462   : > { %19183 = vst [vmem:[#allocation57_spill] sm:$0xff] %v18367_v5  ;;  %v9351_v4 = vpop.f32.mrf.mxu1  ;;  %v10762_v5 = vlaneseq }
 0x463   : > { %v18373_v24 = vadd.f32 %v9351_v4, %v18234_v7 }
 0x464   : > { %v13374_v31 = vpop.f32.mrf.mxu1  ;;  %v18375_v57 = vpop.f32.mrf.mxu0 }
 0x465   : > { %19184 = vst [vmem:[#allocation60_spill] sm:$0xff] %v18375_v57  ;;  %v18378_v20 = vadd.f32 %v13374_v31, %v18237_v39  ;;  %v9038_v39 = vadd.f32 %v18098_v38, %v18161_v27  ;;  %v9037_v38 = vadd.f32 %v18125_v35, %v18173_v36 }
 0x466   : > { %v9364_v48 = vpop.f32.mrf.mxu1  ;;  %v18383_v10 = vpop.f32.mrf.mxu0 }
 0x467   : > { %v18381_v29 = vadd.f32 %v9364_v48, %v18240_v11  ;;  %19186 = vst [vmem:[#allocation61_spill] sm:$0xff] %v18383_v10  ;;  %v13695_v48 = vmov 1983009808   ;;  %v9397_v10 = vadd.f32 %v18267_v9, %v9038_v39 }
 0x468   : > { %v13375_v52 = vpop.f32.mrf.mxu1  ;;  %v18393_v31 = vpop.f32.mrf.mxu0 }
 0x469   : > { %19185 = vst [vmem:[#allocation59_spill] sm:$0xff] %v18381_v29  ;;  %v18386_v55 = vadd.f32 %v13375_v52, %v18243_v54  ;;  %v10760_v29 = vunpack.c.l.s4 %v13695_v48  ;;  %v9036_v54 = vadd.f32 %v18106_v44, %v18167_v50  ;;  %v9396_v44 = vadd.f32 %v18279_v61, %v9037_v38 }
 0x46a   : > { %v9367_v45 = vpop.f32.mrf.mxu1  ;;  %v18406_v48 = vpop.f32.mrf.mxu0  ;;  %v10123_v35 = vadd.f32 %v18245_v58, %v9397_v10  ;;  %v10125_v58 = vadd.f32 %v18271_v25, %v18289_v3  ;;  %v10128_v10 = vadd.f32 %v18275_v26, %v18294_v12  ;;  %v18441_v25 = vadd.f32 %v18291_v51, %v18307_v22 }
 0x46b   : > { %v18389_v7 = vadd.f32 %v9367_v45, %v18247_v28  ;;  %v9039_v28 = vadd.f32 %v18115_v34, %v18170_v18  ;;  %v10763_v45 = vshrl.u32 %v10762_v5, 7  ;;  %v10761_v39 = vunpack.c.0.s8 %v10760_v29 }
 0x46c   : > { %v13378_v4 = vpop.f32.mrf.mxu1  ;;  %v10122_v5 = vadd.f32 %v18257_v60, %v9396_v44  ;;  %v18437_v60 = vadd.f32 %v18286_v2, %v18304_v33  ;;  %v18445_v26 = vadd.f32 %v18296_v13, %v18312_v6  ;;  %v19188_v13 = vld [vmem:[#allocation48_spill] sm:$0xff] }
 0x46d   : > { %v9425_v11 = vadd.f32 %v13378_v4, %v18255_v30  ;;  %v9395_v30 = vadd.f32 %v18273_v46, %v9036_v54  ;;  %v9398_v4 = vadd.f32 %v18277_v42, %v9039_v28  ;;  %v18462_v22 = vadd.f32 %v19188_v13, %v18330_v32  ;;  %v19192_v32 = vld [vmem:[#allocation54_spill] sm:$0xff]  ;;  %v19193_v44 = vld [vmem:[#allocation56_spill] sm:$0xff] }
 0x46e   : > { %v9380_v57 = vpop.f32.mrf.mxu1 }
 0x46f   : > { %v9423_v52 = vadd.f32 %v9380_v57, %v18260_v40  ;;  %v18417_v40 = vld [vmem:[%s18858_s4] ss:$0 sm:$0xff]  ;;  %v10121_v42 = vadd.f32 %v18249_v41, %v9395_v30  ;;  %v10124_v61 = vadd.f32 %v18252_v63, %v9398_v4  ;;  %v18433_v63 = vadd.f32 %v18281_v49, %v18299_v15  ;;  %v19187_v15 = vld [vmem:[#allocation50_spill] sm:$0xff] }
 0x470   : > { %v13379_v27 = vpop.f32.mrf.mxu1  ;;  %v18453_v49 = vadd.f32 %v18309_v47, %v18322_v43  ;;  %v18458_v51 = vadd.f32 %v19187_v15, %v18327_v53  ;;  %v19190_v47 = vld [vmem:[#allocation49_spill] sm:$0xff]  ;;  %v19191_v43 = vld [vmem:[#allocation67_spill] sm:$0xff]  ;;  %v18479_v30 = vadd.f32 %v19192_v32, %v18350_v62 }
 0x471   : > { %v9426_v9 = vadd.f32 %v13379_v27, %v18263_v1  ;;  %v13412_v34 = vpop.f32.mrf.mxu0  ;;  %v18420_v1 = vsub.s32 %v10761_v39, %v10763_v45  ;;  %v18474_v28 = vadd.f32 %v19191_v43, %v18345_v59 }
 0x472   : > { %v9383_v50 = vpop.f32.mrf.mxu1  ;;  %v18481_v4 = vadd.f32 %v13412_v34, %v9425_v11 }
 0x473   : > { %v18411_v18 = vadd.f32 %v9383_v50, %v18269_v8  ;;  %v10127_v8 = vadd.f32 %v18265_v16, %v18284_v0  ;;  %v10106_v29 = vpop.f32.mrf.mxu0  ;;  %v18449_v0 = vadd.f32 %v18301_v21, %v18317_v37  ;;  %v19189_v21 = vld [vmem:[#allocation52_spill] sm:$0xff]  ;;  %v18470_v37 = vadd.f32 %v19190_v47, %v18340_v23  ;;  %v19194_v50 = vld [vmem:[#allocation51_spill] sm:$0xff] }
 0x474   : > { %v13418_v36 = vpop.f32.mrf.mxu1  ;;  %v18466_v6 = vadd.f32 %v19189_v21, %v18335_v14  ;;  %v18483_v14 = vadd.f32 %v10106_v29, %v9423_v52  ;;  %v18488_v59 = vadd.f32 %v19194_v50, %v19193_v44  ;;  %v19195_v52 = vld [vmem:[#allocation53_spill] sm:$0xff] }
 0x475   : > { %v10593_v46 = vadd.f32 %v13418_v36, %v10123_v35  ;;  %v13413_v38 = vpop.f32.mrf.mxu0  ;;  %v18496_v34 = vadd.f32 %v19195_v52, %v18360_v56  ;;  %v19198_v56 = vld [vmem:[#allocation57_spill] sm:$0xff] }
 0x476   : > { %v10464_v57 = vpop.f32.mrf.mxu1  ;;  %v18511_v15 = vadd.f32 %v19198_v56, %v18373_v24 }
 0x477   : > { %v10632_v54 = vadd.f32 %v18417_v40, %v10593_v46  ;;  %v10591_v41 = vadd.f32 %v10464_v57, %v10121_v42  ;;  %v19196_v57 = vld [vmem:[#allocation55_spill] sm:$0xff] }
 0x478   : > { %v13419_v16 = vpop.f32.mrf.mxu1 }
 0x479   : > { %v10664_v3 = vmax.f32 %v10632_v54, 0.0  ;;  %v10630_v2 = vadd.f32 %v18417_v40, %v10591_v41  ;;  %v10594_v12 = vadd.f32 %v13419_v16, %v10124_v61  ;;  %v18492_v61 = vadd.f32 %v13413_v38, %v9426_v9  ;;  %v19197_v16 = vld [vmem:[#allocation58_spill] sm:$0xff] }
 0x47a   : > { %v10467_v33 = vpop.f32.mrf.mxu1 }
 0x47b   : > { %v10662_v53 = vmax.f32 %v10630_v2, 0.0  ;;  %v10633_v27 = vadd.f32 %v18417_v40, %v10594_v12  ;;  %v10592_v45 = vadd.f32 %v10467_v33, %v10122_v5  ;;  %v10695_v23 = vsel %vm6554_vm6, %v10664_v3, -inf }
 0x47c   : > { %v13422_v39 = vpop.f32.mrf.mxu1  ;;  %v18500_v5 = vadd.f32 %v19196_v57, %v18365_v19  ;;  %v18505_v3 = vadd.f32 %v19197_v16, %v18370_v17 }
 0x47d   : > { %v10694_v35 = vsel %vm6554_vm6, %v10662_v53, -inf  ;;  %v10665_v36 = vmax.f32 %v10633_v27, 0.0  ;;  %v10631_v46 = vadd.f32 %v18417_v40, %v10592_v45  ;;  %v10597_v42 = vadd.f32 %v13422_v39, %v10127_v8 }
 0x47e   : > { %v10696_v62 = vmax.f32 %v10694_v35, %v10695_v23  ;;  %v10480_v11 = vpop.f32.mrf.mxu1 }
 0x47f   : > { %v10663_v29 = vmax.f32 %v10631_v46, 0.0  ;;  %v10636_v54 = vadd.f32 %v18417_v40, %v10597_v42  ;;  %v10595_v41 = vadd.f32 %v10480_v11, %v10125_v58  ;;  %v10698_v2 = vsel %vm6554_vm6, %v10665_v36, -inf }
 0x480   : > { %v10758_v9 = vcombine.high %v10696_v62, %v10696_v62  ;;  %v10765_v8 = vrot.slane %v10696_v62, %v18420_v1  ;;  %v13423_v12 = vpop.f32.mrf.mxu1 }
 0x481   : > { %v10697_v19 = vsel %vm6554_vm6, %v10663_v29, -inf  ;;  %v10668_v33 = vmax.f32 %v10636_v54, 0.0  ;;  %v10634_v13 = vadd.f32 %v18417_v40, %v10595_v41  ;;  %v10598_v58 = vadd.f32 %v13423_v12, %v10128_v10 }
 0x482   : > { %v10772_v21 = vrot.slane %v10758_v9, %v18420_v1  ;;  %v10773_v17 = vcombine.high %v10765_v8, %v10765_v8  ;;  %v11095_v47 = vsel %vm11094_vm4, %v10765_v8, -inf  ;;  %v10699_v43 = vmax.f32 %v10697_v19, %v10698_v2 }
 0x483   : > { %v11096_v38 = vrot.slane %v11095_v47, 4  ;;  %v10701_v53 = vsel %vm6554_vm6, %v10668_v33, -inf  ;;  %v10666_v27 = vmax.f32 %v10634_v13, 0.0  ;;  %v18519_v45 = vadd.f32 %v18417_v40, %v10598_v58 }
 0x484   : > { %v10774_v24 = vcombine.high %v10772_v21, %v10772_v21  ;;  %v11102_v32 = vsel %vm11094_vm4, %v10773_v17, -inf  ;;  %v11109_v23 = vsel %vm11094_vm4, %v10772_v21, -inf  ;;  %v10775_v39 = vcombine.high %v10699_v43, %v10699_v43 }
 0x485   : > { %v11097_v10 = vmax.f32 %v11095_v47, %v11096_v38  ;;  %v11103_v44 = vrot.slane %v11102_v32, 4  ;;  %v11110_v50 = vrot.slane %v11109_v23, 4  ;;  %v10782_v35 = vrot.slane %v10699_v43, %v18420_v1 }
 0x486   : > { %v11116_v36 = vsel %vm11094_vm4, %v10774_v24, -inf  ;;  %v10789_v46 = vrot.slane %v10775_v39, %v18420_v1  ;;  %v10700_v42 = vsel %vm6554_vm6, %v10666_v27, -inf  ;;  %v10669_v62 = vmax.f32 %v18519_v45, 0.0 }
 0x487   : > { %v11098_v11 = vrot.slane %v11097_v10, 2  ;;  %v11104_v52 = vmax.f32 %v11102_v32, %v11103_v44  ;;  %v11111_v57 = vmax.f32 %v11109_v23, %v11110_v50  ;;  %v11117_v29 = vrot.slane %v11116_v36, 4  ;;  %v10483_v50 = vpop.f32.mrf.mxu1 }
 0x488   : > { %v10790_v54 = vcombine.high %v10782_v35, %v10782_v35  ;;  %v10791_v41 = vcombine.high %v10789_v46, %v10789_v46  ;;  %v11123_v16 = vsel %vm11094_vm4, %v10782_v35, -inf  ;;  %v11137_v9 = vsel %vm11094_vm4, %v10789_v46, -inf }
 0x489   : > { %v11099_v8 = vmax.f32 %v11097_v10, %v11098_v11  ;;  %v11105_v2 = vrot.slane %v11104_v52, 2  ;;  %v11112_v12 = vrot.slane %v11111_v57, 2  ;;  %v11118_v56 = vmax.f32 %v11116_v36, %v11117_v29 }
 0x48a   : > { %v11124_v19 = vrot.slane %v11123_v16, 4  ;;  %v11130_v33 = vsel %vm11094_vm4, %v10790_v54, -inf  ;;  %v11138_v13 = vrot.slane %v11137_v9, 4  ;;  %v11144_v58 = vsel %vm11094_vm4, %v10791_v41, -inf }
 0x48b   : > { %v11100_v21 = vrot.slane %v11099_v8, 1  ;;  %v11106_v17 = vmax.f32 %v11104_v52, %v11105_v2  ;;  %v11113_v47 = vmax.f32 %v11111_v57, %v11112_v12  ;;  %v11119_v43 = vrot.slane %v11118_v56, 2 }
 0x48c   : > { %v11125_v38 = vmax.f32 %v11123_v16, %v11124_v19  ;;  %v11131_v27 = vrot.slane %v11130_v33, 4  ;;  %v11139_v24 = vmax.f32 %v11137_v9, %v11138_v13  ;;  %v11145_v32 = vrot.slane %v11144_v58, 4 }
 0x48d   : > { %v11101_v23 = vmax.f32 %v11099_v8, %v11100_v21  ;;  %v11107_v39 = vrot.slane %v11106_v17, 1  ;;  %v11114_v10 = vrot.slane %v11113_v47, 1  ;;  %v11120_v44 = vmax.f32 %v11118_v56, %v11119_v43 }
 0x48e   : > { %v11126_v35 = vrot.slane %v11125_v38, 2  ;;  %v11132_v36 = vmax.f32 %v11130_v33, %v11131_v27  ;;  %v11140_v46 = vrot.slane %v11139_v24, 2  ;;  %v11146_v11 = vmax.f32 %v11144_v58, %v11145_v32  ;;  %v13426_v33 = vpop.f32.mrf.mxu1 }
 0x48f   : > { %v11108_v52 = vmax.f32 %v11106_v17, %v11107_v39  ;;  %v11115_v57 = vmax.f32 %v11113_v47, %v11114_v10  ;;  %v11121_v29 = vrot.slane %v11120_v44, 1  ;;  %v10702_v54 = vmax.f32 %v10700_v42, %v10701_v53 }
 0x490   : > { %v11127_v41 = vmax.f32 %v11125_v38, %v11126_v35  ;;  %v11133_v16 = vrot.slane %v11132_v36, 2  ;;  %v11141_v9 = vmax.f32 %v11139_v24, %v11140_v46  ;;  %v11147_v8 = vrot.slane %v11146_v11, 2  ;;  %v10496_v35 = vpop.f32.mrf.mxu1 }
 0x491   : > { %v11122_v2 = vmax.f32 %v11120_v44, %v11121_v29  ;;  %v11608_v12 = vsel %vm11607_vm5, %v11108_v52, %v11101_v23  ;;  %v10792_v56 = vcombine.high %v10702_v54, %v10702_v54  ;;  %v10799_v19 = vrot.slane %v10702_v54, %v18420_v1 }
 0x492   : > { %v11610_v13 = vsel %vm11609_vm8, %v11115_v57, %v11608_v12  ;;  %v11128_v58 = vrot.slane %v11127_v41, 1  ;;  %v11134_v21 = vmax.f32 %v11132_v36, %v11133_v16  ;;  %v11142_v17 = vrot.slane %v11141_v9, 1 }
 0x493   : > { %v11148_v47 = vmax.f32 %v11146_v11, %v11147_v8  ;;  %v11612_v53 = vsel %vm11611_vm11, %v11122_v2, %v11610_v13  ;;  %v10806_v42 = vrot.slane %v10792_v56, %v18420_v1  ;;  %v10807_v43 = vcombine.high %v10799_v19, %v10799_v19 }
 0x494   : > { %v11129_v38 = vmax.f32 %v11127_v41, %v11128_v58  ;;  %v11135_v27 = vrot.slane %v11134_v21, 1  ;;  %v11143_v24 = vmax.f32 %v11141_v9, %v11142_v17  ;;  %v11151_v32 = vsel %vm11094_vm4, %v10799_v19, -inf  ;;  %v13427_v58 = vpop.f32.mrf.mxu1 }
 0x495   : > { %v11149_v23 = vrot.slane %v11148_v47, 1  ;;  %v10808_v39 = vcombine.high %v10806_v42, %v10806_v42  ;;  %v11152_v10 = vrot.slane %v11151_v32, 4  ;;  %v11158_v44 = vsel %vm11094_vm4, %v10807_v43, -inf }
 0x496   : > { %v11136_v36 = vmax.f32 %v11134_v21, %v11135_v27  ;;  %v11614_v46 = vsel %vm11613_vm12, %v11129_v38, %v11612_v53  ;;  %v11159_v11 = vrot.slane %v11158_v44, 4  ;;  %v11165_v52 = vsel %vm11094_vm4, %v10806_v42, -inf }
 0x497   : > { %v11150_v57 = vmax.f32 %v11148_v47, %v11149_v23  ;;  %v11153_v29 = vmax.f32 %v11151_v32, %v11152_v10  ;;  %v11166_v54 = vrot.slane %v11165_v52, 4  ;;  %v11172_v41 = vsel %vm11094_vm4, %v10808_v39, -inf }
 0x498   : > { %v11616_v16 = vsel %vm11615_vm13, %v11136_v36, %v11614_v46  ;;  %v11160_v9 = vmax.f32 %v11158_v44, %v11159_v11  ;;  %v11173_v8 = vrot.slane %v11172_v41, 4  ;;  %v10704_v2 = vsel %vm6554_vm6, %v10669_v62, -inf  ;;  %v10499_v36 = vpop.f32.mrf.mxu1 }
 0x499   : > { %v11618_v12 = vsel %vm11617_vm14, %v11143_v24, %v11616_v16  ;;  %v11154_v56 = vrot.slane %v11153_v29, 2  ;;  %v11167_v19 = vmax.f32 %v11165_v52, %v11166_v54  ;;  %v10596_v13 = vadd.f32 %v10483_v50, %v18433_v63 }
 0x49a   : > { %v11620_v21 = vsel %vm11619_vm15, %v11150_v57, %v11618_v12  ;;  %v11161_v17 = vrot.slane %v11160_v9, 2  ;;  %v11174_v47 = vmax.f32 %v11172_v41, %v11173_v8  ;;  %v10601_v53 = vadd.f32 %v13426_v33, %v18437_v60 }
 0x49b   : > { %11678 = vst.msk [vmem:[%s18553_s12] sm:$0xff] %vm6554_vm6, %v11620_v21  ;;  %v11155_v45 = vmax.f32 %v11153_v29, %v11154_v56  ;;  %v11168_v62 = vrot.slane %v11167_v19, 2  ;;  %v10635_v42 = vadd.f32 %v18417_v40, %v10596_v13  ;;  %v10599_v43 = vadd.f32 %v10496_v35, %v18441_v25 }
 0x49c   : > { %v11162_v38 = vmax.f32 %v11160_v9, %v11161_v17  ;;  %v11175_v63 = vrot.slane %v11174_v47, 2  ;;  %v10640_v50 = vadd.f32 %v18417_v40, %v10601_v53  ;;  %v10602_v27 = vadd.f32 %v13427_v58, %v18445_v26  ;;  %v13430_v17 = vpop.f32.mrf.mxu1 }
 0x49d   : > { %v11156_v24 = vrot.slane %v11155_v45, 1  ;;  %v11169_v32 = vmax.f32 %v11167_v19, %v11168_v62  ;;  %v10667_v60 = vmax.f32 %v10635_v42, 0.0  ;;  %v10638_v33 = vadd.f32 %v18417_v40, %v10599_v43 }
 0x49e   : > { %v11163_v23 = vrot.slane %v11162_v38, 1  ;;  %v11176_v39 = vmax.f32 %v11174_v47, %v11175_v63  ;;  %v10672_v10 = vmax.f32 %v10640_v50, 0.0  ;;  %v10641_v44 = vadd.f32 %v18417_v40, %v10602_v27 }
 0x49f   : > { %v11157_v46 = vmax.f32 %v11155_v45, %v11156_v24  ;;  %v11170_v11 = vrot.slane %v11169_v32, 1  ;;  %v10703_v25 = vsel %vm6554_vm6, %v10667_v60, -inf  ;;  %v10670_v35 = vmax.f32 %v10638_v33, 0.0 }
 0x4a0   : > { %v11164_v52 = vmax.f32 %v11162_v38, %v11163_v23  ;;  %v11177_v57 = vrot.slane %v11176_v39, 1  ;;  %v10705_v29 = vmax.f32 %v10703_v25, %v10704_v2  ;;  %v10707_v26 = vsel %vm6554_vm6, %v10672_v10, -inf }
 0x4a1   : > { %v11171_v54 = vmax.f32 %v11169_v32, %v11170_v11  ;;  %v10706_v41 = vsel %vm6554_vm6, %v10670_v35, -inf  ;;  %v10673_v16 = vmax.f32 %v10641_v44, 0.0  ;;  %v10600_v9 = vadd.f32 %v10499_v36, %v18449_v0 }
 0x4a2   : > { %v11178_v8 = vmax.f32 %v11176_v39, %v11177_v57  ;;  %v11621_v12 = vsel %vm11607_vm5, %v11164_v52, %v11157_v46  ;;  %v10809_v56 = vcombine.high %v10705_v29, %v10705_v29  ;;  %v10816_v19 = vrot.slane %v10705_v29, %v18420_v1 }
 0x4a3   : > { %v11622_v13 = vsel %vm11609_vm8, %v11171_v54, %v11621_v12  ;;  %v10708_v58 = vmax.f32 %v10706_v41, %v10707_v26  ;;  %v18571_v21 = vsel %vm6554_vm6, %v10673_v16, -inf  ;;  %v10639_v2 = vadd.f32 %v18417_v40, %v10600_v9 }
 0x4a4   : > { %v10823_v47 = vrot.slane %v10809_v56, %v18420_v1  ;;  %v10824_v53 = vcombine.high %v10816_v19, %v10816_v19  ;;  %v11179_v0 = vsel %vm11094_vm4, %v10816_v19, -inf  ;;  %v11623_v45 = vsel %vm11611_vm11, %v11178_v8, %v11622_v13 }
 0x4a5   : > { %v11180_v62 = vrot.slane %v11179_v0, 4  ;;  %v10826_v42 = vcombine.high %v10708_v58, %v10708_v58  ;;  %v10833_v43 = vrot.slane %v10708_v58, %v18420_v1  ;;  %v10671_v38 = vmax.f32 %v10639_v2, 0.0 }
 0x4a6   : > { %v10825_v63 = vcombine.high %v10823_v47, %v10823_v47  ;;  %v11186_v50 = vsel %vm11094_vm4, %v10824_v53, -inf  ;;  %v11193_v27 = vsel %vm11094_vm4, %v10823_v47, -inf  ;;  %v10605_v24 = vadd.f32 %v13430_v17, %v18453_v49 }
 0x4a7   : > { %v11181_v32 = vmax.f32 %v11179_v0, %v11180_v62  ;;  %v11187_v60 = vrot.slane %v11186_v50, 4  ;;  %v11194_v33 = vrot.slane %v11193_v27, 4  ;;  %v10840_v23 = vrot.slane %v10826_v42, %v18420_v1 }
 0x4a8   : > { %v11200_v39 = vsel %vm11094_vm4, %v10825_v63, -inf  ;;  %v10841_v10 = vcombine.high %v10833_v43, %v10833_v43  ;;  %v11207_v44 = vsel %vm11094_vm4, %v10833_v43, -inf  ;;  %v10709_v36 = vsel %vm6554_vm6, %v10671_v38, -inf  ;;  %v10512_v63 = vpop.f32.mrf.mxu1 }
 0x4a9   : > { %v11182_v46 = vrot.slane %v11181_v32, 2  ;;  %v11188_v11 = vmax.f32 %v11186_v50, %v11187_v60  ;;  %v11195_v25 = vmax.f32 %v11193_v27, %v11194_v33  ;;  %v11201_v35 = vrot.slane %v11200_v39, 4 }
 0x4aa   : > { %v10842_v52 = vcombine.high %v10840_v23, %v10840_v23  ;;  %v11208_v57 = vrot.slane %v11207_v44, 4  ;;  %v11214_v49 = vsel %vm11094_vm4, %v10841_v10, -inf  ;;  %v11221_v29 = vsel %vm11094_vm4, %v10840_v23, -inf }
 0x4ab   : > { %v11183_v26 = vmax.f32 %v11181_v32, %v11182_v46  ;;  %v11189_v54 = vrot.slane %v11188_v11, 2  ;;  %v11196_v41 = vrot.slane %v11195_v25, 2  ;;  %v11202_v16 = vmax.f32 %v11200_v39, %v11201_v35 }
 0x4ac   : > { %v11209_v9 = vmax.f32 %v11207_v44, %v11208_v57  ;;  %v11215_v8 = vrot.slane %v11214_v49, 4  ;;  %v11222_v12 = vrot.slane %v11221_v29, 4  ;;  %v11228_v56 = vsel %vm11094_vm4, %v10842_v52, -inf }
 0x4ad   : > { %v11184_v19 = vrot.slane %v11183_v26, 1  ;;  %v11190_v13 = vmax.f32 %v11188_v11, %v11189_v54  ;;  %v11197_v58 = vmax.f32 %v11195_v25, %v11196_v41  ;;  %v11203_v2 = vrot.slane %v11202_v16, 2 }
 0x4ae   : > { %v11210_v17 = vrot.slane %v11209_v9, 2  ;;  %v11216_v47 = vmax.f32 %v11214_v49, %v11215_v8  ;;  %v11223_v53 = vmax.f32 %v11221_v29, %v11222_v12  ;;  %v11229_v0 = vrot.slane %v11228_v56, 4  ;;  %v13431_v29 = vpop.f32.mrf.mxu1 }
 0x4af   : > { %v11185_v62 = vmax.f32 %v11183_v26, %v11184_v19  ;;  %v11191_v42 = vrot.slane %v11190_v13, 1  ;;  %v11198_v43 = vrot.slane %v11197_v58, 1  ;;  %v11204_v38 = vmax.f32 %v11202_v16, %v11203_v2 }
 0x4b0   : > { %v11211_v50 = vmax.f32 %v11209_v9, %v11210_v17  ;;  %v11217_v27 = vrot.slane %v11216_v47, 2  ;;  %v11224_v32 = vrot.slane %v11223_v53, 2  ;;  %v11230_v60 = vmax.f32 %v11228_v56, %v11229_v0  ;;  %v10515_v17 = vpop.f32.mrf.mxu1 }
 0x4b1   : > { %v11192_v33 = vmax.f32 %v11190_v13, %v11191_v42  ;;  %v11199_v23 = vmax.f32 %v11197_v58, %v11198_v43  ;;  %v11205_v39 = vrot.slane %v11204_v38, 1  ;;  %v11624_v10 = vsel %vm11613_vm12, %v11185_v62, %v11623_v45 }
 0x4b2   : > { %v11212_v44 = vrot.slane %v11211_v50, 1  ;;  %v11218_v46 = vmax.f32 %v11216_v47, %v11217_v27  ;;  %v11225_v11 = vmax.f32 %v11223_v53, %v11224_v32  ;;  %v11231_v25 = vrot.slane %v11230_v60, 2 }
 0x4b3   : > { %v11206_v35 = vmax.f32 %v11204_v38, %v11205_v39  ;;  %v11625_v52 = vsel %vm11615_vm13, %v11192_v33, %v11624_v10  ;;  %v10711_v57 = vmax.f32 %v10709_v36, %v18571_v21  ;;  %v10644_v49 = vadd.f32 %v18417_v40, %v10605_v24  ;;  %v13434_v10 = vpop.f32.mrf.mxu1 }
 0x4b4   : > { %v11626_v26 = vsel %vm11617_vm14, %v11199_v23, %v11625_v52  ;;  %v11213_v54 = vmax.f32 %v11211_v50, %v11212_v44  ;;  %v11219_v41 = vrot.slane %v11218_v46, 1  ;;  %v11226_v16 = vrot.slane %v11225_v11, 1 }
 0x4b5   : > { %v11627_v45 = vsel %vm11619_vm15, %v11206_v35, %v11626_v26  ;;  %v11232_v9 = vmax.f32 %v11230_v60, %v11231_v25  ;;  %v10843_v8 = vcombine.high %v10711_v57, %v10711_v57  ;;  %v10850_v12 = vrot.slane %v10711_v57, %v18420_v1 }
 0x4b6   : > { %11679 = vst.msk [vmem:[%s18553_s12 + $0x8] sm:$0xff] %vm6554_vm6, %v11627_v45  ;;  %v11220_v56 = vmax.f32 %v11218_v46, %v11219_v41  ;;  %v11227_v19 = vmax.f32 %v11225_v11, %v11226_v16  ;;  %v10676_v13 = vmax.f32 %v10644_v49, 0.0  ;;  %v10603_v21 = vadd.f32 %v10512_v63, %v18458_v51 }
 0x4b7   : > { %v11233_v24 = vrot.slane %v11232_v9, 1  ;;  %v10857_v36 = vrot.slane %v10843_v8, %v18420_v1  ;;  %v10858_v58 = vcombine.high %v10850_v12, %v10850_v12  ;;  %v11235_v2 = vsel %vm11094_vm4, %v10850_v12, -inf }
 0x4b8   : > { %v11628_v47 = vsel %vm11607_vm5, %v11220_v56, %v11213_v54  ;;  %v11236_v53 = vrot.slane %v11235_v2, 4  ;;  %v10713_v0 = vsel %vm6554_vm6, %v10676_v13, -inf  ;;  %v10642_v62 = vadd.f32 %v18417_v40, %v10603_v21 }
 0x4b9   : > { %v11234_v42 = vmax.f32 %v11232_v9, %v11233_v24  ;;  %v11629_v43 = vsel %vm11609_vm8, %v11227_v19, %v11628_v47  ;;  %v10859_v38 = vcombine.high %v10857_v36, %v10857_v36  ;;  %v11242_v51 = vsel %vm11094_vm4, %v10858_v58, -inf }
 0x4ba   : > { %v11237_v63 = vmax.f32 %v11235_v2, %v11236_v53  ;;  %v11243_v50 = vrot.slane %v11242_v51, 4  ;;  %v11249_v27 = vsel %vm11094_vm4, %v10857_v36, -inf  ;;  %v10674_v32 = vmax.f32 %v10642_v62, 0.0  ;;  %v10528_v62 = vpop.f32.mrf.mxu1 }
 0x4bb   : > { %v11250_v60 = vrot.slane %v11249_v27, 4  ;;  %v11256_v33 = vsel %vm11094_vm4, %v10859_v38, -inf  ;;  %v11630_v23 = vsel %vm11611_vm11, %v11234_v42, %v11629_v43  ;;  %v10606_v39 = vadd.f32 %v13431_v29, %v18462_v22 }
 0x4bc   : > { %v11238_v44 = vrot.slane %v11237_v63, 2  ;;  %v11244_v46 = vmax.f32 %v11242_v51, %v11243_v50  ;;  %v11257_v11 = vrot.slane %v11256_v33, 4  ;;  %v10712_v25 = vsel %vm6554_vm6, %v10674_v32, -inf }
 0x4bd   : > { %v11251_v35 = vmax.f32 %v11249_v27, %v11250_v60  ;;  %v10714_v52 = vmax.f32 %v10712_v25, %v10713_v0  ;;  %v10645_v57 = vadd.f32 %v18417_v40, %v10606_v39  ;;  %v10604_v49 = vadd.f32 %v10515_v17, %v18466_v6 }
 0x4be   : > { %v11239_v26 = vmax.f32 %v11237_v63, %v11238_v44  ;;  %v11245_v54 = vrot.slane %v11244_v46, 2  ;;  %v11258_v41 = vmax.f32 %v11256_v33, %v11257_v11  ;;  %v10609_v16 = vadd.f32 %v13434_v10, %v18470_v37 }
 0x4bf   : > { %v11252_v45 = vrot.slane %v11251_v35, 2  ;;  %v10860_v9 = vcombine.high %v10714_v52, %v10714_v52  ;;  %v10867_v22 = vrot.slane %v10714_v52, %v18420_v1  ;;  %v10677_v29 = vmax.f32 %v10645_v57, 0.0 }
 0x4c0   : > { %v11240_v8 = vrot.slane %v11239_v26, 1  ;;  %v11246_v12 = vmax.f32 %v11244_v46, %v11245_v54  ;;  %v11259_v56 = vrot.slane %v11258_v41, 2  ;;  %v10643_v19 = vadd.f32 %v18417_v40, %v10604_v49 }
 0x4c1   : > { %v11253_v13 = vmax.f32 %v11251_v35, %v11252_v45  ;;  %v10874_v21 = vrot.slane %v10860_v9, %v18420_v1  ;;  %v10875_v24 = vcombine.high %v10867_v22, %v10867_v22  ;;  %v11263_v6 = vsel %vm11094_vm4, %v10867_v22, -inf  ;;  %v13435_v35 = vpop.f32.mrf.mxu1 }
 0x4c2   : > { %v11241_v36 = vmax.f32 %v11239_v26, %v11240_v8  ;;  %v11247_v58 = vrot.slane %v11246_v12, 1  ;;  %v11260_v2 = vmax.f32 %v11258_v41, %v11259_v56  ;;  %v11264_v37 = vrot.slane %v11263_v6, 4 }
 0x4c3   : > { %v11254_v17 = vrot.slane %v11253_v13, 1  ;;  %v10876_v47 = vcombine.high %v10874_v21, %v10874_v21  ;;  %v11270_v53 = vsel %vm11094_vm4, %v10875_v24, -inf  ;;  %v11277_v0 = vsel %vm11094_vm4, %v10874_v21, -inf }
 0x4c4   : > { %v11248_v42 = vmax.f32 %v11246_v12, %v11247_v58  ;;  %v11261_v43 = vrot.slane %v11260_v2, 1  ;;  %v11631_v38 = vsel %vm11613_vm12, %v11241_v36, %v11630_v23  ;;  %v11265_v51 = vmax.f32 %v11263_v6, %v11264_v37 }
 0x4c5   : > { %v11255_v63 = vmax.f32 %v11253_v13, %v11254_v17  ;;  %v11271_v50 = vrot.slane %v11270_v53, 4  ;;  %v11278_v27 = vrot.slane %v11277_v0, 4  ;;  %v11284_v32 = vsel %vm11094_vm4, %v10876_v47, -inf }
 0x4c6   : > { %v11262_v60 = vmax.f32 %v11260_v2, %v11261_v43  ;;  %v11632_v33 = vsel %vm11615_vm13, %v11248_v42, %v11631_v38  ;;  %v11266_v39 = vrot.slane %v11265_v51, 2  ;;  %v11285_v10 = vrot.slane %v11284_v32, 4 }
 0x4c7   : > { %v11633_v44 = vsel %vm11617_vm14, %v11255_v63, %v11632_v33  ;;  %v11272_v46 = vmax.f32 %v11270_v53, %v11271_v50  ;;  %v11279_v11 = vmax.f32 %v11277_v0, %v11278_v27  ;;  %v10716_v25 = vsel %vm6554_vm6, %v10677_v29, -inf  ;;  %v10531_v53 = vpop.f32.mrf.mxu1 }
 0x4c8   : > { %v11634_v23 = vsel %vm11619_vm15, %v11262_v60, %v11633_v44  ;;  %v11267_v52 = vmax.f32 %v11265_v51, %v11266_v39  ;;  %v11286_v57 = vmax.f32 %v11284_v32, %v11285_v10  ;;  %v10675_v49 = vmax.f32 %v10643_v19, 0.0 }
 0x4c9   : > { %11680 = vst.msk [vmem:[%s18553_s12 + $0x10] sm:$0xff] %vm6554_vm6, %v11634_v23  ;;  %v11273_v26 = vrot.slane %v11272_v46, 2  ;;  %v11280_v54 = vrot.slane %v11279_v11, 2  ;;  %v10648_v41 = vadd.f32 %v18417_v40, %v10609_v16  ;;  %v10607_v45 = vadd.f32 %v10528_v62, %v18474_v28 }
 0x4ca   : > { %v11268_v9 = vrot.slane %v11267_v52, 1  ;;  %v11287_v22 = vrot.slane %v11286_v57, 2  ;;  %v10715_v8 = vsel %vm6554_vm6, %v10675_v49, -inf  ;;  %v10610_v29 = vadd.f32 %v13435_v35, %v18479_v30 }
 0x4cb   : > { %v11274_v12 = vmax.f32 %v11272_v46, %v11273_v26  ;;  %v11281_v56 = vmax.f32 %v11279_v11, %v11280_v54  ;;  %v10717_v13 = vmax.f32 %v10715_v8, %v10716_v25  ;;  %v10680_v21 = vmax.f32 %v10648_v41, 0.0  ;;  %v13438_v11 = vpop.f32.mrf.mxu1 }
 0x4cc   : > { %v11269_v24 = vmax.f32 %v11267_v52, %v11268_v9  ;;  %v11288_v19 = vmax.f32 %v11286_v57, %v11287_v22  ;;  %v10646_v6 = vadd.f32 %v18417_v40, %v10607_v45  ;;  %v10649_v36 = vadd.f32 %v18417_v40, %v10610_v29 }
 0x4cd   : > { %v11275_v58 = vrot.slane %v11274_v12, 1  ;;  %v11282_v16 = vrot.slane %v11281_v56, 1  ;;  %v10877_v2 = vcombine.high %v10717_v13, %v10717_v13  ;;  %v10884_v28 = vrot.slane %v10717_v13, %v18420_v1 }
 0x4ce   : > { %v11289_v37 = vrot.slane %v11288_v19, 1  ;;  %v10719_v17 = vsel %vm6554_vm6, %v10680_v21, -inf  ;;  %v10678_v47 = vmax.f32 %v10646_v6, 0.0  ;;  %v10681_v30 = vmax.f32 %v10649_v36, 0.0 }
 0x4cf   : > { %v11276_v0 = vmax.f32 %v11274_v12, %v11275_v58  ;;  %v11283_v62 = vmax.f32 %v11281_v56, %v11282_v16  ;;  %v10891_v42 = vrot.slane %v10877_v2, %v18420_v1  ;;  %v10892_v43 = vcombine.high %v10884_v28, %v10884_v28 }
 0x4d0   : > { %v11290_v38 = vmax.f32 %v11288_v19, %v11289_v37  ;;  %v11291_v51 = vsel %vm11094_vm4, %v10884_v28, -inf  ;;  %v10718_v63 = vsel %vm6554_vm6, %v10678_v47, -inf  ;;  %v18639_v50 = vsel %vm6554_vm6, %v10681_v30, -inf }
 0x4d1   : > { %v11635_v27 = vsel %vm11607_vm5, %v11276_v0, %v11269_v24  ;;  %v10893_v32 = vcombine.high %v10891_v42, %v10891_v42  ;;  %v11292_v60 = vrot.slane %v11291_v51, 4  ;;  %v11298_v33 = vsel %vm11094_vm4, %v10892_v43, -inf }
 0x4d2   : > { %v11636_v39 = vsel %vm11609_vm8, %v11283_v62, %v11635_v27  ;;  %v11299_v10 = vrot.slane %v11298_v33, 4  ;;  %v11305_v44 = vsel %vm11094_vm4, %v10891_v42, -inf  ;;  %v10720_v46 = vmax.f32 %v10718_v63, %v10719_v17  ;;  %v10544_v27 = vpop.f32.mrf.mxu1 }
 0x4d3   : > { %v11293_v25 = vmax.f32 %v11291_v51, %v11292_v60  ;;  %v11306_v35 = vrot.slane %v11305_v44, 4  ;;  %v11312_v23 = vsel %vm11094_vm4, %v10893_v32, -inf  ;;  %v11637_v52 = vsel %vm11611_vm11, %v11290_v38, %v11636_v39 }
 0x4d4   : > { %v11300_v57 = vmax.f32 %v11298_v33, %v11299_v10  ;;  %v11313_v49 = vrot.slane %v11312_v23, 4  ;;  %v10894_v26 = vcombine.high %v10720_v46, %v10720_v46  ;;  %v10901_v54 = vrot.slane %v10720_v46, %v18420_v1 }
 0x4d5   : > { %v11294_v41 = vrot.slane %v11293_v25, 2  ;;  %v11307_v45 = vmax.f32 %v11305_v44, %v11306_v35  ;;  %v10608_v9 = vadd.f32 %v10531_v53, %v18488_v59  ;;  %v10613_v22 = vadd.f32 %v13438_v11, %v18496_v34 }
 0x4d6   : > { %v11301_v8 = vrot.slane %v11300_v57, 2  ;;  %v11314_v29 = vmax.f32 %v11312_v23, %v11313_v49  ;;  %v10908_v12 = vrot.slane %v10894_v26, %v18420_v1  ;;  %v10909_v56 = vcombine.high %v10901_v54, %v10901_v54 }
 0x4d7   : > { %v11295_v13 = vmax.f32 %v11293_v25, %v11294_v41  ;;  %v11308_v21 = vrot.slane %v11307_v45, 2  ;;  %v11319_v24 = vsel %vm11094_vm4, %v10901_v54, -inf  ;;  %v10647_v19 = vadd.f32 %v18417_v40, %v10608_v9 }
 0x4d8   : > { %v11302_v6 = vmax.f32 %v11300_v57, %v11301_v8  ;;  %v11315_v36 = vrot.slane %v11314_v29, 2  ;;  %v10910_v58 = vcombine.high %v10908_v12, %v10908_v12  ;;  %v11320_v16 = vrot.slane %v11319_v24, 4 }
 0x4d9   : > { %v11296_v2 = vrot.slane %v11295_v13, 1  ;;  %v11309_v28 = vmax.f32 %v11307_v45, %v11308_v21  ;;  %v11326_v59 = vsel %vm11094_vm4, %v10909_v56, -inf  ;;  %v11333_v34 = vsel %vm11094_vm4, %v10908_v12, -inf }
 0x4da   : > { %v11303_v37 = vrot.slane %v11302_v6, 1  ;;  %v11316_v17 = vmax.f32 %v11314_v29, %v11315_v36  ;;  %v11321_v47 = vmax.f32 %v11319_v24, %v11320_v16  ;;  %v11327_v30 = vrot.slane %v11326_v59, 4 }
 0x4db   : > { %v11297_v53 = vmax.f32 %v11295_v13, %v11296_v2  ;;  %v11310_v0 = vrot.slane %v11309_v28, 1  ;;  %v11334_v62 = vrot.slane %v11333_v34, 4  ;;  %v11340_v42 = vsel %vm11094_vm4, %v10910_v58, -inf }
 0x4dc   : > { %v11304_v43 = vmax.f32 %v11302_v6, %v11303_v37  ;;  %v11317_v38 = vrot.slane %v11316_v17, 1  ;;  %v11322_v51 = vrot.slane %v11321_v47, 2  ;;  %v11328_v63 = vmax.f32 %v11326_v59, %v11327_v30 }
 0x4dd   : > { %v11311_v32 = vmax.f32 %v11309_v28, %v11310_v0  ;;  %v11638_v60 = vsel %vm11613_vm12, %v11297_v53, %v11637_v52  ;;  %v11335_v33 = vmax.f32 %v11333_v34, %v11334_v62  ;;  %v11341_v39 = vrot.slane %v11340_v42, 4  ;;  %v13439_v52 = vpop.f32.mrf.mxu1 }
 0x4de   : > { %v11318_v10 = vmax.f32 %v11316_v17, %v11317_v38  ;;  %v11639_v44 = vsel %vm11615_vm13, %v11304_v43, %v11638_v60  ;;  %v11323_v46 = vmax.f32 %v11321_v47, %v11322_v51  ;;  %v11329_v11 = vrot.slane %v11328_v63, 2 }
 0x4df   : > { %v11640_v25 = vsel %vm11617_vm14, %v11311_v32, %v11639_v44  ;;  %v11336_v35 = vrot.slane %v11335_v33, 2  ;;  %v11342_v23 = vmax.f32 %v11340_v42, %v11341_v39  ;;  %v10679_v57 = vmax.f32 %v10647_v19, 0.0  ;;  %v18670_v28 = vpop.f32.mrf.mxu1 }
 0x4e0   : > { %v11641_v49 = vsel %vm11619_vm15, %v11318_v10, %v11640_v25  ;;  %v11324_v26 = vrot.slane %v11323_v46, 1  ;;  %v11330_v54 = vmax.f32 %v11328_v63, %v11329_v11  ;;  %v10652_v41 = vadd.f32 %v18417_v40, %v10613_v22 }
 0x4e1   : > { %11681 = vst.msk [vmem:[%s18553_s12 + $0x18] sm:$0xff] %vm6554_vm6, %v11641_v49  ;;  %v11337_v45 = vmax.f32 %v11335_v33, %v11336_v35  ;;  %v11343_v9 = vrot.slane %v11342_v23, 2  ;;  %v10721_v8 = vsel %vm6554_vm6, %v10679_v57, -inf  ;;  %v10611_v29 = vadd.f32 %v10544_v27, %v18500_v5 }
 0x4e2   : > { %v11325_v12 = vmax.f32 %v11323_v46, %v11324_v26  ;;  %v11331_v56 = vrot.slane %v11330_v54, 1  ;;  %v10723_v13 = vmax.f32 %v10721_v8, %v18639_v50  ;;  %v10684_v21 = vmax.f32 %v10652_v41, 0.0 }
 0x4e3   : > { %v11338_v24 = vrot.slane %v11337_v45, 1  ;;  %v11344_v19 = vmax.f32 %v11342_v23, %v11343_v9  ;;  %v10650_v6 = vadd.f32 %v18417_v40, %v10611_v29  ;;  %v10614_v22 = vadd.f32 %v13439_v52, %v18505_v3 }
 0x4e4   : > { %v11332_v36 = vmax.f32 %v11330_v54, %v11331_v56  ;;  %v10911_v58 = vcombine.high %v10723_v13, %v10723_v13  ;;  %v10918_v16 = vrot.slane %v10723_v13, %v18420_v1  ;;  %v10725_v2 = vsel %vm6554_vm6, %v10684_v21, -inf }
 0x4e5   : > { %v11339_v5 = vmax.f32 %v11337_v45, %v11338_v24  ;;  %v11345_v59 = vrot.slane %v11344_v19, 1  ;;  %v10682_v34 = vmax.f32 %v10650_v6, 0.0  ;;  %v10653_v50 = vadd.f32 %v18417_v40, %v10614_v22  ;;  %v18680_v40 = vpop.f32.mrf.mxu1 }
 0x4e6   : > { %v11642_v37 = vsel %vm11607_vm5, %v11332_v36, %v11325_v12  ;;  %v10925_v17 = vrot.slane %v10911_v58, %v18420_v1  ;;  %v10926_v47 = vcombine.high %v10918_v16, %v10918_v16  ;;  %v11347_v3 = vsel %vm11094_vm4, %v10918_v16, -inf }
 0x4e7   : > { %v11346_v30 = vmax.f32 %v11344_v19, %v11345_v59  ;;  %v11643_v53 = vsel %vm11609_vm8, %v11339_v5, %v11642_v37  ;;  %v11348_v0 = vrot.slane %v11347_v3, 4  ;;  %v10724_v62 = vsel %vm6554_vm6, %v10682_v34, -inf  ;;  %v10560_v54 = vpop.f32.mrf.mxu1 }
 0x4e8   : > { %v10927_v42 = vcombine.high %v10925_v17, %v10925_v17  ;;  %v11354_v43 = vsel %vm11094_vm4, %v10926_v47, -inf  ;;  %v11361_v38 = vsel %vm11094_vm4, %v10925_v17, -inf  ;;  %v10726_v51 = vmax.f32 %v10724_v62, %v10725_v2 }
 0x4e9   : > { %v11349_v63 = vmax.f32 %v11347_v3, %v11348_v0  ;;  %v11355_v27 = vrot.slane %v11354_v43, 4  ;;  %v11362_v32 = vrot.slane %v11361_v38, 4  ;;  %v11644_v60 = vsel %vm11611_vm11, %v11346_v30, %v11643_v53  ;;  %v13443_v16 = vpop.f32.mrf.mxu1 }
 0x4ea   : > { %v11368_v33 = vsel %vm11094_vm4, %v10927_v42, -inf  ;;  %v10928_v39 = vcombine.high %v10726_v51, %v10726_v51  ;;  %v10935_v10 = vrot.slane %v10726_v51, %v18420_v1  ;;  %v10685_v44 = vmax.f32 %v10653_v50, 0.0 }
 0x4eb   : > { %v11350_v46 = vrot.slane %v11349_v63, 2  ;;  %v11356_v11 = vmax.f32 %v11354_v43, %v11355_v27  ;;  %v11363_v25 = vmax.f32 %v11361_v38, %v11362_v32  ;;  %v11369_v35 = vrot.slane %v11368_v33, 4  ;;  %v10563_v51 = vpop.f32.mrf.mxu1 }
 0x4ec   : > { %v10942_v23 = vrot.slane %v10928_v39, %v18420_v1  ;;  %v10943_v57 = vcombine.high %v10935_v10, %v10935_v10  ;;  %v11375_v49 = vsel %vm11094_vm4, %v10935_v10, -inf  ;;  %v18688_v26 = vsel %vm6554_vm6, %v10685_v44, -inf }
 0x4ed   : > { %v11351_v41 = vmax.f32 %v11349_v63, %v11350_v46  ;;  %v11357_v52 = vrot.slane %v11356_v11, 2  ;;  %v11364_v45 = vrot.slane %v11363_v25, 2  ;;  %v11370_v9 = vmax.f32 %v11368_v33, %v11369_v35  ;;  %v19199_v33 = vld [vmem:[#allocation60_spill] sm:$0xff]  ;;  %v18704_v35 = vld [vmem:[%s18858_s4] ss:$0 sm:$0xff] }
 0x4ee   : > { %v10944_v8 = vcombine.high %v10942_v23, %v10942_v23  ;;  %v11376_v29 = vrot.slane %v11375_v49, 4  ;;  %v11382_v12 = vsel %vm11094_vm4, %v10943_v57, -inf  ;;  %v11389_v56 = vsel %vm11094_vm4, %v10942_v23, -inf }
 0x4ef   : > { %v11352_v13 = vrot.slane %v11351_v41, 1  ;;  %v11358_v21 = vmax.f32 %v11356_v11, %v11357_v52  ;;  %v11365_v24 = vmax.f32 %v11363_v25, %v11364_v45  ;;  %v11371_v19 = vrot.slane %v11370_v9, 2  ;;  %v13446_v45 = vpop.f32.mrf.mxu1 }
 0x4f0   : > { %v11377_v6 = vmax.f32 %v11375_v49, %v11376_v29  ;;  %v11383_v22 = vrot.slane %v11382_v12, 4  ;;  %v11390_v36 = vrot.slane %v11389_v56, 4  ;;  %v11396_v58 = vsel %vm11094_vm4, %v10944_v8, -inf  ;;  %v19200_v49 = vld [vmem:[#allocation59_spill] sm:$0xff] }
 0x4f1   : > { %v11353_v2 = vmax.f32 %v11351_v41, %v11352_v13  ;;  %v11359_v5 = vrot.slane %v11358_v21, 1  ;;  %v11366_v59 = vrot.slane %v11365_v24, 1  ;;  %v11372_v34 = vmax.f32 %v11370_v9, %v11371_v19  ;;  %v19201_v41 = vld [vmem:[#allocation61_spill] sm:$0xff] }
 0x4f2   : > { %v11378_v50 = vrot.slane %v11377_v6, 2  ;;  %v11384_v37 = vmax.f32 %v11382_v12, %v11383_v22  ;;  %v11391_v17 = vmax.f32 %v11389_v56, %v11390_v36  ;;  %v11397_v47 = vrot.slane %v11396_v58, 4 }
 0x4f3   : > { %v11360_v3 = vmax.f32 %v11358_v21, %v11359_v5  ;;  %v11367_v30 = vmax.f32 %v11365_v24, %v11366_v59  ;;  %v11373_v53 = vrot.slane %v11372_v34, 1  ;;  %v11645_v0 = vsel %vm11613_vm12, %v11353_v2, %v11644_v60  ;;  %v10576_v59 = vpop.f32.mrf.mxu1 }
 0x4f4   : > { %v11379_v62 = vmax.f32 %v11377_v6, %v11378_v50  ;;  %v11385_v42 = vrot.slane %v11384_v37, 2  ;;  %v11392_v43 = vrot.slane %v11391_v17, 2  ;;  %v11398_v38 = vmax.f32 %v11396_v58, %v11397_v47 }
 0x4f5   : > { %v11374_v63 = vmax.f32 %v11372_v34, %v11373_v53  ;;  %v11646_v27 = vsel %vm11615_vm13, %v11360_v3, %v11645_v0  ;;  %v10612_v32 = vadd.f32 %v18670_v28, %v18511_v15  ;;  %v10147_v39 = vadd.f32 %v19199_v33, %v18378_v20 }
 0x4f6   : > { %v11647_v10 = vsel %vm11617_vm14, %v11367_v30, %v11646_v27  ;;  %v11380_v44 = vrot.slane %v11379_v62, 1  ;;  %v11386_v46 = vmax.f32 %v11384_v37, %v11385_v42  ;;  %v11393_v60 = vmax.f32 %v11391_v17, %v11392_v43 }
 0x4f7   : > { %v11648_v11 = vsel %vm11619_vm15, %v11374_v63, %v11647_v10  ;;  %v11399_v25 = vrot.slane %v11398_v38, 2  ;;  %v10651_v23 = vadd.f32 %v18704_v35, %v10612_v32  ;;  %v10617_v15 = vadd.f32 %v18680_v40, %v10147_v39 }
 0x4f8   : > { %11682 = vst.msk [vmem:[%s18553_s12 + $0x20] sm:$0xff] %vm6554_vm6, %v11648_v11  ;;  %v11381_v20 = vmax.f32 %v11379_v62, %v11380_v44  ;;  %v11387_v28 = vrot.slane %v11386_v46, 1  ;;  %v11394_v57 = vrot.slane %v11393_v60, 1  ;;  %v10145_v52 = vadd.f32 %v19201_v41, %v19200_v49 }
 0x4f9   : > { %v11400_v9 = vmax.f32 %v11398_v38, %v11399_v25  ;;  %v10683_v8 = vmax.f32 %v10651_v23, 0.0  ;;  %v10656_v29 = vadd.f32 %v18704_v35, %v10617_v15  ;;  %v10148_v12 = vadd.f32 %v18393_v31, %v18386_v55 }
 0x4fa   : > { %v11388_v56 = vmax.f32 %v11386_v46, %v11387_v28  ;;  %v11395_v13 = vmax.f32 %v11393_v60, %v11394_v57  ;;  %v10615_v21 = vadd.f32 %v10560_v54, %v10145_v52  ;;  %v10146_v40 = vadd.f32 %v18406_v48, %v18389_v7 }
 0x4fb   : > { %v11401_v24 = vrot.slane %v11400_v9, 1  ;;  %v10727_v19 = vsel %vm6554_vm6, %v10683_v8, -inf  ;;  %v10688_v6 = vmax.f32 %v10656_v29, 0.0  ;;  %v10618_v22 = vadd.f32 %v13443_v16, %v10148_v12 }
 0x4fc   : > { %v11649_v36 = vsel %vm11607_vm5, %v11388_v56, %v11381_v20  ;;  %v10729_v58 = vmax.f32 %v10727_v19, %v18688_v26  ;;  %v10654_v2 = vadd.f32 %v18704_v35, %v10615_v21  ;;  %v10616_v5 = vadd.f32 %v10563_v51, %v10146_v40 }
 0x4fd   : > { %v11402_v55 = vmax.f32 %v11400_v9, %v11401_v24  ;;  %v11650_v31 = vsel %vm11609_vm8, %v11395_v13, %v11649_v36  ;;  %v10731_v54 = vsel %vm6554_vm6, %v10688_v6, -inf  ;;  %v10657_v7 = vadd.f32 %v18704_v35, %v10618_v22 }
 0x4fe   : > { %v10945_v48 = vcombine.high %v10729_v58, %v10729_v58  ;;  %v10952_v34 = vrot.slane %v10729_v58, %v18420_v1  ;;  %v10686_v50 = vmax.f32 %v10654_v2, 0.0  ;;  %v10655_v16 = vadd.f32 %v18704_v35, %v10616_v5 }
 0x4ff   : > { %v11651_v37 = vsel %vm11611_vm11, %v11402_v55, %v11650_v31  ;;  %v10689_v26 = vmax.f32 %v10657_v7, 0.0  ;;  %v10621_v17 = vadd.f32 %v13446_v45, %v18481_v4  ;;  %v18729_v47 = vadd.f32 %v10576_v59, %v18483_v14 }
 0x500   : > { %v10959_v3 = vrot.slane %v10945_v48, %v18420_v1  ;;  %v10960_v30 = vcombine.high %v10952_v34, %v10952_v34  ;;  %v11403_v53 = vsel %vm11094_vm4, %v10952_v34, -inf  ;;  %v10730_v0 = vsel %vm6554_vm6, %v10686_v50, -inf }
 0x501   : > { %v11404_v62 = vrot.slane %v11403_v53, 4  ;;  %v10732_v42 = vmax.f32 %v10730_v0, %v10731_v54  ;;  %v10734_v43 = vsel %vm6554_vm6, %v10689_v26, -inf  ;;  %v10687_v38 = vmax.f32 %v10655_v16, 0.0 }
 0x502   : > { %v10961_v51 = vcombine.high %v10959_v3, %v10959_v3  ;;  %v11410_v63 = vsel %vm11094_vm4, %v10960_v30, -inf  ;;  %v11417_v4 = vsel %vm11094_vm4, %v10959_v3, -inf  ;;  %v18738_v14 = vadd.f32 %v18704_v35, %v10621_v17 }
 0x503   : > { %v11405_v27 = vmax.f32 %v11403_v53, %v11404_v62  ;;  %v11411_v32 = vrot.slane %v11410_v63, 4  ;;  %v11418_v33 = vrot.slane %v11417_v4, 4  ;;  %v10962_v39 = vcombine.high %v10732_v42, %v10732_v42 }
 0x504   : > { %v11424_v10 = vsel %vm11094_vm4, %v10961_v51, -inf  ;;  %v10969_v44 = vrot.slane %v10732_v42, %v18420_v1  ;;  %v10733_v46 = vsel %vm6554_vm6, %v10687_v38, -inf  ;;  %v10692_v60 = vmax.f32 %v18738_v14, 0.0 }
 0x505   : > { %v11406_v11 = vrot.slane %v11405_v27, 2  ;;  %v11412_v25 = vmax.f32 %v11410_v63, %v11411_v32  ;;  %v11419_v23 = vmax.f32 %v11417_v4, %v11418_v33  ;;  %v11425_v15 = vrot.slane %v11424_v10, 4 }
 0x506   : > { %v10976_v20 = vrot.slane %v10962_v39, %v18420_v1  ;;  %v10977_v28 = vcombine.high %v10969_v44, %v10969_v44  ;;  %v11431_v57 = vsel %vm11094_vm4, %v10969_v44, -inf  ;;  %v10735_v49 = vmax.f32 %v10733_v46, %v10734_v43  ;;  %v13447_v46 = vpop.f32.mrf.mxu1 }
 0x507   : > { %v11407_v41 = vmax.f32 %v11405_v27, %v11406_v11  ;;  %v11413_v52 = vrot.slane %v11412_v25, 2  ;;  %v11420_v45 = vrot.slane %v11419_v23, 2  ;;  %v11426_v9 = vmax.f32 %v11424_v10, %v11425_v15  ;;  %v10109_v11 = vpop.f32.mrf.mxu0 }
 0x508   : > { %v10978_v8 = vcombine.high %v10976_v20, %v10976_v20  ;;  %v11432_v29 = vrot.slane %v11431_v57, 4  ;;  %v11438_v12 = vsel %vm11094_vm4, %v10977_v28, -inf  ;;  %v11445_v56 = vsel %vm11094_vm4, %v10976_v20, -inf }
 0x509   : > { %v11408_v13 = vrot.slane %v11407_v41, 1  ;;  %v11414_v21 = vmax.f32 %v11412_v25, %v11413_v52  ;;  %v11421_v40 = vmax.f32 %v11419_v23, %v11420_v45  ;;  %v11427_v24 = vrot.slane %v11426_v9, 2 }
 0x50a   : > { %v11433_v19 = vmax.f32 %v11431_v57, %v11432_v29  ;;  %v11439_v6 = vrot.slane %v11438_v12, 4  ;;  %v11446_v22 = vrot.slane %v11445_v56, 4  ;;  %v11452_v36 = vsel %vm11094_vm4, %v10978_v8, -inf }
 0x50b   : > { %v11409_v58 = vmax.f32 %v11407_v41, %v11408_v13  ;;  %v11415_v2 = vrot.slane %v11414_v21, 1  ;;  %v11422_v5 = vrot.slane %v11421_v40, 1  ;;  %v11428_v59 = vmax.f32 %v11426_v9, %v11427_v24 }
 0x50c   : > { %v11434_v55 = vrot.slane %v11433_v19, 2  ;;  %v11440_v31 = vmax.f32 %v11438_v12, %v11439_v6  ;;  %v11447_v54 = vmax.f32 %v11445_v56, %v11446_v22  ;;  %v11453_v7 = vrot.slane %v11452_v36, 4 }
 0x50d   : > { %v11416_v48 = vmax.f32 %v11414_v21, %v11415_v2  ;;  %v11423_v34 = vmax.f32 %v11421_v40, %v11422_v5  ;;  %v11429_v50 = vrot.slane %v11428_v59, 1  ;;  %v11652_v16 = vsel %vm11613_vm12, %v11409_v58, %v11651_v37  ;;  %v10579_v21 = vpop.f32.mrf.mxu1 }
 0x50e   : > { %v11435_v26 = vmax.f32 %v11433_v19, %v11434_v55  ;;  %v11441_v17 = vrot.slane %v11440_v31, 2  ;;  %v11448_v3 = vrot.slane %v11447_v54, 2  ;;  %v11454_v30 = vmax.f32 %v11452_v36, %v11453_v7 }
 0x50f   : > { %v11430_v53 = vmax.f32 %v11428_v59, %v11429_v50  ;;  %v11653_v0 = vsel %vm11615_vm13, %v11416_v48, %v11652_v16  ;;  %v10979_v62 = vcombine.high %v10735_v49, %v10735_v49  ;;  %v10986_v42 = vrot.slane %v10735_v49, %v18420_v1 }
 0x510   : > { %v11654_v43 = vsel %vm11617_vm14, %v11423_v34, %v11653_v0  ;;  %v11436_v38 = vrot.slane %v11435_v26, 1  ;;  %v11442_v51 = vmax.f32 %v11440_v31, %v11441_v17  ;;  %v11449_v63 = vmax.f32 %v11447_v54, %v11448_v3 }
 0x511   : > { %v11655_v4 = vsel %vm11619_vm15, %v11430_v53, %v11654_v43  ;;  %v11455_v27 = vrot.slane %v11454_v30, 2  ;;  %v10993_v37 = vrot.slane %v10979_v62, %v18420_v1  ;;  %v10994_v32 = vcombine.high %v10986_v42, %v10986_v42 }
 0x512   : > { %11683 = vst.msk [vmem:[%s18553_s12 + $0x28] sm:$0xff] %vm6554_vm6, %v11655_v4  ;;  %v11437_v33 = vmax.f32 %v11435_v26, %v11436_v38  ;;  %v11443_v39 = vrot.slane %v11442_v51, 1  ;;  %v11450_v10 = vrot.slane %v11449_v63, 1  ;;  %v11459_v44 = vsel %vm11094_vm4, %v10986_v42, -inf }
 0x513   : > { %v11456_v25 = vmax.f32 %v11454_v30, %v11455_v27  ;;  %v10995_v23 = vcombine.high %v10993_v37, %v10993_v37  ;;  %v11460_v15 = vrot.slane %v11459_v44, 4  ;;  %v11466_v20 = vsel %vm11094_vm4, %v10994_v32, -inf }
 0x514   : > { %v11444_v28 = vmax.f32 %v11442_v51, %v11443_v39  ;;  %v11451_v57 = vmax.f32 %v11449_v63, %v11450_v10  ;;  %v11467_v49 = vrot.slane %v11466_v20, 4  ;;  %v11473_v41 = vsel %vm11094_vm4, %v10993_v37, -inf }
 0x515   : > { %v11457_v52 = vrot.slane %v11456_v25, 1  ;;  %v11461_v45 = vmax.f32 %v11459_v44, %v11460_v15  ;;  %v11474_v9 = vrot.slane %v11473_v41, 4  ;;  %v11480_v8 = vsel %vm11094_vm4, %v10995_v23, -inf }
 0x516   : > { %v10150_v29 = vadd.f32 %v10109_v11, %v18411_v18  ;;  %v11656_v12 = vsel %vm11607_vm5, %v11444_v28, %v11437_v33  ;;  %v11468_v56 = vmax.f32 %v11466_v20, %v11467_v49  ;;  %v11481_v13 = vrot.slane %v11480_v8, 4 }
 0x517   : > { %v11458_v40 = vmax.f32 %v11456_v25, %v11457_v52  ;;  %v11657_v24 = vsel %vm11609_vm8, %v11451_v57, %v11656_v12  ;;  %v11462_v19 = vrot.slane %v11461_v45, 2  ;;  %v11475_v6 = vmax.f32 %v11473_v41, %v11474_v9 }
 0x518   : > { %v11469_v22 = vrot.slane %v11468_v56, 2  ;;  %v11482_v36 = vmax.f32 %v11480_v8, %v11481_v13  ;;  %v10658_v58 = vadd.f32 %v18704_v35, %v18729_v47  ;;  %v10622_v2 = vadd.f32 %v13447_v46, %v18492_v61 }
 0x519   : > { %v11463_v5 = vmax.f32 %v11461_v45, %v11462_v19  ;;  %v11476_v59 = vrot.slane %v11475_v6, 2  ;;  %v10737_v18 = vsel %vm6554_vm6, %v10692_v60, -inf  ;;  %v10620_v55 = vadd.f32 %v10579_v21, %v10150_v29 }
 0x51a   : > { %v11470_v31 = vmax.f32 %v11468_v56, %v11469_v22  ;;  %v11483_v54 = vrot.slane %v11482_v36, 2  ;;  %v10690_v7 = vmax.f32 %v10658_v58, 0.0  ;;  %v10661_v48 = vadd.f32 %v18704_v35, %v10622_v2 }
 0x51b   : > { %v11464_v34 = vrot.slane %v11463_v5, 1  ;;  %v11477_v50 = vmax.f32 %v11475_v6, %v11476_v59  ;;  %v11658_v16 = vsel %vm11611_vm11, %v11458_v40, %v11657_v24  ;;  %v10659_v47 = vadd.f32 %v18704_v35, %v10620_v55 }
 0x51c   : > { %v11471_v26 = vrot.slane %v11470_v31, 1  ;;  %v11484_v61 = vmax.f32 %v11482_v36, %v11483_v54  ;;  %v10736_v17 = vsel %vm6554_vm6, %v10690_v7, -inf  ;;  %v10693_v3 = vmax.f32 %v10661_v48, 0.0 }
 0x51d   : > { %v11465_v14 = vmax.f32 %v11463_v5, %v11464_v34  ;;  %v11478_v30 = vrot.slane %v11477_v50, 1  ;;  %v10738_v60 = vmax.f32 %v10736_v17, %v10737_v18  ;;  %v10691_v53 = vmax.f32 %v10659_v47, 0.0 }
 0x51e   : > { %v11472_v0 = vmax.f32 %v11470_v31, %v11471_v26  ;;  %v11485_v62 = vrot.slane %v11484_v61, 1  ;;  %v10740_v4 = vsel %vm6554_vm6, %v10693_v3, -inf }
 0x51f   : > { %v11479_v42 = vmax.f32 %v11477_v50, %v11478_v30  ;;  %v11659_v43 = vsel %vm11613_vm12, %v11465_v14, %v11658_v16  ;;  %v10996_v38 = vcombine.high %v10738_v60, %v10738_v60  ;;  %v11003_v51 = vrot.slane %v10738_v60, %v18420_v1 }
 0x520   : > { %v11486_v63 = vmax.f32 %v11484_v61, %v11485_v62  ;;  %v11660_v35 = vsel %vm11615_vm13, %v11472_v0, %v11659_v43  ;;  %v10739_v27 = vsel %vm6554_vm6, %v10691_v53, -inf }
 0x521   : > { %v11661_v37 = vsel %vm11617_vm14, %v11479_v42, %v11660_v35  ;;  %v11010_v32 = vrot.slane %v10996_v38, %v18420_v1  ;;  %v11011_v33 = vcombine.high %v11003_v51, %v11003_v51  ;;  %v11487_v39 = vsel %vm11094_vm4, %v11003_v51, -inf }
 0x522   : > { %v11662_v10 = vsel %vm11619_vm15, %v11486_v63, %v11661_v37  ;;  %v11488_v44 = vrot.slane %v11487_v39, 4  ;;  %v10741_v46 = vmax.f32 %v10739_v27, %v10740_v4 }
 0x523   : > { %11684 = vst.msk [vmem:[%s18553_s12 + $0x30] sm:$0xff] %vm6554_vm6, %v11662_v10  ;;  %v11012_v11 = vcombine.high %v11010_v32, %v11010_v32  ;;  %v11494_v25 = vsel %vm11094_vm4, %v11011_v33, -inf  ;;  %v11501_v23 = vsel %vm11094_vm4, %v11010_v32, -inf }
 0x524   : > { %v11489_v15 = vmax.f32 %v11487_v39, %v11488_v44  ;;  %v11495_v20 = vrot.slane %v11494_v25, 4  ;;  %v11502_v28 = vrot.slane %v11501_v23, 4  ;;  %v11013_v57 = vcombine.high %v10741_v46, %v10741_v46 }
 0x525   : > { %v11508_v49 = vsel %vm11094_vm4, %v11012_v11, -inf  ;;  %v11020_v41 = vrot.slane %v10741_v46, %v18420_v1 }
 0x526   : > { %v11490_v52 = vrot.slane %v11489_v15, 2  ;;  %v11496_v45 = vmax.f32 %v11494_v25, %v11495_v20  ;;  %v11503_v9 = vmax.f32 %v11501_v23, %v11502_v28  ;;  %v11509_v8 = vrot.slane %v11508_v49, 4 }
 0x527   : > { %v11027_v29 = vrot.slane %v11013_v57, %v18420_v1  ;;  %v11028_v12 = vcombine.high %v11020_v41, %v11020_v41  ;;  %v11515_v56 = vsel %vm11094_vm4, %v11020_v41, -inf }
 0x528   : > { %v11491_v13 = vmax.f32 %v11489_v15, %v11490_v52  ;;  %v11497_v21 = vrot.slane %v11496_v45, 2  ;;  %v11504_v40 = vrot.slane %v11503_v9, 2  ;;  %v11510_v24 = vmax.f32 %v11508_v49, %v11509_v8 }
 0x529   : > { %v11029_v19 = vcombine.high %v11027_v29, %v11027_v29  ;;  %v11516_v6 = vrot.slane %v11515_v56, 4  ;;  %v11522_v22 = vsel %vm11094_vm4, %v11028_v12, -inf  ;;  %v11529_v36 = vsel %vm11094_vm4, %v11027_v29, -inf }
 0x52a   : > { %v11492_v58 = vrot.slane %v11491_v13, 1  ;;  %v11498_v2 = vmax.f32 %v11496_v45, %v11497_v21  ;;  %v11505_v5 = vmax.f32 %v11503_v9, %v11504_v40  ;;  %v11511_v59 = vrot.slane %v11510_v24, 2 }
 0x52b   : > { %v11517_v18 = vmax.f32 %v11515_v56, %v11516_v6  ;;  %v11523_v55 = vrot.slane %v11522_v22, 4  ;;  %v11530_v1 = vrot.slane %v11529_v36, 4  ;;  %v11536_v31 = vsel %vm11094_vm4, %v11029_v19, -inf }
 0x52c   : > { %v11499_v54 = vrot.slane %v11498_v2, 1  ;;  %v11506_v7 = vrot.slane %v11505_v5, 1  ;;  %v11512_v48 = vmax.f32 %v11510_v24, %v11511_v59  ;;  %v11537_v47 = vrot.slane %v11536_v31, 4 }
 0x52d   : > { %v11518_v34 = vrot.slane %v11517_v18, 2  ;;  %v11524_v50 = vmax.f32 %v11522_v22, %v11523_v55  ;;  %v11531_v16 = vmax.f32 %v11529_v36, %v11530_v1  ;;  %v11493_v26 = vmax.f32 %v11491_v13, %v11492_v58 }
 0x52e   : > { %v11500_v61 = vmax.f32 %v11498_v2, %v11499_v54  ;;  %v11507_v17 = vmax.f32 %v11505_v5, %v11506_v7  ;;  %v11513_v3 = vrot.slane %v11512_v48, 1  ;;  %v11538_v53 = vmax.f32 %v11536_v31, %v11537_v47 }
 0x52f   : > { %v11519_v14 = vmax.f32 %v11517_v18, %v11518_v34  ;;  %v11525_v30 = vrot.slane %v11524_v50, 2  ;;  %v11532_v60 = vrot.slane %v11531_v16, 2 }
 0x530   : > { %v11514_v0 = vmax.f32 %v11512_v48, %v11513_v3  ;;  %v11663_v62 = vsel %vm11607_vm5, %v11500_v61, %v11493_v26  ;;  %v11539_v63 = vrot.slane %v11538_v53, 2 }
 0x531   : > { %v11664_v42 = vsel %vm11609_vm8, %v11507_v17, %v11663_v62  ;;  %v11520_v43 = vrot.slane %v11519_v14, 1  ;;  %v11526_v38 = vmax.f32 %v11524_v50, %v11525_v30  ;;  %v11533_v51 = vmax.f32 %v11531_v16, %v11532_v60 }
 0x532   : > { %v11665_v35 = vsel %vm11611_vm11, %v11514_v0, %v11664_v42  ;;  %v11540_v32 = vmax.f32 %v11538_v53, %v11539_v63 }
 0x533   : > { %v11521_v4 = vmax.f32 %v11519_v14, %v11520_v43  ;;  %v11527_v27 = vrot.slane %v11526_v38, 1  ;;  %v11534_v37 = vrot.slane %v11533_v51, 1 }
 0x534   : > { %v11541_v44 = vrot.slane %v11540_v32, 1 }
 0x535   : > { %v11528_v33 = vmax.f32 %v11526_v38, %v11527_v27  ;;  %v11535_v39 = vmax.f32 %v11533_v51, %v11534_v37  ;;  %v11666_v10 = vsel %vm11613_vm12, %v11521_v4, %v11665_v35 }
 0x536   : > { %v11542_v11 = vmax.f32 %v11540_v32, %v11541_v44 }
 0x537   : > { %v11667_v46 = vsel %vm11615_vm13, %v11528_v33, %v11666_v10 }
 0x538   : > { %v11668_v25 = vsel %vm11617_vm14, %v11535_v39, %v11667_v46 }
 0x539   : > { %v11669_v23 = vsel %vm11619_vm15, %v11542_v11, %v11668_v25 }
 0x53a   : > { %11685 = vst.msk [vmem:[%s18553_s12 + $0x38] sm:$0xff] %vm6554_vm6, %v11669_v23 }
 0x53b   : > { %13645 = shalt.err (!%p13642_p3)
}
 0x53c   : > { %s13646_s8 = scalar_lea.hbm %s18805_s25, 1024  ;;  %s13650_s11 = scalar_lea.hbm %s18859_s5, 2048 }
 0x53d   : > { %p13647_p4 = scmp.ne.s32.totalorder %s18805_s25, %s13646_s8  ;;  %p13651_p9 = scmp.lt.s32.totalorder %s18805_s25, %s18859_s5 }
 0x53e   : > { %p13652_p10 = scmp.lt.s32.totalorder %s13650_s11, %s13646_s8 }
 0x53f   : > { %p13648_p7 = pnand %p13647_p4, %p13767_p5 }
 0x540   : > { %p13653_p11 = por %p13652_p10, %p13651_p9 }
 0x541   : > { %p13649_p8 = pneg %p13648_p7 }
 0x543   : > { %p13654_p12 = pnand %p13653_p11, %p13649_p8 }
 0x545   : > { %13657 = shalt.err (!%p13654_p12)
}
 0x546   : > { %s13697_s14 = smov 128   ;;  %s13698_s15 = smov 8  }
 0x547   : > { %13466 = dma.vmem_to_hbm [thread:$0]  (%p13767_p5), %s18807_s16, 1024, %s18805_s25, %s18814_s22, %s13697_s14, %s13697_s14, %s13698_s15  }
 0x548 PF: > { %p13472_p13 = scmp.ge.s32.totalorder %s13692_s21, 2  ;;  %s11715_s17 = sand.u32 1, %s13680_s18  }
 0x549   : > { %s11716_s23 = scalar_lea.sflag [#allocation5], %s11715_s17 }
 0x54a   : > { %p13469_p0 = pnand %p13472_p13, %p13771_p6 }
 0x54c   : > { %p13470_p1 = pneg %p13469_p0 }
 0x54e   : > { %13675 = dma.done.wait (%p13470_p1), %s11716_s23, 1024  }
 0x54f   : > { %13677 = vsyncadd (%p13470_p1), %s11716_s23, 4294966272  ;;  %p15_p2 = scmp.ge.s32.totalorder %s13754_s24, 4   ;;  %s19202_s18 = smov %s13684_s19 }
 0x550   : > { %s19203_s19 = smov %s13688_s20  ;;  %s19204_s20 = smov %s13765_s27 }
 0x551   : > { %s19205_s21 = smov %s13754_s24  ;;  %17 = sbr.rel (!%p15_p2) target bundleno = 3 (0x3), region = 97 }
 0x556   :  { %11721 = vsyncpa [#allocation5], 1 }
 0x557   :  { %11723 = vsyncpa [#allocation5 + $0x1], 1 }

</bundles_post_ra>
